<compile_context>
chip_gen: v6e
topology: v6e:2x2x1
jax: 0.10.0
libtpu: 0.0.40
codegen_flags: <defaults>
</compile_context>

<pallas_src>
import math
import functools

import jax
import jax.numpy as jnp
from jax import lax
from jax.experimental import pallas as pl
from jax.experimental.pallas import tpu as pltpu


# ----------------------------- Fused forward kernel -----------------------------

def _layer_norm(y, g, b, eps):
    mean = jnp.mean(y, axis=-1, keepdims=True)
    c = y - mean
    var = jnp.mean(c * c, axis=-1, keepdims=True)
    return c * lax.rsqrt(var + eps) * g + b


def _fused_forward_kernel(
    x_ref, pe_ref, emb_w_ref, emb_b_ref,
    qw_ref, qb_ref, kw_ref, kb_ref, vw_ref, vb_ref, ow_ref, ob_ref,
    ln1_w_ref, ln1_b_ref, ff1_w_ref, ff1_b_ref, ff2_w_ref, ff2_b_ref,
    ln2_w_ref, ln2_b_ref, dec_w_ref, dec_b_ref,
    o_ref,
    *, num_layers, nhead, eps):
    f32 = jnp.float32
    x = x_ref[0]                                                       # (S, I)
    S = x.shape[0]

    # Embedding + positional encoding.
    # TODO(synk): dropout layers are no-ops here (inference / eval() semantics).
    h = jnp.dot(x, emb_w_ref[...], preferred_element_type=f32) + emb_b_ref[...]
    h = h + pe_ref[...]                                                # (S, D)
    D = h.shape[-1]
    dh = D // nhead
    scale = 1.0 / math.sqrt(dh)

    for l in range(num_layers):
        # ---- multi-head self attention (per-head weights pre-split at prepare time) ----
        attn = None
        for hd in range(nhead):
            q = jnp.dot(h, qw_ref[l, hd], preferred_element_type=f32) + qb_ref[l, hd]
            k = jnp.dot(h, kw_ref[l, hd], preferred_element_type=f32) + kb_ref[l, hd]
            v = jnp.dot(h, vw_ref[l, hd], preferred_element_type=f32) + vb_ref[l, hd]
            # scores = q @ k^T without materializing a transpose
            s = lax.dot_general(q, k, (((1,), (1,)), ((), ())),
                                preferred_element_type=f32) * scale    # (S, S)
            s = s - jnp.max(s, axis=-1, keepdims=True)
            p = jnp.exp(s)
            p = p * pl.reciprocal(jnp.sum(p, axis=-1, keepdims=True), approx=True)
            oh = jnp.dot(p, v, preferred_element_type=f32)             # (S, dh)
            c = jnp.dot(oh, ow_ref[l, hd], preferred_element_type=f32)  # (S, D)
            attn = c if attn is None else attn + c
        attn = attn + ob_ref[l]
        h = _layer_norm(h + attn, ln1_w_ref[l], ln1_b_ref[l], eps)

        # ---- feed-forward (ReLU); the (S, dim_ff) intermediate never leaves VMEM ----
        ff = jnp.dot(h, ff1_w_ref[l], preferred_element_type=f32) + ff1_b_ref[l]
        ff = jnp.maximum(ff, 0.0)
        ff = jnp.dot(ff, ff2_w_ref[l], preferred_element_type=f32) + ff2_b_ref[l]
        h = _layer_norm(h + ff, ln2_w_ref[l], ln2_b_ref[l], eps)

    # Decoder on the last time step (output lanes padded to 128 for unmasked stores).
    last = h[S - 1:S, :]                                               # (1, D)
    out = jnp.dot(last, dec_w_ref[...], preferred_element_type=f32) + dec_b_ref[...]
    o_ref[0] = out.astype(o_ref.dtype)


def _const_spec(shape):
    n = len(shape)
    return pl.BlockSpec(shape, lambda b, n=n: (0,) * n)


def time_series_transformer(x, kp, *, nhead, num_layers, output_len):
    """x: (B, S, input_dim); kp: kernel-layout params from prepare_params().
       Returns (B, output_len)."""
    B, S, I = x.shape
    D = kp["emb_w"].shape[1]
    out_pad = kp["dec_w"].shape[1]

    weight_args = (
        kp["emb_w"], kp["emb_b"],
        kp["qw"], kp["qb"], kp["kw"], kp["kb"], kp["vw"], kp["vb"],
        kp["ow"], kp["ob"],
        kp["ln1_w"], kp["ln1_b"], kp["ff1_w"], kp["ff1_b"],
        kp["ff2_w"], kp["ff2_b"], kp["ln2_w"], kp["ln2_b"],
        kp["dec_w"], kp["dec_b"],
    )

    kernel = functools.partial(_fused_forward_kernel,
                               num_layers=num_layers, nhead=nhead, eps=1e-5)
    out = pl.pallas_call(
        kernel,
        out_shape=jax.ShapeDtypeStruct((B, 1, out_pad), x.dtype),
        grid=(B,),
        in_specs=[pl.BlockSpec((1, S, I), lambda b: (b, 0, 0)),   # x: one batch element/step
                  pl.BlockSpec((S, D), lambda b: (0, 0))]         # pe: first S rows only
                 + [_const_spec(a.shape) for a in weight_args],   # weights: fetched once
        out_specs=pl.BlockSpec((1, 1, out_pad), lambda b: (b, 0, 0)),
        compiler_params=pltpu.CompilerParams(
            dimension_semantics=("parallel",),       # batch axis -> both TCs on v7x
            vmem_limit_bytes=32 * 1024 * 1024,
        ),
    )(x, kp["pe"], *weight_args)
    return out.reshape(B, out_pad)[:, :output_len]


# ----------------------------- Parameters -----------------------------

def make_positional_encoding(max_len, d_model):
    position = jnp.arange(max_len, dtype=jnp.float32)[:, None]
    div_term = jnp.exp(
        jnp.arange(0, d_model, 2, dtype=jnp.float32) * (-math.log(10000.0) / d_model))
    pe = jnp.zeros((max_len, d_model), jnp.float32)
    pe = pe.at[:, 0::2].set(jnp.sin(position * div_term))
    pe = pe.at[:, 1::2].set(jnp.cos(position * div_term))
    return pe


def init_params(key, input_dim, d_model, nhead, num_layers, dim_feedforward,
                output_len, max_len=500):
    """PyTorch-convention parameter shapes (nn.Linear weights are (out, in))."""
    def nrm(k, shape, scale=0.05):
        return scale * jax.random.normal(k, shape, jnp.float32)

    keys = jax.random.split(key, 4 + num_layers)
    params = {
        "emb_w": nrm(keys[0], (d_model, input_dim)),
        "emb_b": nrm(keys[1], (d_model,)),
        "dec_w": nrm(keys[2], (output_len, d_model)),
        "dec_b": nrm(keys[3], (output_len,)),
        "pe": make_positional_encoding(max_len, d_model),
        "layers": [],
    }
    for l in range(num_layers):
        lk = jax.random.split(keys[4 + l], 8)
        params["layers"].append({
            "in_proj_w": nrm(lk[0], (3 * d_model, d_model)),
            "in_proj_b": nrm(lk[1], (3 * d_model,)),
            "out_w": nrm(lk[2], (d_model, d_model)),
            "out_b": nrm(lk[3], (d_model,)),
            "ln1_w": jnp.ones((d_model,), jnp.float32),
            "ln1_b": jnp.zeros((d_model,), jnp.float32),
            "ff1_w": nrm(lk[4], (dim_feedforward, d_model)),
            "ff1_b": nrm(lk[5], (dim_feedforward,)),
            "ff2_w": nrm(lk[6], (d_model, dim_feedforward)),
            "ff2_b": nrm(lk[7], (d_model,)),
            "ln2_w": jnp.ones((d_model,), jnp.float32),
            "ln2_b": jnp.zeros((d_model,), jnp.float32),
        })
    return params


def prepare_params(p, *, nhead, lane_pad=128):
    """One-time conversion of PyTorch-layout params to kernel layout:
    transpose to (K, N), split QKV/out-proj per head, stack layers, pad decoder lanes."""
    D = p["emb_w"].shape[0]
    dh = D // nhead
    layers = p["layers"]

    def stack(fn):
        return jnp.stack([fn(lp) for lp in layers])

    def heads_w(w):   # w: (D, D) PyTorch (out, in) -> (H, D_in, dh)
        wt = w.T
        return jnp.stack([wt[:, h * dh:(h + 1) * dh] for h in range(nhead)])

    def heads_b(b):   # b: (D,) -> (H, 1, dh)
        return jnp.stack([b[h * dh:(h + 1) * dh].reshape(1, dh) for h in range(nhead)])

    qw = stack(lambda lp: heads_w(lp["in_proj_w"][:D]))
    kw = stack(lambda lp: heads_w(lp["in_proj_w"][D:2 * D]))
    vw = stack(lambda lp: heads_w(lp["in_proj_w"][2 * D:]))
    qb = stack(lambda lp: heads_b(lp["in_proj_b"][:D]))
    kb = stack(lambda lp: heads_b(lp["in_proj_b"][D:2 * D]))
    vb = stack(lambda lp: heads_b(lp["in_proj_b"][2 * D:]))
    # out-proj: concat_h(o_h) @ W_o.T  ==  sum_h o_h @ (W_o[:, h*dh:(h+1)*dh]).T
    ow = stack(lambda lp: jnp.stack(
        [lp["out_w"][:, h * dh:(h + 1) * dh].T for h in range(nhead)]))   # (L, H, dh, D)
    ob = stack(lambda lp: lp["out_b"].reshape(1, D))

    out_len = p["dec_w"].shape[0]
    out_pad = ((out_len + lane_pad - 1) // lane_pad) * lane_pad
    dec_w = jnp.zeros((D, out_pad), jnp.float32).at[:, :out_len].set(p["dec_w"].T)
    dec_b = jnp.zeros((1, out_pad), jnp.float32).at[:, :out_len].set(
        p["dec_b"].reshape(1, -1))

    return {
        "pe": p["pe"],
        "emb_w": p["emb_w"].T,                     # (I, D)
        "emb_b": p["emb_b"].reshape(1, D),
        "qw": qw, "qb": qb, "kw": kw, "kb": kb, "vw": vw, "vb": vb,
        "ow": ow, "ob": ob,
        "ln1_w": stack(lambda lp: lp["ln1_w"].reshape(1, D)),
        "ln1_b": stack(lambda lp: lp["ln1_b"].reshape(1, D)),
        "ff1_w": stack(lambda lp: lp["ff1_w"].T),  # (L, D, FF)
        "ff1_b": stack(lambda lp: lp["ff1_b"].reshape(1, -1)),
        "ff2_w": stack(lambda lp: lp["ff2_w"].T),  # (L, FF, D)
        "ff2_b": stack(lambda lp: lp["ff2_b"].reshape(1, D)),
        "ln2_w": stack(lambda lp: lp["ln2_w"].reshape(1, D)),
        "ln2_b": stack(lambda lp: lp["ln2_b"].reshape(1, D)),
        "dec_w": dec_w, "dec_b": dec_b,
    }


# ----------------------------- Pure-JAX reference (PyTorch semantics) -----------------------------

def _ln_ref(y, g, b, eps=1e-5):
    mean = jnp.mean(y, axis=-1, keepdims=True)
    var = jnp.mean((y - mean) ** 2, axis=-1, keepdims=True)
    return (y - mean) * lax.rsqrt(var + eps) * g + b


def reference_forward(x, p, *, nhead):
    B, S, _ = x.shape
    D = p["emb_w"].shape[0]
    dh = D // nhead
    h = x @ p["emb_w"].T + p["emb_b"]
    h = h + p["pe"][:S][None]
    for lp in p["layers"]:
        qkv = h @ lp["in_proj_w"].T + lp["in_proj_b"]
        q, k, v = jnp.split(qkv, 3, axis=-1)
        def heads(t):
            return t.reshape(B, S, nhead, dh).transpose(0, 2, 1, 3)
        q, k, v = heads(q), heads(k), heads(v)
        s = jnp.einsum("bhqd,bhkd->bhqk", q, k) / math.sqrt(dh)
        a = jax.nn.softmax(s, axis=-1)
        o = jnp.einsum("bhqk,bhkd->bhqd", a, v).transpose(0, 2, 1, 3).reshape(B, S, D)
        attn = o @ lp["out_w"].T + lp["out_b"]
        h = _ln_ref(h + attn, lp["ln1_w"], lp["ln1_b"])
        ff = jax.nn.relu(h @ lp["ff1_w"].T + lp["ff1_b"])
        ff = ff @ lp["ff2_w"].T + lp["ff2_b"]
        h = _ln_ref(h + ff, lp["ln2_w"], lp["ln2_b"])
    return h[:, -1, :] @ p["dec_w"].T + p["dec_b"]


# ----------------------------- Main -----------------------------

if __name__ == "__main__":
    # PyTorch defaults: d_model=64, nhead=4, num_layers=2, dim_feedforward=2048, output_len=90.
    INPUT_DIM, D_MODEL, NHEAD, NUM_LAYERS = 4, 64, 4, 2
    DIM_FF, OUTPUT_LEN = 2048, 90
    B, S = 2, 8

    key = jax.random.PRNGKey(0)
    pkey, xkey = jax.random.split(key)
    params = init_params(pkey, INPUT_DIM, D_MODEL, NHEAD, NUM_LAYERS, DIM_FF, OUTPUT_LEN)
    kparams = prepare_params(params, nhead=NHEAD)   # one-time transpose / head-split / pad
    x = jax.random.normal(xkey, (B, S, INPUT_DIM), jnp.float32)

    fwd = jax.jit(functools.partial(time_series_transformer, nhead=NHEAD,
                                    num_layers=NUM_LAYERS, output_len=OUTPUT_LEN))
    out = jax.block_until_ready(fwd(x, kparams))

    assert out.shape == (B, OUTPUT_LEN), out.shape
    assert bool(jnp.all(jnp.isfinite(out)))

    ref = reference_forward(x, params, nhead=NHEAD)
    assert bool(jnp.allclose(out, ref, rtol=2e-2, atol=2e-2)), \
        float(jnp.max(jnp.abs(out - ref)))

    print("KERNEL_OK")
</pallas_src>

<mosaic_0001>
module attributes {stable_mosaic.version = 11 : i64} {
  func.func @_fused_forward_kernel(%arg0: i32, %arg1: memref<1x8x4xf32, #tpu.memory_space<vmem>>, %arg2: memref<8x64xf32, #tpu.memory_space<vmem>>, %arg3: memref<4x64xf32, #tpu.memory_space<vmem>>, %arg4: memref<1x64xf32, #tpu.memory_space<vmem>>, %arg5: memref<2x4x64x16xf32, #tpu.memory_space<vmem>>, %arg6: memref<2x4x1x16xf32, #tpu.memory_space<vmem>>, %arg7: memref<2x4x64x16xf32, #tpu.memory_space<vmem>>, %arg8: memref<2x4x1x16xf32, #tpu.memory_space<vmem>>, %arg9: memref<2x4x64x16xf32, #tpu.memory_space<vmem>>, %arg10: memref<2x4x1x16xf32, #tpu.memory_space<vmem>>, %arg11: memref<2x4x16x64xf32, #tpu.memory_space<vmem>>, %arg12: memref<2x1x64xf32, #tpu.memory_space<vmem>>, %arg13: memref<2x1x64xf32, #tpu.memory_space<vmem>>, %arg14: memref<2x1x64xf32, #tpu.memory_space<vmem>>, %arg15: memref<2x64x2048xf32, #tpu.memory_space<vmem>>, %arg16: memref<2x1x2048xf32, #tpu.memory_space<vmem>>, %arg17: memref<2x2048x64xf32, #tpu.memory_space<vmem>>, %arg18: memref<2x1x64xf32, #tpu.memory_space<vmem>>, %arg19: memref<2x1x64xf32, #tpu.memory_space<vmem>>, %arg20: memref<2x1x64xf32, #tpu.memory_space<vmem>>, %arg21: memref<64x128xf32, #tpu.memory_space<vmem>>, %arg22: memref<1x128xf32, #tpu.memory_space<vmem>>, %arg23: memref<1x1x128xf32, #tpu.memory_space<vmem>>) attributes {dimension_semantics = [#tpu.dimension_semantics<parallel>], iteration_bounds = array<i64: 2>, scalar_prefetch = 0 : i64, scratch_operands = 0 : i64, tpu.core_type = #tpu.core_type<tc>, window_params = [{transform_indices = @transform_0, window_bounds = array<i64: 1, 8, 4>}, {transform_indices = @transform_1, window_bounds = array<i64: 8, 64>}, {pipeline_mode = #tpu.pipeline_mode<synchronous>, transform_indices = @transform_2, window_bounds = array<i64: 4, 64>}, {pipeline_mode = #tpu.pipeline_mode<synchronous>, transform_indices = @transform_3, window_bounds = array<i64: 1, 64>}, {pipeline_mode = #tpu.pipeline_mode<synchronous>, transform_indices = @transform_4, window_bounds = array<i64: 2, 4, 64, 16>}, {pipeline_mode = #tpu.pipeline_mode<synchronous>, transform_indices = @transform_5, window_bounds = array<i64: 2, 4, 1, 16>}, {pipeline_mode = #tpu.pipeline_mode<synchronous>, transform_indices = @transform_6, window_bounds = array<i64: 2, 4, 64, 16>}, {pipeline_mode = #tpu.pipeline_mode<synchronous>, transform_indices = @transform_7, window_bounds = array<i64: 2, 4, 1, 16>}, {pipeline_mode = #tpu.pipeline_mode<synchronous>, transform_indices = @transform_8, window_bounds = array<i64: 2, 4, 64, 16>}, {pipeline_mode = #tpu.pipeline_mode<synchronous>, transform_indices = @transform_9, window_bounds = array<i64: 2, 4, 1, 16>}, {pipeline_mode = #tpu.pipeline_mode<synchronous>, transform_indices = @transform_10, window_bounds = array<i64: 2, 4, 16, 64>}, {pipeline_mode = #tpu.pipeline_mode<synchronous>, transform_indices = @transform_11, window_bounds = array<i64: 2, 1, 64>}, {pipeline_mode = #tpu.pipeline_mode<synchronous>, transform_indices = @transform_12, window_bounds = array<i64: 2, 1, 64>}, {pipeline_mode = #tpu.pipeline_mode<synchronous>, transform_indices = @transform_13, window_bounds = array<i64: 2, 1, 64>}, {pipeline_mode = #tpu.pipeline_mode<synchronous>, transform_indices = @transform_14, window_bounds = array<i64: 2, 64, 2048>}, {pipeline_mode = #tpu.pipeline_mode<synchronous>, transform_indices = @transform_15, window_bounds = array<i64: 2, 1, 2048>}, {pipeline_mode = #tpu.pipeline_mode<synchronous>, transform_indices = @transform_16, window_bounds = array<i64: 2, 2048, 64>}, {pipeline_mode = #tpu.pipeline_mode<synchronous>, transform_indices = @transform_17, window_bounds = array<i64: 2, 1, 64>}, {pipeline_mode = #tpu.pipeline_mode<synchronous>, transform_indices = @transform_18, window_bounds = array<i64: 2, 1, 64>}, {pipeline_mode = #tpu.pipeline_mode<synchronous>, transform_indices = @transform_19, window_bounds = array<i64: 2, 1, 64>}, {pipeline_mode = #tpu.pipeline_mode<synchronous>, transform_indices = @transform_20, window_bounds = array<i64: 64, 128>}, {pipeline_mode = #tpu.pipeline_mode<synchronous>, transform_indices = @transform_21, window_bounds = array<i64: 1, 128>}, {transform_indices = @transform_22, window_bounds = array<i64: 1, 1, 128>}]} {
    %c0 = arith.constant 0 : index
    %c0_0 = arith.constant 0 : index
    %c0_1 = arith.constant 0 : index
    %0 = vector.load %arg1[%c0, %c0_0, %c0_1] : memref<1x8x4xf32, #tpu.memory_space<vmem>>, vector<1x8x4xf32>
    %1 = vector.shape_cast %0 : vector<1x8x4xf32> to vector<8x4xf32>
    %c0_2 = arith.constant 0 : index
    %c0_3 = arith.constant 0 : index
    %2 = vector.load %arg3[%c0_2, %c0_3] : memref<4x64xf32, #tpu.memory_space<vmem>>, vector<4x64xf32>
    %cst = arith.constant dense<0.000000e+00> : vector<8x64xf32>
    %3 = tpu.matmul %1, %2, %cst {dimension_numbers = #tpu.dot_dimension_numbers<[1], [0], [0], [1], [0, 0, 1, 1], [], []>} : vector<8x4xf32>, vector<4x64xf32>, vector<8x64xf32> -> vector<8x64xf32>
    %c0_4 = arith.constant 0 : index
    %c0_5 = arith.constant 0 : index
    %4 = vector.load %arg4[%c0_4, %c0_5] : memref<1x64xf32, #tpu.memory_space<vmem>>, vector<1x64xf32>
    %5 = vector.broadcast %4 : vector<1x64xf32> to vector<8x64xf32>
    %6 = arith.addf %3, %5 : vector<8x64xf32>
    %c0_6 = arith.constant 0 : index
    %c0_7 = arith.constant 0 : index
    %7 = vector.load %arg2[%c0_6, %c0_7] : memref<8x64xf32, #tpu.memory_space<vmem>>, vector<8x64xf32>
    %8 = arith.addf %6, %7 : vector<8x64xf32>
    %c0_8 = arith.constant 0 : index
    %c0_9 = arith.constant 0 : index
    %c0_10 = arith.constant 0 : index
    %c0_11 = arith.constant 0 : index
    %9 = vector.load %arg5[%c0_8, %c0_9, %c0_10, %c0_11] : memref<2x4x64x16xf32, #tpu.memory_space<vmem>>, vector<1x1x64x16xf32>
    %10 = vector.shape_cast %9 : vector<1x1x64x16xf32> to vector<64x16xf32>
    %cst_12 = arith.constant dense<0.000000e+00> : vector<8x16xf32>
    %11 = tpu.matmul %8, %10, %cst_12 {dimension_numbers = #tpu.dot_dimension_numbers<[1], [0], [0], [1], [0, 0, 1, 1], [], []>} : vector<8x64xf32>, vector<64x16xf32>, vector<8x16xf32> -> vector<8x16xf32>
    %c0_13 = arith.constant 0 : index
    %c0_14 = arith.constant 0 : index
    %c0_15 = arith.constant 0 : index
    %c0_16 = arith.constant 0 : index
    %12 = vector.load %arg6[%c0_13, %c0_14, %c0_15, %c0_16] : memref<2x4x1x16xf32, #tpu.memory_space<vmem>>, vector<1x1x1x16xf32>
    %13 = vector.shape_cast %12 : vector<1x1x1x16xf32> to vector<1x16xf32>
    %14 = vector.broadcast %13 : vector<1x16xf32> to vector<8x16xf32>
    %15 = arith.addf %11, %14 : vector<8x16xf32>
    %c0_17 = arith.constant 0 : index
    %c0_18 = arith.constant 0 : index
    %c0_19 = arith.constant 0 : index
    %c0_20 = arith.constant 0 : index
    %16 = vector.load %arg7[%c0_17, %c0_18, %c0_19, %c0_20] : memref<2x4x64x16xf32, #tpu.memory_space<vmem>>, vector<1x1x64x16xf32>
    %17 = vector.shape_cast %16 : vector<1x1x64x16xf32> to vector<64x16xf32>
    %cst_21 = arith.constant dense<0.000000e+00> : vector<8x16xf32>
    %18 = tpu.matmul %8, %17, %cst_21 {dimension_numbers = #tpu.dot_dimension_numbers<[1], [0], [0], [1], [0, 0, 1, 1], [], []>} : vector<8x64xf32>, vector<64x16xf32>, vector<8x16xf32> -> vector<8x16xf32>
    %c0_22 = arith.constant 0 : index
    %c0_23 = arith.constant 0 : index
    %c0_24 = arith.constant 0 : index
    %c0_25 = arith.constant 0 : index
    %19 = vector.load %arg8[%c0_22, %c0_23, %c0_24, %c0_25] : memref<2x4x1x16xf32, #tpu.memory_space<vmem>>, vector<1x1x1x16xf32>
    %20 = vector.shape_cast %19 : vector<1x1x1x16xf32> to vector<1x16xf32>
    %21 = vector.broadcast %20 : vector<1x16xf32> to vector<8x16xf32>
    %22 = arith.addf %18, %21 : vector<8x16xf32>
    %c0_26 = arith.constant 0 : index
    %c0_27 = arith.constant 0 : index
    %c0_28 = arith.constant 0 : index
    %c0_29 = arith.constant 0 : index
    %23 = vector.load %arg9[%c0_26, %c0_27, %c0_28, %c0_29] : memref<2x4x64x16xf32, #tpu.memory_space<vmem>>, vector<1x1x64x16xf32>
    %24 = vector.shape_cast %23 : vector<1x1x64x16xf32> to vector<64x16xf32>
    %cst_30 = arith.constant dense<0.000000e+00> : vector<8x16xf32>
    %25 = tpu.matmul %8, %24, %cst_30 {dimension_numbers = #tpu.dot_dimension_numbers<[1], [0], [0], [1], [0, 0, 1, 1], [], []>} : vector<8x64xf32>, vector<64x16xf32>, vector<8x16xf32> -> vector<8x16xf32>
    %c0_31 = arith.constant 0 : index
    %c0_32 = arith.constant 0 : index
    %c0_33 = arith.constant 0 : index
    %c0_34 = arith.constant 0 : index
    %26 = vector.load %arg10[%c0_31, %c0_32, %c0_33, %c0_34] : memref<2x4x1x16xf32, #tpu.memory_space<vmem>>, vector<1x1x1x16xf32>
    %27 = vector.shape_cast %26 : vector<1x1x1x16xf32> to vector<1x16xf32>
    %28 = vector.broadcast %27 : vector<1x16xf32> to vector<8x16xf32>
    %29 = arith.addf %25, %28 : vector<8x16xf32>
    %cst_35 = arith.constant dense<0.000000e+00> : vector<8x8xf32>
    %30 = tpu.matmul %15, %22, %cst_35 {dimension_numbers = #tpu.dot_dimension_numbers<[1], [1], [0], [0], [0, 0, 1, 0], [], []>} : vector<8x16xf32>, vector<8x16xf32>, vector<8x8xf32> -> vector<8x8xf32>
    %cst_36 = arith.constant 2.500000e-01 : f32
    %31 = vector.broadcast %cst_36 : f32 to vector<8x8xf32>
    %32 = arith.mulf %30, %31 : vector<8x8xf32>
    %cst_37 = arith.constant dense<0xFF800000> : vector<8xf32>
    %33 = vector.multi_reduction <maximumf>, %32, %cst_37 [1] : vector<8x8xf32> to vector<8xf32>
    %34 = vector.shape_cast %33 : vector<8xf32> to vector<8x1xf32>
    %35 = vector.broadcast %34 : vector<8x1xf32> to vector<8x8xf32>
    %36 = arith.subf %32, %35 : vector<8x8xf32>
    %37 = math.exp %36 : vector<8x8xf32>
    %cst_38 = arith.constant dense<0.000000e+00> : vector<8xf32>
    %38 = vector.multi_reduction <add>, %37, %cst_38 [1] : vector<8x8xf32> to vector<8xf32>
    %39 = vector.shape_cast %38 : vector<8xf32> to vector<8x1xf32>
    %40 = tpu.reciprocal %39 {approx = true} : vector<8x1xf32> -> vector<8x1xf32>
    %41 = vector.broadcast %40 : vector<8x1xf32> to vector<8x8xf32>
    %42 = arith.mulf %37, %41 : vector<8x8xf32>
    %cst_39 = arith.constant dense<0.000000e+00> : vector<8x16xf32>
    %43 = tpu.matmul %42, %29, %cst_39 {dimension_numbers = #tpu.dot_dimension_numbers<[1], [0], [0], [1], [0, 0, 1, 1], [], []>} : vector<8x8xf32>, vector<8x16xf32>, vector<8x16xf32> -> vector<8x16xf32>
    %c0_40 = arith.constant 0 : index
    %c0_41 = arith.constant 0 : index
    %c0_42 = arith.constant 0 : index
    %c0_43 = arith.constant 0 : index
    %44 = vector.load %arg11[%c0_40, %c0_41, %c0_42, %c0_43] : memref<2x4x16x64xf32, #tpu.memory_space<vmem>>, vector<1x1x16x64xf32>
    %45 = vector.shape_cast %44 : vector<1x1x16x64xf32> to vector<16x64xf32>
    %cst_44 = arith.constant dense<0.000000e+00> : vector<8x64xf32>
    %46 = tpu.matmul %43, %45, %cst_44 {dimension_numbers = #tpu.dot_dimension_numbers<[1], [0], [0], [1], [0, 0, 1, 1], [], []>} : vector<8x16xf32>, vector<16x64xf32>, vector<8x64xf32> -> vector<8x64xf32>
    %c0_45 = arith.constant 0 : index
    %c1 = arith.constant 1 : index
    %c0_46 = arith.constant 0 : index
    %c0_47 = arith.constant 0 : index
    %47 = vector.load %arg5[%c0_45, %c1, %c0_46, %c0_47] : memref<2x4x64x16xf32, #tpu.memory_space<vmem>>, vector<1x1x64x16xf32>
    %48 = vector.shape_cast %47 : vector<1x1x64x16xf32> to vector<64x16xf32>
    %cst_48 = arith.constant dense<0.000000e+00> : vector<8x16xf32>
    %49 = tpu.matmul %8, %48, %cst_48 {dimension_numbers = #tpu.dot_dimension_numbers<[1], [0], [0], [1], [0, 0, 1, 1], [], []>} : vector<8x64xf32>, vector<64x16xf32>, vector<8x16xf32> -> vector<8x16xf32>
    %c0_49 = arith.constant 0 : index
    %c1_50 = arith.constant 1 : index
    %c0_51 = arith.constant 0 : index
    %c0_52 = arith.constant 0 : index
    %50 = vector.load %arg6[%c0_49, %c1_50, %c0_51, %c0_52] : memref<2x4x1x16xf32, #tpu.memory_space<vmem>>, vector<1x1x1x16xf32>
    %51 = vector.shape_cast %50 : vector<1x1x1x16xf32> to vector<1x16xf32>
    %52 = vector.broadcast %51 : vector<1x16xf32> to vector<8x16xf32>
    %53 = arith.addf %49, %52 : vector<8x16xf32>
    %c0_53 = arith.constant 0 : index
    %c1_54 = arith.constant 1 : index
    %c0_55 = arith.constant 0 : index
    %c0_56 = arith.constant 0 : index
    %54 = vector.load %arg7[%c0_53, %c1_54, %c0_55, %c0_56] : memref<2x4x64x16xf32, #tpu.memory_space<vmem>>, vector<1x1x64x16xf32>
    %55 = vector.shape_cast %54 : vector<1x1x64x16xf32> to vector<64x16xf32>
    %cst_57 = arith.constant dense<0.000000e+00> : vector<8x16xf32>
    %56 = tpu.matmul %8, %55, %cst_57 {dimension_numbers = #tpu.dot_dimension_numbers<[1], [0], [0], [1], [0, 0, 1, 1], [], []>} : vector<8x64xf32>, vector<64x16xf32>, vector<8x16xf32> -> vector<8x16xf32>
    %c0_58 = arith.constant 0 : index
    %c1_59 = arith.constant 1 : index
    %c0_60 = arith.constant 0 : index
    %c0_61 = arith.constant 0 : index
    %57 = vector.load %arg8[%c0_58, %c1_59, %c0_60, %c0_61] : memref<2x4x1x16xf32, #tpu.memory_space<vmem>>, vector<1x1x1x16xf32>
    %58 = vector.shape_cast %57 : vector<1x1x1x16xf32> to vector<1x16xf32>
    %59 = vector.broadcast %58 : vector<1x16xf32> to vector<8x16xf32>
    %60 = arith.addf %56, %59 : vector<8x16xf32>
    %c0_62 = arith.constant 0 : index
    %c1_63 = arith.constant 1 : index
    %c0_64 = arith.constant 0 : index
    %c0_65 = arith.constant 0 : index
    %61 = vector.load %arg9[%c0_62, %c1_63, %c0_64, %c0_65] : memref<2x4x64x16xf32, #tpu.memory_space<vmem>>, vector<1x1x64x16xf32>
    %62 = vector.shape_cast %61 : vector<1x1x64x16xf32> to vector<64x16xf32>
    %cst_66 = arith.constant dense<0.000000e+00> : vector<8x16xf32>
    %63 = tpu.matmul %8, %62, %cst_66 {dimension_numbers = #tpu.dot_dimension_numbers<[1], [0], [0], [1], [0, 0, 1, 1], [], []>} : vector<8x64xf32>, vector<64x16xf32>, vector<8x16xf32> -> vector<8x16xf32>
    %c0_67 = arith.constant 0 : index
    %c1_68 = arith.constant 1 : index
    %c0_69 = arith.constant 0 : index
    %c0_70 = arith.constant 0 : index
    %64 = vector.load %arg10[%c0_67, %c1_68, %c0_69, %c0_70] : memref<2x4x1x16xf32, #tpu.memory_space<vmem>>, vector<1x1x1x16xf32>
    %65 = vector.shape_cast %64 : vector<1x1x1x16xf32> to vector<1x16xf32>
    %66 = vector.broadcast %65 : vector<1x16xf32> to vector<8x16xf32>
    %67 = arith.addf %63, %66 : vector<8x16xf32>
    %cst_71 = arith.constant dense<0.000000e+00> : vector<8x8xf32>
    %68 = tpu.matmul %53, %60, %cst_71 {dimension_numbers = #tpu.dot_dimension_numbers<[1], [1], [0], [0], [0, 0, 1, 0], [], []>} : vector<8x16xf32>, vector<8x16xf32>, vector<8x8xf32> -> vector<8x8xf32>
    %cst_72 = arith.constant 2.500000e-01 : f32
    %69 = vector.broadcast %cst_72 : f32 to vector<8x8xf32>
    %70 = arith.mulf %68, %69 : vector<8x8xf32>
    %cst_73 = arith.constant dense<0xFF800000> : vector<8xf32>
    %71 = vector.multi_reduction <maximumf>, %70, %cst_73 [1] : vector<8x8xf32> to vector<8xf32>
    %72 = vector.shape_cast %71 : vector<8xf32> to vector<8x1xf32>
    %73 = vector.broadcast %72 : vector<8x1xf32> to vector<8x8xf32>
    %74 = arith.subf %70, %73 : vector<8x8xf32>
    %75 = math.exp %74 : vector<8x8xf32>
    %cst_74 = arith.constant dense<0.000000e+00> : vector<8xf32>
    %76 = vector.multi_reduction <add>, %75, %cst_74 [1] : vector<8x8xf32> to vector<8xf32>
    %77 = vector.shape_cast %76 : vector<8xf32> to vector<8x1xf32>
    %78 = tpu.reciprocal %77 {approx = true} : vector<8x1xf32> -> vector<8x1xf32>
    %79 = vector.broadcast %78 : vector<8x1xf32> to vector<8x8xf32>
    %80 = arith.mulf %75, %79 : vector<8x8xf32>
    %cst_75 = arith.constant dense<0.000000e+00> : vector<8x16xf32>
    %81 = tpu.matmul %80, %67, %cst_75 {dimension_numbers = #tpu.dot_dimension_numbers<[1], [0], [0], [1], [0, 0, 1, 1], [], []>} : vector<8x8xf32>, vector<8x16xf32>, vector<8x16xf32> -> vector<8x16xf32>
    %c0_76 = arith.constant 0 : index
    %c1_77 = arith.constant 1 : index
    %c0_78 = arith.constant 0 : index
    %c0_79 = arith.constant 0 : index
    %82 = vector.load %arg11[%c0_76, %c1_77, %c0_78, %c0_79] : memref<2x4x16x64xf32, #tpu.memory_space<vmem>>, vector<1x1x16x64xf32>
    %83 = vector.shape_cast %82 : vector<1x1x16x64xf32> to vector<16x64xf32>
    %cst_80 = arith.constant dense<0.000000e+00> : vector<8x64xf32>
    %84 = tpu.matmul %81, %83, %cst_80 {dimension_numbers = #tpu.dot_dimension_numbers<[1], [0], [0], [1], [0, 0, 1, 1], [], []>} : vector<8x16xf32>, vector<16x64xf32>, vector<8x64xf32> -> vector<8x64xf32>
    %85 = arith.addf %46, %84 : vector<8x64xf32>
    %c0_81 = arith.constant 0 : index
    %c2 = arith.constant 2 : index
    %c0_82 = arith.constant 0 : index
    %c0_83 = arith.constant 0 : index
    %86 = vector.load %arg5[%c0_81, %c2, %c0_82, %c0_83] : memref<2x4x64x16xf32, #tpu.memory_space<vmem>>, vector<1x1x64x16xf32>
    %87 = vector.shape_cast %86 : vector<1x1x64x16xf32> to vector<64x16xf32>
    %cst_84 = arith.constant dense<0.000000e+00> : vector<8x16xf32>
    %88 = tpu.matmul %8, %87, %cst_84 {dimension_numbers = #tpu.dot_dimension_numbers<[1], [0], [0], [1], [0, 0, 1, 1], [], []>} : vector<8x64xf32>, vector<64x16xf32>, vector<8x16xf32> -> vector<8x16xf32>
    %c0_85 = arith.constant 0 : index
    %c2_86 = arith.constant 2 : index
    %c0_87 = arith.constant 0 : index
    %c0_88 = arith.constant 0 : index
    %89 = vector.load %arg6[%c0_85, %c2_86, %c0_87, %c0_88] : memref<2x4x1x16xf32, #tpu.memory_space<vmem>>, vector<1x1x1x16xf32>
    %90 = vector.shape_cast %89 : vector<1x1x1x16xf32> to vector<1x16xf32>
    %91 = vector.broadcast %90 : vector<1x16xf32> to vector<8x16xf32>
    %92 = arith.addf %88, %91 : vector<8x16xf32>
    %c0_89 = arith.constant 0 : index
    %c2_90 = arith.constant 2 : index
    %c0_91 = arith.constant 0 : index
    %c0_92 = arith.constant 0 : index
    %93 = vector.load %arg7[%c0_89, %c2_90, %c0_91, %c0_92] : memref<2x4x64x16xf32, #tpu.memory_space<vmem>>, vector<1x1x64x16xf32>
    %94 = vector.shape_cast %93 : vector<1x1x64x16xf32> to vector<64x16xf32>
    %cst_93 = arith.constant dense<0.000000e+00> : vector<8x16xf32>
    %95 = tpu.matmul %8, %94, %cst_93 {dimension_numbers = #tpu.dot_dimension_numbers<[1], [0], [0], [1], [0, 0, 1, 1], [], []>} : vector<8x64xf32>, vector<64x16xf32>, vector<8x16xf32> -> vector<8x16xf32>
    %c0_94 = arith.constant 0 : index
    %c2_95 = arith.constant 2 : index
    %c0_96 = arith.constant 0 : index
    %c0_97 = arith.constant 0 : index
    %96 = vector.load %arg8[%c0_94, %c2_95, %c0_96, %c0_97] : memref<2x4x1x16xf32, #tpu.memory_space<vmem>>, vector<1x1x1x16xf32>
    %97 = vector.shape_cast %96 : vector<1x1x1x16xf32> to vector<1x16xf32>
    %98 = vector.broadcast %97 : vector<1x16xf32> to vector<8x16xf32>
    %99 = arith.addf %95, %98 : vector<8x16xf32>
    %c0_98 = arith.constant 0 : index
    %c2_99 = arith.constant 2 : index
    %c0_100 = arith.constant 0 : index
    %c0_101 = arith.constant 0 : index
    %100 = vector.load %arg9[%c0_98, %c2_99, %c0_100, %c0_101] : memref<2x4x64x16xf32, #tpu.memory_space<vmem>>, vector<1x1x64x16xf32>
    %101 = vector.shape_cast %100 : vector<1x1x64x16xf32> to vector<64x16xf32>
    %cst_102 = arith.constant dense<0.000000e+00> : vector<8x16xf32>
    %102 = tpu.matmul %8, %101, %cst_102 {dimension_numbers = #tpu.dot_dimension_numbers<[1], [0], [0], [1], [0, 0, 1, 1], [], []>} : vector<8x64xf32>, vector<64x16xf32>, vector<8x16xf32> -> vector<8x16xf32>
    %c0_103 = arith.constant 0 : index
    %c2_104 = arith.constant 2 : index
    %c0_105 = arith.constant 0 : index
    %c0_106 = arith.constant 0 : index
    %103 = vector.load %arg10[%c0_103, %c2_104, %c0_105, %c0_106] : memref<2x4x1x16xf32, #tpu.memory_space<vmem>>, vector<1x1x1x16xf32>
    %104 = vector.shape_cast %103 : vector<1x1x1x16xf32> to vector<1x16xf32>
    %105 = vector.broadcast %104 : vector<1x16xf32> to vector<8x16xf32>
    %106 = arith.addf %102, %105 : vector<8x16xf32>
    %cst_107 = arith.constant dense<0.000000e+00> : vector<8x8xf32>
    %107 = tpu.matmul %92, %99, %cst_107 {dimension_numbers = #tpu.dot_dimension_numbers<[1], [1], [0], [0], [0, 0, 1, 0], [], []>} : vector<8x16xf32>, vector<8x16xf32>, vector<8x8xf32> -> vector<8x8xf32>
    %cst_108 = arith.constant 2.500000e-01 : f32
    %108 = vector.broadcast %cst_108 : f32 to vector<8x8xf32>
    %109 = arith.mulf %107, %108 : vector<8x8xf32>
    %cst_109 = arith.constant dense<0xFF800000> : vector<8xf32>
    %110 = vector.multi_reduction <maximumf>, %109, %cst_109 [1] : vector<8x8xf32> to vector<8xf32>
    %111 = vector.shape_cast %110 : vector<8xf32> to vector<8x1xf32>
    %112 = vector.broadcast %111 : vector<8x1xf32> to vector<8x8xf32>
    %113 = arith.subf %109, %112 : vector<8x8xf32>
    %114 = math.exp %113 : vector<8x8xf32>
    %cst_110 = arith.constant dense<0.000000e+00> : vector<8xf32>
    %115 = vector.multi_reduction <add>, %114, %cst_110 [1] : vector<8x8xf32> to vector<8xf32>
    %116 = vector.shape_cast %115 : vector<8xf32> to vector<8x1xf32>
    %117 = tpu.reciprocal %116 {approx = true} : vector<8x1xf32> -> vector<8x1xf32>
    %118 = vector.broadcast %117 : vector<8x1xf32> to vector<8x8xf32>
    %119 = arith.mulf %114, %118 : vector<8x8xf32>
    %cst_111 = arith.constant dense<0.000000e+00> : vector<8x16xf32>
    %120 = tpu.matmul %119, %106, %cst_111 {dimension_numbers = #tpu.dot_dimension_numbers<[1], [0], [0], [1], [0, 0, 1, 1], [], []>} : vector<8x8xf32>, vector<8x16xf32>, vector<8x16xf32> -> vector<8x16xf32>
    %c0_112 = arith.constant 0 : index
    %c2_113 = arith.constant 2 : index
    %c0_114 = arith.constant 0 : index
    %c0_115 = arith.constant 0 : index
    %121 = vector.load %arg11[%c0_112, %c2_113, %c0_114, %c0_115] : memref<2x4x16x64xf32, #tpu.memory_space<vmem>>, vector<1x1x16x64xf32>
    %122 = vector.shape_cast %121 : vector<1x1x16x64xf32> to vector<16x64xf32>
    %cst_116 = arith.constant dense<0.000000e+00> : vector<8x64xf32>
    %123 = tpu.matmul %120, %122, %cst_116 {dimension_numbers = #tpu.dot_dimension_numbers<[1], [0], [0], [1], [0, 0, 1, 1], [], []>} : vector<8x16xf32>, vector<16x64xf32>, vector<8x64xf32> -> vector<8x64xf32>
    %124 = arith.addf %85, %123 : vector<8x64xf32>
    %c0_117 = arith.constant 0 : index
    %c3 = arith.constant 3 : index
    %c0_118 = arith.constant 0 : index
    %c0_119 = arith.constant 0 : index
    %125 = vector.load %arg5[%c0_117, %c3, %c0_118, %c0_119] : memref<2x4x64x16xf32, #tpu.memory_space<vmem>>, vector<1x1x64x16xf32>
    %126 = vector.shape_cast %125 : vector<1x1x64x16xf32> to vector<64x16xf32>
    %cst_120 = arith.constant dense<0.000000e+00> : vector<8x16xf32>
    %127 = tpu.matmul %8, %126, %cst_120 {dimension_numbers = #tpu.dot_dimension_numbers<[1], [0], [0], [1], [0, 0, 1, 1], [], []>} : vector<8x64xf32>, vector<64x16xf32>, vector<8x16xf32> -> vector<8x16xf32>
    %c0_121 = arith.constant 0 : index
    %c3_122 = arith.constant 3 : index
    %c0_123 = arith.constant 0 : index
    %c0_124 = arith.constant 0 : index
    %128 = vector.load %arg6[%c0_121, %c3_122, %c0_123, %c0_124] : memref<2x4x1x16xf32, #tpu.memory_space<vmem>>, vector<1x1x1x16xf32>
    %129 = vector.shape_cast %128 : vector<1x1x1x16xf32> to vector<1x16xf32>
    %130 = vector.broadcast %129 : vector<1x16xf32> to vector<8x16xf32>
    %131 = arith.addf %127, %130 : vector<8x16xf32>
    %c0_125 = arith.constant 0 : index
    %c3_126 = arith.constant 3 : index
    %c0_127 = arith.constant 0 : index
    %c0_128 = arith.constant 0 : index
    %132 = vector.load %arg7[%c0_125, %c3_126, %c0_127, %c0_128] : memref<2x4x64x16xf32, #tpu.memory_space<vmem>>, vector<1x1x64x16xf32>
    %133 = vector.shape_cast %132 : vector<1x1x64x16xf32> to vector<64x16xf32>
    %cst_129 = arith.constant dense<0.000000e+00> : vector<8x16xf32>
    %134 = tpu.matmul %8, %133, %cst_129 {dimension_numbers = #tpu.dot_dimension_numbers<[1], [0], [0], [1], [0, 0, 1, 1], [], []>} : vector<8x64xf32>, vector<64x16xf32>, vector<8x16xf32> -> vector<8x16xf32>
    %c0_130 = arith.constant 0 : index
    %c3_131 = arith.constant 3 : index
    %c0_132 = arith.constant 0 : index
    %c0_133 = arith.constant 0 : index
    %135 = vector.load %arg8[%c0_130, %c3_131, %c0_132, %c0_133] : memref<2x4x1x16xf32, #tpu.memory_space<vmem>>, vector<1x1x1x16xf32>
    %136 = vector.shape_cast %135 : vector<1x1x1x16xf32> to vector<1x16xf32>
    %137 = vector.broadcast %136 : vector<1x16xf32> to vector<8x16xf32>
    %138 = arith.addf %134, %137 : vector<8x16xf32>
    %c0_134 = arith.constant 0 : index
    %c3_135 = arith.constant 3 : index
    %c0_136 = arith.constant 0 : index
    %c0_137 = arith.constant 0 : index
    %139 = vector.load %arg9[%c0_134, %c3_135, %c0_136, %c0_137] : memref<2x4x64x16xf32, #tpu.memory_space<vmem>>, vector<1x1x64x16xf32>
    %140 = vector.shape_cast %139 : vector<1x1x64x16xf32> to vector<64x16xf32>
    %cst_138 = arith.constant dense<0.000000e+00> : vector<8x16xf32>
    %141 = tpu.matmul %8, %140, %cst_138 {dimension_numbers = #tpu.dot_dimension_numbers<[1], [0], [0], [1], [0, 0, 1, 1], [], []>} : vector<8x64xf32>, vector<64x16xf32>, vector<8x16xf32> -> vector<8x16xf32>
    %c0_139 = arith.constant 0 : index
    %c3_140 = arith.constant 3 : index
    %c0_141 = arith.constant 0 : index
    %c0_142 = arith.constant 0 : index
    %142 = vector.load %arg10[%c0_139, %c3_140, %c0_141, %c0_142] : memref<2x4x1x16xf32, #tpu.memory_space<vmem>>, vector<1x1x1x16xf32>
    %143 = vector.shape_cast %142 : vector<1x1x1x16xf32> to vector<1x16xf32>
    %144 = vector.broadcast %143 : vector<1x16xf32> to vector<8x16xf32>
    %145 = arith.addf %141, %144 : vector<8x16xf32>
    %cst_143 = arith.constant dense<0.000000e+00> : vector<8x8xf32>
    %146 = tpu.matmul %131, %138, %cst_143 {dimension_numbers = #tpu.dot_dimension_numbers<[1], [1], [0], [0], [0, 0, 1, 0], [], []>} : vector<8x16xf32>, vector<8x16xf32>, vector<8x8xf32> -> vector<8x8xf32>
    %cst_144 = arith.constant 2.500000e-01 : f32
    %147 = vector.broadcast %cst_144 : f32 to vector<8x8xf32>
    %148 = arith.mulf %146, %147 : vector<8x8xf32>
    %cst_145 = arith.constant dense<0xFF800000> : vector<8xf32>
    %149 = vector.multi_reduction <maximumf>, %148, %cst_145 [1] : vector<8x8xf32> to vector<8xf32>
    %150 = vector.shape_cast %149 : vector<8xf32> to vector<8x1xf32>
    %151 = vector.broadcast %150 : vector<8x1xf32> to vector<8x8xf32>
    %152 = arith.subf %148, %151 : vector<8x8xf32>
    %153 = math.exp %152 : vector<8x8xf32>
    %cst_146 = arith.constant dense<0.000000e+00> : vector<8xf32>
    %154 = vector.multi_reduction <add>, %153, %cst_146 [1] : vector<8x8xf32> to vector<8xf32>
    %155 = vector.shape_cast %154 : vector<8xf32> to vector<8x1xf32>
    %156 = tpu.reciprocal %155 {approx = true} : vector<8x1xf32> -> vector<8x1xf32>
    %157 = vector.broadcast %156 : vector<8x1xf32> to vector<8x8xf32>
    %158 = arith.mulf %153, %157 : vector<8x8xf32>
    %cst_147 = arith.constant dense<0.000000e+00> : vector<8x16xf32>
    %159 = tpu.matmul %158, %145, %cst_147 {dimension_numbers = #tpu.dot_dimension_numbers<[1], [0], [0], [1], [0, 0, 1, 1], [], []>} : vector<8x8xf32>, vector<8x16xf32>, vector<8x16xf32> -> vector<8x16xf32>
    %c0_148 = arith.constant 0 : index
    %c3_149 = arith.constant 3 : index
    %c0_150 = arith.constant 0 : index
    %c0_151 = arith.constant 0 : index
    %160 = vector.load %arg11[%c0_148, %c3_149, %c0_150, %c0_151] : memref<2x4x16x64xf32, #tpu.memory_space<vmem>>, vector<1x1x16x64xf32>
    %161 = vector.shape_cast %160 : vector<1x1x16x64xf32> to vector<16x64xf32>
    %cst_152 = arith.constant dense<0.000000e+00> : vector<8x64xf32>
    %162 = tpu.matmul %159, %161, %cst_152 {dimension_numbers = #tpu.dot_dimension_numbers<[1], [0], [0], [1], [0, 0, 1, 1], [], []>} : vector<8x16xf32>, vector<16x64xf32>, vector<8x64xf32> -> vector<8x64xf32>
    %163 = arith.addf %124, %162 : vector<8x64xf32>
    %c0_153 = arith.constant 0 : index
    %c0_154 = arith.constant 0 : index
    %c0_155 = arith.constant 0 : index
    %164 = vector.load %arg12[%c0_153, %c0_154, %c0_155] : memref<2x1x64xf32, #tpu.memory_space<vmem>>, vector<1x1x64xf32>
    %165 = vector.shape_cast %164 : vector<1x1x64xf32> to vector<1x64xf32>
    %166 = vector.broadcast %165 : vector<1x64xf32> to vector<8x64xf32>
    %167 = arith.addf %163, %166 : vector<8x64xf32>
    %168 = arith.addf %8, %167 : vector<8x64xf32>
    %c0_156 = arith.constant 0 : index
    %c0_157 = arith.constant 0 : index
    %c0_158 = arith.constant 0 : index
    %169 = vector.load %arg13[%c0_156, %c0_157, %c0_158] : memref<2x1x64xf32, #tpu.memory_space<vmem>>, vector<1x1x64xf32>
    %170 = vector.shape_cast %169 : vector<1x1x64xf32> to vector<1x64xf32>
    %c0_159 = arith.constant 0 : index
    %c0_160 = arith.constant 0 : index
    %c0_161 = arith.constant 0 : index
    %171 = vector.load %arg14[%c0_159, %c0_160, %c0_161] : memref<2x1x64xf32, #tpu.memory_space<vmem>>, vector<1x1x64xf32>
    %172 = vector.shape_cast %171 : vector<1x1x64xf32> to vector<1x64xf32>
    %cst_162 = arith.constant dense<0.000000e+00> : vector<8xf32>
    %173 = vector.multi_reduction <add>, %168, %cst_162 [1] : vector<8x64xf32> to vector<8xf32>
    %174 = vector.shape_cast %173 : vector<8xf32> to vector<8x1xf32>
    %cst_163 = arith.constant 6.400000e+01 : f32
    %175 = vector.broadcast %cst_163 : f32 to vector<8x1xf32>
    %176 = arith.divf %174, %175 : vector<8x1xf32>
    %177 = vector.broadcast %176 : vector<8x1xf32> to vector<8x64xf32>
    %178 = arith.subf %168, %177 : vector<8x64xf32>
    %179 = arith.mulf %178, %178 : vector<8x64xf32>
    %cst_164 = arith.constant dense<0.000000e+00> : vector<8xf32>
    %180 = vector.multi_reduction <add>, %179, %cst_164 [1] : vector<8x64xf32> to vector<8xf32>
    %181 = vector.shape_cast %180 : vector<8xf32> to vector<8x1xf32>
    %cst_165 = arith.constant 6.400000e+01 : f32
    %182 = vector.broadcast %cst_165 : f32 to vector<8x1xf32>
    %183 = arith.divf %181, %182 : vector<8x1xf32>
    %cst_166 = arith.constant 9.99999974E-6 : f32
    %184 = vector.broadcast %cst_166 : f32 to vector<8x1xf32>
    %185 = arith.addf %183, %184 : vector<8x1xf32>
    %186 = math.rsqrt %185 : vector<8x1xf32>
    %187 = vector.broadcast %186 : vector<8x1xf32> to vector<8x64xf32>
    %188 = arith.mulf %178, %187 : vector<8x64xf32>
    %189 = vector.broadcast %170 : vector<1x64xf32> to vector<8x64xf32>
    %190 = arith.mulf %188, %189 : vector<8x64xf32>
    %191 = vector.broadcast %172 : vector<1x64xf32> to vector<8x64xf32>
    %192 = arith.addf %190, %191 : vector<8x64xf32>
    %c0_167 = arith.constant 0 : index
    %c0_168 = arith.constant 0 : index
    %c0_169 = arith.constant 0 : index
    %193 = vector.load %arg15[%c0_167, %c0_168, %c0_169] : memref<2x64x2048xf32, #tpu.memory_space<vmem>>, vector<1x64x2048xf32>
    %194 = vector.shape_cast %193 : vector<1x64x2048xf32> to vector<64x2048xf32>
    %cst_170 = arith.constant dense<0.000000e+00> : vector<8x2048xf32>
    %195 = tpu.matmul %192, %194, %cst_170 {dimension_numbers = #tpu.dot_dimension_numbers<[1], [0], [0], [1], [0, 0, 1, 1], [], []>} : vector<8x64xf32>, vector<64x2048xf32>, vector<8x2048xf32> -> vector<8x2048xf32>
    %c0_171 = arith.constant 0 : index
    %c0_172 = arith.constant 0 : index
    %c0_173 = arith.constant 0 : index
    %196 = vector.load %arg16[%c0_171, %c0_172, %c0_173] : memref<2x1x2048xf32, #tpu.memory_space<vmem>>, vector<1x1x2048xf32>
    %197 = vector.shape_cast %196 : vector<1x1x2048xf32> to vector<1x2048xf32>
    %198 = vector.broadcast %197 : vector<1x2048xf32> to vector<8x2048xf32>
    %199 = arith.addf %195, %198 : vector<8x2048xf32>
    %cst_174 = arith.constant 0.000000e+00 : f32
    %200 = vector.broadcast %cst_174 : f32 to vector<8x2048xf32>
    %201 = arith.maximumf %199, %200 : vector<8x2048xf32>
    %c0_175 = arith.constant 0 : index
    %c0_176 = arith.constant 0 : index
    %c0_177 = arith.constant 0 : index
    %202 = vector.load %arg17[%c0_175, %c0_176, %c0_177] : memref<2x2048x64xf32, #tpu.memory_space<vmem>>, vector<1x2048x64xf32>
    %203 = vector.shape_cast %202 : vector<1x2048x64xf32> to vector<2048x64xf32>
    %cst_178 = arith.constant dense<0.000000e+00> : vector<8x64xf32>
    %204 = tpu.matmul %201, %203, %cst_178 {dimension_numbers = #tpu.dot_dimension_numbers<[1], [0], [0], [1], [0, 0, 1, 1], [], []>} : vector<8x2048xf32>, vector<2048x64xf32>, vector<8x64xf32> -> vector<8x64xf32>
    %c0_179 = arith.constant 0 : index
    %c0_180 = arith.constant 0 : index
    %c0_181 = arith.constant 0 : index
    %205 = vector.load %arg18[%c0_179, %c0_180, %c0_181] : memref<2x1x64xf32, #tpu.memory_space<vmem>>, vector<1x1x64xf32>
    %206 = vector.shape_cast %205 : vector<1x1x64xf32> to vector<1x64xf32>
    %207 = vector.broadcast %206 : vector<1x64xf32> to vector<8x64xf32>
    %208 = arith.addf %204, %207 : vector<8x64xf32>
    %209 = arith.addf %192, %208 : vector<8x64xf32>
    %c0_182 = arith.constant 0 : index
    %c0_183 = arith.constant 0 : index
    %c0_184 = arith.constant 0 : index
    %210 = vector.load %arg19[%c0_182, %c0_183, %c0_184] : memref<2x1x64xf32, #tpu.memory_space<vmem>>, vector<1x1x64xf32>
    %211 = vector.shape_cast %210 : vector<1x1x64xf32> to vector<1x64xf32>
    %c0_185 = arith.constant 0 : index
    %c0_186 = arith.constant 0 : index
    %c0_187 = arith.constant 0 : index
    %212 = vector.load %arg20[%c0_185, %c0_186, %c0_187] : memref<2x1x64xf32, #tpu.memory_space<vmem>>, vector<1x1x64xf32>
    %213 = vector.shape_cast %212 : vector<1x1x64xf32> to vector<1x64xf32>
    %cst_188 = arith.constant dense<0.000000e+00> : vector<8xf32>
    %214 = vector.multi_reduction <add>, %209, %cst_188 [1] : vector<8x64xf32> to vector<8xf32>
    %215 = vector.shape_cast %214 : vector<8xf32> to vector<8x1xf32>
    %cst_189 = arith.constant 6.400000e+01 : f32
    %216 = vector.broadcast %cst_189 : f32 to vector<8x1xf32>
    %217 = arith.divf %215, %216 : vector<8x1xf32>
    %218 = vector.broadcast %217 : vector<8x1xf32> to vector<8x64xf32>
    %219 = arith.subf %209, %218 : vector<8x64xf32>
    %220 = arith.mulf %219, %219 : vector<8x64xf32>
    %cst_190 = arith.constant dense<0.000000e+00> : vector<8xf32>
    %221 = vector.multi_reduction <add>, %220, %cst_190 [1] : vector<8x64xf32> to vector<8xf32>
    %222 = vector.shape_cast %221 : vector<8xf32> to vector<8x1xf32>
    %cst_191 = arith.constant 6.400000e+01 : f32
    %223 = vector.broadcast %cst_191 : f32 to vector<8x1xf32>
    %224 = arith.divf %222, %223 : vector<8x1xf32>
    %cst_192 = arith.constant 9.99999974E-6 : f32
    %225 = vector.broadcast %cst_192 : f32 to vector<8x1xf32>
    %226 = arith.addf %224, %225 : vector<8x1xf32>
    %227 = math.rsqrt %226 : vector<8x1xf32>
    %228 = vector.broadcast %227 : vector<8x1xf32> to vector<8x64xf32>
    %229 = arith.mulf %219, %228 : vector<8x64xf32>
    %230 = vector.broadcast %211 : vector<1x64xf32> to vector<8x64xf32>
    %231 = arith.mulf %229, %230 : vector<8x64xf32>
    %232 = vector.broadcast %213 : vector<1x64xf32> to vector<8x64xf32>
    %233 = arith.addf %231, %232 : vector<8x64xf32>
    %c1_193 = arith.constant 1 : index
    %c0_194 = arith.constant 0 : index
    %c0_195 = arith.constant 0 : index
    %c0_196 = arith.constant 0 : index
    %234 = vector.load %arg5[%c1_193, %c0_194, %c0_195, %c0_196] : memref<2x4x64x16xf32, #tpu.memory_space<vmem>>, vector<1x1x64x16xf32>
    %235 = vector.shape_cast %234 : vector<1x1x64x16xf32> to vector<64x16xf32>
    %cst_197 = arith.constant dense<0.000000e+00> : vector<8x16xf32>
    %236 = tpu.matmul %233, %235, %cst_197 {dimension_numbers = #tpu.dot_dimension_numbers<[1], [0], [0], [1], [0, 0, 1, 1], [], []>} : vector<8x64xf32>, vector<64x16xf32>, vector<8x16xf32> -> vector<8x16xf32>
    %c1_198 = arith.constant 1 : index
    %c0_199 = arith.constant 0 : index
    %c0_200 = arith.constant 0 : index
    %c0_201 = arith.constant 0 : index
    %237 = vector.load %arg6[%c1_198, %c0_199, %c0_200, %c0_201] : memref<2x4x1x16xf32, #tpu.memory_space<vmem>>, vector<1x1x1x16xf32>
    %238 = vector.shape_cast %237 : vector<1x1x1x16xf32> to vector<1x16xf32>
    %239 = vector.broadcast %238 : vector<1x16xf32> to vector<8x16xf32>
    %240 = arith.addf %236, %239 : vector<8x16xf32>
    %c1_202 = arith.constant 1 : index
    %c0_203 = arith.constant 0 : index
    %c0_204 = arith.constant 0 : index
    %c0_205 = arith.constant 0 : index
    %241 = vector.load %arg7[%c1_202, %c0_203, %c0_204, %c0_205] : memref<2x4x64x16xf32, #tpu.memory_space<vmem>>, vector<1x1x64x16xf32>
    %242 = vector.shape_cast %241 : vector<1x1x64x16xf32> to vector<64x16xf32>
    %cst_206 = arith.constant dense<0.000000e+00> : vector<8x16xf32>
    %243 = tpu.matmul %233, %242, %cst_206 {dimension_numbers = #tpu.dot_dimension_numbers<[1], [0], [0], [1], [0, 0, 1, 1], [], []>} : vector<8x64xf32>, vector<64x16xf32>, vector<8x16xf32> -> vector<8x16xf32>
    %c1_207 = arith.constant 1 : index
    %c0_208 = arith.constant 0 : index
    %c0_209 = arith.constant 0 : index
    %c0_210 = arith.constant 0 : index
    %244 = vector.load %arg8[%c1_207, %c0_208, %c0_209, %c0_210] : memref<2x4x1x16xf32, #tpu.memory_space<vmem>>, vector<1x1x1x16xf32>
    %245 = vector.shape_cast %244 : vector<1x1x1x16xf32> to vector<1x16xf32>
    %246 = vector.broadcast %245 : vector<1x16xf32> to vector<8x16xf32>
    %247 = arith.addf %243, %246 : vector<8x16xf32>
    %c1_211 = arith.constant 1 : index
    %c0_212 = arith.constant 0 : index
    %c0_213 = arith.constant 0 : index
    %c0_214 = arith.constant 0 : index
    %248 = vector.load %arg9[%c1_211, %c0_212, %c0_213, %c0_214] : memref<2x4x64x16xf32, #tpu.memory_space<vmem>>, vector<1x1x64x16xf32>
    %249 = vector.shape_cast %248 : vector<1x1x64x16xf32> to vector<64x16xf32>
    %cst_215 = arith.constant dense<0.000000e+00> : vector<8x16xf32>
    %250 = tpu.matmul %233, %249, %cst_215 {dimension_numbers = #tpu.dot_dimension_numbers<[1], [0], [0], [1], [0, 0, 1, 1], [], []>} : vector<8x64xf32>, vector<64x16xf32>, vector<8x16xf32> -> vector<8x16xf32>
    %c1_216 = arith.constant 1 : index
    %c0_217 = arith.constant 0 : index
    %c0_218 = arith.constant 0 : index
    %c0_219 = arith.constant 0 : index
    %251 = vector.load %arg10[%c1_216, %c0_217, %c0_218, %c0_219] : memref<2x4x1x16xf32, #tpu.memory_space<vmem>>, vector<1x1x1x16xf32>
    %252 = vector.shape_cast %251 : vector<1x1x1x16xf32> to vector<1x16xf32>
    %253 = vector.broadcast %252 : vector<1x16xf32> to vector<8x16xf32>
    %254 = arith.addf %250, %253 : vector<8x16xf32>
    %cst_220 = arith.constant dense<0.000000e+00> : vector<8x8xf32>
    %255 = tpu.matmul %240, %247, %cst_220 {dimension_numbers = #tpu.dot_dimension_numbers<[1], [1], [0], [0], [0, 0, 1, 0], [], []>} : vector<8x16xf32>, vector<8x16xf32>, vector<8x8xf32> -> vector<8x8xf32>
    %cst_221 = arith.constant 2.500000e-01 : f32
    %256 = vector.broadcast %cst_221 : f32 to vector<8x8xf32>
    %257 = arith.mulf %255, %256 : vector<8x8xf32>
    %cst_222 = arith.constant dense<0xFF800000> : vector<8xf32>
    %258 = vector.multi_reduction <maximumf>, %257, %cst_222 [1] : vector<8x8xf32> to vector<8xf32>
    %259 = vector.shape_cast %258 : vector<8xf32> to vector<8x1xf32>
    %260 = vector.broadcast %259 : vector<8x1xf32> to vector<8x8xf32>
    %261 = arith.subf %257, %260 : vector<8x8xf32>
    %262 = math.exp %261 : vector<8x8xf32>
    %cst_223 = arith.constant dense<0.000000e+00> : vector<8xf32>
    %263 = vector.multi_reduction <add>, %262, %cst_223 [1] : vector<8x8xf32> to vector<8xf32>
    %264 = vector.shape_cast %263 : vector<8xf32> to vector<8x1xf32>
    %265 = tpu.reciprocal %264 {approx = true} : vector<8x1xf32> -> vector<8x1xf32>
    %266 = vector.broadcast %265 : vector<8x1xf32> to vector<8x8xf32>
    %267 = arith.mulf %262, %266 : vector<8x8xf32>
    %cst_224 = arith.constant dense<0.000000e+00> : vector<8x16xf32>
    %268 = tpu.matmul %267, %254, %cst_224 {dimension_numbers = #tpu.dot_dimension_numbers<[1], [0], [0], [1], [0, 0, 1, 1], [], []>} : vector<8x8xf32>, vector<8x16xf32>, vector<8x16xf32> -> vector<8x16xf32>
    %c1_225 = arith.constant 1 : index
    %c0_226 = arith.constant 0 : index
    %c0_227 = arith.constant 0 : index
    %c0_228 = arith.constant 0 : index
    %269 = vector.load %arg11[%c1_225, %c0_226, %c0_227, %c0_228] : memref<2x4x16x64xf32, #tpu.memory_space<vmem>>, vector<1x1x16x64xf32>
    %270 = vector.shape_cast %269 : vector<1x1x16x64xf32> to vector<16x64xf32>
    %cst_229 = arith.constant dense<0.000000e+00> : vector<8x64xf32>
    %271 = tpu.matmul %268, %270, %cst_229 {dimension_numbers = #tpu.dot_dimension_numbers<[1], [0], [0], [1], [0, 0, 1, 1], [], []>} : vector<8x16xf32>, vector<16x64xf32>, vector<8x64xf32> -> vector<8x64xf32>
    %c1_230 = arith.constant 1 : index
    %c1_231 = arith.constant 1 : index
    %c0_232 = arith.constant 0 : index
    %c0_233 = arith.constant 0 : index
    %272 = vector.load %arg5[%c1_230, %c1_231, %c0_232, %c0_233] : memref<2x4x64x16xf32, #tpu.memory_space<vmem>>, vector<1x1x64x16xf32>
    %273 = vector.shape_cast %272 : vector<1x1x64x16xf32> to vector<64x16xf32>
    %cst_234 = arith.constant dense<0.000000e+00> : vector<8x16xf32>
    %274 = tpu.matmul %233, %273, %cst_234 {dimension_numbers = #tpu.dot_dimension_numbers<[1], [0], [0], [1], [0, 0, 1, 1], [], []>} : vector<8x64xf32>, vector<64x16xf32>, vector<8x16xf32> -> vector<8x16xf32>
    %c1_235 = arith.constant 1 : index
    %c1_236 = arith.constant 1 : index
    %c0_237 = arith.constant 0 : index
    %c0_238 = arith.constant 0 : index
    %275 = vector.load %arg6[%c1_235, %c1_236, %c0_237, %c0_238] : memref<2x4x1x16xf32, #tpu.memory_space<vmem>>, vector<1x1x1x16xf32>
    %276 = vector.shape_cast %275 : vector<1x1x1x16xf32> to vector<1x16xf32>
    %277 = vector.broadcast %276 : vector<1x16xf32> to vector<8x16xf32>
    %278 = arith.addf %274, %277 : vector<8x16xf32>
    %c1_239 = arith.constant 1 : index
    %c1_240 = arith.constant 1 : index
    %c0_241 = arith.constant 0 : index
    %c0_242 = arith.constant 0 : index
    %279 = vector.load %arg7[%c1_239, %c1_240, %c0_241, %c0_242] : memref<2x4x64x16xf32, #tpu.memory_space<vmem>>, vector<1x1x64x16xf32>
    %280 = vector.shape_cast %279 : vector<1x1x64x16xf32> to vector<64x16xf32>
    %cst_243 = arith.constant dense<0.000000e+00> : vector<8x16xf32>
    %281 = tpu.matmul %233, %280, %cst_243 {dimension_numbers = #tpu.dot_dimension_numbers<[1], [0], [0], [1], [0, 0, 1, 1], [], []>} : vector<8x64xf32>, vector<64x16xf32>, vector<8x16xf32> -> vector<8x16xf32>
    %c1_244 = arith.constant 1 : index
    %c1_245 = arith.constant 1 : index
    %c0_246 = arith.constant 0 : index
    %c0_247 = arith.constant 0 : index
    %282 = vector.load %arg8[%c1_244, %c1_245, %c0_246, %c0_247] : memref<2x4x1x16xf32, #tpu.memory_space<vmem>>, vector<1x1x1x16xf32>
    %283 = vector.shape_cast %282 : vector<1x1x1x16xf32> to vector<1x16xf32>
    %284 = vector.broadcast %283 : vector<1x16xf32> to vector<8x16xf32>
    %285 = arith.addf %281, %284 : vector<8x16xf32>
    %c1_248 = arith.constant 1 : index
    %c1_249 = arith.constant 1 : index
    %c0_250 = arith.constant 0 : index
    %c0_251 = arith.constant 0 : index
    %286 = vector.load %arg9[%c1_248, %c1_249, %c0_250, %c0_251] : memref<2x4x64x16xf32, #tpu.memory_space<vmem>>, vector<1x1x64x16xf32>
    %287 = vector.shape_cast %286 : vector<1x1x64x16xf32> to vector<64x16xf32>
    %cst_252 = arith.constant dense<0.000000e+00> : vector<8x16xf32>
    %288 = tpu.matmul %233, %287, %cst_252 {dimension_numbers = #tpu.dot_dimension_numbers<[1], [0], [0], [1], [0, 0, 1, 1], [], []>} : vector<8x64xf32>, vector<64x16xf32>, vector<8x16xf32> -> vector<8x16xf32>
    %c1_253 = arith.constant 1 : index
    %c1_254 = arith.constant 1 : index
    %c0_255 = arith.constant 0 : index
    %c0_256 = arith.constant 0 : index
    %289 = vector.load %arg10[%c1_253, %c1_254, %c0_255, %c0_256] : memref<2x4x1x16xf32, #tpu.memory_space<vmem>>, vector<1x1x1x16xf32>
    %290 = vector.shape_cast %289 : vector<1x1x1x16xf32> to vector<1x16xf32>
    %291 = vector.broadcast %290 : vector<1x16xf32> to vector<8x16xf32>
    %292 = arith.addf %288, %291 : vector<8x16xf32>
    %cst_257 = arith.constant dense<0.000000e+00> : vector<8x8xf32>
    %293 = tpu.matmul %278, %285, %cst_257 {dimension_numbers = #tpu.dot_dimension_numbers<[1], [1], [0], [0], [0, 0, 1, 0], [], []>} : vector<8x16xf32>, vector<8x16xf32>, vector<8x8xf32> -> vector<8x8xf32>
    %cst_258 = arith.constant 2.500000e-01 : f32
    %294 = vector.broadcast %cst_258 : f32 to vector<8x8xf32>
    %295 = arith.mulf %293, %294 : vector<8x8xf32>
    %cst_259 = arith.constant dense<0xFF800000> : vector<8xf32>
    %296 = vector.multi_reduction <maximumf>, %295, %cst_259 [1] : vector<8x8xf32> to vector<8xf32>
    %297 = vector.shape_cast %296 : vector<8xf32> to vector<8x1xf32>
    %298 = vector.broadcast %297 : vector<8x1xf32> to vector<8x8xf32>
    %299 = arith.subf %295, %298 : vector<8x8xf32>
    %300 = math.exp %299 : vector<8x8xf32>
    %cst_260 = arith.constant dense<0.000000e+00> : vector<8xf32>
    %301 = vector.multi_reduction <add>, %300, %cst_260 [1] : vector<8x8xf32> to vector<8xf32>
    %302 = vector.shape_cast %301 : vector<8xf32> to vector<8x1xf32>
    %303 = tpu.reciprocal %302 {approx = true} : vector<8x1xf32> -> vector<8x1xf32>
    %304 = vector.broadcast %303 : vector<8x1xf32> to vector<8x8xf32>
    %305 = arith.mulf %300, %304 : vector<8x8xf32>
    %cst_261 = arith.constant dense<0.000000e+00> : vector<8x16xf32>
    %306 = tpu.matmul %305, %292, %cst_261 {dimension_numbers = #tpu.dot_dimension_numbers<[1], [0], [0], [1], [0, 0, 1, 1], [], []>} : vector<8x8xf32>, vector<8x16xf32>, vector<8x16xf32> -> vector<8x16xf32>
    %c1_262 = arith.constant 1 : index
    %c1_263 = arith.constant 1 : index
    %c0_264 = arith.constant 0 : index
    %c0_265 = arith.constant 0 : index
    %307 = vector.load %arg11[%c1_262, %c1_263, %c0_264, %c0_265] : memref<2x4x16x64xf32, #tpu.memory_space<vmem>>, vector<1x1x16x64xf32>
    %308 = vector.shape_cast %307 : vector<1x1x16x64xf32> to vector<16x64xf32>
    %cst_266 = arith.constant dense<0.000000e+00> : vector<8x64xf32>
    %309 = tpu.matmul %306, %308, %cst_266 {dimension_numbers = #tpu.dot_dimension_numbers<[1], [0], [0], [1], [0, 0, 1, 1], [], []>} : vector<8x16xf32>, vector<16x64xf32>, vector<8x64xf32> -> vector<8x64xf32>
    %310 = arith.addf %271, %309 : vector<8x64xf32>
    %c1_267 = arith.constant 1 : index
    %c2_268 = arith.constant 2 : index
    %c0_269 = arith.constant 0 : index
    %c0_270 = arith.constant 0 : index
    %311 = vector.load %arg5[%c1_267, %c2_268, %c0_269, %c0_270] : memref<2x4x64x16xf32, #tpu.memory_space<vmem>>, vector<1x1x64x16xf32>
    %312 = vector.shape_cast %311 : vector<1x1x64x16xf32> to vector<64x16xf32>
    %cst_271 = arith.constant dense<0.000000e+00> : vector<8x16xf32>
    %313 = tpu.matmul %233, %312, %cst_271 {dimension_numbers = #tpu.dot_dimension_numbers<[1], [0], [0], [1], [0, 0, 1, 1], [], []>} : vector<8x64xf32>, vector<64x16xf32>, vector<8x16xf32> -> vector<8x16xf32>
    %c1_272 = arith.constant 1 : index
    %c2_273 = arith.constant 2 : index
    %c0_274 = arith.constant 0 : index
    %c0_275 = arith.constant 0 : index
    %314 = vector.load %arg6[%c1_272, %c2_273, %c0_274, %c0_275] : memref<2x4x1x16xf32, #tpu.memory_space<vmem>>, vector<1x1x1x16xf32>
    %315 = vector.shape_cast %314 : vector<1x1x1x16xf32> to vector<1x16xf32>
    %316 = vector.broadcast %315 : vector<1x16xf32> to vector<8x16xf32>
    %317 = arith.addf %313, %316 : vector<8x16xf32>
    %c1_276 = arith.constant 1 : index
    %c2_277 = arith.constant 2 : index
    %c0_278 = arith.constant 0 : index
    %c0_279 = arith.constant 0 : index
    %318 = vector.load %arg7[%c1_276, %c2_277, %c0_278, %c0_279] : memref<2x4x64x16xf32, #tpu.memory_space<vmem>>, vector<1x1x64x16xf32>
    %319 = vector.shape_cast %318 : vector<1x1x64x16xf32> to vector<64x16xf32>
    %cst_280 = arith.constant dense<0.000000e+00> : vector<8x16xf32>
    %320 = tpu.matmul %233, %319, %cst_280 {dimension_numbers = #tpu.dot_dimension_numbers<[1], [0], [0], [1], [0, 0, 1, 1], [], []>} : vector<8x64xf32>, vector<64x16xf32>, vector<8x16xf32> -> vector<8x16xf32>
    %c1_281 = arith.constant 1 : index
    %c2_282 = arith.constant 2 : index
    %c0_283 = arith.constant 0 : index
    %c0_284 = arith.constant 0 : index
    %321 = vector.load %arg8[%c1_281, %c2_282, %c0_283, %c0_284] : memref<2x4x1x16xf32, #tpu.memory_space<vmem>>, vector<1x1x1x16xf32>
    %322 = vector.shape_cast %321 : vector<1x1x1x16xf32> to vector<1x16xf32>
    %323 = vector.broadcast %322 : vector<1x16xf32> to vector<8x16xf32>
    %324 = arith.addf %320, %323 : vector<8x16xf32>
    %c1_285 = arith.constant 1 : index
    %c2_286 = arith.constant 2 : index
    %c0_287 = arith.constant 0 : index
    %c0_288 = arith.constant 0 : index
    %325 = vector.load %arg9[%c1_285, %c2_286, %c0_287, %c0_288] : memref<2x4x64x16xf32, #tpu.memory_space<vmem>>, vector<1x1x64x16xf32>
    %326 = vector.shape_cast %325 : vector<1x1x64x16xf32> to vector<64x16xf32>
    %cst_289 = arith.constant dense<0.000000e+00> : vector<8x16xf32>
    %327 = tpu.matmul %233, %326, %cst_289 {dimension_numbers = #tpu.dot_dimension_numbers<[1], [0], [0], [1], [0, 0, 1, 1], [], []>} : vector<8x64xf32>, vector<64x16xf32>, vector<8x16xf32> -> vector<8x16xf32>
    %c1_290 = arith.constant 1 : index
    %c2_291 = arith.constant 2 : index
    %c0_292 = arith.constant 0 : index
    %c0_293 = arith.constant 0 : index
    %328 = vector.load %arg10[%c1_290, %c2_291, %c0_292, %c0_293] : memref<2x4x1x16xf32, #tpu.memory_space<vmem>>, vector<1x1x1x16xf32>
    %329 = vector.shape_cast %328 : vector<1x1x1x16xf32> to vector<1x16xf32>
    %330 = vector.broadcast %329 : vector<1x16xf32> to vector<8x16xf32>
    %331 = arith.addf %327, %330 : vector<8x16xf32>
    %cst_294 = arith.constant dense<0.000000e+00> : vector<8x8xf32>
    %332 = tpu.matmul %317, %324, %cst_294 {dimension_numbers = #tpu.dot_dimension_numbers<[1], [1], [0], [0], [0, 0, 1, 0], [], []>} : vector<8x16xf32>, vector<8x16xf32>, vector<8x8xf32> -> vector<8x8xf32>
    %cst_295 = arith.constant 2.500000e-01 : f32
    %333 = vector.broadcast %cst_295 : f32 to vector<8x8xf32>
    %334 = arith.mulf %332, %333 : vector<8x8xf32>
    %cst_296 = arith.constant dense<0xFF800000> : vector<8xf32>
    %335 = vector.multi_reduction <maximumf>, %334, %cst_296 [1] : vector<8x8xf32> to vector<8xf32>
    %336 = vector.shape_cast %335 : vector<8xf32> to vector<8x1xf32>
    %337 = vector.broadcast %336 : vector<8x1xf32> to vector<8x8xf32>
    %338 = arith.subf %334, %337 : vector<8x8xf32>
    %339 = math.exp %338 : vector<8x8xf32>
    %cst_297 = arith.constant dense<0.000000e+00> : vector<8xf32>
    %340 = vector.multi_reduction <add>, %339, %cst_297 [1] : vector<8x8xf32> to vector<8xf32>
    %341 = vector.shape_cast %340 : vector<8xf32> to vector<8x1xf32>
    %342 = tpu.reciprocal %341 {approx = true} : vector<8x1xf32> -> vector<8x1xf32>
    %343 = vector.broadcast %342 : vector<8x1xf32> to vector<8x8xf32>
    %344 = arith.mulf %339, %343 : vector<8x8xf32>
    %cst_298 = arith.constant dense<0.000000e+00> : vector<8x16xf32>
    %345 = tpu.matmul %344, %331, %cst_298 {dimension_numbers = #tpu.dot_dimension_numbers<[1], [0], [0], [1], [0, 0, 1, 1], [], []>} : vector<8x8xf32>, vector<8x16xf32>, vector<8x16xf32> -> vector<8x16xf32>
    %c1_299 = arith.constant 1 : index
    %c2_300 = arith.constant 2 : index
    %c0_301 = arith.constant 0 : index
    %c0_302 = arith.constant 0 : index
    %346 = vector.load %arg11[%c1_299, %c2_300, %c0_301, %c0_302] : memref<2x4x16x64xf32, #tpu.memory_space<vmem>>, vector<1x1x16x64xf32>
    %347 = vector.shape_cast %346 : vector<1x1x16x64xf32> to vector<16x64xf32>
    %cst_303 = arith.constant dense<0.000000e+00> : vector<8x64xf32>
    %348 = tpu.matmul %345, %347, %cst_303 {dimension_numbers = #tpu.dot_dimension_numbers<[1], [0], [0], [1], [0, 0, 1, 1], [], []>} : vector<8x16xf32>, vector<16x64xf32>, vector<8x64xf32> -> vector<8x64xf32>
    %349 = arith.addf %310, %348 : vector<8x64xf32>
    %c1_304 = arith.constant 1 : index
    %c3_305 = arith.constant 3 : index
    %c0_306 = arith.constant 0 : index
    %c0_307 = arith.constant 0 : index
    %350 = vector.load %arg5[%c1_304, %c3_305, %c0_306, %c0_307] : memref<2x4x64x16xf32, #tpu.memory_space<vmem>>, vector<1x1x64x16xf32>
    %351 = vector.shape_cast %350 : vector<1x1x64x16xf32> to vector<64x16xf32>
    %cst_308 = arith.constant dense<0.000000e+00> : vector<8x16xf32>
    %352 = tpu.matmul %233, %351, %cst_308 {dimension_numbers = #tpu.dot_dimension_numbers<[1], [0], [0], [1], [0, 0, 1, 1], [], []>} : vector<8x64xf32>, vector<64x16xf32>, vector<8x16xf32> -> vector<8x16xf32>
    %c1_309 = arith.constant 1 : index
    %c3_310 = arith.constant 3 : index
    %c0_311 = arith.constant 0 : index
    %c0_312 = arith.constant 0 : index
    %353 = vector.load %arg6[%c1_309, %c3_310, %c0_311, %c0_312] : memref<2x4x1x16xf32, #tpu.memory_space<vmem>>, vector<1x1x1x16xf32>
    %354 = vector.shape_cast %353 : vector<1x1x1x16xf32> to vector<1x16xf32>
    %355 = vector.broadcast %354 : vector<1x16xf32> to vector<8x16xf32>
    %356 = arith.addf %352, %355 : vector<8x16xf32>
    %c1_313 = arith.constant 1 : index
    %c3_314 = arith.constant 3 : index
    %c0_315 = arith.constant 0 : index
    %c0_316 = arith.constant 0 : index
    %357 = vector.load %arg7[%c1_313, %c3_314, %c0_315, %c0_316] : memref<2x4x64x16xf32, #tpu.memory_space<vmem>>, vector<1x1x64x16xf32>
    %358 = vector.shape_cast %357 : vector<1x1x64x16xf32> to vector<64x16xf32>
    %cst_317 = arith.constant dense<0.000000e+00> : vector<8x16xf32>
    %359 = tpu.matmul %233, %358, %cst_317 {dimension_numbers = #tpu.dot_dimension_numbers<[1], [0], [0], [1], [0, 0, 1, 1], [], []>} : vector<8x64xf32>, vector<64x16xf32>, vector<8x16xf32> -> vector<8x16xf32>
    %c1_318 = arith.constant 1 : index
    %c3_319 = arith.constant 3 : index
    %c0_320 = arith.constant 0 : index
    %c0_321 = arith.constant 0 : index
    %360 = vector.load %arg8[%c1_318, %c3_319, %c0_320, %c0_321] : memref<2x4x1x16xf32, #tpu.memory_space<vmem>>, vector<1x1x1x16xf32>
    %361 = vector.shape_cast %360 : vector<1x1x1x16xf32> to vector<1x16xf32>
    %362 = vector.broadcast %361 : vector<1x16xf32> to vector<8x16xf32>
    %363 = arith.addf %359, %362 : vector<8x16xf32>
    %c1_322 = arith.constant 1 : index
    %c3_323 = arith.constant 3 : index
    %c0_324 = arith.constant 0 : index
    %c0_325 = arith.constant 0 : index
    %364 = vector.load %arg9[%c1_322, %c3_323, %c0_324, %c0_325] : memref<2x4x64x16xf32, #tpu.memory_space<vmem>>, vector<1x1x64x16xf32>
    %365 = vector.shape_cast %364 : vector<1x1x64x16xf32> to vector<64x16xf32>
    %cst_326 = arith.constant dense<0.000000e+00> : vector<8x16xf32>
    %366 = tpu.matmul %233, %365, %cst_326 {dimension_numbers = #tpu.dot_dimension_numbers<[1], [0], [0], [1], [0, 0, 1, 1], [], []>} : vector<8x64xf32>, vector<64x16xf32>, vector<8x16xf32> -> vector<8x16xf32>
    %c1_327 = arith.constant 1 : index
    %c3_328 = arith.constant 3 : index
    %c0_329 = arith.constant 0 : index
    %c0_330 = arith.constant 0 : index
    %367 = vector.load %arg10[%c1_327, %c3_328, %c0_329, %c0_330] : memref<2x4x1x16xf32, #tpu.memory_space<vmem>>, vector<1x1x1x16xf32>
    %368 = vector.shape_cast %367 : vector<1x1x1x16xf32> to vector<1x16xf32>
    %369 = vector.broadcast %368 : vector<1x16xf32> to vector<8x16xf32>
    %370 = arith.addf %366, %369 : vector<8x16xf32>
    %cst_331 = arith.constant dense<0.000000e+00> : vector<8x8xf32>
    %371 = tpu.matmul %356, %363, %cst_331 {dimension_numbers = #tpu.dot_dimension_numbers<[1], [1], [0], [0], [0, 0, 1, 0], [], []>} : vector<8x16xf32>, vector<8x16xf32>, vector<8x8xf32> -> vector<8x8xf32>
    %cst_332 = arith.constant 2.500000e-01 : f32
    %372 = vector.broadcast %cst_332 : f32 to vector<8x8xf32>
    %373 = arith.mulf %371, %372 : vector<8x8xf32>
    %cst_333 = arith.constant dense<0xFF800000> : vector<8xf32>
    %374 = vector.multi_reduction <maximumf>, %373, %cst_333 [1] : vector<8x8xf32> to vector<8xf32>
    %375 = vector.shape_cast %374 : vector<8xf32> to vector<8x1xf32>
    %376 = vector.broadcast %375 : vector<8x1xf32> to vector<8x8xf32>
    %377 = arith.subf %373, %376 : vector<8x8xf32>
    %378 = math.exp %377 : vector<8x8xf32>
    %cst_334 = arith.constant dense<0.000000e+00> : vector<8xf32>
    %379 = vector.multi_reduction <add>, %378, %cst_334 [1] : vector<8x8xf32> to vector<8xf32>
    %380 = vector.shape_cast %379 : vector<8xf32> to vector<8x1xf32>
    %381 = tpu.reciprocal %380 {approx = true} : vector<8x1xf32> -> vector<8x1xf32>
    %382 = vector.broadcast %381 : vector<8x1xf32> to vector<8x8xf32>
    %383 = arith.mulf %378, %382 : vector<8x8xf32>
    %cst_335 = arith.constant dense<0.000000e+00> : vector<8x16xf32>
    %384 = tpu.matmul %383, %370, %cst_335 {dimension_numbers = #tpu.dot_dimension_numbers<[1], [0], [0], [1], [0, 0, 1, 1], [], []>} : vector<8x8xf32>, vector<8x16xf32>, vector<8x16xf32> -> vector<8x16xf32>
    %c1_336 = arith.constant 1 : index
    %c3_337 = arith.constant 3 : index
    %c0_338 = arith.constant 0 : index
    %c0_339 = arith.constant 0 : index
    %385 = vector.load %arg11[%c1_336, %c3_337, %c0_338, %c0_339] : memref<2x4x16x64xf32, #tpu.memory_space<vmem>>, vector<1x1x16x64xf32>
    %386 = vector.shape_cast %385 : vector<1x1x16x64xf32> to vector<16x64xf32>
    %cst_340 = arith.constant dense<0.000000e+00> : vector<8x64xf32>
    %387 = tpu.matmul %384, %386, %cst_340 {dimension_numbers = #tpu.dot_dimension_numbers<[1], [0], [0], [1], [0, 0, 1, 1], [], []>} : vector<8x16xf32>, vector<16x64xf32>, vector<8x64xf32> -> vector<8x64xf32>
    %388 = arith.addf %349, %387 : vector<8x64xf32>
    %c1_341 = arith.constant 1 : index
    %c0_342 = arith.constant 0 : index
    %c0_343 = arith.constant 0 : index
    %389 = vector.load %arg12[%c1_341, %c0_342, %c0_343] : memref<2x1x64xf32, #tpu.memory_space<vmem>>, vector<1x1x64xf32>
    %390 = vector.shape_cast %389 : vector<1x1x64xf32> to vector<1x64xf32>
    %391 = vector.broadcast %390 : vector<1x64xf32> to vector<8x64xf32>
    %392 = arith.addf %388, %391 : vector<8x64xf32>
    %393 = arith.addf %233, %392 : vector<8x64xf32>
    %c1_344 = arith.constant 1 : index
    %c0_345 = arith.constant 0 : index
    %c0_346 = arith.constant 0 : index
    %394 = vector.load %arg13[%c1_344, %c0_345, %c0_346] : memref<2x1x64xf32, #tpu.memory_space<vmem>>, vector<1x1x64xf32>
    %395 = vector.shape_cast %394 : vector<1x1x64xf32> to vector<1x64xf32>
    %c1_347 = arith.constant 1 : index
    %c0_348 = arith.constant 0 : index
    %c0_349 = arith.constant 0 : index
    %396 = vector.load %arg14[%c1_347, %c0_348, %c0_349] : memref<2x1x64xf32, #tpu.memory_space<vmem>>, vector<1x1x64xf32>
    %397 = vector.shape_cast %396 : vector<1x1x64xf32> to vector<1x64xf32>
    %cst_350 = arith.constant dense<0.000000e+00> : vector<8xf32>
    %398 = vector.multi_reduction <add>, %393, %cst_350 [1] : vector<8x64xf32> to vector<8xf32>
    %399 = vector.shape_cast %398 : vector<8xf32> to vector<8x1xf32>
    %cst_351 = arith.constant 6.400000e+01 : f32
    %400 = vector.broadcast %cst_351 : f32 to vector<8x1xf32>
    %401 = arith.divf %399, %400 : vector<8x1xf32>
    %402 = vector.broadcast %401 : vector<8x1xf32> to vector<8x64xf32>
    %403 = arith.subf %393, %402 : vector<8x64xf32>
    %404 = arith.mulf %403, %403 : vector<8x64xf32>
    %cst_352 = arith.constant dense<0.000000e+00> : vector<8xf32>
    %405 = vector.multi_reduction <add>, %404, %cst_352 [1] : vector<8x64xf32> to vector<8xf32>
    %406 = vector.shape_cast %405 : vector<8xf32> to vector<8x1xf32>
    %cst_353 = arith.constant 6.400000e+01 : f32
    %407 = vector.broadcast %cst_353 : f32 to vector<8x1xf32>
    %408 = arith.divf %406, %407 : vector<8x1xf32>
    %cst_354 = arith.constant 9.99999974E-6 : f32
    %409 = vector.broadcast %cst_354 : f32 to vector<8x1xf32>
    %410 = arith.addf %408, %409 : vector<8x1xf32>
    %411 = math.rsqrt %410 : vector<8x1xf32>
    %412 = vector.broadcast %411 : vector<8x1xf32> to vector<8x64xf32>
    %413 = arith.mulf %403, %412 : vector<8x64xf32>
    %414 = vector.broadcast %395 : vector<1x64xf32> to vector<8x64xf32>
    %415 = arith.mulf %413, %414 : vector<8x64xf32>
    %416 = vector.broadcast %397 : vector<1x64xf32> to vector<8x64xf32>
    %417 = arith.addf %415, %416 : vector<8x64xf32>
    %c1_355 = arith.constant 1 : index
    %c0_356 = arith.constant 0 : index
    %c0_357 = arith.constant 0 : index
    %418 = vector.load %arg15[%c1_355, %c0_356, %c0_357] : memref<2x64x2048xf32, #tpu.memory_space<vmem>>, vector<1x64x2048xf32>
    %419 = vector.shape_cast %418 : vector<1x64x2048xf32> to vector<64x2048xf32>
    %cst_358 = arith.constant dense<0.000000e+00> : vector<8x2048xf32>
    %420 = tpu.matmul %417, %419, %cst_358 {dimension_numbers = #tpu.dot_dimension_numbers<[1], [0], [0], [1], [0, 0, 1, 1], [], []>} : vector<8x64xf32>, vector<64x2048xf32>, vector<8x2048xf32> -> vector<8x2048xf32>
    %c1_359 = arith.constant 1 : index
    %c0_360 = arith.constant 0 : index
    %c0_361 = arith.constant 0 : index
    %421 = vector.load %arg16[%c1_359, %c0_360, %c0_361] : memref<2x1x2048xf32, #tpu.memory_space<vmem>>, vector<1x1x2048xf32>
    %422 = vector.shape_cast %421 : vector<1x1x2048xf32> to vector<1x2048xf32>
    %423 = vector.broadcast %422 : vector<1x2048xf32> to vector<8x2048xf32>
    %424 = arith.addf %420, %423 : vector<8x2048xf32>
    %cst_362 = arith.constant 0.000000e+00 : f32
    %425 = vector.broadcast %cst_362 : f32 to vector<8x2048xf32>
    %426 = arith.maximumf %424, %425 : vector<8x2048xf32>
    %c1_363 = arith.constant 1 : index
    %c0_364 = arith.constant 0 : index
    %c0_365 = arith.constant 0 : index
    %427 = vector.load %arg17[%c1_363, %c0_364, %c0_365] : memref<2x2048x64xf32, #tpu.memory_space<vmem>>, vector<1x2048x64xf32>
    %428 = vector.shape_cast %427 : vector<1x2048x64xf32> to vector<2048x64xf32>
    %cst_366 = arith.constant dense<0.000000e+00> : vector<8x64xf32>
    %429 = tpu.matmul %426, %428, %cst_366 {dimension_numbers = #tpu.dot_dimension_numbers<[1], [0], [0], [1], [0, 0, 1, 1], [], []>} : vector<8x2048xf32>, vector<2048x64xf32>, vector<8x64xf32> -> vector<8x64xf32>
    %c1_367 = arith.constant 1 : index
    %c0_368 = arith.constant 0 : index
    %c0_369 = arith.constant 0 : index
    %430 = vector.load %arg18[%c1_367, %c0_368, %c0_369] : memref<2x1x64xf32, #tpu.memory_space<vmem>>, vector<1x1x64xf32>
    %431 = vector.shape_cast %430 : vector<1x1x64xf32> to vector<1x64xf32>
    %432 = vector.broadcast %431 : vector<1x64xf32> to vector<8x64xf32>
    %433 = arith.addf %429, %432 : vector<8x64xf32>
    %434 = arith.addf %417, %433 : vector<8x64xf32>
    %c1_370 = arith.constant 1 : index
    %c0_371 = arith.constant 0 : index
    %c0_372 = arith.constant 0 : index
    %435 = vector.load %arg19[%c1_370, %c0_371, %c0_372] : memref<2x1x64xf32, #tpu.memory_space<vmem>>, vector<1x1x64xf32>
    %436 = vector.shape_cast %435 : vector<1x1x64xf32> to vector<1x64xf32>
    %c1_373 = arith.constant 1 : index
    %c0_374 = arith.constant 0 : index
    %c0_375 = arith.constant 0 : index
    %437 = vector.load %arg20[%c1_373, %c0_374, %c0_375] : memref<2x1x64xf32, #tpu.memory_space<vmem>>, vector<1x1x64xf32>
    %438 = vector.shape_cast %437 : vector<1x1x64xf32> to vector<1x64xf32>
    %cst_376 = arith.constant dense<0.000000e+00> : vector<8xf32>
    %439 = vector.multi_reduction <add>, %434, %cst_376 [1] : vector<8x64xf32> to vector<8xf32>
    %440 = vector.shape_cast %439 : vector<8xf32> to vector<8x1xf32>
    %cst_377 = arith.constant 6.400000e+01 : f32
    %441 = vector.broadcast %cst_377 : f32 to vector<8x1xf32>
    %442 = arith.divf %440, %441 : vector<8x1xf32>
    %443 = vector.broadcast %442 : vector<8x1xf32> to vector<8x64xf32>
    %444 = arith.subf %434, %443 : vector<8x64xf32>
    %445 = arith.mulf %444, %444 : vector<8x64xf32>
    %cst_378 = arith.constant dense<0.000000e+00> : vector<8xf32>
    %446 = vector.multi_reduction <add>, %445, %cst_378 [1] : vector<8x64xf32> to vector<8xf32>
    %447 = vector.shape_cast %446 : vector<8xf32> to vector<8x1xf32>
    %cst_379 = arith.constant 6.400000e+01 : f32
    %448 = vector.broadcast %cst_379 : f32 to vector<8x1xf32>
    %449 = arith.divf %447, %448 : vector<8x1xf32>
    %cst_380 = arith.constant 9.99999974E-6 : f32
    %450 = vector.broadcast %cst_380 : f32 to vector<8x1xf32>
    %451 = arith.addf %449, %450 : vector<8x1xf32>
    %452 = math.rsqrt %451 : vector<8x1xf32>
    %453 = vector.broadcast %452 : vector<8x1xf32> to vector<8x64xf32>
    %454 = arith.mulf %444, %453 : vector<8x64xf32>
    %455 = vector.broadcast %436 : vector<1x64xf32> to vector<8x64xf32>
    %456 = arith.mulf %454, %455 : vector<8x64xf32>
    %457 = vector.broadcast %438 : vector<1x64xf32> to vector<8x64xf32>
    %458 = arith.addf %456, %457 : vector<8x64xf32>
    %459 = vector.extract_strided_slice %458 {offsets = [7, 0], sizes = [1, 64], strides = [1, 1]} : vector<8x64xf32> to vector<1x64xf32>
    %c0_381 = arith.constant 0 : index
    %c0_382 = arith.constant 0 : index
    %460 = vector.load %arg21[%c0_381, %c0_382] : memref<64x128xf32, #tpu.memory_space<vmem>>, vector<64x128xf32>
    %cst_383 = arith.constant dense<0.000000e+00> : vector<1x128xf32>
    %461 = tpu.matmul %459, %460, %cst_383 {dimension_numbers = #tpu.dot_dimension_numbers<[1], [0], [0], [1], [0, 0, 1, 1], [], []>} : vector<1x64xf32>, vector<64x128xf32>, vector<1x128xf32> -> vector<1x128xf32>
    %c0_384 = arith.constant 0 : index
    %c0_385 = arith.constant 0 : index
    %462 = vector.load %arg22[%c0_384, %c0_385] : memref<1x128xf32, #tpu.memory_space<vmem>>, vector<1x128xf32>
    %463 = arith.addf %461, %462 : vector<1x128xf32>
    %c0_386 = arith.constant 0 : index
    %c0_387 = arith.constant 0 : index
    %c0_388 = arith.constant 0 : index
    %464 = vector.load %arg23[%c0_386, %c0_387, %c0_388] : memref<1x1x128xf32, #tpu.memory_space<vmem>>, vector<1x1x128xf32>
    %465 = vector.shape_cast %464 : vector<1x1x128xf32> to vector<1x128xf32>
    %466 = vector.shape_cast %463 : vector<1x128xf32> to vector<1x1x128xf32>
    tpu.vector_store %arg23[%c0_386, %c0_387, %c0_388], %466 {strides = array<i32>} : memref<1x1x128xf32, #tpu.memory_space<vmem>>, vector<1x1x128xf32>,
    return
  }
  func.func @transform_0(%arg0: i32) -> (i32, i32, i32) {
    %c0_i32 = arith.constant 0 : i32
    %c0_i32_0 = arith.constant 0 : i32
    %c0_i32_1 = arith.constant 0 : i32
    return %arg0, %c0_i32, %c0_i32_0 : i32, i32, i32
  }
  func.func @transform_1(%arg0: i32) -> (i32, i32) {
    %c0_i32 = arith.constant 0 : i32
    %c0_i32_0 = arith.constant 0 : i32
    %c0_i32_1 = arith.constant 0 : i32
    return %c0_i32, %c0_i32_0 : i32, i32
  }
  func.func @transform_2(%arg0: i32) -> (i32, i32) {
    %c0_i32 = arith.constant 0 : i32
    %c0_i32_0 = arith.constant 0 : i32
    %c0_i32_1 = arith.constant 0 : i32
    return %c0_i32, %c0_i32_0 : i32, i32
  }
  func.func @transform_3(%arg0: i32) -> (i32, i32) {
    %c0_i32 = arith.constant 0 : i32
    %c0_i32_0 = arith.constant 0 : i32
    %c0_i32_1 = arith.constant 0 : i32
    return %c0_i32, %c0_i32_0 : i32, i32
  }
  func.func @transform_4(%arg0: i32) -> (i32, i32, i32, i32) {
    %c0_i32 = arith.constant 0 : i32
    %c0_i32_0 = arith.constant 0 : i32
    %c0_i32_1 = arith.constant 0 : i32
    %c0_i32_2 = arith.constant 0 : i32
    %c0_i32_3 = arith.constant 0 : i32
    return %c0_i32, %c0_i32_0, %c0_i32_1, %c0_i32_2 : i32, i32, i32, i32
  }
  func.func @transform_5(%arg0: i32) -> (i32, i32, i32, i32) {
    %c0_i32 = arith.constant 0 : i32
    %c0_i32_0 = arith.constant 0 : i32
    %c0_i32_1 = arith.constant 0 : i32
    %c0_i32_2 = arith.constant 0 : i32
    %c0_i32_3 = arith.constant 0 : i32
    return %c0_i32, %c0_i32_0, %c0_i32_1, %c0_i32_2 : i32, i32, i32, i32
  }
  func.func @transform_6(%arg0: i32) -> (i32, i32, i32, i32) {
    %c0_i32 = arith.constant 0 : i32
    %c0_i32_0 = arith.constant 0 : i32
    %c0_i32_1 = arith.constant 0 : i32
    %c0_i32_2 = arith.constant 0 : i32
    %c0_i32_3 = arith.constant 0 : i32
    return %c0_i32, %c0_i32_0, %c0_i32_1, %c0_i32_2 : i32, i32, i32, i32
  }
  func.func @transform_7(%arg0: i32) -> (i32, i32, i32, i32) {
    %c0_i32 = arith.constant 0 : i32
    %c0_i32_0 = arith.constant 0 : i32
    %c0_i32_1 = arith.constant 0 : i32
    %c0_i32_2 = arith.constant 0 : i32
    %c0_i32_3 = arith.constant 0 : i32
    return %c0_i32, %c0_i32_0, %c0_i32_1, %c0_i32_2 : i32, i32, i32, i32
  }
  func.func @transform_8(%arg0: i32) -> (i32, i32, i32, i32) {
    %c0_i32 = arith.constant 0 : i32
    %c0_i32_0 = arith.constant 0 : i32
    %c0_i32_1 = arith.constant 0 : i32
    %c0_i32_2 = arith.constant 0 : i32
    %c0_i32_3 = arith.constant 0 : i32
    return %c0_i32, %c0_i32_0, %c0_i32_1, %c0_i32_2 : i32, i32, i32, i32
  }
  func.func @transform_9(%arg0: i32) -> (i32, i32, i32, i32) {
    %c0_i32 = arith.constant 0 : i32
    %c0_i32_0 = arith.constant 0 : i32
    %c0_i32_1 = arith.constant 0 : i32
    %c0_i32_2 = arith.constant 0 : i32
    %c0_i32_3 = arith.constant 0 : i32
    return %c0_i32, %c0_i32_0, %c0_i32_1, %c0_i32_2 : i32, i32, i32, i32
  }
  func.func @transform_10(%arg0: i32) -> (i32, i32, i32, i32) {
    %c0_i32 = arith.constant 0 : i32
    %c0_i32_0 = arith.constant 0 : i32
    %c0_i32_1 = arith.constant 0 : i32
    %c0_i32_2 = arith.constant 0 : i32
    %c0_i32_3 = arith.constant 0 : i32
    return %c0_i32, %c0_i32_0, %c0_i32_1, %c0_i32_2 : i32, i32, i32, i32
  }
  func.func @transform_11(%arg0: i32) -> (i32, i32, i32) {
    %c0_i32 = arith.constant 0 : i32
    %c0_i32_0 = arith.constant 0 : i32
    %c0_i32_1 = arith.constant 0 : i32
    %c0_i32_2 = arith.constant 0 : i32
    return %c0_i32, %c0_i32_0, %c0_i32_1 : i32, i32, i32
  }
  func.func @transform_12(%arg0: i32) -> (i32, i32, i32) {
    %c0_i32 = arith.constant 0 : i32
    %c0_i32_0 = arith.constant 0 : i32
    %c0_i32_1 = arith.constant 0 : i32
    %c0_i32_2 = arith.constant 0 : i32
    return %c0_i32, %c0_i32_0, %c0_i32_1 : i32, i32, i32
  }
  func.func @transform_13(%arg0: i32) -> (i32, i32, i32) {
    %c0_i32 = arith.constant 0 : i32
    %c0_i32_0 = arith.constant 0 : i32
    %c0_i32_1 = arith.constant 0 : i32
    %c0_i32_2 = arith.constant 0 : i32
    return %c0_i32, %c0_i32_0, %c0_i32_1 : i32, i32, i32
  }
  func.func @transform_14(%arg0: i32) -> (i32, i32, i32) {
    %c0_i32 = arith.constant 0 : i32
    %c0_i32_0 = arith.constant 0 : i32
    %c0_i32_1 = arith.constant 0 : i32
    %c0_i32_2 = arith.constant 0 : i32
    return %c0_i32, %c0_i32_0, %c0_i32_1 : i32, i32, i32
  }
  func.func @transform_15(%arg0: i32) -> (i32, i32, i32) {
    %c0_i32 = arith.constant 0 : i32
    %c0_i32_0 = arith.constant 0 : i32
    %c0_i32_1 = arith.constant 0 : i32
    %c0_i32_2 = arith.constant 0 : i32
    return %c0_i32, %c0_i32_0, %c0_i32_1 : i32, i32, i32
  }
  func.func @transform_16(%arg0: i32) -> (i32, i32, i32) {
    %c0_i32 = arith.constant 0 : i32
    %c0_i32_0 = arith.constant 0 : i32
    %c0_i32_1 = arith.constant 0 : i32
    %c0_i32_2 = arith.constant 0 : i32
    return %c0_i32, %c0_i32_0, %c0_i32_1 : i32, i32, i32
  }
  func.func @transform_17(%arg0: i32) -> (i32, i32, i32) {
    %c0_i32 = arith.constant 0 : i32
    %c0_i32_0 = arith.constant 0 : i32
    %c0_i32_1 = arith.constant 0 : i32
    %c0_i32_2 = arith.constant 0 : i32
    return %c0_i32, %c0_i32_0, %c0_i32_1 : i32, i32, i32
  }
  func.func @transform_18(%arg0: i32) -> (i32, i32, i32) {
    %c0_i32 = arith.constant 0 : i32
    %c0_i32_0 = arith.constant 0 : i32
    %c0_i32_1 = arith.constant 0 : i32
    %c0_i32_2 = arith.constant 0 : i32
    return %c0_i32, %c0_i32_0, %c0_i32_1 : i32, i32, i32
  }
  func.func @transform_19(%arg0: i32) -> (i32, i32, i32) {
    %c0_i32 = arith.constant 0 : i32
    %c0_i32_0 = arith.constant 0 : i32
    %c0_i32_1 = arith.constant 0 : i32
    %c0_i32_2 = arith.constant 0 : i32
    return %c0_i32, %c0_i32_0, %c0_i32_1 : i32, i32, i32
  }
  func.func @transform_20(%arg0: i32) -> (i32, i32) {
    %c0_i32 = arith.constant 0 : i32
    %c0_i32_0 = arith.constant 0 : i32
    %c0_i32_1 = arith.constant 0 : i32
    return %c0_i32, %c0_i32_0 : i32, i32
  }
  func.func @transform_21(%arg0: i32) -> (i32, i32) {
    %c0_i32 = arith.constant 0 : i32
    %c0_i32_0 = arith.constant 0 : i32
    %c0_i32_1 = arith.constant 0 : i32
    return %c0_i32, %c0_i32_0 : i32, i32
  }
  func.func @transform_22(%arg0: i32) -> (i32, i32, i32) {
    %c0_i32 = arith.constant 0 : i32
    %c0_i32_0 = arith.constant 0 : i32
    %c0_i32_1 = arith.constant 0 : i32
    return %arg0, %c0_i32, %c0_i32_0 : i32, i32, i32
  }
}

</mosaic_0001>

<bundles_post_ra>
// kernel: time_series_transformer.1
= control target key start
LH: loop header
LB: loop body
LE: loop exit
PB: predicated region body
PF: predicated region fallthrough
CT: control target
= control target key end

     0   :  { %s14568_s0 = inlined_call_operand.vmem [shape: f32[2,8,4], index: 0, kind: input, shape index: {}]   ;;  %s14569_s1 = inlined_call_operand.vmem [shape: f32[500,64], index: 1, kind: input, shape index: {}]   ;;  %s14570_s2 = inlined_call_operand.vmem [shape: f32[4,64], index: 2, kind: input, shape index: {}]   ;;  %s14571_s3 = inlined_call_operand.vmem [shape: f32[1,64], index: 3, kind: input, shape index: {}]   ;;  %s14572_s4 = inlined_call_operand.vmem [shape: f32[2,4,64,16], index: 4, kind: input, shape index: {}]   ;;  %s14573_s5 = inlined_call_operand.vmem [shape: f32[2,4,1,16], index: 5, kind: input, shape index: {}]   ;;  %s14574_s6 = inlined_call_operand.vmem [shape: f32[2,4,64,16], index: 6, kind: input, shape index: {}]   ;;  %s14575_s7 = inlined_call_operand.vmem [shape: f32[2,4,1,16], index: 7, kind: input, shape index: {}]   ;;  %s14576_s8 = inlined_call_operand.vmem [shape: f32[2,4,64,16], index: 8, kind: input, shape index: {}]   ;;  %s14577_s9 = inlined_call_operand.vmem [shape: f32[2,4,1,16], index: 9, kind: input, shape index: {}]   ;;  %s14578_s10 = inlined_call_operand.vmem [shape: f32[2,4,16,64], index: 10, kind: input, shape index: {}]   ;;  %s14579_s11 = inlined_call_operand.vmem [shape: f32[2,1,64], index: 11, kind: input, shape index: {}]   ;;  %s14580_s12 = inlined_call_operand.vmem [shape: f32[2,1,64], index: 12, kind: input, shape index: {}]   ;;  %s14581_s13 = inlined_call_operand.vmem [shape: f32[2,1,64], index: 13, kind: input, shape index: {}]   ;;  %s14582_s14 = inlined_call_operand.vmem [shape: f32[2,64,2048], index: 14, kind: input, shape index: {}]   ;;  %s14583_s15 = inlined_call_operand.vmem [shape: f32[2,1,2048], index: 15, kind: input, shape index: {}]   ;;  %s14584_s16 = inlined_call_operand.vmem [shape: f32[2,2048,64], index: 16, kind: input, shape index: {}]   ;;  %s14585_s17 = inlined_call_operand.vmem [shape: f32[2,1,64], index: 17, kind: input, shape index: {}]   ;;  %s14586_s18 = inlined_call_operand.vmem [shape: f32[2,1,64], index: 18, kind: input, shape index: {}]   ;;  %s14587_s19 = inlined_call_operand.vmem [shape: f32[2,1,64], index: 19, kind: input, shape index: {}]   ;;  %s14588_s20 = inlined_call_operand.vmem [shape: f32[64,128], index: 20, kind: input, shape index: {}]   ;;  %s14589_s21 = inlined_call_operand.vmem [shape: f32[1,128], index: 21, kind: input, shape index: {}]   ;;  %s14590_s22 = inlined_call_operand.hbm [shape: f32[2,1,128], index: 22, kind: output, shape index: {}]  }
   0x1   :  { %14602 = sst [smem:[#allocation11_spill]] %s14568_s0 }
   0x2   :  { %14603 = sst [smem:[#allocation12_spill]] %s14569_s1 }
   0x3   :  { %14604 = sst [smem:[#allocation13_spill]] %s14570_s2 }
   0x4   :  { %14605 = sst [smem:[#allocation14_spill]] %s14571_s3 }
   0x5   :  { %14606 = sst [smem:[#allocation15_spill]] %s14572_s4 }
   0x6   :  { %14607 = sst [smem:[#allocation16_spill]] %s14573_s5 }
   0x7   :  { %14608 = sst [smem:[#allocation17_spill]] %s14574_s6 }
   0x8   :  { %14609 = sst [smem:[#allocation18_spill]] %s14575_s7 }
   0x9   :  { %14610 = sst [smem:[#allocation19_spill]] %s14589_s21 }
   0xa   :  { %14611 = sst [smem:[#allocation20_spill]] %s14590_s22 }
   0xb   :  { %27 = vsyncpa [#allocation3], 0 }
   0xc   :  { %29 = vsyncpa [#allocation3 + $0x1], 0  ;;  %s10734_s3 = smov 0   ;;  %s10736_s28 = smov 0  }
   0xd   :  { %s10738_s29 = smov 0   ;;  %s10740_s30 = smov 0  }
   0xe LB: > { %14612 = sst [smem:[#allocation5_spill]] %s10602_s3  ;;  %s10755_s4 = sadd.s32 4294967295, %s10614_s30   ;;  %s10614_s30 = sphi %s10740_s30, %s14635_s30   ;;  %s10610_s29 = sphi %s10738_s29, %s14637_s29   ;;  %s10606_s28 = sphi %s10736_s28, %s14639_s28   ;;  %s10602_s3 = sphi %s10734_s3, %s14638_s3  }
   0xf   : > { %14613 = sst [smem:[#allocation6_spill]] %s10610_s29  ;;  %s8299_s0 = sadd.s32 4294967294, %s10614_s30  }
  0x10   : > { %14614 = sst [smem:[#allocation7_spill]] %s10614_s30  ;;  %s10759_s23 = sadd.s32 1, %s10614_s30  }
  0x11   : > { %14615 = sst [smem:[#allocation8_spill]] %s10759_s23  ;;  %s509_s1 = sadd.s32 1, %s10610_s29 }
  0x12   : > { %s506_s5 = ssub.s32 %s10614_s30, %s10759_s23  ;;  %p519_p0 = scmp.ne.s32.totalorder %s10610_s29, %s10606_s28 }
  0x13   : > { %p507_p1 = scmp.eq.s32.totalorder %s506_s5, 0  ;;  %p520_p2 = scmp.eq.s32.totalorder %s10755_s4, 1 }
  0x14   : > { %p525_p3 = scmp.ne.s32.totalorder %s10606_s28, %s10602_s3  ;;  %p526_p4 = scmp.eq.s32.totalorder %s8299_s0, 1 }
  0x15   : > { %s10770_s24 = scalar_select %p507_p1, %s10610_s29, %s509_s1  }
  0x16   : > { %p10772_p5 = por %p520_p2, %p519_p0  ;;  %p10776_p6 = por %p526_p4, %p525_p3 }
  0x17   : > { %14616 = sst [smem:[#allocation9_spill]] %s10770_s24  ;;  %p8302_p7 = scmp.ge.s32.totalorder %s10614_s30, 1 }
  0x18   : > { %s14618_s25 = scalar_select %p10776_p6, 1, 0 }
  0x19   : > { %p614_p8 = scmp.lt.s32.totalorder %s10614_s30, 3 }
  0x1a   : > { %14619 = sst [smem:[#allocation10_spill]] %s14618_s25 }
  0x1b   : > { %p615_p9 = pnand %p8302_p7, %p614_p8 }
  0x1c   : > { %s14620_s27 = sld [smem:[#allocation13_spill]] (!%p615_p9)  ;;  %p674_p10 = scmp.lt.s32.totalorder (!%p615_p9), %s10755_s4, 1 }
  0x1d   : > { %618 = sbr.rel (%p615_p9) target bundleno = 9960 (0x26e8), region = 108  ;;  %s14621_s5 = sld [smem:[#allocation15_spill]] (!%p615_p9) }
  0x1e   : > { %s14622_s25 = sld [smem:[#allocation11_spill]] (!%p615_p9)  ;;  %s9011_s2 = sshll.u32 (!%p615_p9), %s10755_s4, 4 }
  0x1f   : > { %s14623_s30 = sld [smem:[#allocation17_spill]] (!%p615_p9)  ;;  %s10618_s0 = smov (!%p615_p9), [#allocation2]  }
  0x20   : > { %s14625_s29 = sld [smem:[#allocation14_spill]] (!%p615_p9) }
  0x21   : > { %s14627_s7 = sld [smem:[#allocation18_spill]] (!%p615_p9) }
  0x22   : > { %v679_v0 = vld [vmem:[%s14620_s27] sm:$0xf]  ;;  %vm691_vm0 = vcmask 1043456   ;;  %v10616_v1 = vmov 0.0   ;;  %vm10617_vm1 = vmmov 0   ;;  %s675_s24 = scalar_select %p674_p10, %s10755_s4, 1 }
  0x23   : > { %9857 = vmatprep.subr.mxu0 %v10616_v1  ;;  %9859 = vmatprep.mubr.msk.f32.mxu0 %vm10617_vm1, %v10616_v1  ;;  %v774_v2 = vld [vmem:[%s14621_s5 + $0x38] sm:$0xff]  ;;  %v773_v3 = vld [vmem:[%s14621_s5 + $0x30] sm:$0xff]  ;;  %vm687_vm2 = vcmask 31744   ;;  %v772_v4 = vld [vmem:[%s14621_s5 + $0x28] sm:$0xff]  ;;  %vm782_vm3 = vcmask 523264   ;;  %vm1026_vm4 = vcmask 130048  }
  0x24   : > { %9858 = vmatpush3.msk.msra.mxu0 %vm691_vm0, %v679_v0  ;;  %9862 = vmatprep.subr.mxu1 %v10616_v1  ;;  %s8303_s27 = sshll.u32 %s675_s24, 3  ;;  %v771_v7 = vld [vmem:[%s14621_s5 + $0x20] sm:$0xff]  ;;  %v770_v9 = vld [vmem:[%s14621_s5 + $0x18] sm:$0xff]  ;;  %v769_v11 = vld [vmem:[%s14621_s5 + $0x10] sm:$0xff]  ;;  %vm1104_vm5 = vcmask 64512   ;;  %s14630_s26 = sld [smem:[#allocation19_spill]] }
  0x25   : > { %9863 = vmatpush3.msra.mxu1 %v774_v2  ;;  %9881 = vmatprep.subr.mxu0 %v10616_v1  ;;  %s677_s3 = scalar_lea.vmem %s14622_s25, %s8303_s27  ;;  %s14624_s22 = smov %s14623_s30  ;;  %v863_v5 = vld [vmem:[%s14623_s30 + $0x38] sm:$0xff]  ;;  %v768_v15 = vld [vmem:[%s14621_s5 + $0x8] sm:$0xff]  ;;  %v767_v17 = vld [vmem:[%s14621_s5] sm:$0xff] }
  0x26   : > { %9864 = vmatprep.subr.mxu1 %v10616_v1  ;;  %9878 = vmatprep.mubr.msk.f32.mxu1 %vm10617_vm1, %v10616_v1  ;;  %v678_v6 = vld [vmem:[%s677_s3] sm:$0xff]  ;;  %v862_v8 = vld [vmem:[%s14624_s22 + $0x30] sm:$0xff]  ;;  %v861_v10 = vld [vmem:[%s14624_s22 + $0x28] sm:$0xff]  ;;  %s14626_s27 = sld [smem:[#allocation12_spill]]  ;;  %s672_s30 = sand.u32 1, %s10606_s28  }
  0x27   : > { %9865 = vmatpush3.msra.mxu1 %v773_v3  ;;  %9860 = vmatmul.mubr.msk.f32.vlgmr.msra.gmra.mxu0 %vm687_vm2, %v678_v6  ;;  %v860_v12 = vld [vmem:[%s14624_s22 + $0x20] sm:$0xff]  ;;  %v859_v13 = vld [vmem:[%s14624_s22 + $0x18] sm:$0xff]  ;;  %v858_v14 = vld [vmem:[%s14624_s22 + $0x10] sm:$0xff]  ;;  %s14628_s3 = sld [smem:[#allocation16_spill]]  ;;  %s673_s24 = scalar_lea.vmem [#allocation2], %s672_s30 }
  0x28   : > { %9866 = vmatprep.subr.mxu1 %v10616_v1  ;;  %9882 = vmatpush3.msra.mxu0 %v863_v5  ;;  %v857_v16 = vld [vmem:[%s14624_s22 + $0x8] sm:$0xff]  ;;  %v856_v18 = vld [vmem:[%s14624_s22] sm:$0xff]  ;;  %v948_v25 = vld [vmem:[%s14576_s8 + $0x38] sm:$0xff]  ;;  %s10558_s4 = sshll.u32 %s10618_s0, 4  ;;  %s10559_s4 = int_to_ptr.vmem [resolvable:$false] %s10558_s4 }
  0x29   : > { %9867 = vmatpush3.msra.mxu1 %v772_v4  ;;  %9883 = vmatprep.subr.mxu0 %v10616_v1  ;;  %v8304_v19 = vld [vmem:[%s14625_s29] ss:$0 sm:$0xff]  ;;  %v947_v26 = vld [vmem:[%s14576_s8 + $0x30] sm:$0xff]  ;;  %v946_v27 = vld [vmem:[%s14576_s8 + $0x28] sm:$0xff]  ;;  %s8244_s29 = sshll.u32 %s673_s24, 4  ;;  %s10560_s1 = scalar_lea.vmem %s10559_s4, 32  ;;  %s8245_s29 = int_to_ptr.vmem [resolvable:$true] %s8244_s29 }
  0x2a   : > { %9868 = vmatprep.subr.mxu1 %v10616_v1  ;;  %9884 = vmatpush3.msra.mxu0 %v862_v8  ;;  %v945_v28 = vld [vmem:[%s14576_s8 + $0x20] sm:$0xff]  ;;  %v944_v29 = vld [vmem:[%s14576_s8 + $0x18] sm:$0xff]  ;;  %v943_v30 = vld [vmem:[%s14576_s8 + $0x10] sm:$0xff]  ;;  %p10561_p0 = scmp.lt.s32.totalorder %s8245_s29, %s10559_s4 }
  0x2b   : > { %9869 = vmatpush3.msra.mxu1 %v771_v7  ;;  %9885 = vmatprep.subr.mxu0 %v10616_v1  ;;  %v942_v31 = vld [vmem:[%s14576_s8 + $0x8] sm:$0xff]  ;;  %v941_v32 = vld [vmem:[%s14576_s8] sm:$0xff]  ;;  %v8334_v33 = vld [vmem:[%s14624_s22 + $0x78] sm:$0xff] }
  0x2c   : > { %9870 = vmatprep.subr.mxu1 %v10616_v1  ;;  %9886 = vmatpush3.msra.mxu0 %v861_v10  ;;  %v765_v21 = vld [vmem:[%s14626_s27] sm:$0xff]  ;;  %v8333_v34 = vld [vmem:[%s14624_s22 + $0x70] sm:$0xff]  ;;  %v8332_v35 = vld [vmem:[%s14624_s22 + $0x68] sm:$0xff]  ;;  %s14631_s27 = sld [smem:[#allocation20_spill]] }
  0x2d   : > { %9871 = vmatpush3.msra.mxu1 %v770_v9  ;;  %9887 = vmatprep.subr.mxu0 %v10616_v1  ;;  %v8331_v36 = vld [vmem:[%s14624_s22 + $0x60] sm:$0xff]  ;;  %v8330_v37 = vld [vmem:[%s14624_s22 + $0x58] sm:$0xff]  ;;  %v8329_v38 = vld [vmem:[%s14624_s22 + $0x50] sm:$0xff]  ;;  %s14629_s21 = smov %s14628_s3 }
  0x2e   : > { %9872 = vmatprep.subr.mxu1 %v10616_v1  ;;  %9888 = vmatpush3.msra.mxu0 %v860_v12  ;;  %v8328_v39 = vld [vmem:[%s14624_s22 + $0x48] sm:$0xff]  ;;  %v8327_v40 = vld [vmem:[%s14624_s22 + $0x40] sm:$0xff]  ;;  %v8323_v4 = vld [vmem:[%s14621_s5 + $0x78] sm:$0xff] }
  0x2f   : > { %9873 = vmatpush3.msra.mxu1 %v769_v11  ;;  %9889 = vmatprep.subr.mxu0 %v10616_v1  ;;  %v8309_v41 = vld [vmem:[%s14627_s7] ss:$0 sm:$0xff]  ;;  %v8322_v5 = vld [vmem:[%s14621_s5 + $0x70] sm:$0xff]  ;;  %v8321_v6 = vld [vmem:[%s14621_s5 + $0x68] sm:$0xff] }
  0x30   : > { %9874 = vmatprep.subr.mxu1 %v10616_v1  ;;  %9897 = vmatprep.mubr.msk.f32.mxu0 %vm10617_vm1, %v10616_v1  ;;  %v8307_v44 = vld [vmem:[%s14628_s3] ss:$0 sm:$0xff]  ;;  %v8319_v8 = vld [vmem:[%s14621_s5 + $0x58] sm:$0xff]  ;;  %v8318_v9 = vld [vmem:[%s14621_s5 + $0x50] sm:$0xff] }
  0x31   : > { %9890 = vmatpush3.msra.mxu0 %v859_v13  ;;  %9875 = vmatpush3.msra.mxu1 %v768_v15  ;;  %v8311_v49 = vld [vmem:[%s14577_s9] ss:$0 sm:$0xff]  ;;  %v8317_v10 = vld [vmem:[%s14621_s5 + $0x48] sm:$0xff]  ;;  %v8345_v12 = vld [vmem:[%s14576_s8 + $0x78] sm:$0xff] }
  0x32   : > { %9891 = vmatprep.subr.mxu0 %v10616_v1  ;;  %9876 = vmatprep.subr.mxu1 %v10616_v1  ;;  %v8320_v7 = vld [vmem:[%s14621_s5 + $0x60] sm:$0xff]  ;;  %v8344_v13 = vld [vmem:[%s14576_s8 + $0x70] sm:$0xff]  ;;  %s14533_s3 = scalar_lea.hbm %s14631_s27, %s9011_s2 }
  0x33   : > { %9892 = vmatpush3.msra.mxu0 %v858_v14  ;;  %9877 = vmatpush3.msra.mxu1 %v767_v17  ;;  %v8316_v11 = vld [vmem:[%s14621_s5 + $0x40] sm:$0xff]  ;;  %v8343_v14 = vld [vmem:[%s14576_s8 + $0x68] sm:$0xff]  ;;  %v8340_v17 = vld [vmem:[%s14576_s8 + $0x50] sm:$0xff] }
  0x34   : > { %9893 = vmatprep.subr.mxu0 %v10616_v1  ;;  %9900 = vmatprep.subr.mxu1 %v10616_v1  ;;  %v8342_v15 = vld [vmem:[%s14576_s8 + $0x60] sm:$0xff] }
  0x35   : > { %9894 = vmatpush3.msra.mxu0 %v857_v16  ;;  %v8341_v16 = vld [vmem:[%s14576_s8 + $0x58] sm:$0xff] }
  0x36   : > { %9895 = vmatprep.subr.mxu0 %v10616_v1 }
  0x37   : > { %9896 = vmatpush3.msra.mxu0 %v856_v18  ;;  %v8339_v18 = vld [vmem:[%s14576_s8 + $0x48] sm:$0xff] }
  0x38   : > { %9919 = vmatprep.subr.mxu0 %v10616_v1 }
  0xe7   : > { %v761_v20 = vpop.f32.mrf.mxu0 }
  0xe8   : > { %v762_v22 = vadd.f32 %v8304_v19, %v761_v20  ;;  %v8336_v19 = vld [vmem:[%s14627_s7 + $0x1] ss:$0 sm:$0xff] }
  0xe9   : > { %v9861_v23 = vpop.f32.mrf.mxu0  ;;  %v8338_v20 = vld [vmem:[%s14576_s8 + $0x40] sm:$0xff] }
  0xea   : > { %v10869_v24 = vadd.f32 %v765_v21, %v762_v22 }
  0xec   : > { %9879 = vmatmul.mubr.msk.f32.vlgmr.msra.gmra.mxu1 %vm782_vm3, %v10869_v24  ;;  %9898 = vmatmul.mubr.msk.f32.vlgmr.msra.gmra.mxu0 %vm782_vm3, %v10869_v24 }
  0xed   : > { %9901 = vmatpush3.msra.mxu1 %v948_v25  ;;  %9916 = vmatprep.mubr.msk.f32.mxu1 %vm10617_vm1, %v10616_v1  ;;  %v8325_v25 = vld [vmem:[%s14629_s21 + $0x1] ss:$0 sm:$0xff] }
  0xee   : > { %9902 = vmatprep.subr.mxu1 %v10616_v1  ;;  %9921 = vmatprep.mubr.msk.f32.mxu0 %vm10617_vm1, %v10616_v1 }
  0xef   : > { %9903 = vmatpush3.msra.mxu1 %v947_v26 }
  0xf0   : > { %9904 = vmatprep.subr.mxu1 %v10616_v1 }
  0xf1   : > { %9905 = vmatpush3.msra.mxu1 %v946_v27 }
  0xf2   : > { %9906 = vmatprep.subr.mxu1 %v10616_v1 }
  0xf3   : > { %9907 = vmatpush3.msra.mxu1 %v945_v28 }
  0xf4   : > { %9908 = vmatprep.subr.mxu1 %v10616_v1 }
  0xf5   : > { %9909 = vmatpush3.msra.mxu1 %v944_v29  ;;  %v8347_v29 = vld [vmem:[%s14577_s9 + $0x1] ss:$0 sm:$0xff] }
  0xf6   : > { %9910 = vmatprep.subr.mxu1 %v10616_v1 }
  0xf7   : > { %9911 = vmatpush3.msra.mxu1 %v943_v30 }
  0xf8   : > { %9912 = vmatprep.subr.mxu1 %v10616_v1 }
  0xf9   : > { %9913 = vmatpush3.msra.mxu1 %v942_v31 }
  0xfa   : > { %9914 = vmatprep.subr.mxu1 %v10616_v1 }
  0xfb   : > { %9915 = vmatpush3.msra.mxu1 %v941_v32 }
  0xfc   : > { %9917 = vmatmul.mubr.msk.f32.vlgmr.msra.gmra.mxu1 %vm782_vm3, %v10869_v24  ;;  %9948 = vmatprep.subr.mxu1 %v10616_v1 }
  0xfd   : > { %9949 = vmatpush3.msra.mxu1 %v8334_v33  ;;  %9964 = vmatprep.mubr.msk.f32.mxu1 %vm10617_vm1, %v10616_v1 }
  0xfe   : > { %9950 = vmatprep.subr.mxu1 %v10616_v1 }
  0xff   : > { %9951 = vmatpush3.msra.mxu1 %v8333_v34 }
 0x100   : > { %9952 = vmatprep.subr.mxu1 %v10616_v1 }
 0x101   : > { %9953 = vmatpush3.msra.mxu1 %v8332_v35 }
 0x102   : > { %9954 = vmatprep.subr.mxu1 %v10616_v1 }
 0x103   : > { %9955 = vmatpush3.msra.mxu1 %v8331_v36 }
 0x104   : > { %9956 = vmatprep.subr.mxu1 %v10616_v1 }
 0x105   : > { %9957 = vmatpush3.msra.mxu1 %v8330_v37 }
 0x106   : > { %9958 = vmatprep.subr.mxu1 %v10616_v1 }
 0x107   : > { %9959 = vmatpush3.msra.mxu1 %v8329_v38 }
 0x108   : > { %9960 = vmatprep.subr.mxu1 %v10616_v1 }
 0x109   : > { %9961 = vmatpush3.msra.mxu1 %v8328_v39 }
 0x10a   : > { %9962 = vmatprep.subr.mxu1 %v10616_v1 }
 0x10b   : > { %9963 = vmatpush3.msra.mxu1 %v8327_v40 }
 0x10c   : > { %9965 = vmatmul.mubr.msk.f32.vlgmr.msra.gmra.mxu1 %vm782_vm3, %v10869_v24  ;;  %9996 = vmatprep.subr.mxu1 %v10616_v1 }
 0x10d   : > { %10000 = vmatprep.mubr.msk.f32.mxu1 %vm10617_vm1, %v10616_v1 }
 0x1ac   : > { %v852_v42 = vpop.f32.mrf.mxu1  ;;  %v937_v43 = vpop.f32.mrf.mxu0 }
 0x1ad   : > { %v938_v45 = vadd.f32 %v8309_v41, %v937_v43  ;;  %v853_v48 = vadd.f32 %v8307_v44, %v852_v42  ;;  %v8353_v42 = vld [vmem:[%s14578_s10 + $0x18] sm:$0xff]  ;;  %v8352_v43 = vld [vmem:[%s14578_s10 + $0x10] sm:$0xff] }
 0x1ae   : > { %v9880_v46 = vpop.f32.mrf.mxu1  ;;  %v9899_v47 = vpop.f32.mrf.mxu0  ;;  %9997 = vmatpush3.msra.mxu1 %v8353_v42 }
 0x1af   : > { %9920 = vmatpush3.xpose.msk.msra.mxu0 %vm1026_vm4, %v938_v45  ;;  %9998 = vmatprep.subr.mxu1 %v10616_v1  ;;  %v1190_v47 = vld [vmem:[%s14578_s10 + $0x8] sm:$0xff] }
 0x1b0   : > { %9924 = vmatprep.subr.mxu0 %v10616_v1  ;;  %9999 = vmatpush3.msra.mxu1 %v8352_v43 }
 0x1b1   : > { %10010 = vmatprep.subr.mxu1 %v10616_v1 }
 0x1b2   : > { %9922 = vmatmul.mubr.msk.f32.vlgmr.msra.gmra.mxu0 %vm1026_vm4, %v853_v48  ;;  %v1189_v48 = vld [vmem:[%s14578_s10] sm:$0xff] }
 0x1b3   : > { %9926 = vmatprep.mubr.msk.f32.mxu0 %vm10617_vm1, %v10616_v1 }
 0x1bc   : > { %v1022_v50 = vpop.f32.mrf.mxu1 }
 0x1bd   : > { %v1023_v51 = vadd.f32 %v8311_v49, %v1022_v50  ;;  %v8374_v49 = vld [vmem:[%s14624_s22 + $0xb8] sm:$0xff]  ;;  %v8373_v50 = vld [vmem:[%s14624_s22 + $0xb0] sm:$0xff] }
 0x1be   : > { %v9918_v52 = vpop.f32.mrf.mxu1 }
 0x1bf   : > { %9925 = vmatpush3.msra.mxu0 %v1023_v51  ;;  %v8372_v51 = vld [vmem:[%s14624_s22 + $0xa8] sm:$0xff]  ;;  %v8371_v52 = vld [vmem:[%s14624_s22 + $0xa0] sm:$0xff] }
 0x1c0   : > { %9929 = vmatprep.subr.mxu0 %v10616_v1 }
 0x1cc   : > { %v10966_v53 = vpop.f32.mrf.mxu1 }
 0x1cd   : > { %v1362_v21 = vadd.f32 %v8336_v19, %v10966_v53  ;;  %v8370_v53 = vld [vmem:[%s14624_s22 + $0x98] sm:$0xff]  ;;  %v8412_v19 = vld [vmem:[%s14624_s22 + $0xf0] sm:$0xff] }
 0x1ce   : > { %v9966_v54 = vpop.f32.mrf.mxu1 }
 0x1cf   : > { %v8369_v54 = vld [vmem:[%s14624_s22 + $0x90] sm:$0xff] }
 0x272   : > { %v1099_v55 = vpop.f32.mrf.mxu0 }
 0x273   : > { %v1103_v56 = vmul.f32 0.25, %v1099_v55  ;;  %v8368_v55 = vld [vmem:[%s14624_s22 + $0x88] sm:$0xff] }
 0x274   : > { %v9923_v57 = vpop.f32.mrf.mxu0 }
 0x275   : > { %v1105_v58 = vsel %vm1104_vm5, %v1103_v56, -inf  ;;  %v8363_v57 = vld [vmem:[%s14621_s5 + $0xb8] sm:$0xff] }
 0x276   : > { %1106 = vmax.xlane.f32.xlu0 %v1105_v58 }
 0x2ff   : > { %v1107_v59 = vpop.xlane.xlu0 %1106 }
 0x300   : > { %v1108_v60 = vsub.f32 %v1103_v56, %v1107_v59  ;;  %v8367_v56 = vld [vmem:[%s14624_s22 + $0x80] sm:$0xff]  ;;  %v8362_v59 = vld [vmem:[%s14621_s5 + $0xb0] sm:$0xff] }
 0x302   : > { %v1109_v61 = vmul.f32 1.442695, %v1108_v60 }
 0x304   : > { %10514 = vpow2.f32 %v1109_v61  ;;  %v8361_v61 = vld [vmem:[%s14621_s5 + $0xa8] sm:$0xff] }
 0x311   : > { %v10515_v62 = vpop.eup %10514 }
 0x312   : > { %v1111_v63 = vsel %vm1104_vm5, %v10515_v62, 0.0 }
 0x313   : > { %1112 = vadd.xlane.f32.xlu0 %v1111_v63  ;;  %v8360_v63 = vld [vmem:[%s14621_s5 + $0xa0] sm:$0xff] }
 0x39c   : > { %v1113_v0 = vpop.xlane.xlu0 %1112 }
 0x39d   : > { %10516 = vrcp.f32 %v1113_v0 }
 0x3aa   : > { %v10517_v2 = vpop.eup %10516 }
 0x3ab   : > { %v1115_v3 = vmul.f32 %v10517_v2, %v10515_v62  ;;  %v8359_v2 = vld [vmem:[%s14621_s5 + $0x98] sm:$0xff] }
 0x3ad   : > { %9927 = vmatmul.mubr.msk.f32.vlgmr.msra.gmra.mxu0 %vm1104_vm5, %v1115_v3  ;;  %v8358_v3 = vld [vmem:[%s14621_s5 + $0x90] sm:$0xff] }
 0x3ae   : > { %9930 = vmatpush3.msra.mxu0 %v8323_v4  ;;  %9945 = vmatprep.mubr.msk.f32.mxu0 %vm10617_vm1, %v10616_v1  ;;  %v8357_v4 = vld [vmem:[%s14621_s5 + $0x88] sm:$0xff] }
 0x3af   : > { %9931 = vmatprep.subr.mxu0 %v10616_v1 }
 0x3b0   : > { %9932 = vmatpush3.msra.mxu0 %v8322_v5  ;;  %v8356_v5 = vld [vmem:[%s14621_s5 + $0x80] sm:$0xff] }
 0x3b1   : > { %9933 = vmatprep.subr.mxu0 %v10616_v1 }
 0x3b2   : > { %9934 = vmatpush3.msra.mxu0 %v8321_v6  ;;  %v8385_v6 = vld [vmem:[%s14576_s8 + $0xb8] sm:$0xff] }
 0x3b3   : > { %9935 = vmatprep.subr.mxu0 %v10616_v1 }
 0x3b4   : > { %9936 = vmatpush3.msra.mxu0 %v8320_v7  ;;  %v8384_v7 = vld [vmem:[%s14576_s8 + $0xb0] sm:$0xff] }
 0x3b5   : > { %9937 = vmatprep.subr.mxu0 %v10616_v1 }
 0x3b6   : > { %9938 = vmatpush3.msra.mxu0 %v8319_v8  ;;  %v8376_v8 = vld [vmem:[%s14627_s7 + $0x2] ss:$0 sm:$0xff] }
 0x3b7   : > { %9939 = vmatprep.subr.mxu0 %v10616_v1 }
 0x3b8   : > { %9940 = vmatpush3.msra.mxu0 %v8318_v9  ;;  %v8383_v9 = vld [vmem:[%s14576_s8 + $0xa8] sm:$0xff] }
 0x3b9   : > { %9941 = vmatprep.subr.mxu0 %v10616_v1 }
 0x3ba   : > { %9942 = vmatpush3.msra.mxu0 %v8317_v10 }
 0x3bb   : > { %9943 = vmatprep.subr.mxu0 %v10616_v1 }
 0x3bc   : > { %9944 = vmatpush3.msra.mxu0 %v8316_v11 }
 0x3bd   : > { %9946 = vmatmul.mubr.msk.f32.vlgmr.msra.gmra.mxu0 %vm782_vm3, %v10869_v24  ;;  %9967 = vmatprep.subr.mxu0 %v10616_v1 }
 0x3be   : > { %9968 = vmatpush3.msra.mxu0 %v8345_v12  ;;  %9983 = vmatprep.mubr.msk.f32.mxu0 %vm10617_vm1, %v10616_v1  ;;  %v8382_v12 = vld [vmem:[%s14576_s8 + $0xa0] sm:$0xff] }
 0x3bf   : > { %9969 = vmatprep.subr.mxu0 %v10616_v1 }
 0x3c0   : > { %9970 = vmatpush3.msra.mxu0 %v8344_v13 }
 0x3c1   : > { %9971 = vmatprep.subr.mxu0 %v10616_v1 }
 0x3c2   : > { %9972 = vmatpush3.msra.mxu0 %v8343_v14  ;;  %v8381_v14 = vld [vmem:[%s14576_s8 + $0x98] sm:$0xff] }
 0x3c3   : > { %9973 = vmatprep.subr.mxu0 %v10616_v1 }
 0x3c4   : > { %9974 = vmatpush3.msra.mxu0 %v8342_v15  ;;  %v8380_v15 = vld [vmem:[%s14576_s8 + $0x90] sm:$0xff] }
 0x3c5   : > { %9975 = vmatprep.subr.mxu0 %v10616_v1 }
 0x3c6   : > { %9976 = vmatpush3.msra.mxu0 %v8341_v16  ;;  %v8379_v16 = vld [vmem:[%s14576_s8 + $0x88] sm:$0xff] }
 0x3c7   : > { %9977 = vmatprep.subr.mxu0 %v10616_v1 }
 0x3c8   : > { %9978 = vmatpush3.msra.mxu0 %v8340_v17  ;;  %v8378_v17 = vld [vmem:[%s14576_s8 + $0x80] sm:$0xff] }
 0x3c9   : > { %9979 = vmatprep.subr.mxu0 %v10616_v1 }
 0x3ca   : > { %9980 = vmatpush3.msra.mxu0 %v8339_v18  ;;  %v8413_v18 = vld [vmem:[%s14624_s22 + $0xf8] sm:$0xff] }
 0x3cb   : > { %9981 = vmatprep.subr.mxu0 %v10616_v1 }
 0x3cc   : > { %9982 = vmatpush3.msra.mxu0 %v8338_v20  ;;  %v8411_v20 = vld [vmem:[%s14624_s22 + $0xe8] sm:$0xff] }
 0x3cd   : > { %9984 = vmatmul.mubr.msk.f32.vlgmr.msra.gmra.mxu0 %vm782_vm3, %v10869_v24  ;;  %9986 = vmatprep.subr.mxu0 %v10616_v1 }
 0x3ce   : > { %9987 = vmatpush3.xpose.msk.msra.mxu0 %vm1026_vm4, %v1362_v21  ;;  %9988 = vmatprep.mubr.msk.f32.mxu0 %vm10617_vm1, %v10616_v1  ;;  %v8410_v21 = vld [vmem:[%s14624_s22 + $0xe0] sm:$0xff] }
 0x3cf   : > { %9991 = vmatprep.subr.mxu0 %v10616_v1 }
 0x46d   : > { %v1185_v22 = vpop.f32.mrf.mxu0 }
 0x46f   : > { %v9928_v23 = vpop.f32.mrf.mxu0 }
 0x470   : > { %v8408_v23 = vld [vmem:[%s14624_s22 + $0xd0] sm:$0xff] }
 0x47d   : > { %v1274_v26 = vpop.f32.mrf.mxu0 }
 0x47e   : > { %v1275_v27 = vadd.f32 %v8325_v25, %v1274_v26  ;;  %v8407_v25 = vld [vmem:[%s14624_s22 + $0xc8] sm:$0xff]  ;;  %v8406_v26 = vld [vmem:[%s14624_s22 + $0xc0] sm:$0xff] }
 0x47f   : > { %v9947_v28 = vpop.f32.mrf.mxu0 }
 0x480   : > { %9989 = vmatmul.mubr.msk.f32.vlgmr.msra.gmra.mxu0 %vm1026_vm4, %v1275_v27 }
 0x481   : > { %9993 = vmatprep.mubr.msk.f32.mxu0 %vm10617_vm1, %v10616_v1 }
 0x48d   : > { %v1448_v30 = vpop.f32.mrf.mxu0 }
 0x48e   : > { %v1449_v31 = vadd.f32 %v8347_v29, %v1448_v30  ;;  %v8365_v29 = vld [vmem:[%s14629_s21 + $0x2] ss:$0 sm:$0xff] }
 0x48f   : > { %v9985_v32 = vpop.f32.mrf.mxu0 }
 0x490   : > { %9992 = vmatpush3.msra.mxu0 %v1449_v31 }
 0x491   : > { %10003 = vmatprep.subr.mxu0 %v10616_v1 }
 0x540   : > { %v1524_v33 = vpop.f32.mrf.mxu0 }
 0x541   : > { %v1528_v34 = vmul.f32 0.25, %v1524_v33  ;;  %v8387_v33 = vld [vmem:[%s14577_s9 + $0x2] ss:$0 sm:$0xff] }
 0x542   : > { %v9990_v35 = vpop.f32.mrf.mxu0 }
 0x543   : > { %v1529_v36 = vsel %vm1104_vm5, %v1528_v34, -inf }
 0x544   : > { %1530 = vmax.xlane.f32.xlu1 %v1529_v36 }
 0x5cd   : > { %v1531_v37 = vpop.xlane.xlu1 %1530 }
 0x5ce   : > { %v1532_v38 = vsub.f32 %v1528_v34, %v1531_v37  ;;  %v8415_v37 = vld [vmem:[%s14627_s7 + $0x3] ss:$0 sm:$0xff] }
 0x5d0   : > { %v1533_v39 = vmul.f32 1.442695, %v1532_v38 }
 0x5d2   : > { %10518 = vpow2.f32 %v1533_v39 }
 0x5df   : > { %v10519_v40 = vpop.eup %10518 }
 0x5e0   : > { %v1535_v41 = vsel %vm1104_vm5, %v10519_v40, 0.0 }
 0x5e1   : > { %1536 = vadd.xlane.f32.xlu1 %v1535_v41 }
 0x66a   : > { %v1537_v44 = vpop.xlane.xlu1 %1536 }
 0x66b   : > { %10520 = vrcp.f32 %v1537_v44 }
 0x678   : > { %v10521_v45 = vpop.eup %10520 }
 0x679   : > { %v1539_v46 = vmul.f32 %v10521_v45, %v10519_v40 }
 0x67b   : > { %9994 = vmatmul.mubr.msk.f32.vlgmr.msra.gmra.mxu0 %vm1104_vm5, %v1539_v46 }
 0x67c   : > { %10004 = vmatpush3.msra.mxu0 %v1190_v47  ;;  %10007 = vmatprep.mubr.msk.f32.mxu0 %vm10617_vm1, %v10616_v1 }
 0x67d   : > { %10005 = vmatprep.subr.mxu0 %v10616_v1 }
 0x67e   : > { %10006 = vmatpush3.msra.mxu0 %v1189_v48 }
 0x67f   : > { %10029 = vmatprep.subr.mxu0 %v10616_v1  ;;  %10008 = vmatmul.mubr.msk.f32.vlgmr.msra.gmra.mxu0 %vm1026_vm4, %v1185_v22  ;;  %v8409_v22 = vld [vmem:[%s14624_s22 + $0xd8] sm:$0xff] }
 0x680   : > { %10030 = vmatpush3.msra.mxu0 %v8374_v49  ;;  %10045 = vmatprep.mubr.msk.f32.mxu0 %vm10617_vm1, %v10616_v1 }
 0x681   : > { %10031 = vmatprep.subr.mxu0 %v10616_v1 }
 0x682   : > { %10032 = vmatpush3.msra.mxu0 %v8373_v50 }
 0x683   : > { %10033 = vmatprep.subr.mxu0 %v10616_v1 }
 0x684   : > { %10034 = vmatpush3.msra.mxu0 %v8372_v51 }
 0x685   : > { %10035 = vmatprep.subr.mxu0 %v10616_v1 }
 0x686   : > { %10036 = vmatpush3.msra.mxu0 %v8371_v52 }
 0x687   : > { %10037 = vmatprep.subr.mxu0 %v10616_v1 }
 0x688   : > { %10038 = vmatpush3.msra.mxu0 %v8370_v53  ;;  %v8393_v53 = vld [vmem:[%s14578_s10 + $0x28] sm:$0xff] }
 0x689   : > { %10039 = vmatprep.subr.mxu0 %v10616_v1 }
 0x68a   : > { %10040 = vmatpush3.msra.mxu0 %v8369_v54  ;;  %v8392_v54 = vld [vmem:[%s14578_s10 + $0x20] sm:$0xff] }
 0x68b   : > { %10041 = vmatprep.subr.mxu0 %v10616_v1 }
 0x68c   : > { %10042 = vmatpush3.msra.mxu0 %v8368_v55  ;;  %v8402_v55 = vld [vmem:[%s14621_s5 + $0xf8] sm:$0xff] }
 0x68d   : > { %10043 = vmatprep.subr.mxu0 %v10616_v1 }
 0x68e   : > { %10044 = vmatpush3.msra.mxu0 %v8367_v56 }
 0x68f   : > { %10046 = vmatmul.mubr.msk.f32.vlgmr.msra.gmra.mxu0 %vm782_vm3, %v10869_v24  ;;  %10067 = vmatprep.subr.mxu0 %v10616_v1 }
 0x690   : > { %10069 = vmatprep.mubr.msk.f32.mxu0 %vm10617_vm1, %v10616_v1 }
 0x73b   : > { %v1609_v58 = vpop.f32.mrf.mxu0 }
 0x73c   : > { %10001 = vmatmul.mubr.msk.f32.vlgmr.msra.gmra.mxu1 %vm1026_vm4, %v1609_v58 }
 0x73d   : > { %10011 = vmatpush3.msra.mxu1 %v8363_v57  ;;  %v9995_v60 = vpop.f32.mrf.mxu0  ;;  %10026 = vmatprep.mubr.msk.f32.mxu1 %vm10617_vm1, %v10616_v1  ;;  %v8401_v57 = vld [vmem:[%s14621_s5 + $0xf0] sm:$0xff] }
 0x73e   : > { %10012 = vmatprep.subr.mxu1 %v10616_v1  ;;  %v8399_v60 = vld [vmem:[%s14621_s5 + $0xe0] sm:$0xff] }
 0x73f   : > { %10013 = vmatpush3.msra.mxu1 %v8362_v59  ;;  %v11134_v62 = vpop.f32.mrf.mxu0  ;;  %v8400_v59 = vld [vmem:[%s14621_s5 + $0xe8] sm:$0xff] }
 0x740   : > { %10014 = vmatprep.subr.mxu1 %v10616_v1 }
 0x741   : > { %10015 = vmatpush3.msra.mxu1 %v8361_v61  ;;  %v10009_v0 = vpop.f32.mrf.mxu0  ;;  %v8398_v61 = vld [vmem:[%s14621_s5 + $0xd8] sm:$0xff] }
 0x742   : > { %10016 = vmatprep.subr.mxu1 %v10616_v1  ;;  %v8396_v0 = vld [vmem:[%s14621_s5 + $0xc8] sm:$0xff] }
 0x743   : > { %10017 = vmatpush3.msra.mxu1 %v8360_v63  ;;  %v8397_v63 = vld [vmem:[%s14621_s5 + $0xd0] sm:$0xff] }
 0x744   : > { %10018 = vmatprep.subr.mxu1 %v10616_v1 }
 0x745   : > { %10019 = vmatpush3.msra.mxu1 %v8359_v2  ;;  %v8395_v2 = vld [vmem:[%s14621_s5 + $0xc0] sm:$0xff] }
 0x746   : > { %10020 = vmatprep.subr.mxu1 %v10616_v1 }
 0x747   : > { %10021 = vmatpush3.msra.mxu1 %v8358_v3  ;;  %v8424_v3 = vld [vmem:[%s14576_s8 + $0xf8] sm:$0xff] }
 0x748   : > { %10022 = vmatprep.subr.mxu1 %v10616_v1 }
 0x749   : > { %10023 = vmatpush3.msra.mxu1 %v8357_v4  ;;  %v8423_v4 = vld [vmem:[%s14576_s8 + $0xf0] sm:$0xff] }
 0x74a   : > { %10024 = vmatprep.subr.mxu1 %v10616_v1 }
 0x74b   : > { %10025 = vmatpush3.msra.mxu1 %v8356_v5  ;;  %v8422_v5 = vld [vmem:[%s14576_s8 + $0xe8] sm:$0xff] }
 0x74c   : > { %10027 = vmatmul.mubr.msk.f32.vlgmr.msra.gmra.mxu1 %vm782_vm3, %v10869_v24  ;;  %10048 = vmatprep.subr.mxu1 %v10616_v1 }
 0x74d   : > { %10049 = vmatpush3.msra.mxu1 %v8385_v6  ;;  %10064 = vmatprep.mubr.msk.f32.mxu1 %vm10617_vm1, %v10616_v1  ;;  %v8421_v6 = vld [vmem:[%s14576_s8 + $0xe0] sm:$0xff] }
 0x74e   : > { %10050 = vmatprep.subr.mxu1 %v10616_v1 }
 0x74f   : > { %v1932_v10 = vpop.f32.mrf.mxu0  ;;  %10051 = vmatpush3.msra.mxu1 %v8384_v7  ;;  %v8420_v7 = vld [vmem:[%s14576_s8 + $0xd8] sm:$0xff] }
 0x750   : > { %v1933_v11 = vadd.f32 %v8376_v8, %v1932_v10  ;;  %10052 = vmatprep.subr.mxu1 %v10616_v1  ;;  %v8419_v8 = vld [vmem:[%s14576_s8 + $0xd0] sm:$0xff]  ;;  %v8417_v10 = vld [vmem:[%s14576_s8 + $0xc0] sm:$0xff] }
 0x751   : > { %v10047_v13 = vpop.f32.mrf.mxu0  ;;  %10053 = vmatpush3.msra.mxu1 %v8383_v9  ;;  %v8418_v9 = vld [vmem:[%s14576_s8 + $0xc8] sm:$0xff] }
 0x752   : > { %10054 = vmatprep.subr.mxu1 %v10616_v1  ;;  %10068 = vmatpush3.xpose.msk.msra.mxu0 %vm1026_vm4, %v1933_v11 }
 0x753   : > { %10055 = vmatpush3.msra.mxu1 %v8382_v12  ;;  %10072 = vmatprep.subr.mxu0 %v10616_v1 }
 0x754   : > { %10056 = vmatprep.subr.mxu1 %v10616_v1 }
 0x755   : > { %10057 = vmatpush3.msra.mxu1 %v8381_v14 }
 0x756   : > { %10058 = vmatprep.subr.mxu1 %v10616_v1 }
 0x757   : > { %10059 = vmatpush3.msra.mxu1 %v8380_v15  ;;  %v8404_v15 = vld [vmem:[%s14629_s21 + $0x3] ss:$0 sm:$0xff] }
 0x758   : > { %10060 = vmatprep.subr.mxu1 %v10616_v1 }
 0x759   : > { %10061 = vmatpush3.msra.mxu1 %v8379_v16 }
 0x75a   : > { %10062 = vmatprep.subr.mxu1 %v10616_v1 }
 0x75b   : > { %10063 = vmatpush3.msra.mxu1 %v8378_v17 }
 0x75c   : > { %10065 = vmatmul.mubr.msk.f32.vlgmr.msra.gmra.mxu1 %vm782_vm3, %v10869_v24  ;;  %10103 = vmatprep.subr.mxu1 %v10616_v1 }
 0x75d   : > { %10104 = vmatpush3.msra.mxu1 %v8413_v18  ;;  %10119 = vmatprep.mubr.msk.f32.mxu1 %vm10617_vm1, %v10616_v1 }
 0x75e   : > { %10105 = vmatprep.subr.mxu1 %v10616_v1 }
 0x75f   : > { %10106 = vmatpush3.msra.mxu1 %v8412_v19  ;;  %v8426_v19 = vld [vmem:[%s14577_s9 + $0x3] ss:$0 sm:$0xff] }
 0x760   : > { %10107 = vmatprep.subr.mxu1 %v10616_v1 }
 0x761   : > { %10108 = vmatpush3.msra.mxu1 %v8411_v20 }
 0x762   : > { %10109 = vmatprep.subr.mxu1 %v10616_v1 }
 0x763   : > { %10110 = vmatpush3.msra.mxu1 %v8410_v21 }
 0x764   : > { %10111 = vmatprep.subr.mxu1 %v10616_v1 }
 0x765   : > { %10112 = vmatpush3.msra.mxu1 %v8409_v22 }
 0x766   : > { %10113 = vmatprep.subr.mxu1 %v10616_v1 }
 0x767   : > { %10114 = vmatpush3.msra.mxu1 %v8408_v23 }
 0x768   : > { %10115 = vmatprep.subr.mxu1 %v10616_v1 }
 0x769   : > { %10116 = vmatpush3.msra.mxu1 %v8407_v25 }
 0x76a   : > { %10117 = vmatprep.subr.mxu1 %v10616_v1 }
 0x76b   : > { %10118 = vmatpush3.msra.mxu1 %v8406_v26 }
 0x76c   : > { %10120 = vmatmul.mubr.msk.f32.vlgmr.msra.gmra.mxu1 %vm782_vm3, %v10869_v24  ;;  %10141 = vmatprep.subr.mxu1 %v10616_v1 }
 0x76d   : > { %10143 = vmatprep.mubr.msk.f32.mxu1 %vm10617_vm1, %v10616_v1 }
 0x7fc   : > { %v11239_v27 = vpop.f32.mrf.mxu1 }
 0x7fd   : > { %v1759_v11 = vadd.f32 %v11134_v62, %v11239_v27 }
 0x7fe   : > { %v10002_v28 = vpop.f32.mrf.mxu1 }
 0x80c   : > { %v1845_v30 = vpop.f32.mrf.mxu1 }
 0x80d   : > { %v1846_v31 = vadd.f32 %v8365_v29, %v1845_v30 }
 0x80e   : > { %v10028_v32 = vpop.f32.mrf.mxu1 }
 0x80f   : > { %10070 = vmatmul.mubr.msk.f32.vlgmr.msra.gmra.mxu0 %vm1026_vm4, %v1846_v31 }
 0x810   : > { %10074 = vmatprep.mubr.msk.f32.mxu0 %vm10617_vm1, %v10616_v1 }
 0x81c   : > { %v2019_v34 = vpop.f32.mrf.mxu1 }
 0x81d   : > { %v2020_v35 = vadd.f32 %v8387_v33, %v2019_v34 }
 0x81e   : > { %v10066_v36 = vpop.f32.mrf.mxu1 }
 0x81f   : > { %10073 = vmatpush3.msra.mxu0 %v2020_v35  ;;  %v8432_v35 = vld [vmem:[%s14578_s10 + $0x38] sm:$0xff]  ;;  %v8431_v36 = vld [vmem:[%s14578_s10 + $0x30] sm:$0xff] }
 0x820   : > { %10077 = vmatprep.subr.mxu0 %v10616_v1 }
 0x82c   : > { %v2431_v38 = vpop.f32.mrf.mxu1 }
 0x82d   : > { %v2432_v39 = vadd.f32 %v8415_v37, %v2431_v38 }
 0x82e   : > { %v10121_v40 = vpop.f32.mrf.mxu1 }
 0x82f   : > { %10142 = vmatpush3.xpose.msk.msra.mxu1 %vm1026_vm4, %v2432_v39  ;;  %v8434_v40 = vld [vmem:[%s14579_s11] ss:$0 sm:$0xff] }
 0x830   : > { %10146 = vmatprep.subr.mxu1 %v10616_v1 }
 0x8cf   : > { %v2095_v41 = vpop.f32.mrf.mxu0 }
 0x8d0   : > { %v2099_v42 = vmul.f32 0.25, %v2095_v41 }
 0x8d1   : > { %v10071_v43 = vpop.f32.mrf.mxu0 }
 0x8d2   : > { %v2100_v44 = vsel %vm1104_vm5, %v2099_v42, -inf }
 0x8d3   : > { %2101 = vmax.xlane.f32.xlu0 %v2100_v44 }
 0x95c   : > { %v2102_v45 = vpop.xlane.xlu0 %2101 }
 0x95d   : > { %v2103_v46 = vsub.f32 %v2099_v42, %v2102_v45 }
 0x95f   : > { %v2104_v47 = vmul.f32 1.442695, %v2103_v46 }
 0x961   : > { %10522 = vpow2.f32 %v2104_v47 }
 0x96e   : > { %v10523_v48 = vpop.eup %10522 }
 0x96f   : > { %v2106_v49 = vsel %vm1104_vm5, %v10523_v48, 0.0 }
 0x970   : > { %2107 = vadd.xlane.f32.xlu1 %v2106_v49 }
 0x9f9   : > { %v2108_v50 = vpop.xlane.xlu1 %2107 }
 0x9fa   : > { %10524 = vrcp.f32 %v2108_v50 }
 0xa07   : > { %v10525_v51 = vpop.eup %10524 }
 0xa08   : > { %v2110_v52 = vmul.f32 %v10525_v51, %v10523_v48  ;;  %v2912_v51 = vld [vmem:[%s14582_s14 + $0x388] sm:$0xff] }
 0xa0a   : > { %10075 = vmatmul.mubr.msk.f32.vlgmr.msra.gmra.mxu0 %vm1104_vm5, %v2110_v52  ;;  %v2911_v52 = vld [vmem:[%s14582_s14 + $0x380] sm:$0xff] }
 0xa0b   : > { %10078 = vmatpush3.msra.mxu0 %v8393_v53  ;;  %10081 = vmatprep.mubr.msk.f32.mxu0 %vm10617_vm1, %v10616_v1  ;;  %v2913_v53 = vld [vmem:[%s14582_s14 + $0x390] sm:$0xff] }
 0xa0c   : > { %10079 = vmatprep.subr.mxu0 %v10616_v1 }
 0xa0d   : > { %10080 = vmatpush3.msra.mxu0 %v8392_v54  ;;  %v2896_v54 = vld [vmem:[%s14582_s14 + $0x308] sm:$0xff] }
 0xa0e   : > { %10084 = vmatprep.subr.mxu0 %v10616_v1 }
 0xaca   : > { %v2180_v56 = vpop.f32.mrf.mxu0 }
 0xacb   : > { %10082 = vmatmul.mubr.msk.f32.vlgmr.msra.gmra.mxu0 %vm1026_vm4, %v2180_v56  ;;  %v2895_v56 = vld [vmem:[%s14582_s14 + $0x300] sm:$0xff] }
 0xacc   : > { %10085 = vmatpush3.msra.mxu0 %v8402_v55  ;;  %v10076_v58 = vpop.f32.mrf.mxu0  ;;  %10100 = vmatprep.mubr.msk.f32.mxu0 %vm10617_vm1, %v10616_v1  ;;  %v2898_v55 = vld [vmem:[%s14582_s14 + $0x318] sm:$0xff] }
 0xacd   : > { %10086 = vmatprep.subr.mxu0 %v10616_v1  ;;  %v2880_v58 = vld [vmem:[%s14582_s14 + $0x288] sm:$0xff] }
 0xace   : > { %10087 = vmatpush3.msra.mxu0 %v8401_v57  ;;  %v2897_v57 = vld [vmem:[%s14582_s14 + $0x310] sm:$0xff] }
 0xacf   : > { %10088 = vmatprep.subr.mxu0 %v10616_v1 }
 0xad0   : > { %10089 = vmatpush3.msra.mxu0 %v8400_v59  ;;  %v2882_v59 = vld [vmem:[%s14582_s14 + $0x298] sm:$0xff] }
 0xad1   : > { %10090 = vmatprep.subr.mxu0 %v10616_v1 }
 0xad2   : > { %10091 = vmatpush3.msra.mxu0 %v8399_v60  ;;  %v2879_v60 = vld [vmem:[%s14582_s14 + $0x280] sm:$0xff] }
 0xad3   : > { %10092 = vmatprep.subr.mxu0 %v10616_v1 }
 0xad4   : > { %10093 = vmatpush3.msra.mxu0 %v8398_v61  ;;  %v2881_v61 = vld [vmem:[%s14582_s14 + $0x290] sm:$0xff] }
 0xad5   : > { %10094 = vmatprep.subr.mxu0 %v10616_v1 }
 0xad6   : > { %10095 = vmatpush3.msra.mxu0 %v8397_v63  ;;  %v2864_v63 = vld [vmem:[%s14582_s14 + $0x208] sm:$0xff] }
 0xad7   : > { %10096 = vmatprep.subr.mxu0 %v10616_v1 }
 0xad8   : > { %10097 = vmatpush3.msra.mxu0 %v8396_v0  ;;  %v2866_v0 = vld [vmem:[%s14582_s14 + $0x218] sm:$0xff] }
 0xad9   : > { %10098 = vmatprep.subr.mxu0 %v10616_v1 }
 0xada   : > { %10099 = vmatpush3.msra.mxu0 %v8395_v2  ;;  %v2863_v2 = vld [vmem:[%s14582_s14 + $0x200] sm:$0xff] }
 0xadb   : > { %10101 = vmatmul.mubr.msk.f32.vlgmr.msra.gmra.mxu0 %vm782_vm3, %v10869_v24  ;;  %10122 = vmatprep.subr.mxu0 %v10616_v1 }
 0xadc   : > { %10123 = vmatpush3.msra.mxu0 %v8424_v3  ;;  %10138 = vmatprep.mubr.msk.f32.mxu0 %vm10617_vm1, %v10616_v1  ;;  %v2865_v3 = vld [vmem:[%s14582_s14 + $0x210] sm:$0xff] }
 0xadd   : > { %10124 = vmatprep.subr.mxu0 %v10616_v1 }
 0xade   : > { %10125 = vmatpush3.msra.mxu0 %v8423_v4  ;;  %v2848_v4 = vld [vmem:[%s14582_s14 + $0x188] sm:$0xff] }
 0xadf   : > { %10126 = vmatprep.subr.mxu0 %v10616_v1 }
 0xae0   : > { %10127 = vmatpush3.msra.mxu0 %v8422_v5  ;;  %v2850_v5 = vld [vmem:[%s14582_s14 + $0x198] sm:$0xff] }
 0xae1   : > { %10128 = vmatprep.subr.mxu0 %v10616_v1 }
 0xae2   : > { %10129 = vmatpush3.msra.mxu0 %v8421_v6  ;;  %v2847_v6 = vld [vmem:[%s14582_s14 + $0x180] sm:$0xff] }
 0xae3   : > { %10130 = vmatprep.subr.mxu0 %v10616_v1 }
 0xae4   : > { %10131 = vmatpush3.msra.mxu0 %v8420_v7  ;;  %v2849_v7 = vld [vmem:[%s14582_s14 + $0x190] sm:$0xff] }
 0xae5   : > { %10132 = vmatprep.subr.mxu0 %v10616_v1 }
 0xae6   : > { %10133 = vmatpush3.msra.mxu0 %v8419_v8  ;;  %v2832_v8 = vld [vmem:[%s14582_s14 + $0x108] sm:$0xff] }
 0xae7   : > { %10134 = vmatprep.subr.mxu0 %v10616_v1 }
 0xae8   : > { %10135 = vmatpush3.msra.mxu0 %v8418_v9  ;;  %v2834_v9 = vld [vmem:[%s14582_s14 + $0x118] sm:$0xff] }
 0xae9   : > { %10136 = vmatprep.subr.mxu0 %v10616_v1 }
 0xaea   : > { %10137 = vmatpush3.msra.mxu0 %v8417_v10  ;;  %v2831_v10 = vld [vmem:[%s14582_s14 + $0x100] sm:$0xff] }
 0xaeb   : > { %10139 = vmatmul.mubr.msk.f32.vlgmr.msra.gmra.mxu0 %vm782_vm3, %v10869_v24 }
 0xaec   : > { %3149 = vmatprep.mubr.f32.mxu0 %v10616_v1 }
 0xb8b   : > { %v2256_v12 = vpop.f32.mrf.mxu0 }
 0xb8c   : > { %v2260_v13 = vadd.f32 %v2256_v12, %v1759_v11  ;;  %v2833_v11 = vld [vmem:[%s14582_s14 + $0x110] sm:$0xff]  ;;  %v2816_v12 = vld [vmem:[%s14582_s14 + $0x88] sm:$0xff] }
 0xb8d   : > { %v10083_v14 = vpop.f32.mrf.mxu0 }
 0xb8e   : > { %v2815_v14 = vld [vmem:[%s14582_s14 + $0x80] sm:$0xff] }
 0xb9b   : > { %v2344_v16 = vpop.f32.mrf.mxu0 }
 0xb9c   : > { %v2345_v17 = vadd.f32 %v8404_v15, %v2344_v16  ;;  %v2817_v15 = vld [vmem:[%s14582_s14 + $0x90] sm:$0xff]  ;;  %v2800_v16 = vld [vmem:[%s14582_s14 + $0x8] sm:$0xff] }
 0xb9d   : > { %v10102_v18 = vpop.f32.mrf.mxu0 }
 0xb9e   : > { %10144 = vmatmul.mubr.msk.f32.vlgmr.msra.gmra.mxu1 %vm1026_vm4, %v2345_v17  ;;  %v2802_v17 = vld [vmem:[%s14582_s14 + $0x18] sm:$0xff]  ;;  %v2799_v18 = vld [vmem:[%s14582_s14] sm:$0xff] }
 0xb9f   : > { %10148 = vmatprep.mubr.msk.f32.mxu1 %vm10617_vm1, %v10616_v1 }
 0xbab   : > { %v2518_v62 = vpop.f32.mrf.mxu0 }
 0xbac   : > { %v2519_v20 = vadd.f32 %v8426_v19, %v2518_v62  ;;  %v2801_v19 = vld [vmem:[%s14582_s14 + $0x10] sm:$0xff]  ;;  %v2916_v62 = vld [vmem:[%s14582_s14 + $0x3a8] sm:$0xff] }
 0xbad   : > { %v10140_v21 = vpop.f32.mrf.mxu0 }
 0xbae   : > { %10147 = vmatpush3.msra.mxu1 %v2519_v20  ;;  %v2918_v20 = vld [vmem:[%s14582_s14 + $0x3b8] sm:$0xff] }
 0xbaf   : > { %10151 = vmatprep.subr.mxu1 %v10616_v1 }
 0xc5e   : > { %v2594_v22 = vpop.f32.mrf.mxu1 }
 0xc5f   : > { %v2598_v23 = vmul.f32 0.25, %v2594_v22 }
 0xc60   : > { %v10145_v25 = vpop.f32.mrf.mxu1 }
 0xc61   : > { %v2599_v26 = vsel %vm1104_vm5, %v2598_v23, -inf }
 0xc62   : > { %2600 = vmax.xlane.f32.xlu0 %v2599_v26  ;;  %v8435_v26 = vld [vmem:[%s14580_s12] ss:$0 sm:$0xff] }
 0xceb   : > { %v2601_v27 = vpop.xlane.xlu0 %2600 }
 0xcec   : > { %v2602_v28 = vsub.f32 %v2598_v23, %v2601_v27 }
 0xcee   : > { %v2603_v29 = vmul.f32 1.442695, %v2602_v28  ;;  %v8436_v28 = vld [vmem:[%s14581_s13] ss:$0 sm:$0xff] }
 0xcf0   : > { %10526 = vpow2.f32 %v2603_v29 }
 0xcfd   : > { %v10527_v30 = vpop.eup %10526 }
 0xcfe   : > { %v2605_v31 = vsel %vm1104_vm5, %v10527_v30, 0.0 }
 0xcff   : > { %2606 = vadd.xlane.f32.xlu1 %v2605_v31  ;;  %v2915_v31 = vld [vmem:[%s14582_s14 + $0x3a0] sm:$0xff] }
 0xd88   : > { %v2607_v32 = vpop.xlane.xlu1 %2606 }
 0xd89   : > { %10528 = vrcp.f32 %v2607_v32  ;;  %v2917_v32 = vld [vmem:[%s14582_s14 + $0x3b0] sm:$0xff] }
 0xd96   : > { %v10529_v33 = vpop.eup %10528 }
 0xd97   : > { %v2609_v34 = vmul.f32 %v10529_v33, %v10527_v30  ;;  %v2900_v33 = vld [vmem:[%s14582_s14 + $0x328] sm:$0xff] }
 0xd99   : > { %10149 = vmatmul.mubr.msk.f32.vlgmr.msra.gmra.mxu1 %vm1104_vm5, %v2609_v34  ;;  %v2902_v34 = vld [vmem:[%s14582_s14 + $0x338] sm:$0xff] }
 0xd9a   : > { %10152 = vmatpush3.msra.mxu1 %v8432_v35  ;;  %10155 = vmatprep.mubr.msk.f32.mxu1 %vm10617_vm1, %v10616_v1  ;;  %v2899_v35 = vld [vmem:[%s14582_s14 + $0x320] sm:$0xff] }
 0xd9b   : > { %10153 = vmatprep.subr.mxu1 %v10616_v1 }
 0xd9c   : > { %10154 = vmatpush3.msra.mxu1 %v8431_v36  ;;  %v2901_v36 = vld [vmem:[%s14582_s14 + $0x330] sm:$0xff] }
 0xd9d   : > { %3030 = vmatprep.subr.mxu1 %v2912_v51  ;;  %v2835_v51 = vld [vmem:[%s14582_s14 + $0x120] sm:$0xff] }
 0xe59   : > { %v2679_v37 = vpop.f32.mrf.mxu1 }
 0xe5a   : > { %10156 = vmatmul.mubr.msk.f32.vlgmr.msra.gmra.mxu1 %vm1026_vm4, %v2679_v37  ;;  %v2884_v37 = vld [vmem:[%s14582_s14 + $0x2a8] sm:$0xff] }
 0xe5b   : > { %v10150_v38 = vpop.f32.mrf.mxu1  ;;  %3078 = vmatprep.mubr.f32.mxu1 %v10616_v1  ;;  %3031 = vmatpush1.msra.mxu1 %v2911_v52  ;;  %v2820_v52 = vld [vmem:[%s14582_s14 + $0xa8] sm:$0xff] }
 0xe5c   : > { %3032 = vmatprep.subr.mxu1 %v2896_v54  ;;  %v2886_v38 = vld [vmem:[%s14582_s14 + $0x2b8] sm:$0xff]  ;;  %v2819_v54 = vld [vmem:[%s14582_s14 + $0xa0] sm:$0xff] }
 0xe5d   : > { %3033 = vmatpush1.msra.mxu1 %v2895_v56  ;;  %v2804_v56 = vld [vmem:[%s14582_s14 + $0x28] sm:$0xff] }
 0xe5e   : > { %3034 = vmatprep.subr.mxu1 %v2880_v58  ;;  %v2803_v58 = vld [vmem:[%s14582_s14 + $0x20] sm:$0xff] }
 0xe5f   : > { %3035 = vmatpush1.msra.mxu1 %v2879_v60  ;;  %v2920_v60 = vld [vmem:[%s14582_s14 + $0x3c8] sm:$0xff] }
 0xe60   : > { %3036 = vmatprep.subr.mxu1 %v2864_v63  ;;  %v2919_v63 = vld [vmem:[%s14582_s14 + $0x3c0] sm:$0xff] }
 0xe61   : > { %3037 = vmatpush1.msra.mxu1 %v2863_v2  ;;  %v2904_v2 = vld [vmem:[%s14582_s14 + $0x348] sm:$0xff] }
 0xe62   : > { %3038 = vmatprep.subr.mxu1 %v2848_v4  ;;  %v2903_v4 = vld [vmem:[%s14582_s14 + $0x340] sm:$0xff] }
 0xe63   : > { %3039 = vmatpush1.msra.mxu1 %v2847_v6  ;;  %v2888_v6 = vld [vmem:[%s14582_s14 + $0x2c8] sm:$0xff] }
 0xe64   : > { %3040 = vmatprep.subr.mxu1 %v2832_v8  ;;  %v2887_v8 = vld [vmem:[%s14582_s14 + $0x2c0] sm:$0xff] }
 0xe65   : > { %3041 = vmatpush1.msra.mxu1 %v2831_v10  ;;  %v2872_v10 = vld [vmem:[%s14582_s14 + $0x248] sm:$0xff] }
 0xe66   : > { %3042 = vmatprep.subr.mxu1 %v2816_v12  ;;  %v2871_v12 = vld [vmem:[%s14582_s14 + $0x240] sm:$0xff] }
 0xe67   : > { %3043 = vmatpush1.msra.mxu1 %v2815_v14  ;;  %v2856_v14 = vld [vmem:[%s14582_s14 + $0x1c8] sm:$0xff] }
 0xe68   : > { %3044 = vmatprep.subr.mxu1 %v2800_v16  ;;  %v2855_v16 = vld [vmem:[%s14582_s14 + $0x1c0] sm:$0xff] }
 0xe69   : > { %3045 = vmatpush1.msra.mxu1 %v2799_v18  ;;  %v2840_v18 = vld [vmem:[%s14582_s14 + $0x148] sm:$0xff] }
 0xe6a   : > { %3172 = vmatprep.subr.mxu1 %v2916_v62  ;;  %v2839_v62 = vld [vmem:[%s14582_s14 + $0x140] sm:$0xff] }
 0xf1a   : > { %v2755_v39 = vpop.f32.mrf.mxu1 }
 0xf1b   : > { %v2759_v41 = vadd.f32 %v2755_v39, %v2260_v13  ;;  %v2818_v13 = vld [vmem:[%s14582_s14 + $0x98] sm:$0xff]  ;;  %v2883_v39 = vld [vmem:[%s14582_s14 + $0x2a0] sm:$0xff] }
 0xf1c   : > { %v10157_v42 = vpop.f32.mrf.mxu1 }
 0xf1d   : > { %v2767_v43 = vadd.f32 %v8434_v40, %v2759_v41  ;;  %v2885_v40 = vld [vmem:[%s14582_s14 + $0x2b0] sm:$0xff]  ;;  %v2868_v41 = vld [vmem:[%s14582_s14 + $0x228] sm:$0xff]  ;;  %v2870_v42 = vld [vmem:[%s14582_s14 + $0x238] sm:$0xff] }
 0xf1f   : > { %v2768_v44 = vadd.f32 %v2767_v43, %v10869_v24  ;;  %v2914_v24 = vld [vmem:[%s14582_s14 + $0x398] sm:$0xff]  ;;  %v2867_v43 = vld [vmem:[%s14582_s14 + $0x220] sm:$0xff] }
 0xf20   : > { %3101 = vmatprep.subr.mxu0 %v2914_v24  ;;  %v2837_v24 = vld [vmem:[%s14582_s14 + $0x130] sm:$0xff] }
 0xf21   : > { %v2771_v45 = vsel %vm782_vm3, %v2768_v44, 0.0  ;;  %3102 = vmatpush1.msra.mxu0 %v2913_v53  ;;  %v2822_v53 = vld [vmem:[%s14582_s14 + $0xb8] sm:$0xff] }
 0xf22   : > { %2772 = vadd.xlane.f32.xlu0 %v2771_v45  ;;  %3103 = vmatprep.subr.mxu0 %v2898_v55  ;;  %v2852_v45 = vld [vmem:[%s14582_s14 + $0x1a8] sm:$0xff]  ;;  %v2821_v55 = vld [vmem:[%s14582_s14 + $0xb0] sm:$0xff] }
 0xf23   : > { %3104 = vmatpush1.msra.mxu0 %v2897_v57  ;;  %v2806_v57 = vld [vmem:[%s14582_s14 + $0x38] sm:$0xff] }
 0xf24   : > { %3105 = vmatprep.subr.mxu0 %v2882_v59  ;;  %v2805_v59 = vld [vmem:[%s14582_s14 + $0x30] sm:$0xff] }
 0xf25   : > { %3106 = vmatpush1.msra.mxu0 %v2881_v61  ;;  %v2922_v61 = vld [vmem:[%s14582_s14 + $0x3d8] sm:$0xff] }
 0xf26   : > { %3107 = vmatprep.subr.mxu0 %v2866_v0  ;;  %v2921_v0 = vld [vmem:[%s14582_s14 + $0x3d0] sm:$0xff] }
 0xf27   : > { %3108 = vmatpush1.msra.mxu0 %v2865_v3  ;;  %v2906_v3 = vld [vmem:[%s14582_s14 + $0x358] sm:$0xff] }
 0xf28   : > { %3109 = vmatprep.subr.mxu0 %v2850_v5  ;;  %v2905_v5 = vld [vmem:[%s14582_s14 + $0x350] sm:$0xff] }
 0xf29   : > { %3110 = vmatpush1.msra.mxu0 %v2849_v7  ;;  %v2890_v7 = vld [vmem:[%s14582_s14 + $0x2d8] sm:$0xff] }
 0xf2a   : > { %3111 = vmatprep.subr.mxu0 %v2834_v9  ;;  %v2889_v9 = vld [vmem:[%s14582_s14 + $0x2d0] sm:$0xff] }
 0xf2b   : > { %3112 = vmatpush1.msra.mxu0 %v2833_v11  ;;  %v2874_v11 = vld [vmem:[%s14582_s14 + $0x258] sm:$0xff] }
 0xf2c   : > { %3113 = vmatprep.subr.mxu0 %v2818_v13  ;;  %v2873_v13 = vld [vmem:[%s14582_s14 + $0x250] sm:$0xff] }
 0xf2d   : > { %3114 = vmatpush1.msra.mxu0 %v2817_v15  ;;  %v2858_v15 = vld [vmem:[%s14582_s14 + $0x1d8] sm:$0xff] }
 0xf2e   : > { %3115 = vmatprep.subr.mxu0 %v2802_v17  ;;  %v2857_v17 = vld [vmem:[%s14582_s14 + $0x1d0] sm:$0xff] }
 0xf2f   : > { %3116 = vmatpush1.msra.mxu0 %v2801_v19  ;;  %v2842_v19 = vld [vmem:[%s14582_s14 + $0x158] sm:$0xff] }
 0xf30   : > { %3243 = vmatprep.subr.mxu0 %v2918_v20  ;;  %v2841_v20 = vld [vmem:[%s14582_s14 + $0x150] sm:$0xff] }
 0xfab   : > { %v2773_v46 = vpop.xlane.xlu0 %2772 }
 0xfac   : > { %v2775_v47 = vmul.f32 0.015625, %v2773_v46  ;;  %v2854_v46 = vld [vmem:[%s14582_s14 + $0x1b8] sm:$0xff] }
 0xfae   : > { %v11373_v48 = vsub.f32 %v2768_v44, %v2775_v47  ;;  %v2869_v44 = vld [vmem:[%s14582_s14 + $0x230] sm:$0xff]  ;;  %v2851_v47 = vld [vmem:[%s14582_s14 + $0x1a0] sm:$0xff] }
 0xfb0   : > { %v2777_v49 = vmul.f32 %v11373_v48, %v11373_v48 }
 0xfb2   : > { %v2778_v50 = vsel %vm782_vm3, %v2777_v49, 0.0  ;;  %v2836_v49 = vld [vmem:[%s14582_s14 + $0x128] sm:$0xff] }
 0xfb3   : > { %2779 = vadd.xlane.f32.xlu1 %v2778_v50  ;;  %v2838_v50 = vld [vmem:[%s14582_s14 + $0x138] sm:$0xff] }
0x103c   : > { %v2780_v21 = vpop.xlane.xlu1 %2779 }
0x103d   : > { %v2781_v22 = vmul.f32 0.015625, %v2780_v21  ;;  %v2824_v21 = vld [vmem:[%s14582_s14 + $0xc8] sm:$0xff] }
0x103f   : > { %v2782_v23 = vadd.f32 1e-05, %v2781_v22  ;;  %v2826_v22 = vld [vmem:[%s14582_s14 + $0xd8] sm:$0xff] }
0x1041   : > { %10530 = vrsqrt.f32 %v2782_v23  ;;  %v2823_v23 = vld [vmem:[%s14582_s14 + $0xc0] sm:$0xff] }
0x104e   : > { %v10531_v25 = vpop.eup %10530 }
0x104f   : > { %v2784_v27 = vmul.f32 %v10531_v25, %v11373_v48  ;;  %v2853_v48 = vld [vmem:[%s14582_s14 + $0x1b0] sm:$0xff] }
0x1050   : > { %v2825_v25 = vld [vmem:[%s14582_s14 + $0xd0] sm:$0xff] }
0x1051   : > { %v2791_v29 = vmul.f32 %v8435_v26, %v2784_v27  ;;  %v2808_v26 = vld [vmem:[%s14582_s14 + $0x48] sm:$0xff]  ;;  %v2810_v27 = vld [vmem:[%s14582_s14 + $0x58] sm:$0xff] }
0x1053   : > { %v11487_v30 = vadd.f32 %v8436_v28, %v2791_v29  ;;  %v2807_v28 = vld [vmem:[%s14582_s14 + $0x40] sm:$0xff]  ;;  %v2809_v29 = vld [vmem:[%s14582_s14 + $0x50] sm:$0xff] }
0x1055   : > { %8437 = vmatmul.mubr.msk.f32.vlgmr.msra.gmra.mxu1 %vm782_vm3, %v11487_v30  ;;  %8438 = vmatmul.mubr.msk.f32.vlgmr.msra.gmra.mxu0 %vm782_vm3, %v11487_v30 }
0x1056   : > { %3173 = vmatpush1.msra.mxu1 %v2915_v31  ;;  %3244 = vmatpush1.msra.mxu0 %v2917_v32  ;;  %v2924_v31 = vld [vmem:[%s14582_s14 + $0x3e8] sm:$0xff]  ;;  %v2926_v32 = vld [vmem:[%s14582_s14 + $0x3f8] sm:$0xff] }
0x1057   : > { %3174 = vmatprep.subr.mxu1 %v2900_v33  ;;  %3245 = vmatprep.subr.mxu0 %v2902_v34  ;;  %v2923_v33 = vld [vmem:[%s14582_s14 + $0x3e0] sm:$0xff]  ;;  %v2925_v34 = vld [vmem:[%s14582_s14 + $0x3f0] sm:$0xff] }
0x1058   : > { %3175 = vmatpush1.msra.mxu1 %v2899_v35  ;;  %3246 = vmatpush1.msra.mxu0 %v2901_v36  ;;  %v2908_v35 = vld [vmem:[%s14582_s14 + $0x368] sm:$0xff]  ;;  %v2910_v36 = vld [vmem:[%s14582_s14 + $0x378] sm:$0xff] }
0x1059   : > { %3176 = vmatprep.subr.mxu1 %v2884_v37  ;;  %3247 = vmatprep.subr.mxu0 %v2886_v38  ;;  %v2907_v37 = vld [vmem:[%s14582_s14 + $0x360] sm:$0xff]  ;;  %v2909_v38 = vld [vmem:[%s14582_s14 + $0x370] sm:$0xff] }
0x105a   : > { %3177 = vmatpush1.msra.mxu1 %v2883_v39  ;;  %3248 = vmatpush1.msra.mxu0 %v2885_v40  ;;  %v2892_v39 = vld [vmem:[%s14582_s14 + $0x2e8] sm:$0xff]  ;;  %v2894_v40 = vld [vmem:[%s14582_s14 + $0x2f8] sm:$0xff] }
0x105b   : > { %3178 = vmatprep.subr.mxu1 %v2868_v41  ;;  %3249 = vmatprep.subr.mxu0 %v2870_v42  ;;  %v2891_v41 = vld [vmem:[%s14582_s14 + $0x2e0] sm:$0xff]  ;;  %v2893_v42 = vld [vmem:[%s14582_s14 + $0x2f0] sm:$0xff] }
0x105c   : > { %3179 = vmatpush1.msra.mxu1 %v2867_v43  ;;  %3250 = vmatpush1.msra.mxu0 %v2869_v44  ;;  %v2876_v43 = vld [vmem:[%s14582_s14 + $0x268] sm:$0xff]  ;;  %v2878_v44 = vld [vmem:[%s14582_s14 + $0x278] sm:$0xff] }
0x105d   : > { %3180 = vmatprep.subr.mxu1 %v2852_v45  ;;  %3251 = vmatprep.subr.mxu0 %v2854_v46  ;;  %v2875_v45 = vld [vmem:[%s14582_s14 + $0x260] sm:$0xff]  ;;  %v2877_v46 = vld [vmem:[%s14582_s14 + $0x270] sm:$0xff] }
0x105e   : > { %3181 = vmatpush1.msra.mxu1 %v2851_v47  ;;  %3252 = vmatpush1.msra.mxu0 %v2853_v48  ;;  %v2860_v47 = vld [vmem:[%s14582_s14 + $0x1e8] sm:$0xff]  ;;  %v2862_v48 = vld [vmem:[%s14582_s14 + $0x1f8] sm:$0xff] }
0x105f   : > { %3182 = vmatprep.subr.mxu1 %v2836_v49  ;;  %3253 = vmatprep.subr.mxu0 %v2838_v50  ;;  %v2859_v49 = vld [vmem:[%s14582_s14 + $0x1e0] sm:$0xff]  ;;  %v2861_v50 = vld [vmem:[%s14582_s14 + $0x1f0] sm:$0xff] }
0x1060   : > { %3183 = vmatpush1.msra.mxu1 %v2835_v51  ;;  %3254 = vmatpush1.msra.mxu0 %v2837_v24  ;;  %v2844_v51 = vld [vmem:[%s14582_s14 + $0x168] sm:$0xff]  ;;  %v2846_v24 = vld [vmem:[%s14582_s14 + $0x178] sm:$0xff] }
0x1061   : > { %3184 = vmatprep.subr.mxu1 %v2820_v52  ;;  %3255 = vmatprep.subr.mxu0 %v2822_v53  ;;  %v2843_v52 = vld [vmem:[%s14582_s14 + $0x160] sm:$0xff]  ;;  %v2845_v53 = vld [vmem:[%s14582_s14 + $0x170] sm:$0xff] }
0x1062   : > { %3185 = vmatpush1.msra.mxu1 %v2819_v54  ;;  %3256 = vmatpush1.msra.mxu0 %v2821_v55  ;;  %v2828_v54 = vld [vmem:[%s14582_s14 + $0xe8] sm:$0xff]  ;;  %v2830_v55 = vld [vmem:[%s14582_s14 + $0xf8] sm:$0xff] }
0x1063   : > { %3186 = vmatprep.subr.mxu1 %v2804_v56  ;;  %3257 = vmatprep.subr.mxu0 %v2806_v57  ;;  %v2827_v56 = vld [vmem:[%s14582_s14 + $0xe0] sm:$0xff]  ;;  %v2829_v57 = vld [vmem:[%s14582_s14 + $0xf0] sm:$0xff] }
0x1064   : > { %3187 = vmatpush1.msra.mxu1 %v2803_v58  ;;  %3220 = vmatprep.mubr.f32.mxu1 %v10616_v1  ;;  %v2812_v58 = vld [vmem:[%s14582_s14 + $0x68] sm:$0xff] }
0x1065   : > { %3258 = vmatpush1.msra.mxu0 %v2805_v59  ;;  %3291 = vmatprep.mubr.f32.mxu0 %v10616_v1  ;;  %v2814_v59 = vld [vmem:[%s14582_s14 + $0x78] sm:$0xff] }
0x1066   : > { %8439 = vmatmul.mubr.msk.f32.vlgmr.msra.gmra.mxu1 %vm782_vm3, %v11487_v30  ;;  %8440 = vmatmul.mubr.msk.f32.vlgmr.msra.gmra.mxu0 %vm782_vm3, %v11487_v30 }
0x1067   : > { %3314 = vmatprep.subr.mxu1 %v2920_v60  ;;  %3385 = vmatprep.subr.mxu0 %v2922_v61  ;;  %v2811_v60 = vld [vmem:[%s14582_s14 + $0x60] sm:$0xff]  ;;  %v2813_v61 = vld [vmem:[%s14582_s14 + $0x70] sm:$0xff] }
0x1068   : > { %3315 = vmatpush1.msra.mxu1 %v2919_v63  ;;  %3386 = vmatpush1.msra.mxu0 %v2921_v0  ;;  %v3629_v63 = vld [vmem:[%s14584_s16 + $0xf8] sm:$0xff] }
0x1069   : > { %3316 = vmatprep.subr.mxu1 %v2904_v2  ;;  %3387 = vmatprep.subr.mxu0 %v2906_v3  ;;  %v3661_v0 = vld [vmem:[%s14584_s16 + $0x1f8] sm:$0xff] }
0x106a   : > { %3317 = vmatpush1.msra.mxu1 %v2903_v4  ;;  %3388 = vmatpush1.msra.mxu0 %v2905_v5  ;;  %v3613_v2 = vld [vmem:[%s14584_s16 + $0x78] sm:$0xff]  ;;  %v3628_v4 = vld [vmem:[%s14584_s16 + $0xf0] sm:$0xff] }
0x106b   : > { %3318 = vmatprep.subr.mxu1 %v2888_v6  ;;  %3389 = vmatprep.subr.mxu0 %v2890_v7  ;;  %v3645_v3 = vld [vmem:[%s14584_s16 + $0x178] sm:$0xff]  ;;  %v3660_v5 = vld [vmem:[%s14584_s16 + $0x1f0] sm:$0xff] }
0x106c   : > { %3319 = vmatpush1.msra.mxu1 %v2887_v8  ;;  %3390 = vmatpush1.msra.mxu0 %v2889_v9  ;;  %v3612_v6 = vld [vmem:[%s14584_s16 + $0x70] sm:$0xff]  ;;  %v3627_v8 = vld [vmem:[%s14584_s16 + $0xe8] sm:$0xff] }
0x106d   : > { %3320 = vmatprep.subr.mxu1 %v2872_v10  ;;  %3391 = vmatprep.subr.mxu0 %v2874_v11  ;;  %v3644_v7 = vld [vmem:[%s14584_s16 + $0x170] sm:$0xff]  ;;  %v3659_v9 = vld [vmem:[%s14584_s16 + $0x1e8] sm:$0xff] }
0x106e   : > { %3321 = vmatpush1.msra.mxu1 %v2871_v12  ;;  %3392 = vmatpush1.msra.mxu0 %v2873_v13  ;;  %v3611_v10 = vld [vmem:[%s14584_s16 + $0x68] sm:$0xff]  ;;  %v3626_v12 = vld [vmem:[%s14584_s16 + $0xe0] sm:$0xff] }
0x106f   : > { %3322 = vmatprep.subr.mxu1 %v2856_v14  ;;  %3393 = vmatprep.subr.mxu0 %v2858_v15  ;;  %v3643_v11 = vld [vmem:[%s14584_s16 + $0x168] sm:$0xff]  ;;  %v3658_v13 = vld [vmem:[%s14584_s16 + $0x1e0] sm:$0xff] }
0x1070   : > { %3323 = vmatpush1.msra.mxu1 %v2855_v16  ;;  %3394 = vmatpush1.msra.mxu0 %v2857_v17  ;;  %v3610_v14 = vld [vmem:[%s14584_s16 + $0x60] sm:$0xff]  ;;  %v3625_v16 = vld [vmem:[%s14584_s16 + $0xd8] sm:$0xff] }
0x1071   : > { %3324 = vmatprep.subr.mxu1 %v2840_v18  ;;  %3395 = vmatprep.subr.mxu0 %v2842_v19  ;;  %v3642_v15 = vld [vmem:[%s14584_s16 + $0x160] sm:$0xff]  ;;  %v3657_v17 = vld [vmem:[%s14584_s16 + $0x1d8] sm:$0xff] }
0x1072   : > { %3325 = vmatpush1.msra.mxu1 %v2839_v62  ;;  %3396 = vmatpush1.msra.mxu0 %v2841_v20  ;;  %v3609_v18 = vld [vmem:[%s14584_s16 + $0x58] sm:$0xff]  ;;  %v3624_v62 = vld [vmem:[%s14584_s16 + $0xd0] sm:$0xff] }
0x1073   : > { %3326 = vmatprep.subr.mxu1 %v2824_v21  ;;  %3397 = vmatprep.subr.mxu0 %v2826_v22  ;;  %v3641_v19 = vld [vmem:[%s14584_s16 + $0x158] sm:$0xff]  ;;  %v3656_v20 = vld [vmem:[%s14584_s16 + $0x1d0] sm:$0xff] }
0x1074   : > { %3327 = vmatpush1.msra.mxu1 %v2823_v23  ;;  %3398 = vmatpush1.msra.mxu0 %v2825_v25  ;;  %v3608_v21 = vld [vmem:[%s14584_s16 + $0x50] sm:$0xff]  ;;  %v3623_v23 = vld [vmem:[%s14584_s16 + $0xc8] sm:$0xff] }
0x1075   : > { %3328 = vmatprep.subr.mxu1 %v2808_v26  ;;  %3399 = vmatprep.subr.mxu0 %v2810_v27  ;;  %v3640_v22 = vld [vmem:[%s14584_s16 + $0x150] sm:$0xff]  ;;  %v3655_v25 = vld [vmem:[%s14584_s16 + $0x1c8] sm:$0xff] }
0x1076   : > { %3329 = vmatpush1.msra.mxu1 %v2807_v28  ;;  %3362 = vmatprep.mubr.f32.mxu1 %v10616_v1  ;;  %v3607_v26 = vld [vmem:[%s14584_s16 + $0x48] sm:$0xff]  ;;  %v3622_v28 = vld [vmem:[%s14584_s16 + $0xc0] sm:$0xff] }
0x1077   : > { %3400 = vmatpush1.msra.mxu0 %v2809_v29  ;;  %3433 = vmatprep.mubr.f32.mxu0 %v10616_v1  ;;  %v3639_v27 = vld [vmem:[%s14584_s16 + $0x148] sm:$0xff]  ;;  %v3654_v29 = vld [vmem:[%s14584_s16 + $0x1c0] sm:$0xff] }
0x1078   : > { %8441 = vmatmul.mubr.msk.f32.vlgmr.msra.gmra.mxu1 %vm782_vm3, %v11487_v30  ;;  %8442 = vmatmul.mubr.msk.f32.vlgmr.msra.gmra.mxu0 %vm782_vm3, %v11487_v30 }
0x1079   : > { %3456 = vmatprep.subr.mxu1 %v2924_v31  ;;  %3527 = vmatprep.subr.mxu0 %v2926_v32  ;;  %v3606_v31 = vld [vmem:[%s14584_s16 + $0x40] sm:$0xff] }
0x107a   : > { %3457 = vmatpush1.msra.mxu1 %v2923_v33  ;;  %3528 = vmatpush1.msra.mxu0 %v2925_v34  ;;  %v3638_v32 = vld [vmem:[%s14584_s16 + $0x140] sm:$0xff]  ;;  %v3621_v33 = vld [vmem:[%s14584_s16 + $0xb8] sm:$0xff] }
0x107b   : > { %3458 = vmatprep.subr.mxu1 %v2908_v35  ;;  %3529 = vmatprep.subr.mxu0 %v2910_v36  ;;  %v3653_v34 = vld [vmem:[%s14584_s16 + $0x1b8] sm:$0xff] }
0x107c   : > { %3459 = vmatpush1.msra.mxu1 %v2907_v37  ;;  %3530 = vmatpush1.msra.mxu0 %v2909_v38  ;;  %v3605_v35 = vld [vmem:[%s14584_s16 + $0x38] sm:$0xff]  ;;  %v3620_v37 = vld [vmem:[%s14584_s16 + $0xb0] sm:$0xff] }
0x107d   : > { %3460 = vmatprep.subr.mxu1 %v2892_v39  ;;  %3531 = vmatprep.subr.mxu0 %v2894_v40  ;;  %v3637_v36 = vld [vmem:[%s14584_s16 + $0x138] sm:$0xff]  ;;  %v3652_v38 = vld [vmem:[%s14584_s16 + $0x1b0] sm:$0xff] }
0x107e   : > { %3461 = vmatpush1.msra.mxu1 %v2891_v41  ;;  %3532 = vmatpush1.msra.mxu0 %v2893_v42  ;;  %v3604_v39 = vld [vmem:[%s14584_s16 + $0x30] sm:$0xff]  ;;  %v3619_v41 = vld [vmem:[%s14584_s16 + $0xa8] sm:$0xff] }
0x107f   : > { %3462 = vmatprep.subr.mxu1 %v2876_v43  ;;  %3533 = vmatprep.subr.mxu0 %v2878_v44  ;;  %v3636_v40 = vld [vmem:[%s14584_s16 + $0x130] sm:$0xff]  ;;  %v3651_v42 = vld [vmem:[%s14584_s16 + $0x1a8] sm:$0xff] }
0x1080   : > { %3463 = vmatpush1.msra.mxu1 %v2875_v45  ;;  %3534 = vmatpush1.msra.mxu0 %v2877_v46  ;;  %v3603_v43 = vld [vmem:[%s14584_s16 + $0x28] sm:$0xff]  ;;  %v3618_v45 = vld [vmem:[%s14584_s16 + $0xa0] sm:$0xff] }
0x1081   : > { %3464 = vmatprep.subr.mxu1 %v2860_v47  ;;  %3535 = vmatprep.subr.mxu0 %v2862_v48  ;;  %v3635_v44 = vld [vmem:[%s14584_s16 + $0x128] sm:$0xff]  ;;  %v3650_v46 = vld [vmem:[%s14584_s16 + $0x1a0] sm:$0xff] }
0x1082   : > { %3465 = vmatpush1.msra.mxu1 %v2859_v49  ;;  %3536 = vmatpush1.msra.mxu0 %v2861_v50  ;;  %v3602_v47 = vld [vmem:[%s14584_s16 + $0x20] sm:$0xff]  ;;  %v3617_v49 = vld [vmem:[%s14584_s16 + $0x98] sm:$0xff] }
0x1083   : > { %3466 = vmatprep.subr.mxu1 %v2844_v51  ;;  %3537 = vmatprep.subr.mxu0 %v2846_v24  ;;  %v3634_v48 = vld [vmem:[%s14584_s16 + $0x120] sm:$0xff]  ;;  %v3649_v50 = vld [vmem:[%s14584_s16 + $0x198] sm:$0xff] }
0x1084   : > { %3467 = vmatpush1.msra.mxu1 %v2843_v52  ;;  %3538 = vmatpush1.msra.mxu0 %v2845_v53  ;;  %v3601_v51 = vld [vmem:[%s14584_s16 + $0x18] sm:$0xff]  ;;  %v3616_v52 = vld [vmem:[%s14584_s16 + $0x90] sm:$0xff] }
0x1085   : > { %3468 = vmatprep.subr.mxu1 %v2828_v54  ;;  %3539 = vmatprep.subr.mxu0 %v2830_v55  ;;  %v3633_v24 = vld [vmem:[%s14584_s16 + $0x118] sm:$0xff]  ;;  %v3648_v53 = vld [vmem:[%s14584_s16 + $0x190] sm:$0xff] }
0x1086   : > { %3469 = vmatpush1.msra.mxu1 %v2827_v56  ;;  %3540 = vmatpush1.msra.mxu0 %v2829_v57  ;;  %v3600_v54 = vld [vmem:[%s14584_s16 + $0x10] sm:$0xff]  ;;  %v3615_v56 = vld [vmem:[%s14584_s16 + $0x88] sm:$0xff] }
0x1087   : > { %3470 = vmatprep.subr.mxu1 %v2812_v58  ;;  %3541 = vmatprep.subr.mxu0 %v2814_v59  ;;  %v3632_v55 = vld [vmem:[%s14584_s16 + $0x110] sm:$0xff]  ;;  %v3647_v57 = vld [vmem:[%s14584_s16 + $0x188] sm:$0xff] }
0x1088   : > { %3471 = vmatpush1.msra.mxu1 %v2811_v60  ;;  %3504 = vmatprep.mubr.f32.mxu1 %v10616_v1  ;;  %v3599_v58 = vld [vmem:[%s14584_s16 + $0x8] sm:$0xff]  ;;  %v3614_v60 = vld [vmem:[%s14584_s16 + $0x80] sm:$0xff] }
0x1089   : > { %3542 = vmatpush1.msra.mxu0 %v2813_v61  ;;  %3575 = vmatprep.mubr.f32.mxu0 %v10616_v1  ;;  %v3631_v59 = vld [vmem:[%s14584_s16 + $0x108] sm:$0xff]  ;;  %v3646_v61 = vld [vmem:[%s14584_s16 + $0x180] sm:$0xff] }
0x108a   : > { %8443 = vmatmul.mubr.msk.f32.vlgmr.msra.gmra.mxu1 %vm782_vm3, %v11487_v30  ;;  %8444 = vmatmul.mubr.msk.f32.vlgmr.msra.gmra.mxu0 %vm782_vm3, %v11487_v30 }
0x108b   : > { %9152 = vmatprep.subr.mxu1 %v3629_v63  ;;  %9187 = vmatprep.subr.mxu0 %v3661_v0  ;;  %v3598_v63 = vld [vmem:[%s14584_s16] sm:$0xff] }
0x108c   : > { %9153 = vmatpush3.msra.mxu1 %v3613_v2  ;;  %9188 = vmatpush3.msra.mxu0 %v3645_v3  ;;  %v3630_v0 = vld [vmem:[%s14584_s16 + $0x100] sm:$0xff]  ;;  %v3693_v2 = vld [vmem:[%s14584_s16 + $0x2f8] sm:$0xff] }
0x108d   : > { %9154 = vmatprep.subr.mxu1 %v3628_v4  ;;  %9189 = vmatprep.subr.mxu0 %v3660_v5  ;;  %v3725_v3 = vld [vmem:[%s14584_s16 + $0x3f8] sm:$0xff]  ;;  %v2931_v4 = vlaneseq }
0x108e   : > { %9155 = vmatpush3.msra.mxu1 %v3612_v6  ;;  %9190 = vmatpush3.msra.mxu0 %v3644_v7 }
0x108f   : > { %9156 = vmatprep.subr.mxu1 %v3627_v8  ;;  %9191 = vmatprep.subr.mxu0 %v3659_v9  ;;  %v11991_v5 = vshrl.u32 %v2931_v4, 7  ;;  %v12002_v8 = vld [vmem:[%s14583_s15] sm:$0xff] }
0x1090   : > { %9157 = vmatpush3.msra.mxu1 %v3611_v10  ;;  %9192 = vmatpush3.msra.mxu0 %v3643_v11  ;;  %v3702_v4 = vld [vmem:[%s14584_s16 + $0x340] sm:$0xff] }
0x1091   : > { %9158 = vmatprep.subr.mxu1 %v3626_v12  ;;  %9193 = vmatprep.subr.mxu0 %v3658_v13  ;;  %v11994_v6 = vsub.s32 0, %v11991_v5  ;;  %v11997_v7 = vsub.s32 2, %v11991_v5  ;;  %v12005_v9 = vsub.s32 1, %v11991_v5  ;;  %v12008_v10 = vsub.s32 3, %v11991_v5 }
0x1092   : > { %9159 = vmatpush3.msra.mxu1 %v3610_v14  ;;  %9194 = vmatpush3.msra.mxu0 %v3642_v15 }
0x1093   : > { %9160 = vmatprep.subr.mxu1 %v3625_v16  ;;  %9195 = vmatprep.subr.mxu0 %v3657_v17  ;;  %v2934_v11 = vrot.slane %v12002_v8, %v11994_v6  ;;  %v2942_v12 = vrot.slane %v12002_v8, %v11997_v7  ;;  %v2938_v13 = vrot.slane %v12002_v8, %v12005_v9 }
0x1094   : > { %9161 = vmatpush3.msra.mxu1 %v3609_v18  ;;  %9196 = vmatpush3.msra.mxu0 %v3641_v19  ;;  %v2946_v14 = vrot.slane %v12002_v8, %v12008_v10 }
0x1095   : > { %9162 = vmatprep.subr.mxu1 %v3624_v62  ;;  %9197 = vmatprep.subr.mxu0 %v3656_v20 }
0x1096   : > { %9163 = vmatpush3.msra.mxu1 %v3608_v21  ;;  %9198 = vmatpush3.msra.mxu0 %v3640_v22 }
0x1097   : > { %9164 = vmatprep.subr.mxu1 %v3623_v23  ;;  %9199 = vmatprep.subr.mxu0 %v3655_v25 }
0x1098   : > { %9165 = vmatpush3.msra.mxu1 %v3607_v26  ;;  %9200 = vmatpush3.msra.mxu0 %v3639_v27  ;;  %v3677_v27 = vld [vmem:[%s14584_s16 + $0x278] sm:$0xff] }
0x1099   : > { %9166 = vmatprep.subr.mxu1 %v3622_v28  ;;  %9201 = vmatprep.subr.mxu0 %v3654_v29  ;;  %v3709_v28 = vld [vmem:[%s14584_s16 + $0x378] sm:$0xff]  ;;  %v3692_v29 = vld [vmem:[%s14584_s16 + $0x2f0] sm:$0xff] }
0x109a   : > { %9167 = vmatpush3.msra.mxu1 %v3606_v31  ;;  %9202 = vmatpush3.msra.mxu0 %v3638_v32  ;;  %v3724_v31 = vld [vmem:[%s14584_s16 + $0x3f0] sm:$0xff] }
0x109b   : > { %9168 = vmatprep.subr.mxu1 %v3621_v33  ;;  %9203 = vmatprep.subr.mxu0 %v3653_v34  ;;  %v3676_v32 = vld [vmem:[%s14584_s16 + $0x270] sm:$0xff]  ;;  %v3691_v34 = vld [vmem:[%s14584_s16 + $0x2e8] sm:$0xff] }
0x109c   : > { %9169 = vmatpush3.msra.mxu1 %v3605_v35  ;;  %9204 = vmatpush3.msra.mxu0 %v3637_v36  ;;  %v3708_v33 = vld [vmem:[%s14584_s16 + $0x370] sm:$0xff]  ;;  %v3723_v35 = vld [vmem:[%s14584_s16 + $0x3e8] sm:$0xff] }
0x109d   : > { %9170 = vmatprep.subr.mxu1 %v3620_v37  ;;  %9205 = vmatprep.subr.mxu0 %v3652_v38  ;;  %v3675_v36 = vld [vmem:[%s14584_s16 + $0x268] sm:$0xff]  ;;  %v3690_v38 = vld [vmem:[%s14584_s16 + $0x2e0] sm:$0xff] }
0x109e   : > { %9171 = vmatpush3.msra.mxu1 %v3604_v39  ;;  %9206 = vmatpush3.msra.mxu0 %v3636_v40  ;;  %v3707_v37 = vld [vmem:[%s14584_s16 + $0x368] sm:$0xff]  ;;  %v3722_v39 = vld [vmem:[%s14584_s16 + $0x3e0] sm:$0xff] }
0x109f   : > { %9172 = vmatprep.subr.mxu1 %v3619_v41  ;;  %9207 = vmatprep.subr.mxu0 %v3651_v42  ;;  %v3674_v40 = vld [vmem:[%s14584_s16 + $0x260] sm:$0xff]  ;;  %v12061_v42 = vsub.s32 5, %v11991_v5 }
0x10a0   : > { %9173 = vmatpush3.msra.mxu1 %v3603_v43  ;;  %9208 = vmatpush3.msra.mxu0 %v3635_v44  ;;  %v3706_v41 = vld [vmem:[%s14584_s16 + $0x360] sm:$0xff]  ;;  %v12064_v43 = vsub.s32 7, %v11991_v5  ;;  %v3689_v44 = vld [vmem:[%s14584_s16 + $0x2d8] sm:$0xff] }
0x10a1   : > { %9174 = vmatprep.subr.mxu1 %v3618_v45  ;;  %9209 = vmatprep.subr.mxu0 %v3650_v46  ;;  %v3721_v45 = vld [vmem:[%s14584_s16 + $0x3d8] sm:$0xff] }
0x10a2   : > { %9175 = vmatpush3.msra.mxu1 %v3602_v47  ;;  %9210 = vmatpush3.msra.mxu0 %v3634_v48  ;;  %v3673_v46 = vld [vmem:[%s14584_s16 + $0x258] sm:$0xff]  ;;  %v3688_v48 = vld [vmem:[%s14584_s16 + $0x2d0] sm:$0xff] }
0x10a3   : > { %9176 = vmatprep.subr.mxu1 %v3617_v49  ;;  %9211 = vmatprep.subr.mxu0 %v3649_v50  ;;  %v3705_v47 = vld [vmem:[%s14584_s16 + $0x358] sm:$0xff]  ;;  %v3720_v49 = vld [vmem:[%s14584_s16 + $0x3d0] sm:$0xff]  ;;  %v2954_v50 = vrot.slane %v12002_v8, %v12061_v42 }
0x10a4   : > { %9177 = vmatpush3.msra.mxu1 %v3601_v51  ;;  %9212 = vmatpush3.msra.mxu0 %v3633_v24  ;;  %v2962_v51 = vrot.slane %v12002_v8, %v12064_v43  ;;  %v3672_v24 = vld [vmem:[%s14584_s16 + $0x250] sm:$0xff] }
0x10a5   : > { %9178 = vmatprep.subr.mxu1 %v3616_v52  ;;  %9213 = vmatprep.subr.mxu0 %v3648_v53  ;;  %v3704_v52 = vld [vmem:[%s14584_s16 + $0x350] sm:$0xff] }
0x10a6   : > { %9179 = vmatpush3.msra.mxu1 %v3600_v54  ;;  %9214 = vmatpush3.msra.mxu0 %v3632_v55  ;;  %v3687_v55 = vld [vmem:[%s14584_s16 + $0x2c8] sm:$0xff] }
0x10a7   : > { %9180 = vmatprep.subr.mxu1 %v3615_v56  ;;  %9215 = vmatprep.subr.mxu0 %v3647_v57  ;;  %v3719_v56 = vld [vmem:[%s14584_s16 + $0x3c8] sm:$0xff] }
0x10a8   : > { %9181 = vmatpush3.msra.mxu1 %v3599_v58  ;;  %9216 = vmatpush3.msra.mxu0 %v3631_v59  ;;  %v3671_v57 = vld [vmem:[%s14584_s16 + $0x248] sm:$0xff] }
0x10a9   : > { %9182 = vmatprep.subr.mxu1 %v3614_v60  ;;  %9217 = vmatprep.subr.mxu0 %v3646_v61  ;;  %v3703_v58 = vld [vmem:[%s14584_s16 + $0x348] sm:$0xff]  ;;  %v3686_v61 = vld [vmem:[%s14584_s16 + $0x2c0] sm:$0xff] }
0x10aa   : > { %9183 = vmatpush3.msra.mxu1 %v3598_v63  ;;  %9218 = vmatpush3.msra.mxu0 %v3630_v0  ;;  %v3718_v63 = vld [vmem:[%s14584_s16 + $0x3c0] sm:$0xff] }
0x10ab   : > { %9222 = vmatprep.subr.mxu1 %v3693_v2  ;;  %9257 = vmatprep.subr.mxu0 %v3725_v3  ;;  %v3670_v3 = vld [vmem:[%s14584_s16 + $0x240] sm:$0xff] }
0x1115   : > { %v3080_v15 = vpop.f32.mrf.mxu1  ;;  %v3151_v16 = vpop.f32.mrf.mxu0 }
0x1116   : > { %v3081_v17 = vadd.f32 %v3080_v15, %v2934_v11  ;;  %v3152_v18 = vadd.f32 %v3151_v16, %v2942_v12  ;;  %v3669_v15 = vld [vmem:[%s14584_s16 + $0x238] sm:$0xff] }
0x1117   : > { %v3082_v19 = vpop.f32.mrf.mxu1  ;;  %v3153_v62 = vpop.f32.mrf.mxu0  ;;  %v3701_v16 = vld [vmem:[%s14584_s16 + $0x338] sm:$0xff] }
0x1118   : > { %v3083_v20 = vadd.f32 %v3082_v19, %v2938_v13  ;;  %v3154_v21 = vadd.f32 %v3153_v62, %v2946_v14  ;;  %v3582_v25 = vmax.f32 %v3081_v17, 0.0  ;;  %v3584_v26 = vmax.f32 %v3152_v18, 0.0  ;;  %v3685_v13 = vld [vmem:[%s14584_s16 + $0x2b8] sm:$0xff]  ;;  %v3684_v17 = vld [vmem:[%s14584_s16 + $0x2b0] sm:$0xff] }
0x1119   : > { %v3717_v14 = vld [vmem:[%s14584_s16 + $0x3b8] sm:$0xff]  ;;  %v3716_v18 = vld [vmem:[%s14584_s16 + $0x3b0] sm:$0xff] }
0x111a   : > { %v3583_v22 = vmax.f32 %v3083_v20, 0.0  ;;  %v3585_v23 = vmax.f32 %v3154_v21, 0.0  ;;  %v3668_v19 = vld [vmem:[%s14584_s16 + $0x230] sm:$0xff]  ;;  %v3683_v20 = vld [vmem:[%s14584_s16 + $0x2a8] sm:$0xff] }
0x111b   : > { %v3700_v62 = vld [vmem:[%s14584_s16 + $0x330] sm:$0xff]  ;;  %v3715_v21 = vld [vmem:[%s14584_s16 + $0x3a8] sm:$0xff] }
0x111c   : > { %3925 = vmatprep.mubr.f32.mxu1 %v3583_v22  ;;  %3995 = vmatprep.mubr.f32.mxu0 %v3585_v23  ;;  %v12153_v22 = vsub.s32 4, %v11991_v5  ;;  %v12156_v23 = vsub.s32 6, %v11991_v5  ;;  %v3714_v5 = vld [vmem:[%s14584_s16 + $0x3a0] sm:$0xff] }
0x111d   : > { %3926 = vmatmul.mubr.f32.vlgmr.msra.gmra.mxu1 %v3582_v25  ;;  %3996 = vmatmul.mubr.f32.vlgmr.msra.gmra.mxu0 %v3584_v26  ;;  %v3667_v25 = vld [vmem:[%s14584_s16 + $0x228] sm:$0xff] }
0x111e   : > { %9223 = vmatpush3.msra.mxu1 %v3677_v27  ;;  %9258 = vmatpush3.msra.mxu0 %v3709_v28  ;;  %v3699_v26 = vld [vmem:[%s14584_s16 + $0x328] sm:$0xff]  ;;  %v3682_v27 = vld [vmem:[%s14584_s16 + $0x2a0] sm:$0xff] }
0x111f   : > { %9224 = vmatprep.subr.mxu1 %v3692_v29  ;;  %9259 = vmatprep.subr.mxu0 %v3724_v31  ;;  %v3666_v28 = vld [vmem:[%s14584_s16 + $0x220] sm:$0xff]  ;;  %v3681_v31 = vld [vmem:[%s14584_s16 + $0x298] sm:$0xff] }
0x1120   : > { %9225 = vmatpush3.msra.mxu1 %v3676_v32  ;;  %9260 = vmatpush3.msra.mxu0 %v3708_v33  ;;  %v3698_v29 = vld [vmem:[%s14584_s16 + $0x320] sm:$0xff]  ;;  %v3713_v32 = vld [vmem:[%s14584_s16 + $0x398] sm:$0xff]  ;;  %v2950_v33 = vrot.slane %v12002_v8, %v12153_v22 }
0x1121   : > { %9226 = vmatprep.subr.mxu1 %v3691_v34  ;;  %9261 = vmatprep.subr.mxu0 %v3723_v35  ;;  %v2958_v34 = vrot.slane %v12002_v8, %v12156_v23  ;;  %v3665_v35 = vld [vmem:[%s14584_s16 + $0x218] sm:$0xff]  ;;  %v3712_v8 = vld [vmem:[%s14584_s16 + $0x390] sm:$0xff] }
0x1122   : > { %9227 = vmatpush3.msra.mxu1 %v3675_v36  ;;  %9262 = vmatpush3.msra.mxu0 %v3707_v37  ;;  %v3697_v36 = vld [vmem:[%s14584_s16 + $0x318] sm:$0xff]  ;;  %v3680_v37 = vld [vmem:[%s14584_s16 + $0x290] sm:$0xff] }
0x1123   : > { %9228 = vmatprep.subr.mxu1 %v3690_v38  ;;  %9263 = vmatprep.subr.mxu0 %v3722_v39  ;;  %v12201_v38 = vld [vmem:[%s14583_s15 + $0x8] sm:$0xff]  ;;  %v3664_v39 = vld [vmem:[%s14584_s16 + $0x210] sm:$0xff] }
0x1124   : > { %9229 = vmatpush3.msra.mxu1 %v3674_v40  ;;  %9264 = vmatpush3.msra.mxu0 %v3706_v41  ;;  %v3696_v40 = vld [vmem:[%s14584_s16 + $0x310] sm:$0xff]  ;;  %v2970_v41 = vrot.slane %v12201_v38, %v12005_v9 }
0x1125   : > { %9230 = vmatprep.subr.mxu1 %v3689_v44  ;;  %9265 = vmatprep.subr.mxu0 %v3721_v45  ;;  %v2978_v44 = vrot.slane %v12201_v38, %v12008_v10  ;;  %v3679_v45 = vld [vmem:[%s14584_s16 + $0x288] sm:$0xff] }
0x1126   : > { %v12094_v53 = vpop.f32.mrf.mxu1  ;;  %v12096_v54 = vpop.f32.mrf.mxu0  ;;  %9231 = vmatpush3.msra.mxu1 %v3673_v46  ;;  %9266 = vmatpush3.msra.mxu0 %v3705_v47  ;;  %v3711_v46 = vld [vmem:[%s14584_s16 + $0x388] sm:$0xff] }
0x1127   : > { %9232 = vmatprep.subr.mxu1 %v3688_v48  ;;  %9267 = vmatprep.subr.mxu0 %v3720_v49  ;;  %v3223_v47 = vadd.f32 %v12094_v53, %v2950_v33  ;;  %v3294_v48 = vadd.f32 %v12096_v54, %v2958_v34  ;;  %v3710_v53 = vld [vmem:[%s14584_s16 + $0x380] sm:$0xff]  ;;  %v3768_v33 = vld [vmem:[%s14584_s16 + $0x550] sm:$0xff]  ;;  %v3751_v34 = vld [vmem:[%s14584_s16 + $0x4c8] sm:$0xff] }
0x1128   : > { %v3224_v59 = vpop.f32.mrf.mxu1  ;;  %v3295_v60 = vpop.f32.mrf.mxu0  ;;  %9233 = vmatpush3.msra.mxu1 %v3672_v24  ;;  %9268 = vmatpush3.msra.mxu0 %v3704_v52  ;;  %v3695_v24 = vld [vmem:[%s14584_s16 + $0x308] sm:$0xff]  ;;  %v3678_v52 = vld [vmem:[%s14584_s16 + $0x280] sm:$0xff] }
0x1129   : > { %v3225_v0 = vadd.f32 %v3224_v59, %v2954_v50  ;;  %v3296_v2 = vadd.f32 %v3295_v60, %v2962_v51  ;;  %9234 = vmatprep.subr.mxu1 %v3687_v55  ;;  %9269 = vmatprep.subr.mxu0 %v3719_v56  ;;  %v3663_v51 = vld [vmem:[%s14584_s16 + $0x208] sm:$0xff]  ;;  %v3662_v56 = vld [vmem:[%s14584_s16 + $0x200] sm:$0xff]  ;;  %v3586_v60 = vmax.f32 %v3223_v47, 0.0  ;;  %v3765_v47 = vld [vmem:[%s14584_s16 + $0x538] sm:$0xff] }
0x112a   : > { %9235 = vmatpush3.msra.mxu1 %v3671_v57  ;;  %9270 = vmatpush3.msra.mxu0 %v3703_v58  ;;  %v3694_v57 = vld [vmem:[%s14584_s16 + $0x300] sm:$0xff] }
0x112b   : > { %v3587_v11 = vmax.f32 %v3225_v0, 0.0  ;;  %v3589_v12 = vmax.f32 %v3296_v2, 0.0  ;;  %9236 = vmatprep.subr.mxu1 %v3686_v61  ;;  %9271 = vmatprep.subr.mxu0 %v3718_v63  ;;  %v3588_v61 = vmax.f32 %v3294_v48, 0.0  ;;  %v3757_v63 = vld [vmem:[%s14584_s16 + $0x4f8] sm:$0xff]  ;;  %v3748_v48 = vld [vmem:[%s14584_s16 + $0x4b0] sm:$0xff] }
0x112c   : > { %9237 = vmatpush3.msra.mxu1 %v3670_v3  ;;  %9272 = vmatpush3.msra.mxu0 %v3702_v4  ;;  %v3789_v0 = vld [vmem:[%s14584_s16 + $0x5f8] sm:$0xff] }
0x112d   : > { %4065 = vmatprep.mubr.f32.mxu1 %v3587_v11  ;;  %4135 = vmatprep.mubr.f32.mxu0 %v3589_v12  ;;  %v3741_v2 = vld [vmem:[%s14584_s16 + $0x478] sm:$0xff]  ;;  %v3756_v12 = vld [vmem:[%s14584_s16 + $0x4f0] sm:$0xff] }
0x112e   : > { %9238 = vmatprep.subr.mxu1 %v3685_v13  ;;  %9273 = vmatprep.subr.mxu0 %v3717_v14  ;;  %v3773_v4 = vld [vmem:[%s14584_s16 + $0x578] sm:$0xff]  ;;  %v3788_v13 = vld [vmem:[%s14584_s16 + $0x5f0] sm:$0xff] }
0x112f   : > { %9239 = vmatpush3.msra.mxu1 %v3669_v15  ;;  %9274 = vmatpush3.msra.mxu0 %v3701_v16  ;;  %v3740_v14 = vld [vmem:[%s14584_s16 + $0x470] sm:$0xff]  ;;  %v3755_v16 = vld [vmem:[%s14584_s16 + $0x4e8] sm:$0xff] }
0x1130   : > { %9240 = vmatprep.subr.mxu1 %v3684_v17  ;;  %9275 = vmatprep.subr.mxu0 %v3716_v18  ;;  %v3772_v15 = vld [vmem:[%s14584_s16 + $0x570] sm:$0xff]  ;;  %v3787_v17 = vld [vmem:[%s14584_s16 + $0x5e8] sm:$0xff] }
0x1131   : > { %9241 = vmatpush3.msra.mxu1 %v3668_v19  ;;  %9276 = vmatpush3.msra.mxu0 %v3700_v62  ;;  %v3739_v18 = vld [vmem:[%s14584_s16 + $0x468] sm:$0xff]  ;;  %v3754_v62 = vld [vmem:[%s14584_s16 + $0x4e0] sm:$0xff] }
0x1132   : > { %9242 = vmatprep.subr.mxu1 %v3683_v20  ;;  %9277 = vmatprep.subr.mxu0 %v3715_v21  ;;  %v3771_v19 = vld [vmem:[%s14584_s16 + $0x568] sm:$0xff]  ;;  %v3786_v20 = vld [vmem:[%s14584_s16 + $0x5e0] sm:$0xff] }
0x1133   : > { %9243 = vmatpush3.msra.mxu1 %v3667_v25  ;;  %9278 = vmatpush3.msra.mxu0 %v3699_v26  ;;  %v3738_v21 = vld [vmem:[%s14584_s16 + $0x460] sm:$0xff]  ;;  %v3753_v26 = vld [vmem:[%s14584_s16 + $0x4d8] sm:$0xff] }
0x1134   : > { %9244 = vmatprep.subr.mxu1 %v3682_v27  ;;  %9279 = vmatprep.subr.mxu0 %v3714_v5  ;;  %v3770_v25 = vld [vmem:[%s14584_s16 + $0x560] sm:$0xff]  ;;  %v3785_v27 = vld [vmem:[%s14584_s16 + $0x5d8] sm:$0xff] }
0x1135   : > { %9245 = vmatpush3.msra.mxu1 %v3666_v28  ;;  %9280 = vmatpush3.msra.mxu0 %v3698_v29  ;;  %v3737_v5 = vld [vmem:[%s14584_s16 + $0x458] sm:$0xff]  ;;  %v3752_v29 = vld [vmem:[%s14584_s16 + $0x4d0] sm:$0xff] }
0x1136   : > { %9246 = vmatprep.subr.mxu1 %v3681_v31  ;;  %9281 = vmatprep.subr.mxu0 %v3713_v32  ;;  %v3769_v28 = vld [vmem:[%s14584_s16 + $0x558] sm:$0xff]  ;;  %v3784_v31 = vld [vmem:[%s14584_s16 + $0x5d0] sm:$0xff] }
0x1137   : > { %9247 = vmatpush3.msra.mxu1 %v3665_v35  ;;  %9282 = vmatpush3.msra.mxu0 %v3697_v36  ;;  %v3736_v32 = vld [vmem:[%s14584_s16 + $0x450] sm:$0xff]  ;;  %v3783_v35 = vld [vmem:[%s14584_s16 + $0x5c8] sm:$0xff] }
0x1138   : > { %v12221_v49 = vpop.f32.mrf.mxu1  ;;  %v12223_v50 = vpop.f32.mrf.mxu0  ;;  %9248 = vmatprep.subr.mxu1 %v3680_v37  ;;  %9283 = vmatprep.subr.mxu0 %v3712_v8  ;;  %v3735_v36 = vld [vmem:[%s14584_s16 + $0x448] sm:$0xff]  ;;  %v3750_v8 = vld [vmem:[%s14584_s16 + $0x4c0] sm:$0xff] }
0x1139   : > { %9249 = vmatpush3.msra.mxu1 %v3664_v39  ;;  %9284 = vmatpush3.msra.mxu0 %v3696_v40  ;;  %v3767_v37 = vld [vmem:[%s14584_s16 + $0x548] sm:$0xff]  ;;  %v3782_v39 = vld [vmem:[%s14584_s16 + $0x5c0] sm:$0xff] }
0x113a   : > { %v3366_v54 = vpop.f32.mrf.mxu1  ;;  %v3437_v55 = vpop.f32.mrf.mxu0  ;;  %9250 = vmatprep.subr.mxu1 %v3679_v45  ;;  %9285 = vmatprep.subr.mxu0 %v3711_v46  ;;  %v3734_v40 = vld [vmem:[%s14584_s16 + $0x440] sm:$0xff]  ;;  %v3781_v45 = vld [vmem:[%s14584_s16 + $0x5b8] sm:$0xff] }
0x113b   : > { %v3367_v58 = vadd.f32 %v3366_v54, %v2970_v41  ;;  %v3438_v59 = vadd.f32 %v3437_v55, %v2978_v44  ;;  %9251 = vmatpush3.msra.mxu1 %v3663_v51  ;;  %9286 = vmatpush3.msra.mxu0 %v3695_v24  ;;  %v3766_v41 = vld [vmem:[%s14584_s16 + $0x540] sm:$0xff]  ;;  %v3749_v44 = vld [vmem:[%s14584_s16 + $0x4b8] sm:$0xff]  ;;  %v3780_v51 = vld [vmem:[%s14584_s16 + $0x5b0] sm:$0xff] }
0x113c   : > { %9252 = vmatprep.subr.mxu1 %v3678_v52  ;;  %9287 = vmatprep.subr.mxu0 %v3710_v53  ;;  %v3733_v46 = vld [vmem:[%s14584_s16 + $0x438] sm:$0xff]  ;;  %v3732_v24 = vld [vmem:[%s14584_s16 + $0x430] sm:$0xff]  ;;  %v3747_v53 = vld [vmem:[%s14584_s16 + $0x4a8] sm:$0xff] }
0x113d   : > { %9253 = vmatpush3.msra.mxu1 %v3662_v56  ;;  %9288 = vmatpush3.msra.mxu0 %v3694_v57  ;;  %v3591_v3 = vmax.f32 %v3367_v58, 0.0  ;;  %v3593_v11 = vmax.f32 %v3438_v59, 0.0  ;;  %v3764_v52 = vld [vmem:[%s14584_s16 + $0x530] sm:$0xff]  ;;  %v3779_v54 = vld [vmem:[%s14584_s16 + $0x5a8] sm:$0xff]  ;;  %v3746_v57 = vld [vmem:[%s14584_s16 + $0x4a0] sm:$0xff] }
0x113e   : > { %4066 = vmatmul.mubr.f32.vlgmr.msra.gmra.mxu1 %v3586_v60  ;;  %4136 = vmatmul.mubr.f32.vlgmr.msra.gmra.mxu0 %v3588_v61  ;;  %v3731_v55 = vld [vmem:[%s14584_s16 + $0x428] sm:$0xff]  ;;  %v3778_v58 = vld [vmem:[%s14584_s16 + $0x5a0] sm:$0xff] }
0x113f   : > { %9292 = vmatprep.subr.mxu1 %v3757_v63  ;;  %9327 = vmatprep.subr.mxu0 %v3789_v0  ;;  %v3763_v56 = vld [vmem:[%s14584_s16 + $0x528] sm:$0xff]  ;;  %v3730_v59 = vld [vmem:[%s14584_s16 + $0x420] sm:$0xff]  ;;  %v3745_v63 = vld [vmem:[%s14584_s16 + $0x498] sm:$0xff] }
0x1140   : > { %9293 = vmatpush3.msra.mxu1 %v3741_v2  ;;  %4205 = vmatprep.mubr.f32.mxu1 %v3591_v3  ;;  %v3762_v60 = vld [vmem:[%s14584_s16 + $0x520] sm:$0xff]  ;;  %v3777_v0 = vld [vmem:[%s14584_s16 + $0x598] sm:$0xff]  ;;  %v2966_v2 = vrot.slane %v12201_v38, %v11994_v6  ;;  %v2974_v3 = vrot.slane %v12201_v38, %v11997_v7 }
0x1141   : > { %9328 = vmatpush3.msra.mxu0 %v3773_v4  ;;  %4275 = vmatprep.mubr.f32.mxu0 %v3593_v11  ;;  %v3729_v11 = vld [vmem:[%s14584_s16 + $0x418] sm:$0xff] }
0x1142   : > { %9294 = vmatprep.subr.mxu1 %v3756_v12  ;;  %9329 = vmatprep.subr.mxu0 %v3788_v13  ;;  %v3761_v12 = vld [vmem:[%s14584_s16 + $0x518] sm:$0xff]  ;;  %v3744_v13 = vld [vmem:[%s14584_s16 + $0x490] sm:$0xff] }
0x1143   : > { %9295 = vmatpush3.msra.mxu1 %v3740_v14  ;;  %9330 = vmatpush3.msra.mxu0 %v3772_v15  ;;  %v3776_v14 = vld [vmem:[%s14584_s16 + $0x590] sm:$0xff]  ;;  %v2986_v15 = vrot.slane %v12201_v38, %v12061_v42 }
0x1144   : > { %9296 = vmatprep.subr.mxu1 %v3755_v16  ;;  %9331 = vmatprep.subr.mxu0 %v3787_v17  ;;  %v3728_v16 = vld [vmem:[%s14584_s16 + $0x410] sm:$0xff] }
0x1145   : > { %9297 = vmatpush3.msra.mxu1 %v3739_v18  ;;  %9332 = vmatpush3.msra.mxu0 %v3771_v19  ;;  %v3760_v17 = vld [vmem:[%s14584_s16 + $0x510] sm:$0xff]  ;;  %v2994_v19 = vrot.slane %v12201_v38, %v12064_v43 }
0x1146   : > { %9298 = vmatprep.subr.mxu1 %v3754_v62  ;;  %9333 = vmatprep.subr.mxu0 %v3786_v20  ;;  %v3743_v62 = vld [vmem:[%s14584_s16 + $0x488] sm:$0xff] }
0x1147   : > { %9299 = vmatpush3.msra.mxu1 %v3738_v21  ;;  %9334 = vmatpush3.msra.mxu0 %v3770_v25  ;;  %v3775_v20 = vld [vmem:[%s14584_s16 + $0x588] sm:$0xff]  ;;  %v3365_v21 = vadd.f32 %v12221_v49, %v2966_v2  ;;  %v3436_v25 = vadd.f32 %v12223_v50, %v2974_v3  ;;  %v3774_v49 = vld [vmem:[%s14584_s16 + $0x580] sm:$0xff]  ;;  %v3832_v2 = vld [vmem:[%s14584_s16 + $0x750] sm:$0xff] }
0x1148   : > { %9300 = vmatprep.subr.mxu1 %v3753_v26  ;;  %9335 = vmatprep.subr.mxu0 %v3785_v27  ;;  %v3727_v27 = vld [vmem:[%s14584_s16 + $0x408] sm:$0xff] }
0x1149   : > { %9301 = vmatpush3.msra.mxu1 %v3737_v5  ;;  %9336 = vmatpush3.msra.mxu0 %v3769_v28  ;;  %v3759_v5 = vld [vmem:[%s14584_s16 + $0x508] sm:$0xff]  ;;  %v3742_v28 = vld [vmem:[%s14584_s16 + $0x480] sm:$0xff] }
0x114a   : > { %9302 = vmatprep.subr.mxu1 %v3752_v29  ;;  %9337 = vmatprep.subr.mxu0 %v3784_v31  ;;  %v12387_v61 = vpop.f32.mrf.mxu1  ;;  %v12399_v4 = vpop.f32.mrf.mxu0  ;;  %v3726_v29 = vld [vmem:[%s14584_s16 + $0x400] sm:$0xff]  ;;  %v3815_v3 = vld [vmem:[%s14584_s16 + $0x6c8] sm:$0xff] }
0x114b   : > { %9303 = vmatpush3.msra.mxu1 %v3736_v32  ;;  %9338 = vmatpush3.msra.mxu0 %v3768_v33  ;;  %v3758_v31 = vld [vmem:[%s14584_s16 + $0x500] sm:$0xff]  ;;  %v3590_v33 = vmax.f32 %v3365_v21, 0.0  ;;  %v3812_v21 = vld [vmem:[%s14584_s16 + $0x6b0] sm:$0xff] }
0x114c   : > { %9304 = vmatprep.subr.mxu1 %v3751_v34  ;;  %9339 = vmatprep.subr.mxu0 %v3783_v35  ;;  %v3508_v18 = vpop.f32.mrf.mxu1  ;;  %v3579_v26 = vpop.f32.mrf.mxu0  ;;  %v3592_v34 = vmax.f32 %v3436_v25, 0.0  ;;  %v3821_v35 = vld [vmem:[%s14584_s16 + $0x6f8] sm:$0xff]  ;;  %v3844_v25 = vld [vmem:[%s14584_s16 + $0x7b0] sm:$0xff] }
0x114d   : > { %9305 = vmatpush3.msra.mxu1 %v3735_v36  ;;  %9340 = vmatpush3.msra.mxu0 %v3767_v37  ;;  %v3509_v50 = vadd.f32 %v3508_v18, %v2986_v15  ;;  %v3580_v32 = vadd.f32 %v3579_v26, %v2994_v19  ;;  %v3853_v36 = vld [vmem:[%s14584_s16 + $0x7f8] sm:$0xff]  ;;  %v3846_v15 = vld [vmem:[%s14584_s16 + $0x7c0] sm:$0xff]  ;;  %v3796_v26 = vld [vmem:[%s14584_s16 + $0x630] sm:$0xff] }
0x114e   : > { %9306 = vmatprep.subr.mxu1 %v3750_v8  ;;  %9341 = vmatprep.subr.mxu0 %v3782_v39  ;;  %v3805_v37 = vld [vmem:[%s14584_s16 + $0x678] sm:$0xff] }
0x114f   : > { %9307 = vmatpush3.msra.mxu1 %v3734_v40  ;;  %9342 = vmatpush3.msra.mxu0 %v3766_v41  ;;  %v3595_v8 = vmax.f32 %v3509_v50, 0.0  ;;  %v3837_v39 = vld [vmem:[%s14584_s16 + $0x778] sm:$0xff]  ;;  %v3597_v40 = vmax.f32 %v3580_v32, 0.0  ;;  %v3820_v41 = vld [vmem:[%s14584_s16 + $0x6f0] sm:$0xff]  ;;  %v3827_v50 = vld [vmem:[%s14584_s16 + $0x728] sm:$0xff] }
0x1150   : > { %9308 = vmatprep.subr.mxu1 %v3749_v44  ;;  %9343 = vmatprep.subr.mxu0 %v3781_v45  ;;  %v3852_v44 = vld [vmem:[%s14584_s16 + $0x7f0] sm:$0xff]  ;;  %v3813_v18 = vld [vmem:[%s14584_s16 + $0x6b8] sm:$0xff]  ;;  %v3794_v32 = vld [vmem:[%s14584_s16 + $0x620] sm:$0xff] }
0x1151   : > { %9309 = vmatpush3.msra.mxu1 %v3733_v46  ;;  %9344 = vmatpush3.msra.mxu0 %v3765_v47  ;;  %v3804_v45 = vld [vmem:[%s14584_s16 + $0x670] sm:$0xff]  ;;  %v3819_v47 = vld [vmem:[%s14584_s16 + $0x6e8] sm:$0xff]  ;;  %v3845_v19 = vld [vmem:[%s14584_s16 + $0x7b8] sm:$0xff] }
0x1152   : > { %9310 = vmatprep.subr.mxu1 %v3748_v48  ;;  %9345 = vmatprep.subr.mxu0 %v3780_v51  ;;  %v3836_v46 = vld [vmem:[%s14584_s16 + $0x770] sm:$0xff]  ;;  %v3851_v48 = vld [vmem:[%s14584_s16 + $0x7e8] sm:$0xff] }
0x1153   : > { %9311 = vmatpush3.msra.mxu1 %v3732_v24  ;;  %9346 = vmatpush3.msra.mxu0 %v3764_v52  ;;  %v3803_v51 = vld [vmem:[%s14584_s16 + $0x668] sm:$0xff]  ;;  %v3818_v52 = vld [vmem:[%s14584_s16 + $0x6e0] sm:$0xff] }
0x1154   : > { %9312 = vmatprep.subr.mxu1 %v3747_v53  ;;  %9347 = vmatprep.subr.mxu0 %v3779_v54  ;;  %v3835_v24 = vld [vmem:[%s14584_s16 + $0x768] sm:$0xff]  ;;  %v3850_v53 = vld [vmem:[%s14584_s16 + $0x7e0] sm:$0xff] }
0x1155   : > { %9313 = vmatpush3.msra.mxu1 %v3731_v55  ;;  %9348 = vmatpush3.msra.mxu0 %v3763_v56  ;;  %v3802_v54 = vld [vmem:[%s14584_s16 + $0x660] sm:$0xff]  ;;  %v3817_v56 = vld [vmem:[%s14584_s16 + $0x6d8] sm:$0xff] }
0x1156   : > { %9314 = vmatprep.subr.mxu1 %v3746_v57  ;;  %9349 = vmatprep.subr.mxu0 %v3778_v58  ;;  %v3834_v55 = vld [vmem:[%s14584_s16 + $0x760] sm:$0xff]  ;;  %v3849_v57 = vld [vmem:[%s14584_s16 + $0x7d8] sm:$0xff] }
0x1157   : > { %9315 = vmatpush3.msra.mxu1 %v3730_v59  ;;  %9350 = vmatpush3.msra.mxu0 %v3762_v60  ;;  %v3801_v58 = vld [vmem:[%s14584_s16 + $0x658] sm:$0xff]  ;;  %v3816_v60 = vld [vmem:[%s14584_s16 + $0x6d0] sm:$0xff] }
0x1158   : > { %9316 = vmatprep.subr.mxu1 %v3745_v63  ;;  %9351 = vmatprep.subr.mxu0 %v3777_v0  ;;  %v3833_v59 = vld [vmem:[%s14584_s16 + $0x758] sm:$0xff]  ;;  %v3848_v63 = vld [vmem:[%s14584_s16 + $0x7d0] sm:$0xff] }
0x1159   : > { %9317 = vmatpush3.msra.mxu1 %v3729_v11  ;;  %9352 = vmatpush3.msra.mxu0 %v3761_v12  ;;  %v3800_v0 = vld [vmem:[%s14584_s16 + $0x650] sm:$0xff]  ;;  %v3847_v11 = vld [vmem:[%s14584_s16 + $0x7c8] sm:$0xff] }
0x115a   : > { %9318 = vmatprep.subr.mxu1 %v3744_v13  ;;  %9353 = vmatprep.subr.mxu0 %v3776_v14  ;;  %v3799_v12 = vld [vmem:[%s14584_s16 + $0x648] sm:$0xff]  ;;  %v3814_v14 = vld [vmem:[%s14584_s16 + $0x6c0] sm:$0xff] }
0x115b   : > { %9319 = vmatpush3.msra.mxu1 %v3728_v16  ;;  %9354 = vmatpush3.msra.mxu0 %v3760_v17  ;;  %v3831_v13 = vld [vmem:[%s14584_s16 + $0x748] sm:$0xff]  ;;  %v3798_v16 = vld [vmem:[%s14584_s16 + $0x640] sm:$0xff] }
0x115c   : > { %9320 = vmatprep.subr.mxu1 %v3743_v62  ;;  %9355 = vmatprep.subr.mxu0 %v3775_v20  ;;  %v3830_v17 = vld [vmem:[%s14584_s16 + $0x740] sm:$0xff]  ;;  %v3797_v62 = vld [vmem:[%s14584_s16 + $0x638] sm:$0xff] }
0x115d   : > { %9321 = vmatpush3.msra.mxu1 %v3727_v27  ;;  %9356 = vmatpush3.msra.mxu0 %v3759_v5  ;;  %v3829_v20 = vld [vmem:[%s14584_s16 + $0x738] sm:$0xff]  ;;  %v3828_v27 = vld [vmem:[%s14584_s16 + $0x730] sm:$0xff]  ;;  %v3811_v5 = vld [vmem:[%s14584_s16 + $0x6a8] sm:$0xff] }
0x115e   : > { %9322 = vmatprep.subr.mxu1 %v3742_v28  ;;  %9357 = vmatprep.subr.mxu0 %v3774_v49  ;;  %v3843_v28 = vld [vmem:[%s14584_s16 + $0x7a8] sm:$0xff] }
0x115f   : > { %9323 = vmatpush3.msra.mxu1 %v3726_v29  ;;  %9358 = vmatpush3.msra.mxu0 %v3758_v31  ;;  %v3795_v49 = vld [vmem:[%s14584_s16 + $0x628] sm:$0xff]  ;;  %v3810_v29 = vld [vmem:[%s14584_s16 + $0x6a0] sm:$0xff] }
0x1160   : > { %4206 = vmatmul.mubr.f32.vlgmr.msra.gmra.mxu1 %v3590_v33  ;;  %4276 = vmatmul.mubr.f32.vlgmr.msra.gmra.mxu0 %v3592_v34  ;;  %v3842_v31 = vld [vmem:[%s14584_s16 + $0x7a0] sm:$0xff]  ;;  %v3809_v34 = vld [vmem:[%s14584_s16 + $0x698] sm:$0xff] }
0x1161   : > { %9362 = vmatprep.subr.mxu1 %v3821_v35  ;;  %9397 = vmatprep.subr.mxu0 %v3853_v36  ;;  %v3826_v33 = vld [vmem:[%s14584_s16 + $0x720] sm:$0xff]  ;;  %v3841_v35 = vld [vmem:[%s14584_s16 + $0x798] sm:$0xff]  ;;  %v2982_v36 = vrot.slane %v12201_v38, %v12153_v22 }
0x1162   : > { %9363 = vmatpush3.msra.mxu1 %v3805_v37  ;;  %4345 = vmatprep.mubr.f32.mxu1 %v3595_v8  ;;  %v2990_v37 = vrot.slane %v12201_v38, %v12156_v23  ;;  %v3793_v8 = vld [vmem:[%s14584_s16 + $0x618] sm:$0xff]  ;;  %v3840_v38 = vld [vmem:[%s14584_s16 + $0x790] sm:$0xff] }
0x1163   : > { %9398 = vmatpush3.msra.mxu0 %v3837_v39  ;;  %4415 = vmatprep.mubr.f32.mxu0 %v3597_v40  ;;  %v3825_v39 = vld [vmem:[%s14584_s16 + $0x718] sm:$0xff]  ;;  %v3808_v40 = vld [vmem:[%s14584_s16 + $0x690] sm:$0xff] }
0x1164   : > { %9364 = vmatprep.subr.mxu1 %v3820_v41  ;;  %9399 = vmatprep.subr.mxu0 %v3852_v44  ;;  %v3792_v41 = vld [vmem:[%s14584_s16 + $0x610] sm:$0xff] }
0x1165   : > { %9365 = vmatpush3.msra.mxu1 %v3804_v45  ;;  %9400 = vmatpush3.msra.mxu0 %v3836_v46  ;;  %v3824_v44 = vld [vmem:[%s14584_s16 + $0x710] sm:$0xff]  ;;  %v3807_v45 = vld [vmem:[%s14584_s16 + $0x688] sm:$0xff] }
0x1166   : > { %9366 = vmatprep.subr.mxu1 %v3819_v47  ;;  %9401 = vmatprep.subr.mxu0 %v3851_v48  ;;  %v3839_v46 = vld [vmem:[%s14584_s16 + $0x788] sm:$0xff]  ;;  %v3507_v47 = vadd.f32 %v12387_v61, %v2982_v36  ;;  %v3578_v48 = vadd.f32 %v12399_v4, %v2990_v37  ;;  %v3838_v61 = vld [vmem:[%s14584_s16 + $0x780] sm:$0xff] }
0x1167   : > { %9367 = vmatpush3.msra.mxu1 %v3803_v51  ;;  %9402 = vmatpush3.msra.mxu0 %v3835_v24  ;;  %v3791_v51 = vld [vmem:[%s14584_s16 + $0x608] sm:$0xff]  ;;  %v3790_v4 = vld [vmem:[%s14584_s16 + $0x600] sm:$0xff] }
0x1168   : > { %9368 = vmatprep.subr.mxu1 %v3818_v52  ;;  %9403 = vmatprep.subr.mxu0 %v3850_v53  ;;  %v3823_v24 = vld [vmem:[%s14584_s16 + $0x708] sm:$0xff]  ;;  %v3806_v52 = vld [vmem:[%s14584_s16 + $0x680] sm:$0xff] }
0x1169   : > { %9369 = vmatpush3.msra.mxu1 %v3802_v54  ;;  %9404 = vmatpush3.msra.mxu0 %v3834_v55  ;;  %v3822_v53 = vld [vmem:[%s14584_s16 + $0x700] sm:$0xff]  ;;  %v3594_v54 = vmax.f32 %v3507_v47, 0.0  ;;  %v3596_v55 = vmax.f32 %v3578_v48, 0.0  ;;  %v8464_v47 = vld [vmem:[%s14624_s22 + $0x128] sm:$0xff] }
0x116a   : > { %9370 = vmatprep.subr.mxu1 %v3817_v56  ;;  %9405 = vmatprep.subr.mxu0 %v3849_v57  ;;  %v8452_v48 = vld [vmem:[%s14621_s5 + $0x120] sm:$0xff] }
0x116b   : > { %9371 = vmatpush3.msra.mxu1 %v3801_v58  ;;  %9406 = vmatpush3.msra.mxu0 %v3833_v59 }
0x116c   : > { %9372 = vmatprep.subr.mxu1 %v3816_v60  ;;  %9407 = vmatprep.subr.mxu0 %v3848_v63  ;;  %v8445_v63 = vld [vmem:[%s14585_s17] ss:$0 sm:$0xff] }
0x116d   : > { %9373 = vmatpush3.msra.mxu1 %v3800_v0  ;;  %9408 = vmatpush3.msra.mxu0 %v3832_v2 }
0x116e   : > { %9374 = vmatprep.subr.mxu1 %v3815_v3  ;;  %9409 = vmatprep.subr.mxu0 %v3847_v11 }
0x116f   : > { %9375 = vmatpush3.msra.mxu1 %v3799_v12  ;;  %9410 = vmatpush3.msra.mxu0 %v3831_v13 }
0x1170   : > { %9376 = vmatprep.subr.mxu1 %v3814_v14  ;;  %9411 = vmatprep.subr.mxu0 %v3846_v15 }
0x1171   : > { %9377 = vmatpush3.msra.mxu1 %v3798_v16  ;;  %9412 = vmatpush3.msra.mxu0 %v3830_v17 }
0x1172   : > { %9378 = vmatprep.subr.mxu1 %v3813_v18  ;;  %9413 = vmatprep.subr.mxu0 %v3845_v19 }
0x1173   : > { %9379 = vmatpush3.msra.mxu1 %v3797_v62  ;;  %9414 = vmatpush3.msra.mxu0 %v3829_v20 }
0x1174   : > { %9380 = vmatprep.subr.mxu1 %v3812_v21  ;;  %9415 = vmatprep.subr.mxu0 %v3844_v25 }
0x1175   : > { %9381 = vmatpush3.msra.mxu1 %v3796_v26  ;;  %9416 = vmatpush3.msra.mxu0 %v3828_v27 }
0x1176   : > { %9382 = vmatprep.subr.mxu1 %v3811_v5  ;;  %9417 = vmatprep.subr.mxu0 %v3843_v28 }
0x1177   : > { %9383 = vmatpush3.msra.mxu1 %v3795_v49  ;;  %9418 = vmatpush3.msra.mxu0 %v3827_v50 }
0x1178   : > { %9384 = vmatprep.subr.mxu1 %v3810_v29  ;;  %9419 = vmatprep.subr.mxu0 %v3842_v31 }
0x1179   : > { %9385 = vmatpush3.msra.mxu1 %v3794_v32  ;;  %9420 = vmatpush3.msra.mxu0 %v3826_v33 }
0x117a   : > { %9386 = vmatprep.subr.mxu1 %v3809_v34  ;;  %9421 = vmatprep.subr.mxu0 %v3841_v35 }
0x117b   : > { %9387 = vmatpush3.msra.mxu1 %v3793_v8  ;;  %9422 = vmatpush3.msra.mxu0 %v3825_v39 }
0x117c   : > { %9388 = vmatprep.subr.mxu1 %v3808_v40  ;;  %9423 = vmatprep.subr.mxu0 %v3840_v38 }
0x117d   : > { %9389 = vmatpush3.msra.mxu1 %v3792_v41  ;;  %9424 = vmatpush3.msra.mxu0 %v3824_v44  ;;  %v8455_v41 = vld [vmem:[%s14621_s5 + $0x138] sm:$0xff] }
0x117e   : > { %9390 = vmatprep.subr.mxu1 %v3807_v45  ;;  %9425 = vmatprep.subr.mxu0 %v3839_v46  ;;  %v8466_v44 = vld [vmem:[%s14624_s22 + $0x138] sm:$0xff]  ;;  %v8465_v45 = vld [vmem:[%s14624_s22 + $0x130] sm:$0xff]  ;;  %v8453_v46 = vld [vmem:[%s14621_s5 + $0x128] sm:$0xff] }
0x117f   : > { %9391 = vmatpush3.msra.mxu1 %v3791_v51  ;;  %9426 = vmatpush3.msra.mxu0 %v3823_v24  ;;  %v8463_v51 = vld [vmem:[%s14624_s22 + $0x120] sm:$0xff]  ;;  %v8451_v24 = vld [vmem:[%s14621_s5 + $0x118] sm:$0xff] }
0x1180   : > { %9392 = vmatprep.subr.mxu1 %v3806_v52  ;;  %9427 = vmatprep.subr.mxu0 %v3838_v61  ;;  %v8462_v52 = vld [vmem:[%s14624_s22 + $0x118] sm:$0xff]  ;;  %v8450_v61 = vld [vmem:[%s14621_s5 + $0x110] sm:$0xff] }
0x1181   : > { %9393 = vmatpush3.msra.mxu1 %v3790_v4  ;;  %9428 = vmatpush3.msra.mxu0 %v3822_v53  ;;  %v8461_v4 = vld [vmem:[%s14624_s22 + $0x110] sm:$0xff]  ;;  %v8449_v53 = vld [vmem:[%s14621_s5 + $0x108] sm:$0xff] }
0x1182   : > { %4346 = vmatmul.mubr.f32.vlgmr.msra.gmra.mxu1 %v3594_v54  ;;  %4416 = vmatmul.mubr.f32.vlgmr.msra.gmra.mxu0 %v3596_v55  ;;  %v8460_v54 = vld [vmem:[%s14624_s22 + $0x108] sm:$0xff]  ;;  %v8448_v55 = vld [vmem:[%s14621_s5 + $0x100] sm:$0xff] }
0x1183   : > { %10158 = vmatprep.subr.mxu1 %v10616_v1  ;;  %10177 = vmatprep.subr.mxu0 %v10616_v1 }
0x1184   : > { %10174 = vmatprep.mubr.msk.f32.mxu1 %vm10617_vm1, %v10616_v1  ;;  %10193 = vmatprep.mubr.msk.f32.mxu0 %vm10617_vm1, %v10616_v1 }
0x1185   : > { %10159 = vmatpush3.msra.mxu1 %v8455_v41  ;;  %10178 = vmatpush3.msra.mxu0 %v8466_v44 }
0x1186   : > { %10160 = vmatprep.subr.mxu1 %v10616_v1  ;;  %10179 = vmatprep.subr.mxu0 %v10616_v1 }
0x1187   : > { %10180 = vmatpush3.msra.mxu0 %v8465_v45 }
0x1188   : > { %10181 = vmatprep.subr.mxu0 %v10616_v1 }
0x1189   : > { %10182 = vmatpush3.msra.mxu0 %v8464_v47 }
0x118a   : > { %10183 = vmatprep.subr.mxu0 %v10616_v1 }
0x118b   : > { %10184 = vmatpush3.msra.mxu0 %v8463_v51 }
0x118c   : > { %10185 = vmatprep.subr.mxu0 %v10616_v1 }
0x118d   : > { %10186 = vmatpush3.msra.mxu0 %v8462_v52 }
0x118e   : > { %10187 = vmatprep.subr.mxu0 %v10616_v1 }
0x118f   : > { %10188 = vmatpush3.msra.mxu0 %v8461_v4 }
0x1190   : > { %10189 = vmatprep.subr.mxu0 %v10616_v1 }
0x1191   : > { %10190 = vmatpush3.msra.mxu0 %v8460_v54 }
0x1192   : > { %10191 = vmatprep.subr.mxu0 %v10616_v1 }
0x11dd   : > { %v9184_v56 = vpop.f32.mrf.mxu1  ;;  %v9219_v58 = vpop.f32.mrf.mxu0 }
0x11df   : > { %v9185_v57 = vpop.f32.mrf.mxu1  ;;  %v9220_v0 = vpop.f32.mrf.mxu0 }
0x11e0   : > { %v9186_v60 = vadd.f32 %v9185_v57, %v9184_v56  ;;  %v9221_v13 = vadd.f32 %v9220_v0, %v9219_v58  ;;  %v8459_v56 = vld [vmem:[%s14624_s22 + $0x100] sm:$0xff] }
0x11e1   : > { %10192 = vmatpush3.msra.mxu0 %v8459_v56  ;;  %v8492_v56 = vld [vmem:[%s14621_s5 + $0x170] sm:$0xff] }
0x11e2   : > { %v3928_v3 = vadd.f32 %v9186_v60, %v8445_v63  ;;  %10215 = vmatprep.subr.mxu0 %v10616_v1  ;;  %v8446_v63 = vld [vmem:[%s14586_s18] ss:$0 sm:$0xff] }
0x11e4   : > { %v3998_v15 = vadd.f32 %v9221_v13, %v3928_v3  ;;  %v8476_v13 = vld [vmem:[%s14576_s8 + $0x130] sm:$0xff] }
0x11fe   : > { %v9254_v59 = vpop.f32.mrf.mxu1  ;;  %v9289_v11 = vpop.f32.mrf.mxu0 }
0x1200   : > { %v9255_v2 = vpop.f32.mrf.mxu1  ;;  %v9290_v16 = vpop.f32.mrf.mxu0 }
0x1201   : > { %v9256_v14 = vadd.f32 %v9255_v2, %v9254_v59  ;;  %v9291_v62 = vadd.f32 %v9290_v16, %v9289_v11  ;;  %v8447_v2 = vld [vmem:[%s14587_s19] ss:$0 sm:$0xff]  ;;  %v8473_v16 = vld [vmem:[%s14576_s8 + $0x118] sm:$0xff] }
0x1203   : > { %v4068_v18 = vadd.f32 %v9256_v14, %v3998_v15  ;;  %v8475_v14 = vld [vmem:[%s14576_s8 + $0x128] sm:$0xff]  ;;  %v8474_v15 = vld [vmem:[%s14576_s8 + $0x120] sm:$0xff] }
0x1205   : > { %v4138_v21 = vadd.f32 %v9291_v62, %v4068_v18  ;;  %v8471_v18 = vld [vmem:[%s14576_s8 + $0x108] sm:$0xff]  ;;  %v8504_v62 = vld [vmem:[%s14624_s22 + $0x178] sm:$0xff] }
0x1220   : > { %v9324_v12 = vpop.f32.mrf.mxu1  ;;  %v9359_v19 = vpop.f32.mrf.mxu0 }
0x1222   : > { %v9325_v17 = vpop.f32.mrf.mxu1  ;;  %v9360_v25 = vpop.f32.mrf.mxu0 }
0x1223   : > { %v9326_v20 = vadd.f32 %v9325_v17, %v9324_v12  ;;  %v9361_v28 = vadd.f32 %v9360_v25, %v9359_v19  ;;  %v8477_v12 = vld [vmem:[%s14576_s8 + $0x138] sm:$0xff]  ;;  %v8472_v17 = vld [vmem:[%s14576_s8 + $0x110] sm:$0xff]  ;;  %v8470_v19 = vld [vmem:[%s14576_s8 + $0x100] sm:$0xff] }
0x1224   : > { %v8501_v25 = vld [vmem:[%s14624_s22 + $0x160] sm:$0xff] }
0x1225   : > { %v4208_v26 = vadd.f32 %v9326_v20, %v4138_v21  ;;  %v8503_v20 = vld [vmem:[%s14624_s22 + $0x170] sm:$0xff]  ;;  %v8502_v21 = vld [vmem:[%s14624_s22 + $0x168] sm:$0xff] }
0x1227   : > { %v4278_v29 = vadd.f32 %v9361_v28, %v4208_v26  ;;  %v8500_v26 = vld [vmem:[%s14624_s22 + $0x158] sm:$0xff]  ;;  %v8497_v28 = vld [vmem:[%s14624_s22 + $0x140] sm:$0xff] }
0x1242   : > { %v9394_v27 = vpop.f32.mrf.mxu1  ;;  %v9429_v5 = vpop.f32.mrf.mxu0 }
0x1244   : > { %v9395_v49 = vpop.f32.mrf.mxu1  ;;  %v9430_v50 = vpop.f32.mrf.mxu0 }
0x1245   : > { %v9396_v31 = vadd.f32 %v9395_v49, %v9394_v27  ;;  %v9431_v33 = vadd.f32 %v9430_v50, %v9429_v5  ;;  %v8499_v27 = vld [vmem:[%s14624_s22 + $0x150] sm:$0xff]  ;;  %v8498_v5 = vld [vmem:[%s14624_s22 + $0x148] sm:$0xff]  ;;  %v8468_v49 = vld [vmem:[%s14627_s7 + $0x4] ss:$0 sm:$0xff] }
0x1247   : > { %v4348_v32 = vadd.f32 %v9396_v31, %v4278_v29  ;;  %v8457_v31 = vld [vmem:[%s14629_s21 + $0x4] ss:$0 sm:$0xff] }
0x1249   : > { %v4418_v34 = vadd.f32 %v9431_v33, %v4348_v32 }
0x124b   : > { %v4421_v35 = vadd.f32 %v4418_v34, %v11487_v30  ;;  %v8454_v30 = vld [vmem:[%s14621_s5 + $0x130] sm:$0xff] }
0x124c   : > { %10161 = vmatpush3.msra.mxu1 %v8454_v30 }
0x124d   : > { %v4424_v36 = vsel %vm782_vm3, %v4421_v35, 0.0  ;;  %10162 = vmatprep.subr.mxu1 %v10616_v1 }
0x124e   : > { %4425 = vadd.xlane.f32.xlu0 %v4424_v36  ;;  %10163 = vmatpush3.msra.mxu1 %v8453_v46  ;;  %v8479_v36 = vld [vmem:[%s14577_s9 + $0x4] ss:$0 sm:$0xff] }
0x124f   : > { %10164 = vmatprep.subr.mxu1 %v10616_v1 }
0x1250   : > { %10165 = vmatpush3.msra.mxu1 %v8452_v48 }
0x1251   : > { %10166 = vmatprep.subr.mxu1 %v10616_v1 }
0x1252   : > { %10167 = vmatpush3.msra.mxu1 %v8451_v24 }
0x1253   : > { %10168 = vmatprep.subr.mxu1 %v10616_v1 }
0x1254   : > { %10169 = vmatpush3.msra.mxu1 %v8450_v61 }
0x1255   : > { %10170 = vmatprep.subr.mxu1 %v10616_v1 }
0x1256   : > { %10171 = vmatpush3.msra.mxu1 %v8449_v53 }
0x1257   : > { %10172 = vmatprep.subr.mxu1 %v10616_v1 }
0x1258   : > { %10173 = vmatpush3.msra.mxu1 %v8448_v55  ;;  %v8493_v55 = vld [vmem:[%s14621_s5 + $0x178] sm:$0xff] }
0x1259   : > { %10196 = vmatprep.subr.mxu1 %v10616_v1 }
0x12d7   : > { %v4426_v37 = vpop.xlane.xlu0 %4425 }
0x12d8   : > { %v4427_v8 = vmul.f32 0.015625, %v4426_v37 }
0x12da   : > { %v4428_v39 = vsub.f32 %v4421_v35, %v4427_v8 }
0x12dc   : > { %v4429_v40 = vmul.f32 %v4428_v39, %v4428_v39 }
0x12de   : > { %v4430_v38 = vsel %vm782_vm3, %v4429_v40, 0.0  ;;  %v8506_v40 = vld [vmem:[%s14627_s7 + $0x5] ss:$0 sm:$0xff] }
0x12df   : > { %4431 = vadd.xlane.f32.xlu1 %v4430_v38 }
0x1368   : > { %v4432_v57 = vpop.xlane.xlu1 %4431 }
0x1369   : > { %v4433_v58 = vmul.f32 0.015625, %v4432_v57  ;;  %v8491_v57 = vld [vmem:[%s14621_s5 + $0x168] sm:$0xff] }
0x136b   : > { %v4434_v59 = vadd.f32 1e-05, %v4433_v58  ;;  %v8490_v58 = vld [vmem:[%s14621_s5 + $0x160] sm:$0xff] }
0x136d   : > { %10532 = vrsqrt.f32 %v4434_v59  ;;  %v8489_v59 = vld [vmem:[%s14621_s5 + $0x158] sm:$0xff] }
0x137a   : > { %v10533_v60 = vpop.eup %10532 }
0x137b   : > { %v4436_v0 = vmul.f32 %v10533_v60, %v4428_v39  ;;  %v8488_v60 = vld [vmem:[%s14621_s5 + $0x150] sm:$0xff] }
0x137d   : > { %v4443_v3 = vmul.f32 %v8446_v63, %v4436_v0  ;;  %v8487_v63 = vld [vmem:[%s14621_s5 + $0x148] sm:$0xff]  ;;  %v8486_v0 = vld [vmem:[%s14621_s5 + $0x140] sm:$0xff] }
0x137f   : > { %v12729_v11 = vadd.f32 %v8447_v2, %v4443_v3  ;;  %v8515_v2 = vld [vmem:[%s14576_s8 + $0x178] sm:$0xff]  ;;  %v8514_v3 = vld [vmem:[%s14576_s8 + $0x170] sm:$0xff] }
0x1381   : > { %10175 = vmatmul.mubr.msk.f32.vlgmr.msra.gmra.mxu1 %vm782_vm3, %v12729_v11  ;;  %10194 = vmatmul.mubr.msk.f32.vlgmr.msra.gmra.mxu0 %vm782_vm3, %v12729_v11 }
0x1382   : > { %10197 = vmatpush3.msra.mxu1 %v8477_v12  ;;  %10212 = vmatprep.mubr.msk.f32.mxu1 %vm10617_vm1, %v10616_v1  ;;  %v8513_v12 = vld [vmem:[%s14576_s8 + $0x168] sm:$0xff] }
0x1383   : > { %10198 = vmatprep.subr.mxu1 %v10616_v1  ;;  %10217 = vmatprep.mubr.msk.f32.mxu0 %vm10617_vm1, %v10616_v1 }
0x1384   : > { %10199 = vmatpush3.msra.mxu1 %v8476_v13  ;;  %v8512_v13 = vld [vmem:[%s14576_s8 + $0x160] sm:$0xff] }
0x1385   : > { %10200 = vmatprep.subr.mxu1 %v10616_v1 }
0x1386   : > { %10201 = vmatpush3.msra.mxu1 %v8475_v14  ;;  %v8511_v14 = vld [vmem:[%s14576_s8 + $0x158] sm:$0xff] }
0x1387   : > { %10202 = vmatprep.subr.mxu1 %v10616_v1 }
0x1388   : > { %10203 = vmatpush3.msra.mxu1 %v8474_v15  ;;  %v8510_v15 = vld [vmem:[%s14576_s8 + $0x150] sm:$0xff] }
0x1389   : > { %10204 = vmatprep.subr.mxu1 %v10616_v1 }
0x138a   : > { %10205 = vmatpush3.msra.mxu1 %v8473_v16  ;;  %v8509_v16 = vld [vmem:[%s14576_s8 + $0x148] sm:$0xff] }
0x138b   : > { %10206 = vmatprep.subr.mxu1 %v10616_v1 }
0x138c   : > { %10207 = vmatpush3.msra.mxu1 %v8472_v17  ;;  %v8508_v17 = vld [vmem:[%s14576_s8 + $0x140] sm:$0xff] }
0x138d   : > { %10208 = vmatprep.subr.mxu1 %v10616_v1 }
0x138e   : > { %10209 = vmatpush3.msra.mxu1 %v8471_v18  ;;  %v8485_v18 = vld [vmem:[%s14578_s10 + $0x48] sm:$0xff] }
0x138f   : > { %10210 = vmatprep.subr.mxu1 %v10616_v1 }
0x1390   : > { %10211 = vmatpush3.msra.mxu1 %v8470_v19  ;;  %v8484_v19 = vld [vmem:[%s14578_s10 + $0x40] sm:$0xff] }
0x1391   : > { %10213 = vmatmul.mubr.msk.f32.vlgmr.msra.gmra.mxu1 %vm782_vm3, %v12729_v11  ;;  %10244 = vmatprep.subr.mxu1 %v10616_v1 }
0x1392   : > { %10245 = vmatpush3.msra.mxu1 %v8504_v62  ;;  %10260 = vmatprep.mubr.msk.f32.mxu1 %vm10617_vm1, %v10616_v1  ;;  %v8544_v62 = vld [vmem:[%s14624_s22 + $0x1b8] sm:$0xff] }
0x1393   : > { %10246 = vmatprep.subr.mxu1 %v10616_v1 }
0x1394   : > { %10247 = vmatpush3.msra.mxu1 %v8503_v20 }
0x1395   : > { %10248 = vmatprep.subr.mxu1 %v10616_v1 }
0x1396   : > { %10249 = vmatpush3.msra.mxu1 %v8502_v21  ;;  %v8543_v21 = vld [vmem:[%s14624_s22 + $0x1b0] sm:$0xff] }
0x1397   : > { %10250 = vmatprep.subr.mxu1 %v10616_v1 }
0x1398   : > { %10251 = vmatpush3.msra.mxu1 %v8501_v25 }
0x1399   : > { %10252 = vmatprep.subr.mxu1 %v10616_v1 }
0x139a   : > { %10253 = vmatpush3.msra.mxu1 %v8500_v26  ;;  %v8542_v26 = vld [vmem:[%s14624_s22 + $0x1a8] sm:$0xff] }
0x139b   : > { %10254 = vmatprep.subr.mxu1 %v10616_v1 }
0x139c   : > { %10255 = vmatpush3.msra.mxu1 %v8499_v27  ;;  %v8541_v27 = vld [vmem:[%s14624_s22 + $0x1a0] sm:$0xff] }
0x139d   : > { %10256 = vmatprep.subr.mxu1 %v10616_v1 }
0x139e   : > { %10257 = vmatpush3.msra.mxu1 %v8498_v5  ;;  %v8540_v5 = vld [vmem:[%s14624_s22 + $0x198] sm:$0xff] }
0x139f   : > { %10258 = vmatprep.subr.mxu1 %v10616_v1 }
0x13a0   : > { %10259 = vmatpush3.msra.mxu1 %v8497_v28  ;;  %v8539_v28 = vld [vmem:[%s14624_s22 + $0x190] sm:$0xff] }
0x13a1   : > { %10261 = vmatmul.mubr.msk.f32.vlgmr.msra.gmra.mxu1 %vm782_vm3, %v12729_v11  ;;  %10282 = vmatprep.subr.mxu1 %v10616_v1 }
0x13a2   : > { %10284 = vmatprep.mubr.msk.f32.mxu1 %vm10617_vm1, %v10616_v1 }
0x1441   : > { %v4537_v50 = vpop.f32.mrf.mxu1  ;;  %v4624_v29 = vpop.f32.mrf.mxu0 }
0x1442   : > { %v4625_v32 = vadd.f32 %v8468_v49, %v4624_v29  ;;  %v4538_v35 = vadd.f32 %v8457_v31, %v4537_v50  ;;  %v8538_v49 = vld [vmem:[%s14624_s22 + $0x188] sm:$0xff]  ;;  %v8537_v50 = vld [vmem:[%s14624_s22 + $0x180] sm:$0xff] }
0x1443   : > { %v10176_v33 = vpop.f32.mrf.mxu1  ;;  %v10195_v34 = vpop.f32.mrf.mxu0  ;;  %v8495_v29 = vld [vmem:[%s14629_s21 + $0x5] ss:$0 sm:$0xff] }
0x1444   : > { %10216 = vmatpush3.xpose.msk.msra.mxu0 %vm1026_vm4, %v4625_v32  ;;  %v8517_v34 = vld [vmem:[%s14577_s9 + $0x5] ss:$0 sm:$0xff] }
0x1445   : > { %10220 = vmatprep.subr.mxu0 %v10616_v1 }
0x1447   : > { %10218 = vmatmul.mubr.msk.f32.vlgmr.msra.gmra.mxu0 %vm1026_vm4, %v4538_v35 }
0x1448   : > { %10222 = vmatprep.mubr.msk.f32.mxu0 %vm10617_vm1, %v10616_v1 }
0x1451   : > { %v4711_v37 = vpop.f32.mrf.mxu1 }
0x1452   : > { %v4712_v8 = vadd.f32 %v8479_v36, %v4711_v37 }
0x1453   : > { %v10214_v39 = vpop.f32.mrf.mxu1 }
0x1454   : > { %10221 = vmatpush3.msra.mxu0 %v4712_v8 }
0x1455   : > { %10225 = vmatprep.subr.mxu0 %v10616_v1 }
0x1461   : > { %v5049_v38 = vpop.f32.mrf.mxu1 }
0x1462   : > { %v5050_v41 = vadd.f32 %v8506_v40, %v5049_v38  ;;  %v8546_v40 = vld [vmem:[%s14627_s7 + $0x6] ss:$0 sm:$0xff] }
0x1463   : > { %v10262_v44 = vpop.f32.mrf.mxu1 }
0x1464   : > { %10283 = vmatpush3.xpose.msk.msra.mxu1 %vm1026_vm4, %v5050_v41 }
0x1465   : > { %10287 = vmatprep.subr.mxu1 %v10616_v1 }
0x1507   : > { %v4787_v30 = vpop.f32.mrf.mxu0 }
0x1508   : > { %v4791_v45 = vmul.f32 0.25, %v4787_v30 }
0x1509   : > { %v10219_v46 = vpop.f32.mrf.mxu0 }
0x150a   : > { %v4792_v47 = vsel %vm1104_vm5, %v4791_v45, -inf }
0x150b   : > { %4793 = vmax.xlane.f32.xlu0 %v4792_v47 }
0x1594   : > { %v4794_v48 = vpop.xlane.xlu0 %4793 }
0x1595   : > { %v4795_v51 = vsub.f32 %v4791_v45, %v4794_v48 }
0x1597   : > { %v4796_v24 = vmul.f32 1.442695, %v4795_v51 }
0x1599   : > { %10534 = vpow2.f32 %v4796_v24 }
0x15a6   : > { %v10535_v52 = vpop.eup %10534 }
0x15a7   : > { %v4798_v61 = vsel %vm1104_vm5, %v10535_v52, 0.0 }
0x15a8   : > { %4799 = vadd.xlane.f32.xlu1 %v4798_v61 }
0x1631   : > { %v4800_v4 = vpop.xlane.xlu1 %4799 }
0x1632   : > { %10536 = vrcp.f32 %v4800_v4 }
0x163f   : > { %v10537_v53 = vpop.eup %10536 }
0x1640   : > { %v4802_v54 = vmul.f32 %v10537_v53, %v10535_v52 }
0x1642   : > { %10223 = vmatmul.mubr.msk.f32.vlgmr.msra.gmra.mxu0 %vm1104_vm5, %v4802_v54 }
0x1643   : > { %10226 = vmatpush3.msra.mxu0 %v8493_v55  ;;  %10241 = vmatprep.mubr.msk.f32.mxu0 %vm10617_vm1, %v10616_v1  ;;  %v8523_v55 = vld [vmem:[%s14578_s10 + $0x58] sm:$0xff] }
0x1644   : > { %10227 = vmatprep.subr.mxu0 %v10616_v1 }
0x1645   : > { %10228 = vmatpush3.msra.mxu0 %v8492_v56  ;;  %v8522_v56 = vld [vmem:[%s14578_s10 + $0x50] sm:$0xff] }
0x1646   : > { %10229 = vmatprep.subr.mxu0 %v10616_v1 }
0x1647   : > { %10230 = vmatpush3.msra.mxu0 %v8491_v57  ;;  %v8533_v57 = vld [vmem:[%s14621_s5 + $0x1b8] sm:$0xff] }
0x1648   : > { %10231 = vmatprep.subr.mxu0 %v10616_v1 }
0x1649   : > { %10232 = vmatpush3.msra.mxu0 %v8490_v58 }
0x164a   : > { %10233 = vmatprep.subr.mxu0 %v10616_v1 }
0x164b   : > { %10234 = vmatpush3.msra.mxu0 %v8489_v59  ;;  %v8532_v59 = vld [vmem:[%s14621_s5 + $0x1b0] sm:$0xff] }
0x164c   : > { %10235 = vmatprep.subr.mxu0 %v10616_v1 }
0x164d   : > { %10236 = vmatpush3.msra.mxu0 %v8488_v60 }
0x164e   : > { %10237 = vmatprep.subr.mxu0 %v10616_v1 }
0x164f   : > { %10238 = vmatpush3.msra.mxu0 %v8487_v63  ;;  %v8531_v63 = vld [vmem:[%s14621_s5 + $0x1a8] sm:$0xff] }
0x1650   : > { %10239 = vmatprep.subr.mxu0 %v10616_v1 }
0x1651   : > { %10240 = vmatpush3.msra.mxu0 %v8486_v0  ;;  %v8530_v0 = vld [vmem:[%s14621_s5 + $0x1a0] sm:$0xff] }
0x1652   : > { %10242 = vmatmul.mubr.msk.f32.vlgmr.msra.gmra.mxu0 %vm782_vm3, %v12729_v11  ;;  %10263 = vmatprep.subr.mxu0 %v10616_v1 }
0x1653   : > { %10264 = vmatpush3.msra.mxu0 %v8515_v2  ;;  %10279 = vmatprep.mubr.msk.f32.mxu0 %vm10617_vm1, %v10616_v1  ;;  %v8529_v2 = vld [vmem:[%s14621_s5 + $0x198] sm:$0xff] }
0x1654   : > { %10265 = vmatprep.subr.mxu0 %v10616_v1 }
0x1655   : > { %10266 = vmatpush3.msra.mxu0 %v8514_v3  ;;  %v8528_v3 = vld [vmem:[%s14621_s5 + $0x190] sm:$0xff] }
0x1656   : > { %10267 = vmatprep.subr.mxu0 %v10616_v1 }
0x1657   : > { %10268 = vmatpush3.msra.mxu0 %v8513_v12  ;;  %v8527_v12 = vld [vmem:[%s14621_s5 + $0x188] sm:$0xff] }
0x1658   : > { %10269 = vmatprep.subr.mxu0 %v10616_v1 }
0x1659   : > { %10270 = vmatpush3.msra.mxu0 %v8512_v13  ;;  %v8526_v13 = vld [vmem:[%s14621_s5 + $0x180] sm:$0xff] }
0x165a   : > { %10271 = vmatprep.subr.mxu0 %v10616_v1 }
0x165b   : > { %10272 = vmatpush3.msra.mxu0 %v8511_v14  ;;  %v8555_v14 = vld [vmem:[%s14576_s8 + $0x1b8] sm:$0xff] }
0x165c   : > { %10273 = vmatprep.subr.mxu0 %v10616_v1 }
0x165d   : > { %10274 = vmatpush3.msra.mxu0 %v8510_v15  ;;  %v8554_v15 = vld [vmem:[%s14576_s8 + $0x1b0] sm:$0xff] }
0x165e   : > { %10275 = vmatprep.subr.mxu0 %v10616_v1 }
0x165f   : > { %10276 = vmatpush3.msra.mxu0 %v8509_v16  ;;  %v8553_v16 = vld [vmem:[%s14576_s8 + $0x1a8] sm:$0xff] }
0x1660   : > { %10277 = vmatprep.subr.mxu0 %v10616_v1 }
0x1661   : > { %10278 = vmatpush3.msra.mxu0 %v8508_v17  ;;  %v8552_v17 = vld [vmem:[%s14576_s8 + $0x1a0] sm:$0xff] }
0x1662   : > { %10280 = vmatmul.mubr.msk.f32.vlgmr.msra.gmra.mxu0 %vm782_vm3, %v12729_v11  ;;  %10299 = vmatprep.subr.mxu0 %v10616_v1 }
0x1663   : > { %10300 = vmatpush3.msra.mxu0 %v8485_v18  ;;  %10303 = vmatprep.mubr.msk.f32.mxu0 %vm10617_vm1, %v10616_v1  ;;  %v8551_v18 = vld [vmem:[%s14576_s8 + $0x198] sm:$0xff] }
0x1664   : > { %10301 = vmatprep.subr.mxu0 %v10616_v1 }
0x1665   : > { %10302 = vmatpush3.msra.mxu0 %v8484_v19  ;;  %v8550_v19 = vld [vmem:[%s14576_s8 + $0x190] sm:$0xff] }
0x1666   : > { %10325 = vmatprep.subr.mxu0 %v10616_v1 }
0x1702   : > { %v4872_v20 = vpop.f32.mrf.mxu0 }
0x1703   : > { %10304 = vmatmul.mubr.msk.f32.vlgmr.msra.gmra.mxu0 %vm1026_vm4, %v4872_v20  ;;  %v8548_v20 = vld [vmem:[%s14576_s8 + $0x180] sm:$0xff] }
0x1704   : > { %10326 = vmatpush3.msra.mxu0 %v8544_v62  ;;  %v10224_v25 = vpop.f32.mrf.mxu0  ;;  %10341 = vmatprep.mubr.msk.f32.mxu0 %vm10617_vm1, %v10616_v1  ;;  %v8549_v62 = vld [vmem:[%s14576_s8 + $0x188] sm:$0xff] }
0x1705   : > { %10327 = vmatprep.subr.mxu0 %v10616_v1  ;;  %v8582_v25 = vld [vmem:[%s14624_s22 + $0x1f0] sm:$0xff] }
0x1706   : > { %10328 = vmatpush3.msra.mxu0 %v8543_v21  ;;  %v8583_v21 = vld [vmem:[%s14624_s22 + $0x1f8] sm:$0xff] }
0x1707   : > { %10329 = vmatprep.subr.mxu0 %v10616_v1 }
0x1708   : > { %10330 = vmatpush3.msra.mxu0 %v8542_v26  ;;  %v8581_v26 = vld [vmem:[%s14624_s22 + $0x1e8] sm:$0xff] }
0x1709   : > { %10331 = vmatprep.subr.mxu0 %v10616_v1 }
0x170a   : > { %10332 = vmatpush3.msra.mxu0 %v8541_v27  ;;  %v8580_v27 = vld [vmem:[%s14624_s22 + $0x1e0] sm:$0xff] }
0x170b   : > { %10333 = vmatprep.subr.mxu0 %v10616_v1 }
0x170c   : > { %10334 = vmatpush3.msra.mxu0 %v8540_v5  ;;  %v8579_v5 = vld [vmem:[%s14624_s22 + $0x1d8] sm:$0xff] }
0x170d   : > { %10335 = vmatprep.subr.mxu0 %v10616_v1 }
0x170e   : > { %10336 = vmatpush3.msra.mxu0 %v8539_v28  ;;  %v8578_v28 = vld [vmem:[%s14624_s22 + $0x1d0] sm:$0xff] }
0x170f   : > { %10337 = vmatprep.subr.mxu0 %v10616_v1 }
0x1710   : > { %10338 = vmatpush3.msra.mxu0 %v8538_v49  ;;  %v8577_v49 = vld [vmem:[%s14624_s22 + $0x1c8] sm:$0xff] }
0x1711   : > { %10339 = vmatprep.subr.mxu0 %v10616_v1 }
0x1712   : > { %v4962_v31 = vpop.f32.mrf.mxu0  ;;  %10340 = vmatpush3.msra.mxu0 %v8537_v50  ;;  %v8576_v50 = vld [vmem:[%s14624_s22 + $0x1c0] sm:$0xff] }
0x1713   : > { %v4963_v32 = vadd.f32 %v8495_v29, %v4962_v31  ;;  %10342 = vmatmul.mubr.msk.f32.vlgmr.msra.gmra.mxu0 %vm782_vm3, %v12729_v11  ;;  %10363 = vmatprep.subr.mxu0 %v10616_v1 }
0x1714   : > { %v10243_v33 = vpop.f32.mrf.mxu0  ;;  %10365 = vmatprep.mubr.msk.f32.mxu0 %vm10617_vm1, %v10616_v1 }
0x1715   : > { %10285 = vmatmul.mubr.msk.f32.vlgmr.msra.gmra.mxu1 %vm1026_vm4, %v4963_v32  ;;  %v8535_v32 = vld [vmem:[%s14629_s21 + $0x6] ss:$0 sm:$0xff] }
0x1716   : > { %10289 = vmatprep.mubr.msk.f32.mxu1 %vm10617_vm1, %v10616_v1 }
0x1722   : > { %v5136_v35 = vpop.f32.mrf.mxu0 }
0x1723   : > { %v5137_v36 = vadd.f32 %v8517_v34, %v5136_v35 }
0x1724   : > { %v10281_v37 = vpop.f32.mrf.mxu0 }
0x1725   : > { %10288 = vmatpush3.msra.mxu1 %v5137_v36  ;;  %v8557_v36 = vld [vmem:[%s14577_s9 + $0x6] ss:$0 sm:$0xff] }
0x1726   : > { %10292 = vmatprep.subr.mxu1 %v10616_v1 }
0x17c3   : > { %v12965_v8 = vpop.f32.mrf.mxu0 }
0x17c5   : > { %v10305_v39 = vpop.f32.mrf.mxu0 }
0x17d3   : > { %v5620_v38 = vpop.f32.mrf.mxu0 }
0x17d4   : > { %v5621_v41 = vadd.f32 %v8546_v40, %v5620_v38  ;;  %v8585_v38 = vld [vmem:[%s14627_s7 + $0x7] ss:$0 sm:$0xff]  ;;  %s10554_s7 = scalar_lea.vmem %s8245_s29, 16 }
0x17d5   : > { %v5212_v44 = vpop.f32.mrf.mxu1  ;;  %v10343_v30 = vpop.f32.mrf.mxu0  ;;  %p10555_p11 = scmp.ne.s32.totalorder %s8245_s29, %s10554_s7  ;;  %p10562_p1 = scmp.lt.s32.totalorder %s10560_s1, %s10554_s7 }
0x17d6   : > { %v5216_v45 = vmul.f32 0.25, %v5212_v44  ;;  %10364 = vmatpush3.xpose.msk.msra.mxu0 %vm1026_vm4, %v5621_v41 }
0x17d7   : > { %v10286_v46 = vpop.f32.mrf.mxu1  ;;  %10368 = vmatprep.subr.mxu0 %v10616_v1  ;;  %p10556_p12 = pnand %p10555_p11, %p10772_p5  ;;  %p10563_p2 = por %p10562_p1, %p10561_p0 }
0x17d8   : > { %v5217_v47 = vsel %vm1104_vm5, %v5216_v45, -inf }
0x17d9   : > { %5218 = vmax.xlane.f32.xlu0 %v5217_v47  ;;  %p10557_p13 = pneg %p10556_p12 }
0x17db   : > { %p10564_p3 = pnand %p10563_p2, %p10557_p13 }
0x1862   : > { %v5219_v48 = vpop.xlane.xlu0 %5218 }
0x1863   : > { %v5220_v51 = vsub.f32 %v5216_v45, %v5219_v48 }
0x1865   : > { %v5221_v24 = vmul.f32 1.442695, %v5220_v51 }
0x1867   : > { %10538 = vpow2.f32 %v5221_v24 }
0x1874   : > { %v10539_v52 = vpop.eup %10538 }
0x1875   : > { %v5223_v61 = vsel %vm1104_vm5, %v10539_v52, 0.0 }
0x1876   : > { %5224 = vadd.xlane.f32.xlu1 %v5223_v61 }
0x18ff   : > { %v5225_v4 = vpop.xlane.xlu1 %5224 }
0x1900   : > { %10540 = vrcp.f32 %v5225_v4 }
0x190d   : > { %v10541_v53 = vpop.eup %10540 }
0x190e   : > { %v5227_v54 = vmul.f32 %v10541_v53, %v10539_v52 }
0x1910   : > { %10290 = vmatmul.mubr.msk.f32.vlgmr.msra.gmra.mxu1 %vm1104_vm5, %v5227_v54 }
0x1911   : > { %10293 = vmatpush3.msra.mxu1 %v8523_v55  ;;  %10296 = vmatprep.mubr.msk.f32.mxu1 %vm10617_vm1, %v10616_v1 }
0x1912   : > { %10294 = vmatprep.subr.mxu1 %v10616_v1 }
0x1913   : > { %10295 = vmatpush3.msra.mxu1 %v8522_v56  ;;  %v8563_v56 = vld [vmem:[%s14578_s10 + $0x68] sm:$0xff] }
0x1914   : > { %10306 = vmatprep.subr.mxu1 %v10616_v1 }
0x19d0   : > { %v5297_v58 = vpop.f32.mrf.mxu1 }
0x19d1   : > { %10297 = vmatmul.mubr.msk.f32.vlgmr.msra.gmra.mxu1 %vm1026_vm4, %v5297_v58  ;;  %v8572_v58 = vld [vmem:[%s14621_s5 + $0x1f8] sm:$0xff] }
0x19d2   : > { %10307 = vmatpush3.msra.mxu1 %v8533_v57  ;;  %v10291_v60 = vpop.f32.mrf.mxu1  ;;  %10322 = vmatprep.mubr.msk.f32.mxu1 %vm10617_vm1, %v10616_v1  ;;  %v8562_v57 = vld [vmem:[%s14578_s10 + $0x60] sm:$0xff] }
0x19d3   : > { %10308 = vmatprep.subr.mxu1 %v10616_v1  ;;  %v8571_v60 = vld [vmem:[%s14621_s5 + $0x1f0] sm:$0xff] }
0x19d4   : > { %10309 = vmatpush3.msra.mxu1 %v8532_v59 }
0x19d5   : > { %10310 = vmatprep.subr.mxu1 %v10616_v1 }
0x19d6   : > { %10311 = vmatpush3.msra.mxu1 %v8531_v63 }
0x19d7   : > { %10312 = vmatprep.subr.mxu1 %v10616_v1 }
0x19d8   : > { %10313 = vmatpush3.msra.mxu1 %v8530_v0  ;;  %v8570_v0 = vld [vmem:[%s14621_s5 + $0x1e8] sm:$0xff] }
0x19d9   : > { %10314 = vmatprep.subr.mxu1 %v10616_v1 }
0x19da   : > { %10315 = vmatpush3.msra.mxu1 %v8529_v2  ;;  %v8569_v2 = vld [vmem:[%s14621_s5 + $0x1e0] sm:$0xff] }
0x19db   : > { %10316 = vmatprep.subr.mxu1 %v10616_v1 }
0x19dc   : > { %10317 = vmatpush3.msra.mxu1 %v8528_v3  ;;  %v8568_v3 = vld [vmem:[%s14621_s5 + $0x1d8] sm:$0xff] }
0x19dd   : > { %10318 = vmatprep.subr.mxu1 %v10616_v1 }
0x19de   : > { %10319 = vmatpush3.msra.mxu1 %v8527_v12  ;;  %v8567_v12 = vld [vmem:[%s14621_s5 + $0x1d0] sm:$0xff] }
0x19df   : > { %10320 = vmatprep.subr.mxu1 %v10616_v1 }
0x19e0   : > { %10321 = vmatpush3.msra.mxu1 %v8526_v13  ;;  %v8566_v13 = vld [vmem:[%s14621_s5 + $0x1c8] sm:$0xff] }
0x19e1   : > { %10323 = vmatmul.mubr.msk.f32.vlgmr.msra.gmra.mxu1 %vm782_vm3, %v12729_v11  ;;  %10344 = vmatprep.subr.mxu1 %v10616_v1 }
0x19e2   : > { %10345 = vmatpush3.msra.mxu1 %v8555_v14  ;;  %10360 = vmatprep.mubr.msk.f32.mxu1 %vm10617_vm1, %v10616_v1  ;;  %v8565_v14 = vld [vmem:[%s14621_s5 + $0x1c0] sm:$0xff]  ;;  %s8232_s5 = scalar_lea.sflag [#allocation3], %s672_s30 }
0x19e3   : > { %10346 = vmatprep.subr.mxu1 %v10616_v1 }
0x19e4   : > { %10347 = vmatpush3.msra.mxu1 %v8554_v15  ;;  %v8594_v15 = vld [vmem:[%s14576_s8 + $0x1f8] sm:$0xff] }
0x19e5   : > { %10348 = vmatprep.subr.mxu1 %v10616_v1 }
0x19e6   : > { %10349 = vmatpush3.msra.mxu1 %v8553_v16  ;;  %v8593_v16 = vld [vmem:[%s14576_s8 + $0x1f0] sm:$0xff] }
0x19e7   : > { %10350 = vmatprep.subr.mxu1 %v10616_v1 }
0x19e8   : > { %10351 = vmatpush3.msra.mxu1 %v8552_v17  ;;  %v8592_v17 = vld [vmem:[%s14576_s8 + $0x1e8] sm:$0xff] }
0x19e9   : > { %10352 = vmatprep.subr.mxu1 %v10616_v1 }
0x19ea   : > { %10353 = vmatpush3.msra.mxu1 %v8551_v18  ;;  %v8591_v18 = vld [vmem:[%s14576_s8 + $0x1e0] sm:$0xff] }
0x19eb   : > { %10354 = vmatprep.subr.mxu1 %v10616_v1 }
0x19ec   : > { %10355 = vmatpush3.msra.mxu1 %v8550_v19  ;;  %v8590_v19 = vld [vmem:[%s14576_s8 + $0x1d8] sm:$0xff] }
0x19ed   : > { %10356 = vmatprep.subr.mxu1 %v10616_v1 }
0x19ee   : > { %10357 = vmatpush3.msra.mxu1 %v8549_v62  ;;  %v8589_v62 = vld [vmem:[%s14576_s8 + $0x1d0] sm:$0xff] }
0x19ef   : > { %10358 = vmatprep.subr.mxu1 %v10616_v1 }
0x19f0   : > { %10359 = vmatpush3.msra.mxu1 %v8548_v20  ;;  %v8588_v20 = vld [vmem:[%s14576_s8 + $0x1c8] sm:$0xff] }
0x19f1   : > { %10361 = vmatmul.mubr.msk.f32.vlgmr.msra.gmra.mxu1 %vm782_vm3, %v12729_v11  ;;  %10399 = vmatprep.subr.mxu1 %v10616_v1 }
0x19f2   : > { %10400 = vmatpush3.msra.mxu1 %v8583_v21  ;;  %10415 = vmatprep.mubr.msk.f32.mxu1 %vm10617_vm1, %v10616_v1  ;;  %v8587_v21 = vld [vmem:[%s14576_s8 + $0x1c0] sm:$0xff] }
0x19f3   : > { %10401 = vmatprep.subr.mxu1 %v10616_v1 }
0x19f4   : > { %10402 = vmatpush3.msra.mxu1 %v8582_v25 }
0x19f5   : > { %10403 = vmatprep.subr.mxu1 %v10616_v1 }
0x19f6   : > { %10404 = vmatpush3.msra.mxu1 %v8581_v26 }
0x19f7   : > { %10405 = vmatprep.subr.mxu1 %v10616_v1 }
0x19f8   : > { %10406 = vmatpush3.msra.mxu1 %v8580_v27 }
0x19f9   : > { %10407 = vmatprep.subr.mxu1 %v10616_v1 }
0x19fa   : > { %10408 = vmatpush3.msra.mxu1 %v8579_v5 }
0x19fb   : > { %10409 = vmatprep.subr.mxu1 %v10616_v1 }
0x19fc   : > { %10410 = vmatpush3.msra.mxu1 %v8578_v28  ;;  %v8574_v28 = vld [vmem:[%s14629_s21 + $0x7] ss:$0 sm:$0xff] }
0x19fd   : > { %10411 = vmatprep.subr.mxu1 %v10616_v1 }
0x19fe   : > { %10412 = vmatpush3.msra.mxu1 %v8577_v49 }
0x19ff   : > { %10413 = vmatprep.subr.mxu1 %v10616_v1 }
0x1a00   : > { %10414 = vmatpush3.msra.mxu1 %v8576_v50 }
0x1a01   : > { %10416 = vmatmul.mubr.msk.f32.vlgmr.msra.gmra.mxu1 %vm782_vm3, %v12729_v11  ;;  %10437 = vmatprep.subr.mxu1 %v10616_v1 }
0x1a02   : > { %10439 = vmatprep.mubr.msk.f32.mxu1 %vm10617_vm1, %v10616_v1 }
0x1a91   : > { %v13096_v29 = vpop.f32.mrf.mxu1 }
0x1a92   : > { %v5447_v25 = vadd.f32 %v12965_v8, %v13096_v29 }
0x1a93   : > { %v10298_v31 = vpop.f32.mrf.mxu1 }
0x1aa1   : > { %v5533_v33 = vpop.f32.mrf.mxu1 }
0x1aa2   : > { %v5534_v34 = vadd.f32 %v8535_v32, %v5533_v33  ;;  %v8596_v32 = vld [vmem:[%s14577_s9 + $0x7] ss:$0 sm:$0xff] }
0x1aa3   : > { %v10324_v35 = vpop.f32.mrf.mxu1 }
0x1aa4   : > { %10366 = vmatmul.mubr.msk.f32.vlgmr.msra.gmra.mxu0 %vm1026_vm4, %v5534_v34 }
0x1aa5   : > { %10370 = vmatprep.mubr.msk.f32.mxu0 %vm10617_vm1, %v10616_v1 }
0x1ab1   : > { %v5707_v37 = vpop.f32.mrf.mxu1 }
0x1ab2   : > { %v5708_v39 = vadd.f32 %v8557_v36, %v5707_v37 }
0x1ab3   : > { %v10362_v40 = vpop.f32.mrf.mxu1 }
0x1ab4   : > { %10369 = vmatpush3.msra.mxu0 %v5708_v39 }
0x1ab5   : > { %10373 = vmatprep.subr.mxu0 %v10616_v1 }
0x1ac1   : > { %v6119_v41 = vpop.f32.mrf.mxu1 }
0x1ac2   : > { %v6120_v44 = vadd.f32 %v8585_v38, %v6119_v41 }
0x1ac3   : > { %v10417_v30 = vpop.f32.mrf.mxu1 }
0x1ac4   : > { %10438 = vmatpush3.xpose.msk.msra.mxu1 %vm1026_vm4, %v6120_v44 }
0x1ac5   : > { %10442 = vmatprep.subr.mxu1 %v10616_v1 }
0x1b64   : > { %v5783_v45 = vpop.f32.mrf.mxu0 }
0x1b65   : > { %v5787_v46 = vmul.f32 0.25, %v5783_v45 }
0x1b66   : > { %v10367_v47 = vpop.f32.mrf.mxu0 }
0x1b67   : > { %v5788_v48 = vsel %vm1104_vm5, %v5787_v46, -inf  ;;  %v8602_v47 = vld [vmem:[%s14578_s10 + $0x78] sm:$0xff] }
0x1b68   : > { %5789 = vmax.xlane.f32.xlu0 %v5788_v48  ;;  %v8601_v48 = vld [vmem:[%s14578_s10 + $0x70] sm:$0xff] }
0x1bf1   : > { %v5790_v51 = vpop.xlane.xlu0 %5789 }
0x1bf2   : > { %v5791_v24 = vsub.f32 %v5787_v46, %v5790_v51 }
0x1bf4   : > { %v5792_v52 = vmul.f32 1.442695, %v5791_v24 }
0x1bf6   : > { %10542 = vpow2.f32 %v5792_v52 }
0x1c03   : > { %v10543_v61 = vpop.eup %10542 }
0x1c04   : > { %v5794_v4 = vsel %vm1104_vm5, %v10543_v61, 0.0 }
0x1c05   : > { %5795 = vadd.xlane.f32.xlu1 %v5794_v4 }
0x1c8e   : > { %v5796_v53 = vpop.xlane.xlu1 %5795 }
0x1c8f   : > { %10544 = vrcp.f32 %v5796_v53 }
0x1c9c   : > { %v10545_v54 = vpop.eup %10544 }
0x1c9d   : > { %v5798_v55 = vmul.f32 %v10545_v54, %v10543_v61  ;;  %v8605_v61 = vld [vmem:[%s14579_s11 + $0x1] ss:$0 sm:$0xff] }
0x1c9f   : > { %10371 = vmatmul.mubr.msk.f32.vlgmr.msra.gmra.mxu0 %vm1104_vm5, %v5798_v55 }
0x1ca0   : > { %10374 = vmatpush3.msra.mxu0 %v8563_v56  ;;  %10377 = vmatprep.mubr.msk.f32.mxu0 %vm10617_vm1, %v10616_v1 }
0x1ca1   : > { %10375 = vmatprep.subr.mxu0 %v10616_v1 }
0x1ca2   : > { %10376 = vmatpush3.msra.mxu0 %v8562_v57 }
0x1ca3   : > { %10380 = vmatprep.subr.mxu0 %v10616_v1 }
0x1d5f   : > { %v5868_v59 = vpop.f32.mrf.mxu0 }
0x1d60   : > { %10378 = vmatmul.mubr.msk.f32.vlgmr.msra.gmra.mxu0 %vm1026_vm4, %v5868_v59 }
0x1d61   : > { %10381 = vmatpush3.msra.mxu0 %v8572_v58  ;;  %v10372_v63 = vpop.f32.mrf.mxu0  ;;  %10396 = vmatprep.mubr.msk.f32.mxu0 %vm10617_vm1, %v10616_v1 }
0x1d62   : > { %10382 = vmatprep.subr.mxu0 %v10616_v1 }
0x1d63   : > { %10383 = vmatpush3.msra.mxu0 %v8571_v60 }
0x1d64   : > { %10384 = vmatprep.subr.mxu0 %v10616_v1 }
0x1d65   : > { %10385 = vmatpush3.msra.mxu0 %v8570_v0  ;;  %v8723_v0 = vld [vmem:[%s14582_s14 + $0x788] sm:$0xff] }
0x1d66   : > { %10386 = vmatprep.subr.mxu0 %v10616_v1 }
0x1d67   : > { %10387 = vmatpush3.msra.mxu0 %v8569_v2  ;;  %v8722_v2 = vld [vmem:[%s14582_s14 + $0x780] sm:$0xff] }
0x1d68   : > { %10388 = vmatprep.subr.mxu0 %v10616_v1 }
0x1d69   : > { %10389 = vmatpush3.msra.mxu0 %v8568_v3  ;;  %v8724_v3 = vld [vmem:[%s14582_s14 + $0x790] sm:$0xff] }
0x1d6a   : > { %10390 = vmatprep.subr.mxu0 %v10616_v1 }
0x1d6b   : > { %10391 = vmatpush3.msra.mxu0 %v8567_v12  ;;  %v8707_v12 = vld [vmem:[%s14582_s14 + $0x708] sm:$0xff] }
0x1d6c   : > { %10392 = vmatprep.subr.mxu0 %v10616_v1 }
0x1d6d   : > { %10393 = vmatpush3.msra.mxu0 %v8566_v13  ;;  %v8709_v13 = vld [vmem:[%s14582_s14 + $0x718] sm:$0xff] }
0x1d6e   : > { %10394 = vmatprep.subr.mxu0 %v10616_v1 }
0x1d6f   : > { %10395 = vmatpush3.msra.mxu0 %v8565_v14  ;;  %v8706_v14 = vld [vmem:[%s14582_s14 + $0x700] sm:$0xff] }
0x1d70   : > { %10397 = vmatmul.mubr.msk.f32.vlgmr.msra.gmra.mxu0 %vm782_vm3, %v12729_v11  ;;  %10418 = vmatprep.subr.mxu0 %v10616_v1 }
0x1d71   : > { %10419 = vmatpush3.msra.mxu0 %v8594_v15  ;;  %10434 = vmatprep.mubr.msk.f32.mxu0 %vm10617_vm1, %v10616_v1  ;;  %v8708_v15 = vld [vmem:[%s14582_s14 + $0x710] sm:$0xff] }
0x1d72   : > { %10420 = vmatprep.subr.mxu0 %v10616_v1 }
0x1d73   : > { %10421 = vmatpush3.msra.mxu0 %v8593_v16  ;;  %v8691_v16 = vld [vmem:[%s14582_s14 + $0x688] sm:$0xff] }
0x1d74   : > { %10422 = vmatprep.subr.mxu0 %v10616_v1 }
0x1d75   : > { %10423 = vmatpush3.msra.mxu0 %v8592_v17  ;;  %v8693_v17 = vld [vmem:[%s14582_s14 + $0x698] sm:$0xff] }
0x1d76   : > { %10424 = vmatprep.subr.mxu0 %v10616_v1 }
0x1d77   : > { %10425 = vmatpush3.msra.mxu0 %v8591_v18  ;;  %v8690_v18 = vld [vmem:[%s14582_s14 + $0x680] sm:$0xff] }
0x1d78   : > { %10426 = vmatprep.subr.mxu0 %v10616_v1 }
0x1d79   : > { %10427 = vmatpush3.msra.mxu0 %v8590_v19  ;;  %v8692_v19 = vld [vmem:[%s14582_s14 + $0x690] sm:$0xff] }
0x1d7a   : > { %10428 = vmatprep.subr.mxu0 %v10616_v1 }
0x1d7b   : > { %10429 = vmatpush3.msra.mxu0 %v8589_v62  ;;  %v8675_v62 = vld [vmem:[%s14582_s14 + $0x608] sm:$0xff] }
0x1d7c   : > { %10430 = vmatprep.subr.mxu0 %v10616_v1 }
0x1d7d   : > { %10431 = vmatpush3.msra.mxu0 %v8588_v20  ;;  %v8677_v20 = vld [vmem:[%s14582_s14 + $0x618] sm:$0xff] }
0x1d7e   : > { %10432 = vmatprep.subr.mxu0 %v10616_v1 }
0x1d7f   : > { %10433 = vmatpush3.msra.mxu0 %v8587_v21  ;;  %v8674_v21 = vld [vmem:[%s14582_s14 + $0x600] sm:$0xff] }
0x1d80   : > { %10435 = vmatmul.mubr.msk.f32.vlgmr.msra.gmra.mxu0 %vm782_vm3, %v12729_v11 }
0x1d81   : > { %6841 = vmatprep.mubr.f32.mxu0 %v10616_v1 }
0x1e20   : > { %v5944_v26 = vpop.f32.mrf.mxu0 }
0x1e21   : > { %v5948_v27 = vadd.f32 %v5944_v26, %v5447_v25  ;;  %v8676_v25 = vld [vmem:[%s14582_s14 + $0x610] sm:$0xff]  ;;  %v8659_v26 = vld [vmem:[%s14582_s14 + $0x588] sm:$0xff] }
0x1e22   : > { %v10379_v5 = vpop.f32.mrf.mxu0 }
0x1e23   : > { %v8658_v5 = vld [vmem:[%s14582_s14 + $0x580] sm:$0xff] }
0x1e30   : > { %v6032_v49 = vpop.f32.mrf.mxu0 }
0x1e31   : > { %v6033_v50 = vadd.f32 %v8574_v28, %v6032_v49  ;;  %v8660_v28 = vld [vmem:[%s14582_s14 + $0x590] sm:$0xff]  ;;  %v8643_v49 = vld [vmem:[%s14582_s14 + $0x508] sm:$0xff] }
0x1e32   : > { %v10398_v31 = vpop.f32.mrf.mxu0 }
0x1e33   : > { %10440 = vmatmul.mubr.msk.f32.vlgmr.msra.gmra.mxu1 %vm1026_vm4, %v6033_v50  ;;  %v8645_v50 = vld [vmem:[%s14582_s14 + $0x518] sm:$0xff]  ;;  %v8642_v31 = vld [vmem:[%s14582_s14 + $0x500] sm:$0xff] }
0x1e34   : > { %10444 = vmatprep.mubr.msk.f32.mxu1 %vm10617_vm1, %v10616_v1 }
0x1e40   : > { %v6206_v8 = vpop.f32.mrf.mxu0 }
0x1e41   : > { %v6207_v29 = vadd.f32 %v8596_v32, %v6206_v8  ;;  %v8644_v32 = vld [vmem:[%s14582_s14 + $0x510] sm:$0xff]  ;;  %v8627_v8 = vld [vmem:[%s14582_s14 + $0x488] sm:$0xff] }
0x1e42   : > { %v10436_v33 = vpop.f32.mrf.mxu0 }
0x1e43   : > { %10443 = vmatpush3.msra.mxu1 %v6207_v29  ;;  %v8629_v29 = vld [vmem:[%s14582_s14 + $0x498] sm:$0xff]  ;;  %v8626_v33 = vld [vmem:[%s14582_s14 + $0x480] sm:$0xff] }
0x1e44   : > { %10447 = vmatprep.subr.mxu1 %v10616_v1 }
0x1ef3   : > { %v6282_v34 = vpop.f32.mrf.mxu1 }
0x1ef4   : > { %v6286_v35 = vmul.f32 0.25, %v6282_v34  ;;  %v8628_v34 = vld [vmem:[%s14582_s14 + $0x490] sm:$0xff] }
0x1ef5   : > { %v10441_v36 = vpop.f32.mrf.mxu1 }
0x1ef6   : > { %v6287_v37 = vsel %vm1104_vm5, %v6286_v35, -inf  ;;  %v8613_v36 = vld [vmem:[%s14582_s14 + $0x418] sm:$0xff] }
0x1ef7   : > { %6288 = vmax.xlane.f32.xlu0 %v6287_v37  ;;  %v8610_v37 = vld [vmem:[%s14582_s14 + $0x400] sm:$0xff] }
0x1f80   : > { %v6289_v39 = vpop.xlane.xlu0 %6288 }
0x1f81   : > { %v6290_v40 = vsub.f32 %v6286_v35, %v6289_v39  ;;  %v8611_v35 = vld [vmem:[%s14582_s14 + $0x408] sm:$0xff]  ;;  %v8612_v39 = vld [vmem:[%s14582_s14 + $0x410] sm:$0xff] }
0x1f83   : > { %v6291_v38 = vmul.f32 1.442695, %v6290_v40  ;;  %v8727_v40 = vld [vmem:[%s14582_s14 + $0x7a8] sm:$0xff] }
0x1f85   : > { %10546 = vpow2.f32 %v6291_v38  ;;  %v8729_v38 = vld [vmem:[%s14582_s14 + $0x7b8] sm:$0xff] }
0x1f92   : > { %v10547_v41 = vpop.eup %10546 }
0x1f93   : > { %v6293_v44 = vsel %vm1104_vm5, %v10547_v41, 0.0 }
0x1f94   : > { %6294 = vadd.xlane.f32.xlu1 %v6293_v44 }
0x201d   : > { %v6295_v30 = vpop.xlane.xlu1 %6294 }
0x201e   : > { %10548 = vrcp.f32 %v6295_v30 }
0x202b   : > { %v10549_v45 = vpop.eup %10548 }
0x202c   : > { %v6297_v46 = vmul.f32 %v10549_v45, %v10547_v41 }
0x202e   : > { %10445 = vmatmul.mubr.msk.f32.vlgmr.msra.gmra.mxu1 %vm1104_vm5, %v6297_v46  ;;  %v8608_v46 = vld [vmem:[%s14580_s12 + $0x1] ss:$0 sm:$0xff] }
0x202f   : > { %10448 = vmatpush3.msra.mxu1 %v8602_v47  ;;  %10451 = vmatprep.mubr.msk.f32.mxu1 %vm10617_vm1, %v10616_v1 }
0x2030   : > { %10449 = vmatprep.subr.mxu1 %v10616_v1 }
0x2031   : > { %10450 = vmatpush3.msra.mxu1 %v8601_v48  ;;  %v8609_v48 = vld [vmem:[%s14581_s13 + $0x1] ss:$0 sm:$0xff] }
0x2032   : > { %6722 = vmatprep.subr.mxu1 %v8723_v0  ;;  %v8678_v0 = vld [vmem:[%s14582_s14 + $0x620] sm:$0xff] }
0x20ee   : > { %v6367_v51 = vpop.f32.mrf.mxu1 }
0x20ef   : > { %10452 = vmatmul.mubr.msk.f32.vlgmr.msra.gmra.mxu1 %vm1026_vm4, %v6367_v51 }
0x20f0   : > { %v10446_v24 = vpop.f32.mrf.mxu1  ;;  %6770 = vmatprep.mubr.f32.mxu1 %v10616_v1  ;;  %6723 = vmatpush1.msra.mxu1 %v8722_v2  ;;  %v8663_v2 = vld [vmem:[%s14582_s14 + $0x5a8] sm:$0xff] }
0x20f1   : > { %6724 = vmatprep.subr.mxu1 %v8707_v12  ;;  %v8662_v12 = vld [vmem:[%s14582_s14 + $0x5a0] sm:$0xff] }
0x20f2   : > { %6725 = vmatpush1.msra.mxu1 %v8706_v14  ;;  %v8647_v14 = vld [vmem:[%s14582_s14 + $0x528] sm:$0xff] }
0x20f3   : > { %6726 = vmatprep.subr.mxu1 %v8691_v16  ;;  %v8646_v16 = vld [vmem:[%s14582_s14 + $0x520] sm:$0xff] }
0x20f4   : > { %6727 = vmatpush1.msra.mxu1 %v8690_v18  ;;  %v8631_v18 = vld [vmem:[%s14582_s14 + $0x4a8] sm:$0xff] }
0x20f5   : > { %6728 = vmatprep.subr.mxu1 %v8675_v62  ;;  %v8630_v62 = vld [vmem:[%s14582_s14 + $0x4a0] sm:$0xff] }
0x20f6   : > { %6729 = vmatpush1.msra.mxu1 %v8674_v21  ;;  %v8615_v21 = vld [vmem:[%s14582_s14 + $0x428] sm:$0xff] }
0x20f7   : > { %6730 = vmatprep.subr.mxu1 %v8659_v26  ;;  %v8614_v26 = vld [vmem:[%s14582_s14 + $0x420] sm:$0xff] }
0x20f8   : > { %6731 = vmatpush1.msra.mxu1 %v8658_v5  ;;  %v8731_v5 = vld [vmem:[%s14582_s14 + $0x7c8] sm:$0xff] }
0x20f9   : > { %6732 = vmatprep.subr.mxu1 %v8643_v49  ;;  %v8730_v49 = vld [vmem:[%s14582_s14 + $0x7c0] sm:$0xff] }
0x20fa   : > { %6733 = vmatpush1.msra.mxu1 %v8642_v31  ;;  %v8715_v31 = vld [vmem:[%s14582_s14 + $0x748] sm:$0xff] }
0x20fb   : > { %6734 = vmatprep.subr.mxu1 %v8627_v8  ;;  %v8714_v8 = vld [vmem:[%s14582_s14 + $0x740] sm:$0xff] }
0x20fc   : > { %6735 = vmatpush1.msra.mxu1 %v8626_v33  ;;  %v8699_v33 = vld [vmem:[%s14582_s14 + $0x6c8] sm:$0xff] }
0x20fd   : > { %6736 = vmatprep.subr.mxu1 %v8611_v35  ;;  %v8698_v35 = vld [vmem:[%s14582_s14 + $0x6c0] sm:$0xff] }
0x20fe   : > { %6737 = vmatpush1.msra.mxu1 %v8610_v37  ;;  %v8683_v37 = vld [vmem:[%s14582_s14 + $0x648] sm:$0xff] }
0x20ff   : > { %6864 = vmatprep.subr.mxu1 %v8727_v40  ;;  %v8682_v40 = vld [vmem:[%s14582_s14 + $0x640] sm:$0xff] }
0x21af   : > { %v6443_v52 = vpop.f32.mrf.mxu1 }
0x21b0   : > { %v6447_v4 = vadd.f32 %v6443_v52, %v5948_v27  ;;  %v8661_v27 = vld [vmem:[%s14582_s14 + $0x598] sm:$0xff]  ;;  %v8726_v52 = vld [vmem:[%s14582_s14 + $0x7a0] sm:$0xff] }
0x21b1   : > { %v10453_v53 = vpop.f32.mrf.mxu1 }
0x21b2   : > { %v6456_v54 = vadd.f32 %v8605_v61, %v6447_v4  ;;  %v8728_v61 = vld [vmem:[%s14582_s14 + $0x7b0] sm:$0xff]  ;;  %v8711_v4 = vld [vmem:[%s14582_s14 + $0x728] sm:$0xff]  ;;  %v8713_v53 = vld [vmem:[%s14582_s14 + $0x738] sm:$0xff] }
0x21b4   : > { %v6457_v55 = vadd.f32 %v6456_v54, %v12729_v11  ;;  %v8725_v11 = vld [vmem:[%s14582_s14 + $0x798] sm:$0xff]  ;;  %v8710_v54 = vld [vmem:[%s14582_s14 + $0x720] sm:$0xff] }
0x21b5   : > { %6793 = vmatprep.subr.mxu0 %v8725_v11  ;;  %v8680_v11 = vld [vmem:[%s14582_s14 + $0x630] sm:$0xff] }
0x21b6   : > { %v6462_v56 = vsel %vm782_vm3, %v6457_v55, 0.0  ;;  %6794 = vmatpush1.msra.mxu0 %v8724_v3  ;;  %v8665_v3 = vld [vmem:[%s14582_s14 + $0x5b8] sm:$0xff] }
0x21b7   : > { %6463 = vadd.xlane.f32.xlu0 %v6462_v56  ;;  %6795 = vmatprep.subr.mxu0 %v8709_v13  ;;  %v8695_v56 = vld [vmem:[%s14582_s14 + $0x6a8] sm:$0xff]  ;;  %v8664_v13 = vld [vmem:[%s14582_s14 + $0x5b0] sm:$0xff] }
0x21b8   : > { %6796 = vmatpush1.msra.mxu0 %v8708_v15  ;;  %v8649_v15 = vld [vmem:[%s14582_s14 + $0x538] sm:$0xff] }
0x21b9   : > { %6797 = vmatprep.subr.mxu0 %v8693_v17  ;;  %v8648_v17 = vld [vmem:[%s14582_s14 + $0x530] sm:$0xff] }
0x21ba   : > { %6798 = vmatpush1.msra.mxu0 %v8692_v19  ;;  %v8633_v19 = vld [vmem:[%s14582_s14 + $0x4b8] sm:$0xff] }
0x21bb   : > { %6799 = vmatprep.subr.mxu0 %v8677_v20  ;;  %v8632_v20 = vld [vmem:[%s14582_s14 + $0x4b0] sm:$0xff] }
0x21bc   : > { %6800 = vmatpush1.msra.mxu0 %v8676_v25  ;;  %v8617_v25 = vld [vmem:[%s14582_s14 + $0x438] sm:$0xff] }
0x21bd   : > { %6801 = vmatprep.subr.mxu0 %v8661_v27  ;;  %v8616_v27 = vld [vmem:[%s14582_s14 + $0x430] sm:$0xff] }
0x21be   : > { %6802 = vmatpush1.msra.mxu0 %v8660_v28  ;;  %v8733_v28 = vld [vmem:[%s14582_s14 + $0x7d8] sm:$0xff] }
0x21bf   : > { %6803 = vmatprep.subr.mxu0 %v8645_v50  ;;  %v8732_v50 = vld [vmem:[%s14582_s14 + $0x7d0] sm:$0xff] }
0x21c0   : > { %6804 = vmatpush1.msra.mxu0 %v8644_v32  ;;  %v8717_v32 = vld [vmem:[%s14582_s14 + $0x758] sm:$0xff] }
0x21c1   : > { %6805 = vmatprep.subr.mxu0 %v8629_v29  ;;  %v8716_v29 = vld [vmem:[%s14582_s14 + $0x750] sm:$0xff] }
0x21c2   : > { %6806 = vmatpush1.msra.mxu0 %v8628_v34  ;;  %v8701_v34 = vld [vmem:[%s14582_s14 + $0x6d8] sm:$0xff] }
0x21c3   : > { %6807 = vmatprep.subr.mxu0 %v8613_v36  ;;  %v8700_v36 = vld [vmem:[%s14582_s14 + $0x6d0] sm:$0xff] }
0x21c4   : > { %6808 = vmatpush1.msra.mxu0 %v8612_v39  ;;  %v8685_v39 = vld [vmem:[%s14582_s14 + $0x658] sm:$0xff] }
0x21c5   : > { %6935 = vmatprep.subr.mxu0 %v8729_v38  ;;  %v8684_v38 = vld [vmem:[%s14582_s14 + $0x650] sm:$0xff] }
0x2240   : > { %v6464_v57 = vpop.xlane.xlu0 %6463 }
0x2241   : > { %v6465_v58 = vmul.f32 0.015625, %v6464_v57  ;;  %v8697_v57 = vld [vmem:[%s14582_s14 + $0x6b8] sm:$0xff] }
0x2243   : > { %v13230_v59 = vsub.f32 %v6457_v55, %v6465_v58  ;;  %v8712_v55 = vld [vmem:[%s14582_s14 + $0x730] sm:$0xff]  ;;  %v8694_v58 = vld [vmem:[%s14582_s14 + $0x6a0] sm:$0xff] }
0x2245   : > { %v6467_v60 = vmul.f32 %v13230_v59, %v13230_v59 }
0x2247   : > { %v6468_v63 = vsel %vm782_vm3, %v6467_v60, 0.0  ;;  %v8679_v60 = vld [vmem:[%s14582_s14 + $0x628] sm:$0xff] }
0x2248   : > { %6469 = vadd.xlane.f32.xlu1 %v6468_v63  ;;  %v8681_v63 = vld [vmem:[%s14582_s14 + $0x638] sm:$0xff] }
0x22d1   : > { %v6470_v41 = vpop.xlane.xlu1 %6469 }
0x22d2   : > { %v6471_v44 = vmul.f32 0.015625, %v6470_v41  ;;  %v8667_v41 = vld [vmem:[%s14582_s14 + $0x5c8] sm:$0xff] }
0x22d4   : > { %v6472_v30 = vadd.f32 1e-05, %v6471_v44  ;;  %v8669_v44 = vld [vmem:[%s14582_s14 + $0x5d8] sm:$0xff] }
0x22d6   : > { %10550 = vrsqrt.f32 %v6472_v30  ;;  %v8666_v30 = vld [vmem:[%s14582_s14 + $0x5c0] sm:$0xff] }
0x22e3   : > { %v10551_v45 = vpop.eup %10550 }
0x22e4   : > { %v6474_v47 = vmul.f32 %v10551_v45, %v13230_v59  ;;  %v8696_v59 = vld [vmem:[%s14582_s14 + $0x6b0] sm:$0xff] }
0x22e5   : > { %v8668_v45 = vld [vmem:[%s14582_s14 + $0x5d0] sm:$0xff] }
0x22e6   : > { %v6481_v51 = vmul.f32 %v8608_v46, %v6474_v47  ;;  %v8651_v46 = vld [vmem:[%s14582_s14 + $0x548] sm:$0xff]  ;;  %v8653_v47 = vld [vmem:[%s14582_s14 + $0x558] sm:$0xff] }
0x22e8   : > { %v13344_v24 = vadd.f32 %v8609_v48, %v6481_v51  ;;  %v8650_v48 = vld [vmem:[%s14582_s14 + $0x540] sm:$0xff]  ;;  %v8652_v51 = vld [vmem:[%s14582_s14 + $0x550] sm:$0xff] }
0x22ea   : > { %8740 = vmatmul.mubr.msk.f32.vlgmr.msra.gmra.mxu1 %vm782_vm3, %v13344_v24  ;;  %8741 = vmatmul.mubr.msk.f32.vlgmr.msra.gmra.mxu0 %vm782_vm3, %v13344_v24 }
0x22eb   : > { %6865 = vmatpush1.msra.mxu1 %v8726_v52  ;;  %6936 = vmatpush1.msra.mxu0 %v8728_v61  ;;  %v8635_v52 = vld [vmem:[%s14582_s14 + $0x4c8] sm:$0xff]  ;;  %v8637_v61 = vld [vmem:[%s14582_s14 + $0x4d8] sm:$0xff] }
0x22ec   : > { %6866 = vmatprep.subr.mxu1 %v8711_v4  ;;  %6937 = vmatprep.subr.mxu0 %v8713_v53  ;;  %v8634_v4 = vld [vmem:[%s14582_s14 + $0x4c0] sm:$0xff]  ;;  %v8636_v53 = vld [vmem:[%s14582_s14 + $0x4d0] sm:$0xff] }
0x22ed   : > { %6867 = vmatpush1.msra.mxu1 %v8710_v54  ;;  %6938 = vmatpush1.msra.mxu0 %v8712_v55  ;;  %v8619_v54 = vld [vmem:[%s14582_s14 + $0x448] sm:$0xff]  ;;  %v8621_v55 = vld [vmem:[%s14582_s14 + $0x458] sm:$0xff] }
0x22ee   : > { %6868 = vmatprep.subr.mxu1 %v8695_v56  ;;  %6939 = vmatprep.subr.mxu0 %v8697_v57  ;;  %v8618_v56 = vld [vmem:[%s14582_s14 + $0x440] sm:$0xff]  ;;  %v8620_v57 = vld [vmem:[%s14582_s14 + $0x450] sm:$0xff] }
0x22ef   : > { %6869 = vmatpush1.msra.mxu1 %v8694_v58  ;;  %6940 = vmatpush1.msra.mxu0 %v8696_v59  ;;  %v8735_v58 = vld [vmem:[%s14582_s14 + $0x7e8] sm:$0xff]  ;;  %v8737_v59 = vld [vmem:[%s14582_s14 + $0x7f8] sm:$0xff] }
0x22f0   : > { %6870 = vmatprep.subr.mxu1 %v8679_v60  ;;  %6941 = vmatprep.subr.mxu0 %v8681_v63  ;;  %v8734_v60 = vld [vmem:[%s14582_s14 + $0x7e0] sm:$0xff]  ;;  %v8736_v63 = vld [vmem:[%s14582_s14 + $0x7f0] sm:$0xff] }
0x22f1   : > { %6871 = vmatpush1.msra.mxu1 %v8678_v0  ;;  %6942 = vmatpush1.msra.mxu0 %v8680_v11  ;;  %v8719_v0 = vld [vmem:[%s14582_s14 + $0x768] sm:$0xff]  ;;  %v8721_v11 = vld [vmem:[%s14582_s14 + $0x778] sm:$0xff] }
0x22f2   : > { %6872 = vmatprep.subr.mxu1 %v8663_v2  ;;  %6943 = vmatprep.subr.mxu0 %v8665_v3  ;;  %v8718_v2 = vld [vmem:[%s14582_s14 + $0x760] sm:$0xff]  ;;  %v8720_v3 = vld [vmem:[%s14582_s14 + $0x770] sm:$0xff] }
0x22f3   : > { %6873 = vmatpush1.msra.mxu1 %v8662_v12  ;;  %6944 = vmatpush1.msra.mxu0 %v8664_v13  ;;  %v8703_v12 = vld [vmem:[%s14582_s14 + $0x6e8] sm:$0xff]  ;;  %v8705_v13 = vld [vmem:[%s14582_s14 + $0x6f8] sm:$0xff] }
0x22f4   : > { %6874 = vmatprep.subr.mxu1 %v8647_v14  ;;  %6945 = vmatprep.subr.mxu0 %v8649_v15  ;;  %v8702_v14 = vld [vmem:[%s14582_s14 + $0x6e0] sm:$0xff]  ;;  %v8704_v15 = vld [vmem:[%s14582_s14 + $0x6f0] sm:$0xff] }
0x22f5   : > { %6875 = vmatpush1.msra.mxu1 %v8646_v16  ;;  %6946 = vmatpush1.msra.mxu0 %v8648_v17  ;;  %v8687_v16 = vld [vmem:[%s14582_s14 + $0x668] sm:$0xff]  ;;  %v8689_v17 = vld [vmem:[%s14582_s14 + $0x678] sm:$0xff] }
0x22f6   : > { %6876 = vmatprep.subr.mxu1 %v8631_v18  ;;  %6947 = vmatprep.subr.mxu0 %v8633_v19  ;;  %v8686_v18 = vld [vmem:[%s14582_s14 + $0x660] sm:$0xff]  ;;  %v8688_v19 = vld [vmem:[%s14582_s14 + $0x670] sm:$0xff] }
0x22f7   : > { %6877 = vmatpush1.msra.mxu1 %v8630_v62  ;;  %6948 = vmatpush1.msra.mxu0 %v8632_v20  ;;  %v8671_v62 = vld [vmem:[%s14582_s14 + $0x5e8] sm:$0xff]  ;;  %v8673_v20 = vld [vmem:[%s14582_s14 + $0x5f8] sm:$0xff] }
0x22f8   : > { %6878 = vmatprep.subr.mxu1 %v8615_v21  ;;  %6949 = vmatprep.subr.mxu0 %v8617_v25  ;;  %v8670_v21 = vld [vmem:[%s14582_s14 + $0x5e0] sm:$0xff]  ;;  %v8672_v25 = vld [vmem:[%s14582_s14 + $0x5f0] sm:$0xff] }
0x22f9   : > { %6879 = vmatpush1.msra.mxu1 %v8614_v26  ;;  %6912 = vmatprep.mubr.f32.mxu1 %v10616_v1  ;;  %v8655_v26 = vld [vmem:[%s14582_s14 + $0x568] sm:$0xff] }
0x22fa   : > { %6950 = vmatpush1.msra.mxu0 %v8616_v27  ;;  %6983 = vmatprep.mubr.f32.mxu0 %v10616_v1  ;;  %v8657_v27 = vld [vmem:[%s14582_s14 + $0x578] sm:$0xff] }
0x22fb   : > { %8742 = vmatmul.mubr.msk.f32.vlgmr.msra.gmra.mxu1 %vm782_vm3, %v13344_v24  ;;  %8743 = vmatmul.mubr.msk.f32.vlgmr.msra.gmra.mxu0 %vm782_vm3, %v13344_v24 }
0x22fc   : > { %7006 = vmatprep.subr.mxu1 %v8731_v5  ;;  %7077 = vmatprep.subr.mxu0 %v8733_v28  ;;  %v8654_v5 = vld [vmem:[%s14582_s14 + $0x560] sm:$0xff]  ;;  %v8656_v28 = vld [vmem:[%s14582_s14 + $0x570] sm:$0xff] }
0x22fd   : > { %7007 = vmatpush1.msra.mxu1 %v8730_v49  ;;  %7078 = vmatpush1.msra.mxu0 %v8732_v50  ;;  %v8639_v49 = vld [vmem:[%s14582_s14 + $0x4e8] sm:$0xff]  ;;  %v8641_v50 = vld [vmem:[%s14582_s14 + $0x4f8] sm:$0xff] }
0x22fe   : > { %7008 = vmatprep.subr.mxu1 %v8715_v31  ;;  %7079 = vmatprep.subr.mxu0 %v8717_v32  ;;  %v8638_v31 = vld [vmem:[%s14582_s14 + $0x4e0] sm:$0xff]  ;;  %v8640_v32 = vld [vmem:[%s14582_s14 + $0x4f0] sm:$0xff] }
0x22ff   : > { %7009 = vmatpush1.msra.mxu1 %v8714_v8  ;;  %7080 = vmatpush1.msra.mxu0 %v8716_v29  ;;  %v8623_v8 = vld [vmem:[%s14582_s14 + $0x468] sm:$0xff]  ;;  %v8625_v29 = vld [vmem:[%s14582_s14 + $0x478] sm:$0xff] }
0x2300   : > { %7010 = vmatprep.subr.mxu1 %v8699_v33  ;;  %7081 = vmatprep.subr.mxu0 %v8701_v34  ;;  %v8622_v33 = vld [vmem:[%s14582_s14 + $0x460] sm:$0xff]  ;;  %v8624_v34 = vld [vmem:[%s14582_s14 + $0x470] sm:$0xff] }
0x2301   : > { %7011 = vmatpush1.msra.mxu1 %v8698_v35  ;;  %7082 = vmatpush1.msra.mxu0 %v8700_v36  ;;  %v8779_v35 = vld [vmem:[%s14584_s16 + $0x8f8] sm:$0xff] }
0x2302   : > { %7012 = vmatprep.subr.mxu1 %v8683_v37  ;;  %7083 = vmatprep.subr.mxu0 %v8685_v39  ;;  %v8811_v36 = vld [vmem:[%s14584_s16 + $0x9f8] sm:$0xff] }
0x2303   : > { %7013 = vmatpush1.msra.mxu1 %v8682_v40  ;;  %7084 = vmatpush1.msra.mxu0 %v8684_v38  ;;  %v8763_v37 = vld [vmem:[%s14584_s16 + $0x878] sm:$0xff]  ;;  %v8778_v40 = vld [vmem:[%s14584_s16 + $0x8f0] sm:$0xff] }
0x2304   : > { %7014 = vmatprep.subr.mxu1 %v8667_v41  ;;  %7085 = vmatprep.subr.mxu0 %v8669_v44  ;;  %v8795_v39 = vld [vmem:[%s14584_s16 + $0x978] sm:$0xff]  ;;  %v8810_v38 = vld [vmem:[%s14584_s16 + $0x9f0] sm:$0xff] }
0x2305   : > { %7015 = vmatpush1.msra.mxu1 %v8666_v30  ;;  %7086 = vmatpush1.msra.mxu0 %v8668_v45  ;;  %v8762_v41 = vld [vmem:[%s14584_s16 + $0x870] sm:$0xff]  ;;  %v8777_v30 = vld [vmem:[%s14584_s16 + $0x8e8] sm:$0xff] }
0x2306   : > { %7016 = vmatprep.subr.mxu1 %v8651_v46  ;;  %7087 = vmatprep.subr.mxu0 %v8653_v47  ;;  %v8794_v44 = vld [vmem:[%s14584_s16 + $0x970] sm:$0xff]  ;;  %v8809_v45 = vld [vmem:[%s14584_s16 + $0x9e8] sm:$0xff] }
0x2307   : > { %7017 = vmatpush1.msra.mxu1 %v8650_v48  ;;  %7088 = vmatpush1.msra.mxu0 %v8652_v51  ;;  %v8761_v46 = vld [vmem:[%s14584_s16 + $0x868] sm:$0xff]  ;;  %v8776_v48 = vld [vmem:[%s14584_s16 + $0x8e0] sm:$0xff] }
0x2308   : > { %7018 = vmatprep.subr.mxu1 %v8635_v52  ;;  %7089 = vmatprep.subr.mxu0 %v8637_v61  ;;  %v8793_v47 = vld [vmem:[%s14584_s16 + $0x968] sm:$0xff]  ;;  %v8808_v51 = vld [vmem:[%s14584_s16 + $0x9e0] sm:$0xff] }
0x2309   : > { %7019 = vmatpush1.msra.mxu1 %v8634_v4  ;;  %7090 = vmatpush1.msra.mxu0 %v8636_v53  ;;  %v8760_v52 = vld [vmem:[%s14584_s16 + $0x860] sm:$0xff]  ;;  %v8775_v4 = vld [vmem:[%s14584_s16 + $0x8d8] sm:$0xff] }
0x230a   : > { %7020 = vmatprep.subr.mxu1 %v8619_v54  ;;  %7091 = vmatprep.subr.mxu0 %v8621_v55  ;;  %v8792_v61 = vld [vmem:[%s14584_s16 + $0x960] sm:$0xff]  ;;  %v8807_v53 = vld [vmem:[%s14584_s16 + $0x9d8] sm:$0xff] }
0x230b   : > { %7021 = vmatpush1.msra.mxu1 %v8618_v56  ;;  %7054 = vmatprep.mubr.f32.mxu1 %v10616_v1  ;;  %v8759_v54 = vld [vmem:[%s14584_s16 + $0x858] sm:$0xff]  ;;  %v8774_v56 = vld [vmem:[%s14584_s16 + $0x8d0] sm:$0xff] }
0x230c   : > { %7092 = vmatpush1.msra.mxu0 %v8620_v57  ;;  %7125 = vmatprep.mubr.f32.mxu0 %v10616_v1  ;;  %v8791_v55 = vld [vmem:[%s14584_s16 + $0x958] sm:$0xff]  ;;  %v8806_v57 = vld [vmem:[%s14584_s16 + $0x9d0] sm:$0xff] }
0x230d   : > { %8744 = vmatmul.mubr.msk.f32.vlgmr.msra.gmra.mxu1 %vm782_vm3, %v13344_v24  ;;  %8745 = vmatmul.mubr.msk.f32.vlgmr.msra.gmra.mxu0 %vm782_vm3, %v13344_v24 }
0x230e   : > { %7148 = vmatprep.subr.mxu1 %v8735_v58  ;;  %7219 = vmatprep.subr.mxu0 %v8737_v59  ;;  %v8758_v58 = vld [vmem:[%s14584_s16 + $0x850] sm:$0xff] }
0x230f   : > { %7149 = vmatpush1.msra.mxu1 %v8734_v60  ;;  %7220 = vmatpush1.msra.mxu0 %v8736_v63  ;;  %v8790_v59 = vld [vmem:[%s14584_s16 + $0x950] sm:$0xff]  ;;  %v8773_v60 = vld [vmem:[%s14584_s16 + $0x8c8] sm:$0xff] }
0x2310   : > { %7150 = vmatprep.subr.mxu1 %v8719_v0  ;;  %7221 = vmatprep.subr.mxu0 %v8721_v11  ;;  %v8805_v63 = vld [vmem:[%s14584_s16 + $0x9c8] sm:$0xff] }
0x2311   : > { %7151 = vmatpush1.msra.mxu1 %v8718_v2  ;;  %7222 = vmatpush1.msra.mxu0 %v8720_v3  ;;  %v8757_v0 = vld [vmem:[%s14584_s16 + $0x848] sm:$0xff]  ;;  %v8772_v2 = vld [vmem:[%s14584_s16 + $0x8c0] sm:$0xff] }
0x2312   : > { %7152 = vmatprep.subr.mxu1 %v8703_v12  ;;  %7223 = vmatprep.subr.mxu0 %v8705_v13  ;;  %v8789_v11 = vld [vmem:[%s14584_s16 + $0x948] sm:$0xff]  ;;  %v8804_v3 = vld [vmem:[%s14584_s16 + $0x9c0] sm:$0xff] }
0x2313   : > { %7153 = vmatpush1.msra.mxu1 %v8702_v14  ;;  %7224 = vmatpush1.msra.mxu0 %v8704_v15  ;;  %v8756_v12 = vld [vmem:[%s14584_s16 + $0x840] sm:$0xff]  ;;  %v8771_v14 = vld [vmem:[%s14584_s16 + $0x8b8] sm:$0xff] }
0x2314   : > { %7154 = vmatprep.subr.mxu1 %v8687_v16  ;;  %7225 = vmatprep.subr.mxu0 %v8689_v17  ;;  %v8788_v13 = vld [vmem:[%s14584_s16 + $0x940] sm:$0xff]  ;;  %v8803_v15 = vld [vmem:[%s14584_s16 + $0x9b8] sm:$0xff] }
0x2315   : > { %7155 = vmatpush1.msra.mxu1 %v8686_v18  ;;  %7226 = vmatpush1.msra.mxu0 %v8688_v19  ;;  %v8755_v16 = vld [vmem:[%s14584_s16 + $0x838] sm:$0xff]  ;;  %v8770_v18 = vld [vmem:[%s14584_s16 + $0x8b0] sm:$0xff] }
0x2316   : > { %7156 = vmatprep.subr.mxu1 %v8671_v62  ;;  %7227 = vmatprep.subr.mxu0 %v8673_v20  ;;  %v8787_v17 = vld [vmem:[%s14584_s16 + $0x938] sm:$0xff]  ;;  %v8802_v19 = vld [vmem:[%s14584_s16 + $0x9b0] sm:$0xff] }
0x2317   : > { %7157 = vmatpush1.msra.mxu1 %v8670_v21  ;;  %7228 = vmatpush1.msra.mxu0 %v8672_v25  ;;  %v8754_v62 = vld [vmem:[%s14584_s16 + $0x830] sm:$0xff]  ;;  %v8769_v21 = vld [vmem:[%s14584_s16 + $0x8a8] sm:$0xff] }
0x2318   : > { %7158 = vmatprep.subr.mxu1 %v8655_v26  ;;  %7229 = vmatprep.subr.mxu0 %v8657_v27  ;;  %v8786_v20 = vld [vmem:[%s14584_s16 + $0x930] sm:$0xff]  ;;  %v8801_v25 = vld [vmem:[%s14584_s16 + $0x9a8] sm:$0xff] }
0x2319   : > { %7159 = vmatpush1.msra.mxu1 %v8654_v5  ;;  %7230 = vmatpush1.msra.mxu0 %v8656_v28  ;;  %v8753_v26 = vld [vmem:[%s14584_s16 + $0x828] sm:$0xff]  ;;  %v8768_v5 = vld [vmem:[%s14584_s16 + $0x8a0] sm:$0xff] }
0x231a   : > { %7160 = vmatprep.subr.mxu1 %v8639_v49  ;;  %7231 = vmatprep.subr.mxu0 %v8641_v50  ;;  %v8785_v27 = vld [vmem:[%s14584_s16 + $0x928] sm:$0xff]  ;;  %v8800_v28 = vld [vmem:[%s14584_s16 + $0x9a0] sm:$0xff] }
0x231b   : > { %7161 = vmatpush1.msra.mxu1 %v8638_v31  ;;  %7232 = vmatpush1.msra.mxu0 %v8640_v32  ;;  %v8752_v49 = vld [vmem:[%s14584_s16 + $0x820] sm:$0xff]  ;;  %v8767_v31 = vld [vmem:[%s14584_s16 + $0x898] sm:$0xff] }
0x231c   : > { %7162 = vmatprep.subr.mxu1 %v8623_v8  ;;  %7233 = vmatprep.subr.mxu0 %v8625_v29  ;;  %v8784_v50 = vld [vmem:[%s14584_s16 + $0x920] sm:$0xff]  ;;  %v8799_v32 = vld [vmem:[%s14584_s16 + $0x998] sm:$0xff] }
0x231d   : > { %7163 = vmatpush1.msra.mxu1 %v8622_v33  ;;  %7196 = vmatprep.mubr.f32.mxu1 %v10616_v1  ;;  %v8751_v8 = vld [vmem:[%s14584_s16 + $0x818] sm:$0xff]  ;;  %v8766_v33 = vld [vmem:[%s14584_s16 + $0x890] sm:$0xff] }
0x231e   : > { %7234 = vmatpush1.msra.mxu0 %v8624_v34  ;;  %7267 = vmatprep.mubr.f32.mxu0 %v10616_v1  ;;  %v8783_v29 = vld [vmem:[%s14584_s16 + $0x918] sm:$0xff]  ;;  %v8798_v34 = vld [vmem:[%s14584_s16 + $0x990] sm:$0xff] }
0x231f   : > { %8746 = vmatmul.mubr.msk.f32.vlgmr.msra.gmra.mxu1 %vm782_vm3, %v13344_v24  ;;  %8747 = vmatmul.mubr.msk.f32.vlgmr.msra.gmra.mxu0 %vm782_vm3, %v13344_v24 }
0x2320   : > { %9568 = vmatprep.subr.mxu1 %v8779_v35  ;;  %9603 = vmatprep.subr.mxu0 %v8811_v36  ;;  %v8750_v35 = vld [vmem:[%s14584_s16 + $0x810] sm:$0xff] }
0x2321   : > { %9569 = vmatpush3.msra.mxu1 %v8763_v37  ;;  %9604 = vmatpush3.msra.mxu0 %v8795_v39  ;;  %v8782_v36 = vld [vmem:[%s14584_s16 + $0x910] sm:$0xff]  ;;  %v8765_v37 = vld [vmem:[%s14584_s16 + $0x888] sm:$0xff] }
0x2322   : > { %9570 = vmatprep.subr.mxu1 %v8778_v40  ;;  %9605 = vmatprep.subr.mxu0 %v8810_v38  ;;  %v8797_v39 = vld [vmem:[%s14584_s16 + $0x988] sm:$0xff] }
0x2323   : > { %9571 = vmatpush3.msra.mxu1 %v8762_v41  ;;  %9606 = vmatpush3.msra.mxu0 %v8794_v44  ;;  %v8749_v40 = vld [vmem:[%s14584_s16 + $0x808] sm:$0xff]  ;;  %v8764_v41 = vld [vmem:[%s14584_s16 + $0x880] sm:$0xff] }
0x2324   : > { %9572 = vmatprep.subr.mxu1 %v8777_v30  ;;  %9607 = vmatprep.subr.mxu0 %v8809_v45  ;;  %v8781_v38 = vld [vmem:[%s14584_s16 + $0x908] sm:$0xff]  ;;  %v8796_v44 = vld [vmem:[%s14584_s16 + $0x980] sm:$0xff] }
0x2325   : > { %9573 = vmatpush3.msra.mxu1 %v8761_v46  ;;  %9608 = vmatpush3.msra.mxu0 %v8793_v47  ;;  %v8748_v30 = vld [vmem:[%s14584_s16 + $0x800] sm:$0xff]  ;;  %v8843_v46 = vld [vmem:[%s14584_s16 + $0xaf8] sm:$0xff] }
0x2326   : > { %9574 = vmatprep.subr.mxu1 %v8776_v48  ;;  %9609 = vmatprep.subr.mxu0 %v8808_v51  ;;  %v8780_v45 = vld [vmem:[%s14584_s16 + $0x900] sm:$0xff]  ;;  %v8875_v47 = vld [vmem:[%s14584_s16 + $0xbf8] sm:$0xff]  ;;  %v13851_v48 = vld [vmem:[%s14583_s15 + $0x10] sm:$0xff] }
0x2327   : > { %9575 = vmatpush3.msra.mxu1 %v8760_v52  ;;  %9610 = vmatpush3.msra.mxu0 %v8792_v61  ;;  %v6626_v51 = vrot.slane %v13851_v48, %v11994_v6  ;;  %v6634_v52 = vrot.slane %v13851_v48, %v11997_v7  ;;  %v6630_v61 = vrot.slane %v13851_v48, %v12005_v9 }
0x2328   : > { %9576 = vmatprep.subr.mxu1 %v8775_v4  ;;  %9611 = vmatprep.subr.mxu0 %v8807_v53  ;;  %v6638_v4 = vrot.slane %v13851_v48, %v12008_v10 }
0x2329   : > { %9577 = vmatpush3.msra.mxu1 %v8759_v54  ;;  %9612 = vmatpush3.msra.mxu0 %v8791_v55 }
0x232a   : > { %9578 = vmatprep.subr.mxu1 %v8774_v56  ;;  %9613 = vmatprep.subr.mxu0 %v8806_v57 }
0x232b   : > { %9579 = vmatpush3.msra.mxu1 %v8758_v58  ;;  %9614 = vmatpush3.msra.mxu0 %v8790_v59 }
0x232c   : > { %9580 = vmatprep.subr.mxu1 %v8773_v60  ;;  %9615 = vmatprep.subr.mxu0 %v8805_v63 }
0x232d   : > { %9581 = vmatpush3.msra.mxu1 %v8757_v0  ;;  %9616 = vmatpush3.msra.mxu0 %v8789_v11 }
0x232e   : > { %9582 = vmatprep.subr.mxu1 %v8772_v2  ;;  %9617 = vmatprep.subr.mxu0 %v8804_v3  ;;  %v8827_v3 = vld [vmem:[%s14584_s16 + $0xa78] sm:$0xff] }
0x232f   : > { %9583 = vmatpush3.msra.mxu1 %v8756_v12  ;;  %9618 = vmatpush3.msra.mxu0 %v8788_v13  ;;  %v8859_v12 = vld [vmem:[%s14584_s16 + $0xb78] sm:$0xff]  ;;  %v8842_v13 = vld [vmem:[%s14584_s16 + $0xaf0] sm:$0xff] }
0x2330   : > { %9584 = vmatprep.subr.mxu1 %v8771_v14  ;;  %9619 = vmatprep.subr.mxu0 %v8803_v15  ;;  %v8874_v14 = vld [vmem:[%s14584_s16 + $0xbf0] sm:$0xff] }
0x2331   : > { %9585 = vmatpush3.msra.mxu1 %v8755_v16  ;;  %9620 = vmatpush3.msra.mxu0 %v8787_v17  ;;  %v8826_v15 = vld [vmem:[%s14584_s16 + $0xa70] sm:$0xff]  ;;  %v8841_v17 = vld [vmem:[%s14584_s16 + $0xae8] sm:$0xff] }
0x2332   : > { %9586 = vmatprep.subr.mxu1 %v8770_v18  ;;  %9621 = vmatprep.subr.mxu0 %v8802_v19  ;;  %v8858_v16 = vld [vmem:[%s14584_s16 + $0xb70] sm:$0xff]  ;;  %v8873_v18 = vld [vmem:[%s14584_s16 + $0xbe8] sm:$0xff] }
0x2333   : > { %9587 = vmatpush3.msra.mxu1 %v8754_v62  ;;  %9622 = vmatpush3.msra.mxu0 %v8786_v20  ;;  %v8825_v19 = vld [vmem:[%s14584_s16 + $0xa68] sm:$0xff]  ;;  %v8840_v20 = vld [vmem:[%s14584_s16 + $0xae0] sm:$0xff] }
0x2334   : > { %9588 = vmatprep.subr.mxu1 %v8769_v21  ;;  %9623 = vmatprep.subr.mxu0 %v8801_v25  ;;  %v8857_v62 = vld [vmem:[%s14584_s16 + $0xb68] sm:$0xff]  ;;  %v8872_v21 = vld [vmem:[%s14584_s16 + $0xbe0] sm:$0xff] }
0x2335   : > { %9589 = vmatpush3.msra.mxu1 %v8753_v26  ;;  %9624 = vmatpush3.msra.mxu0 %v8785_v27  ;;  %v8824_v25 = vld [vmem:[%s14584_s16 + $0xa60] sm:$0xff]  ;;  %v8839_v27 = vld [vmem:[%s14584_s16 + $0xad8] sm:$0xff] }
0x2336   : > { %9590 = vmatprep.subr.mxu1 %v8768_v5  ;;  %9625 = vmatprep.subr.mxu0 %v8800_v28  ;;  %v8856_v26 = vld [vmem:[%s14584_s16 + $0xb60] sm:$0xff]  ;;  %v8871_v5 = vld [vmem:[%s14584_s16 + $0xbd8] sm:$0xff] }
0x2337   : > { %9591 = vmatpush3.msra.mxu1 %v8752_v49  ;;  %9626 = vmatpush3.msra.mxu0 %v8784_v50  ;;  %v8823_v28 = vld [vmem:[%s14584_s16 + $0xa58] sm:$0xff]  ;;  %v8838_v50 = vld [vmem:[%s14584_s16 + $0xad0] sm:$0xff] }
0x2338   : > { %9592 = vmatprep.subr.mxu1 %v8767_v31  ;;  %9627 = vmatprep.subr.mxu0 %v8799_v32  ;;  %v8855_v49 = vld [vmem:[%s14584_s16 + $0xb58] sm:$0xff]  ;;  %v8870_v31 = vld [vmem:[%s14584_s16 + $0xbd0] sm:$0xff]  ;;  %v6646_v32 = vrot.slane %v13851_v48, %v12061_v42 }
0x2339   : > { %9593 = vmatpush3.msra.mxu1 %v8751_v8  ;;  %9628 = vmatpush3.msra.mxu0 %v8783_v29  ;;  %v6654_v8 = vrot.slane %v13851_v48, %v12064_v43  ;;  %v8822_v29 = vld [vmem:[%s14584_s16 + $0xa50] sm:$0xff] }
0x233a   : > { %9594 = vmatprep.subr.mxu1 %v8766_v33  ;;  %9629 = vmatprep.subr.mxu0 %v8798_v34  ;;  %v8854_v33 = vld [vmem:[%s14584_s16 + $0xb50] sm:$0xff] }
0x233b   : > { %9595 = vmatpush3.msra.mxu1 %v8750_v35  ;;  %9630 = vmatpush3.msra.mxu0 %v8782_v36  ;;  %v8837_v36 = vld [vmem:[%s14584_s16 + $0xac8] sm:$0xff] }
0x233c   : > { %9596 = vmatprep.subr.mxu1 %v8765_v37  ;;  %9631 = vmatprep.subr.mxu0 %v8797_v39  ;;  %v8869_v37 = vld [vmem:[%s14584_s16 + $0xbc8] sm:$0xff] }
0x233d   : > { %9597 = vmatpush3.msra.mxu1 %v8749_v40  ;;  %9632 = vmatpush3.msra.mxu0 %v8781_v38  ;;  %v8821_v39 = vld [vmem:[%s14584_s16 + $0xa48] sm:$0xff] }
0x233e   : > { %9598 = vmatprep.subr.mxu1 %v8764_v41  ;;  %9633 = vmatprep.subr.mxu0 %v8796_v44  ;;  %v8853_v40 = vld [vmem:[%s14584_s16 + $0xb48] sm:$0xff]  ;;  %v8836_v44 = vld [vmem:[%s14584_s16 + $0xac0] sm:$0xff] }
0x233f   : > { %9599 = vmatpush3.msra.mxu1 %v8748_v30  ;;  %9634 = vmatpush3.msra.mxu0 %v8780_v45  ;;  %v8868_v30 = vld [vmem:[%s14584_s16 + $0xbc0] sm:$0xff] }
0x2340   : > { %9638 = vmatprep.subr.mxu1 %v8843_v46  ;;  %9673 = vmatprep.subr.mxu0 %v8875_v47  ;;  %v8820_v47 = vld [vmem:[%s14584_s16 + $0xa40] sm:$0xff] }
0x23aa   : > { %v6772_v53 = vpop.f32.mrf.mxu1  ;;  %v6843_v54 = vpop.f32.mrf.mxu0 }
0x23ab   : > { %v6773_v55 = vadd.f32 %v6772_v53, %v6626_v51  ;;  %v6844_v56 = vadd.f32 %v6843_v54, %v6634_v52  ;;  %v8852_v51 = vld [vmem:[%s14584_s16 + $0xb40] sm:$0xff]  ;;  %v8867_v53 = vld [vmem:[%s14584_s16 + $0xbb8] sm:$0xff] }
0x23ac   : > { %v6774_v57 = vpop.f32.mrf.mxu1  ;;  %v6845_v58 = vpop.f32.mrf.mxu0  ;;  %v8819_v54 = vld [vmem:[%s14584_s16 + $0xa38] sm:$0xff] }
0x23ad   : > { %v6775_v59 = vadd.f32 %v6774_v57, %v6630_v61  ;;  %v6846_v60 = vadd.f32 %v6845_v58, %v6638_v4  ;;  %v7274_v11 = vmax.f32 %v6773_v55, 0.0  ;;  %v7276_v2 = vmax.f32 %v6844_v56, 0.0  ;;  %v8835_v4 = vld [vmem:[%s14584_s16 + $0xab8] sm:$0xff]  ;;  %v8834_v56 = vld [vmem:[%s14584_s16 + $0xab0] sm:$0xff] }
0x23ae   : > { %v8851_v55 = vld [vmem:[%s14584_s16 + $0xb38] sm:$0xff]  ;;  %v8866_v57 = vld [vmem:[%s14584_s16 + $0xbb0] sm:$0xff] }
0x23af   : > { %v7275_v63 = vmax.f32 %v6775_v59, 0.0  ;;  %v7277_v0 = vmax.f32 %v6846_v60, 0.0  ;;  %v8818_v58 = vld [vmem:[%s14584_s16 + $0xa30] sm:$0xff]  ;;  %v8833_v60 = vld [vmem:[%s14584_s16 + $0xaa8] sm:$0xff] }
0x23b0   : > { %v8850_v59 = vld [vmem:[%s14584_s16 + $0xb30] sm:$0xff] }
0x23b1   : > { %7619 = vmatprep.mubr.f32.mxu1 %v7275_v63  ;;  %7689 = vmatprep.mubr.f32.mxu0 %v7277_v0  ;;  %v8865_v63 = vld [vmem:[%s14584_s16 + $0xba8] sm:$0xff] }
0x23b2   : > { %7620 = vmatmul.mubr.f32.vlgmr.msra.gmra.mxu1 %v7274_v11  ;;  %7690 = vmatmul.mubr.f32.vlgmr.msra.gmra.mxu0 %v7276_v2  ;;  %v8817_v0 = vld [vmem:[%s14584_s16 + $0xa28] sm:$0xff]  ;;  %v8832_v2 = vld [vmem:[%s14584_s16 + $0xaa0] sm:$0xff] }
0x23b3   : > { %9639 = vmatpush3.msra.mxu1 %v8827_v3  ;;  %9674 = vmatpush3.msra.mxu0 %v8859_v12  ;;  %v8849_v11 = vld [vmem:[%s14584_s16 + $0xb28] sm:$0xff]  ;;  %v8864_v3 = vld [vmem:[%s14584_s16 + $0xba0] sm:$0xff] }
0x23b4   : > { %9640 = vmatprep.subr.mxu1 %v8842_v13  ;;  %9675 = vmatprep.subr.mxu0 %v8874_v14  ;;  %v8816_v12 = vld [vmem:[%s14584_s16 + $0xa20] sm:$0xff]  ;;  %v8831_v14 = vld [vmem:[%s14584_s16 + $0xa98] sm:$0xff] }
0x23b5   : > { %9641 = vmatpush3.msra.mxu1 %v8826_v15  ;;  %9676 = vmatpush3.msra.mxu0 %v8858_v16  ;;  %v8848_v13 = vld [vmem:[%s14584_s16 + $0xb20] sm:$0xff]  ;;  %v8863_v15 = vld [vmem:[%s14584_s16 + $0xb98] sm:$0xff]  ;;  %v6642_v16 = vrot.slane %v13851_v48, %v12153_v22 }
0x23b6   : > { %9642 = vmatprep.subr.mxu1 %v8841_v17  ;;  %9677 = vmatprep.subr.mxu0 %v8873_v18  ;;  %v6650_v17 = vrot.slane %v13851_v48, %v12156_v23  ;;  %v8815_v18 = vld [vmem:[%s14584_s16 + $0xa18] sm:$0xff]  ;;  %v8862_v48 = vld [vmem:[%s14584_s16 + $0xb90] sm:$0xff] }
0x23b7   : > { %9643 = vmatpush3.msra.mxu1 %v8825_v19  ;;  %9678 = vmatpush3.msra.mxu0 %v8857_v62  ;;  %v8847_v19 = vld [vmem:[%s14584_s16 + $0xb18] sm:$0xff]  ;;  %v8830_v62 = vld [vmem:[%s14584_s16 + $0xa90] sm:$0xff] }
0x23b8   : > { %9644 = vmatprep.subr.mxu1 %v8840_v20  ;;  %9679 = vmatprep.subr.mxu0 %v8872_v21  ;;  %v14032_v20 = vld [vmem:[%s14583_s15 + $0x18] sm:$0xff]  ;;  %v8814_v21 = vld [vmem:[%s14584_s16 + $0xa10] sm:$0xff] }
0x23b9   : > { %9645 = vmatpush3.msra.mxu1 %v8824_v25  ;;  %9680 = vmatpush3.msra.mxu0 %v8856_v26  ;;  %v8846_v25 = vld [vmem:[%s14584_s16 + $0xb10] sm:$0xff]  ;;  %v6662_v26 = vrot.slane %v14032_v20, %v12005_v9  ;;  %v8813_v9 = vld [vmem:[%s14584_s16 + $0xa08] sm:$0xff] }
0x23ba   : > { %9646 = vmatprep.subr.mxu1 %v8839_v27  ;;  %9681 = vmatprep.subr.mxu0 %v8871_v5  ;;  %v6670_v27 = vrot.slane %v14032_v20, %v12008_v10  ;;  %v8829_v5 = vld [vmem:[%s14584_s16 + $0xa88] sm:$0xff] }
0x23bb   : > { %v13931_v34 = vpop.f32.mrf.mxu1  ;;  %v13933_v35 = vpop.f32.mrf.mxu0  ;;  %9647 = vmatpush3.msra.mxu1 %v8823_v28  ;;  %9682 = vmatpush3.msra.mxu0 %v8855_v49  ;;  %v8861_v28 = vld [vmem:[%s14584_s16 + $0xb88] sm:$0xff] }
0x23bc   : > { %9648 = vmatprep.subr.mxu1 %v8838_v50  ;;  %9683 = vmatprep.subr.mxu0 %v8870_v31  ;;  %v6915_v49 = vadd.f32 %v13931_v34, %v6642_v16  ;;  %v6986_v50 = vadd.f32 %v13933_v35, %v6650_v17  ;;  %v8845_v10 = vld [vmem:[%s14584_s16 + $0xb08] sm:$0xff]  ;;  %v8812_v35 = vld [vmem:[%s14584_s16 + $0xa00] sm:$0xff] }
0x23bd   : > { %v6916_v38 = vpop.f32.mrf.mxu1  ;;  %v6987_v41 = vpop.f32.mrf.mxu0  ;;  %9649 = vmatpush3.msra.mxu1 %v8822_v29  ;;  %9684 = vmatpush3.msra.mxu0 %v8854_v33  ;;  %v8860_v29 = vld [vmem:[%s14584_s16 + $0xb80] sm:$0xff]  ;;  %v8933_v16 = vld [vmem:[%s14584_s16 + $0xdc8] sm:$0xff] }
0x23be   : > { %v6917_v45 = vadd.f32 %v6916_v38, %v6646_v32  ;;  %v6988_v46 = vadd.f32 %v6987_v41, %v6654_v8  ;;  %9650 = vmatprep.subr.mxu1 %v8837_v36  ;;  %9685 = vmatprep.subr.mxu0 %v8869_v37  ;;  %v8828_v8 = vld [vmem:[%s14584_s16 + $0xa80] sm:$0xff]  ;;  %v7280_v38 = vmax.f32 %v6986_v50, 0.0  ;;  %v8907_v41 = vld [vmem:[%s14584_s16 + $0xcf8] sm:$0xff]  ;;  %v8885_v17 = vld [vmem:[%s14584_s16 + $0xc48] sm:$0xff] }
0x23bf   : > { %9651 = vmatpush3.msra.mxu1 %v8821_v39  ;;  %9686 = vmatpush3.msra.mxu0 %v8853_v40  ;;  %v8844_v36 = vld [vmem:[%s14584_s16 + $0xb00] sm:$0xff]  ;;  %v7278_v40 = vmax.f32 %v6915_v49, 0.0  ;;  %v8930_v49 = vld [vmem:[%s14584_s16 + $0xdb0] sm:$0xff] }
0x23c0   : > { %v7279_v52 = vmax.f32 %v6917_v45, 0.0  ;;  %v7281_v61 = vmax.f32 %v6988_v46, 0.0  ;;  %9652 = vmatprep.subr.mxu1 %v8836_v44  ;;  %9687 = vmatprep.subr.mxu0 %v8868_v30  ;;  %v8939_v44 = vld [vmem:[%s14584_s16 + $0xdf8] sm:$0xff]  ;;  %v8882_v50 = vld [vmem:[%s14584_s16 + $0xc30] sm:$0xff] }
0x23c1   : > { %9653 = vmatpush3.msra.mxu1 %v8820_v47  ;;  %9688 = vmatpush3.msra.mxu0 %v8852_v51  ;;  %v8891_v30 = vld [vmem:[%s14584_s16 + $0xc78] sm:$0xff]  ;;  %v8906_v51 = vld [vmem:[%s14584_s16 + $0xcf0] sm:$0xff] }
0x23c2   : > { %7759 = vmatprep.mubr.f32.mxu1 %v7279_v52  ;;  %7829 = vmatprep.mubr.f32.mxu0 %v7281_v61  ;;  %v8923_v46 = vld [vmem:[%s14584_s16 + $0xd78] sm:$0xff]  ;;  %v8938_v52 = vld [vmem:[%s14584_s16 + $0xdf0] sm:$0xff] }
0x23c3   : > { %9654 = vmatprep.subr.mxu1 %v8835_v4  ;;  %9689 = vmatprep.subr.mxu0 %v8867_v53  ;;  %v8890_v61 = vld [vmem:[%s14584_s16 + $0xc70] sm:$0xff]  ;;  %v8905_v53 = vld [vmem:[%s14584_s16 + $0xce8] sm:$0xff] }
0x23c4   : > { %9655 = vmatpush3.msra.mxu1 %v8819_v54  ;;  %9690 = vmatpush3.msra.mxu0 %v8851_v55  ;;  %v8922_v4 = vld [vmem:[%s14584_s16 + $0xd70] sm:$0xff]  ;;  %v8937_v54 = vld [vmem:[%s14584_s16 + $0xde8] sm:$0xff] }
0x23c5   : > { %9656 = vmatprep.subr.mxu1 %v8834_v56  ;;  %9691 = vmatprep.subr.mxu0 %v8866_v57  ;;  %v8889_v55 = vld [vmem:[%s14584_s16 + $0xc68] sm:$0xff]  ;;  %v8904_v57 = vld [vmem:[%s14584_s16 + $0xce0] sm:$0xff] }
0x23c6   : > { %9657 = vmatpush3.msra.mxu1 %v8818_v58  ;;  %9692 = vmatpush3.msra.mxu0 %v8850_v59  ;;  %v8921_v56 = vld [vmem:[%s14584_s16 + $0xd68] sm:$0xff]  ;;  %v8936_v58 = vld [vmem:[%s14584_s16 + $0xde0] sm:$0xff] }
0x23c7   : > { %9658 = vmatprep.subr.mxu1 %v8833_v60  ;;  %9693 = vmatprep.subr.mxu0 %v8865_v63  ;;  %v8888_v59 = vld [vmem:[%s14584_s16 + $0xc60] sm:$0xff]  ;;  %v8903_v63 = vld [vmem:[%s14584_s16 + $0xcd8] sm:$0xff] }
0x23c8   : > { %9659 = vmatpush3.msra.mxu1 %v8817_v0  ;;  %9694 = vmatpush3.msra.mxu0 %v8849_v11  ;;  %v8920_v60 = vld [vmem:[%s14584_s16 + $0xd60] sm:$0xff]  ;;  %v8935_v0 = vld [vmem:[%s14584_s16 + $0xdd8] sm:$0xff] }
0x23c9   : > { %9660 = vmatprep.subr.mxu1 %v8832_v2  ;;  %9695 = vmatprep.subr.mxu0 %v8864_v3  ;;  %v8887_v11 = vld [vmem:[%s14584_s16 + $0xc58] sm:$0xff]  ;;  %v8902_v3 = vld [vmem:[%s14584_s16 + $0xcd0] sm:$0xff] }
0x23ca   : > { %9661 = vmatpush3.msra.mxu1 %v8816_v12  ;;  %9696 = vmatpush3.msra.mxu0 %v8848_v13  ;;  %v8919_v2 = vld [vmem:[%s14584_s16 + $0xd58] sm:$0xff]  ;;  %v8934_v12 = vld [vmem:[%s14584_s16 + $0xdd0] sm:$0xff] }
0x23cb   : > { %9662 = vmatprep.subr.mxu1 %v8831_v14  ;;  %9697 = vmatprep.subr.mxu0 %v8863_v15  ;;  %v8886_v13 = vld [vmem:[%s14584_s16 + $0xc50] sm:$0xff]  ;;  %v8901_v15 = vld [vmem:[%s14584_s16 + $0xcc8] sm:$0xff] }
0x23cc   : > { %9663 = vmatpush3.msra.mxu1 %v8815_v18  ;;  %9698 = vmatpush3.msra.mxu0 %v8847_v19  ;;  %v8918_v14 = vld [vmem:[%s14584_s16 + $0xd50] sm:$0xff]  ;;  %v8917_v18 = vld [vmem:[%s14584_s16 + $0xd48] sm:$0xff]  ;;  %v8900_v19 = vld [vmem:[%s14584_s16 + $0xcc0] sm:$0xff] }
0x23cd   : > { %v14052_v31 = vpop.f32.mrf.mxu1  ;;  %v14054_v32 = vpop.f32.mrf.mxu0  ;;  %9664 = vmatprep.subr.mxu1 %v8830_v62  ;;  %9699 = vmatprep.subr.mxu0 %v8862_v48  ;;  %v8932_v62 = vld [vmem:[%s14584_s16 + $0xdc0] sm:$0xff] }
0x23ce   : > { %9665 = vmatpush3.msra.mxu1 %v8814_v21  ;;  %9700 = vmatpush3.msra.mxu0 %v8846_v25  ;;  %v8884_v48 = vld [vmem:[%s14584_s16 + $0xc40] sm:$0xff]  ;;  %v8899_v25 = vld [vmem:[%s14584_s16 + $0xcb8] sm:$0xff] }
0x23cf   : > { %v7058_v33 = vpop.f32.mrf.mxu1  ;;  %v7129_v34 = vpop.f32.mrf.mxu0  ;;  %9666 = vmatprep.subr.mxu1 %v8829_v5  ;;  %9701 = vmatprep.subr.mxu0 %v8861_v28  ;;  %v8916_v21 = vld [vmem:[%s14584_s16 + $0xd40] sm:$0xff]  ;;  %v8915_v5 = vld [vmem:[%s14584_s16 + $0xd38] sm:$0xff]  ;;  %v8898_v28 = vld [vmem:[%s14584_s16 + $0xcb0] sm:$0xff] }
0x23d0   : > { %v7059_v37 = vadd.f32 %v7058_v33, %v6662_v26  ;;  %v7130_v39 = vadd.f32 %v7129_v34, %v6670_v27  ;;  %9667 = vmatpush3.msra.mxu1 %v8813_v9  ;;  %9702 = vmatpush3.msra.mxu0 %v8845_v10  ;;  %v8931_v26 = vld [vmem:[%s14584_s16 + $0xdb8] sm:$0xff]  ;;  %v8914_v9 = vld [vmem:[%s14584_s16 + $0xd30] sm:$0xff]  ;;  %v8897_v10 = vld [vmem:[%s14584_s16 + $0xca8] sm:$0xff] }
0x23d1   : > { %9668 = vmatprep.subr.mxu1 %v8828_v8  ;;  %9703 = vmatprep.subr.mxu0 %v8860_v29  ;;  %v8883_v27 = vld [vmem:[%s14584_s16 + $0xc38] sm:$0xff]  ;;  %v8929_v8 = vld [vmem:[%s14584_s16 + $0xda8] sm:$0xff]  ;;  %v8896_v34 = vld [vmem:[%s14584_s16 + $0xca0] sm:$0xff] }
0x23d2   : > { %9669 = vmatpush3.msra.mxu1 %v8812_v35  ;;  %9704 = vmatpush3.msra.mxu0 %v8844_v36  ;;  %v7283_v45 = vmax.f32 %v7059_v37, 0.0  ;;  %v7285_v47 = vmax.f32 %v7130_v39, 0.0  ;;  %v8881_v29 = vld [vmem:[%s14584_s16 + $0xc28] sm:$0xff]  ;;  %v8928_v35 = vld [vmem:[%s14584_s16 + $0xda0] sm:$0xff] }
0x23d3   : > { %7760 = vmatmul.mubr.f32.vlgmr.msra.gmra.mxu1 %v7278_v40  ;;  %7830 = vmatmul.mubr.f32.vlgmr.msra.gmra.mxu0 %v7280_v38  ;;  %v8913_v33 = vld [vmem:[%s14584_s16 + $0xd28] sm:$0xff]  ;;  %v8880_v36 = vld [vmem:[%s14584_s16 + $0xc20] sm:$0xff]  ;;  %v8895_v40 = vld [vmem:[%s14584_s16 + $0xc98] sm:$0xff] }
0x23d4   : > { %9708 = vmatprep.subr.mxu1 %v8907_v41  ;;  %9743 = vmatprep.subr.mxu0 %v8939_v44  ;;  %v8912_v37 = vld [vmem:[%s14584_s16 + $0xd20] sm:$0xff]  ;;  %v8927_v38 = vld [vmem:[%s14584_s16 + $0xd98] sm:$0xff]  ;;  %v6658_v41 = vrot.slane %v14032_v20, %v11994_v6  ;;  %v6666_v44 = vrot.slane %v14032_v20, %v11997_v7  ;;  %v8894_v6 = vld [vmem:[%s14584_s16 + $0xc90] sm:$0xff] }
0x23d5   : > { %9709 = vmatpush3.msra.mxu1 %v8891_v30  ;;  %7899 = vmatprep.mubr.f32.mxu1 %v7283_v45  ;;  %v8879_v45 = vld [vmem:[%s14584_s16 + $0xc18] sm:$0xff]  ;;  %v8926_v7 = vld [vmem:[%s14584_s16 + $0xd90] sm:$0xff] }
0x23d6   : > { %9744 = vmatpush3.msra.mxu0 %v8923_v46  ;;  %7969 = vmatprep.mubr.f32.mxu0 %v7285_v47  ;;  %v8911_v46 = vld [vmem:[%s14584_s16 + $0xd18] sm:$0xff]  ;;  %v6678_v47 = vrot.slane %v14032_v20, %v12061_v42  ;;  %v8893_v42 = vld [vmem:[%s14584_s16 + $0xc88] sm:$0xff] }
0x23d7   : > { %9710 = vmatprep.subr.mxu1 %v8906_v51  ;;  %9745 = vmatprep.subr.mxu0 %v8938_v52  ;;  %v8878_v51 = vld [vmem:[%s14584_s16 + $0xc10] sm:$0xff] }
0x23d8   : > { %9711 = vmatpush3.msra.mxu1 %v8890_v61  ;;  %9746 = vmatpush3.msra.mxu0 %v8922_v4  ;;  %v8910_v52 = vld [vmem:[%s14584_s16 + $0xd10] sm:$0xff]  ;;  %v6686_v4 = vrot.slane %v14032_v20, %v12064_v43  ;;  %v8877_v43 = vld [vmem:[%s14584_s16 + $0xc08] sm:$0xff] }
0x23d9   : > { %9712 = vmatprep.subr.mxu1 %v8905_v53  ;;  %9747 = vmatprep.subr.mxu0 %v8937_v54  ;;  %v8925_v53 = vld [vmem:[%s14584_s16 + $0xd88] sm:$0xff]  ;;  %v7057_v54 = vadd.f32 %v14052_v31, %v6658_v41  ;;  %v8924_v31 = vld [vmem:[%s14584_s16 + $0xd80] sm:$0xff] }
0x23da   : > { %9713 = vmatpush3.msra.mxu1 %v8889_v55  ;;  %9748 = vmatpush3.msra.mxu0 %v8921_v56  ;;  %v7128_v55 = vadd.f32 %v14054_v32, %v6666_v44  ;;  %v8996_v41 = vld [vmem:[%s14584_s16 + $0xfc0] sm:$0xff] }
0x23db   : > { %9714 = vmatprep.subr.mxu1 %v8904_v57  ;;  %9749 = vmatprep.subr.mxu0 %v8936_v58  ;;  %v8909_v57 = vld [vmem:[%s14584_s16 + $0xd08] sm:$0xff]  ;;  %v8892_v58 = vld [vmem:[%s14584_s16 + $0xc80] sm:$0xff] }
0x23dc   : > { %9715 = vmatpush3.msra.mxu1 %v8888_v59  ;;  %9750 = vmatpush3.msra.mxu0 %v8920_v60  ;;  %v8876_v59 = vld [vmem:[%s14584_s16 + $0xc00] sm:$0xff] }
0x23dd   : > { %9716 = vmatprep.subr.mxu1 %v8903_v63  ;;  %9751 = vmatprep.subr.mxu0 %v8935_v0  ;;  %v8908_v60 = vld [vmem:[%s14584_s16 + $0xd00] sm:$0xff]  ;;  %v7282_v0 = vmax.f32 %v7057_v54, 0.0  ;;  %v8945_v54 = vld [vmem:[%s14584_s16 + $0xe28] sm:$0xff] }
0x23de   : > { %9717 = vmatpush3.msra.mxu1 %v8887_v11  ;;  %9752 = vmatpush3.msra.mxu0 %v8919_v2  ;;  %v7284_v11 = vmax.f32 %v7128_v55, 0.0  ;;  %v8971_v2 = vld [vmem:[%s14584_s16 + $0xef8] sm:$0xff]  ;;  %v8948_v44 = vld [vmem:[%s14584_s16 + $0xe40] sm:$0xff]  ;;  %v8977_v55 = vld [vmem:[%s14584_s16 + $0xf28] sm:$0xff] }
0x23df   : > { %9718 = vmatprep.subr.mxu1 %v8902_v3  ;;  %9753 = vmatprep.subr.mxu0 %v8934_v12  ;;  %v14218_v39 = vpop.f32.mrf.mxu1  ;;  %v14230_v30 = vpop.f32.mrf.mxu0  ;;  %v9003_v3 = vld [vmem:[%s14584_s16 + $0xff8] sm:$0xff] }
0x23e0   : > { %9719 = vmatpush3.msra.mxu1 %v8886_v13  ;;  %9754 = vmatpush3.msra.mxu0 %v8918_v14  ;;  %v8955_v12 = vld [vmem:[%s14584_s16 + $0xe78] sm:$0xff] }
0x23e1   : > { %9720 = vmatprep.subr.mxu1 %v8901_v15  ;;  %9755 = vmatprep.subr.mxu0 %v8933_v16  ;;  %v7200_v61 = vpop.f32.mrf.mxu1  ;;  %v7271_v56 = vpop.f32.mrf.mxu0  ;;  %v8987_v14 = vld [vmem:[%s14584_s16 + $0xf78] sm:$0xff]  ;;  %v8970_v16 = vld [vmem:[%s14584_s16 + $0xef0] sm:$0xff] }
0x23e2   : > { %9721 = vmatpush3.msra.mxu1 %v8885_v17  ;;  %9756 = vmatpush3.msra.mxu0 %v8917_v18  ;;  %v7201_v32 = vadd.f32 %v7200_v61, %v6678_v47  ;;  %v7272_v63 = vadd.f32 %v7271_v56, %v6686_v4  ;;  %v9002_v17 = vld [vmem:[%s14584_s16 + $0xff0] sm:$0xff]  ;;  %v8979_v47 = vld [vmem:[%s14584_s16 + $0xf38] sm:$0xff]  ;;  %v8960_v56 = vld [vmem:[%s14584_s16 + $0xea0] sm:$0xff] }
0x23e3   : > { %9722 = vmatprep.subr.mxu1 %v8900_v19  ;;  %9757 = vmatprep.subr.mxu0 %v8932_v62  ;;  %v8954_v18 = vld [vmem:[%s14584_s16 + $0xe70] sm:$0xff]  ;;  %v8969_v62 = vld [vmem:[%s14584_s16 + $0xee8] sm:$0xff] }
0x23e4   : > { %9723 = vmatpush3.msra.mxu1 %v8884_v48  ;;  %9758 = vmatpush3.msra.mxu0 %v8916_v21  ;;  %v7287_v13 = vmax.f32 %v7201_v32, 0.0  ;;  %v7289_v15 = vmax.f32 %v7272_v63, 0.0  ;;  %v8986_v19 = vld [vmem:[%s14584_s16 + $0xf70] sm:$0xff]  ;;  %v9001_v48 = vld [vmem:[%s14584_s16 + $0xfe8] sm:$0xff]  ;;  %v8991_v32 = vld [vmem:[%s14584_s16 + $0xf98] sm:$0xff] }
0x23e5   : > { %9724 = vmatprep.subr.mxu1 %v8899_v25  ;;  %9759 = vmatprep.subr.mxu0 %v8931_v26  ;;  %v8953_v21 = vld [vmem:[%s14584_s16 + $0xe68] sm:$0xff]  ;;  %v8968_v26 = vld [vmem:[%s14584_s16 + $0xee0] sm:$0xff]  ;;  %v8946_v61 = vld [vmem:[%s14584_s16 + $0xe30] sm:$0xff] }
0x23e6   : > { %9725 = vmatpush3.msra.mxu1 %v8883_v27  ;;  %9760 = vmatpush3.msra.mxu0 %v8915_v5  ;;  %v8985_v25 = vld [vmem:[%s14584_s16 + $0xf68] sm:$0xff]  ;;  %v9000_v27 = vld [vmem:[%s14584_s16 + $0xfe0] sm:$0xff]  ;;  %v8978_v4 = vld [vmem:[%s14584_s16 + $0xf30] sm:$0xff] }
0x23e7   : > { %9726 = vmatprep.subr.mxu1 %v8898_v28  ;;  %9761 = vmatprep.subr.mxu0 %v8930_v49  ;;  %v8952_v5 = vld [vmem:[%s14584_s16 + $0xe60] sm:$0xff]  ;;  %v8967_v49 = vld [vmem:[%s14584_s16 + $0xed8] sm:$0xff] }
0x23e8   : > { %9727 = vmatpush3.msra.mxu1 %v8882_v50  ;;  %9762 = vmatpush3.msra.mxu0 %v8914_v9  ;;  %v8984_v28 = vld [vmem:[%s14584_s16 + $0xf60] sm:$0xff]  ;;  %v8999_v50 = vld [vmem:[%s14584_s16 + $0xfd8] sm:$0xff] }
0x23e9   : > { %9728 = vmatprep.subr.mxu1 %v8897_v10  ;;  %9763 = vmatprep.subr.mxu0 %v8929_v8  ;;  %v8951_v9 = vld [vmem:[%s14584_s16 + $0xe58] sm:$0xff]  ;;  %v8966_v8 = vld [vmem:[%s14584_s16 + $0xed0] sm:$0xff] }
0x23ea   : > { %9729 = vmatpush3.msra.mxu1 %v8881_v29  ;;  %9764 = vmatpush3.msra.mxu0 %v8913_v33  ;;  %v8983_v10 = vld [vmem:[%s14584_s16 + $0xf58] sm:$0xff]  ;;  %v8998_v29 = vld [vmem:[%s14584_s16 + $0xfd0] sm:$0xff] }
0x23eb   : > { %9730 = vmatprep.subr.mxu1 %v8896_v34  ;;  %9765 = vmatprep.subr.mxu0 %v8928_v35  ;;  %v8950_v33 = vld [vmem:[%s14584_s16 + $0xe50] sm:$0xff]  ;;  %v8965_v35 = vld [vmem:[%s14584_s16 + $0xec8] sm:$0xff]  ;;  %v8943_v63 = vld [vmem:[%s14584_s16 + $0xe18] sm:$0xff] }
0x23ec   : > { %9731 = vmatpush3.msra.mxu1 %v8880_v36  ;;  %9766 = vmatpush3.msra.mxu0 %v8912_v37  ;;  %v8982_v34 = vld [vmem:[%s14584_s16 + $0xf50] sm:$0xff]  ;;  %v8997_v36 = vld [vmem:[%s14584_s16 + $0xfc8] sm:$0xff] }
0x23ed   : > { %9732 = vmatprep.subr.mxu1 %v8895_v40  ;;  %9767 = vmatprep.subr.mxu0 %v8927_v38  ;;  %v8949_v37 = vld [vmem:[%s14584_s16 + $0xe48] sm:$0xff]  ;;  %v8964_v38 = vld [vmem:[%s14584_s16 + $0xec0] sm:$0xff] }
0x23ee   : > { %9733 = vmatpush3.msra.mxu1 %v8879_v45  ;;  %9768 = vmatpush3.msra.mxu0 %v8911_v46  ;;  %v8981_v40 = vld [vmem:[%s14584_s16 + $0xf48] sm:$0xff]  ;;  %v8980_v45 = vld [vmem:[%s14584_s16 + $0xf40] sm:$0xff]  ;;  %v8963_v46 = vld [vmem:[%s14584_s16 + $0xeb8] sm:$0xff] }
0x23ef   : > { %9734 = vmatprep.subr.mxu1 %v8894_v6  ;;  %9769 = vmatprep.subr.mxu0 %v8926_v7  ;;  %v8995_v6 = vld [vmem:[%s14584_s16 + $0xfb8] sm:$0xff] }
0x23f0   : > { %9735 = vmatpush3.msra.mxu1 %v8878_v51  ;;  %9770 = vmatpush3.msra.mxu0 %v8910_v52  ;;  %v8947_v7 = vld [vmem:[%s14584_s16 + $0xe38] sm:$0xff]  ;;  %v8962_v51 = vld [vmem:[%s14584_s16 + $0xeb0] sm:$0xff] }
0x23f1   : > { %9736 = vmatprep.subr.mxu1 %v8893_v42  ;;  %9771 = vmatprep.subr.mxu0 %v8925_v53  ;;  %v8994_v52 = vld [vmem:[%s14584_s16 + $0xfb0] sm:$0xff]  ;;  %v8961_v42 = vld [vmem:[%s14584_s16 + $0xea8] sm:$0xff] }
0x23f2   : > { %9737 = vmatpush3.msra.mxu1 %v8877_v43  ;;  %9772 = vmatpush3.msra.mxu0 %v8909_v57  ;;  %v8993_v53 = vld [vmem:[%s14584_s16 + $0xfa8] sm:$0xff]  ;;  %v8992_v43 = vld [vmem:[%s14584_s16 + $0xfa0] sm:$0xff] }
0x23f3   : > { %9738 = vmatprep.subr.mxu1 %v8892_v58  ;;  %9773 = vmatprep.subr.mxu0 %v8924_v31  ;;  %v8944_v57 = vld [vmem:[%s14584_s16 + $0xe20] sm:$0xff]  ;;  %v8959_v31 = vld [vmem:[%s14584_s16 + $0xe98] sm:$0xff] }
0x23f4   : > { %9739 = vmatpush3.msra.mxu1 %v8876_v59  ;;  %9774 = vmatpush3.msra.mxu0 %v8908_v60  ;;  %v8976_v58 = vld [vmem:[%s14584_s16 + $0xf20] sm:$0xff]  ;;  %v6674_v59 = vrot.slane %v14032_v20, %v12153_v22  ;;  %v6682_v60 = vrot.slane %v14032_v20, %v12156_v23  ;;  %v8990_v22 = vld [vmem:[%s14584_s16 + $0xf90] sm:$0xff] }
0x23f5   : > { %7900 = vmatmul.mubr.f32.vlgmr.msra.gmra.mxu1 %v7282_v0  ;;  %7970 = vmatmul.mubr.f32.vlgmr.msra.gmra.mxu0 %v7284_v11  ;;  %v8975_v0 = vld [vmem:[%s14584_s16 + $0xf18] sm:$0xff]  ;;  %v8958_v11 = vld [vmem:[%s14584_s16 + $0xe90] sm:$0xff] }
0x23f6   : > { %9778 = vmatprep.subr.mxu1 %v8971_v2  ;;  %9813 = vmatprep.subr.mxu0 %v9003_v3  ;;  %v8942_v23 = vld [vmem:[%s14584_s16 + $0xe10] sm:$0xff]  ;;  %v8957_v2 = vld [vmem:[%s14584_s16 + $0xe88] sm:$0xff] }
0x23f7   : > { %9779 = vmatpush3.msra.mxu1 %v8955_v12  ;;  %8039 = vmatprep.mubr.f32.mxu1 %v7287_v13  ;;  %v8974_v20 = vld [vmem:[%s14584_s16 + $0xf10] sm:$0xff]  ;;  %v8989_v3 = vld [vmem:[%s14584_s16 + $0xf88] sm:$0xff]  ;;  %v7199_v12 = vadd.f32 %v14218_v39, %v6674_v59  ;;  %v7270_v13 = vadd.f32 %v14230_v30, %v6682_v60  ;;  %v8988_v39 = vld [vmem:[%s14584_s16 + $0xf80] sm:$0xff] }
0x23f8   : > { %9814 = vmatpush3.msra.mxu0 %v8987_v14  ;;  %8109 = vmatprep.mubr.f32.mxu0 %v7289_v15  ;;  %v8941_v14 = vld [vmem:[%s14584_s16 + $0xe08] sm:$0xff]  ;;  %v8940_v30 = vld [vmem:[%s14584_s16 + $0xe00] sm:$0xff]  ;;  %v8150_v60 = vld [vmem:[%s14588_s20 + $0x18] sm:$0xff] }
0x23f9   : > { %9780 = vmatprep.subr.mxu1 %v8970_v16  ;;  %9815 = vmatprep.subr.mxu0 %v9002_v17  ;;  %v8973_v15 = vld [vmem:[%s14584_s16 + $0xf08] sm:$0xff]  ;;  %v8956_v16 = vld [vmem:[%s14584_s16 + $0xe80] sm:$0xff] }
0x23fa   : > { %9781 = vmatpush3.msra.mxu1 %v8954_v18  ;;  %9816 = vmatpush3.msra.mxu0 %v8986_v19  ;;  %v8972_v17 = vld [vmem:[%s14584_s16 + $0xf00] sm:$0xff]  ;;  %v7286_v18 = vmax.f32 %v7199_v12, 0.0  ;;  %v7288_v19 = vmax.f32 %v7270_v13, 0.0 }
0x23fb   : > { %9782 = vmatprep.subr.mxu1 %v8969_v62  ;;  %9817 = vmatprep.subr.mxu0 %v9001_v48  ;;  %v8151_v59 = vld [vmem:[%s14588_s20 + $0x20] sm:$0xff] }
0x23fc   : > { %9783 = vmatpush3.msra.mxu1 %v8953_v21  ;;  %9818 = vmatpush3.msra.mxu0 %v8985_v25  ;;  %v9009_v13 = vld [vmem:[%s14587_s19 + $0x1] ss:$0 sm:$0xff] }
0x23fd   : > { %9784 = vmatprep.subr.mxu1 %v8968_v26  ;;  %9819 = vmatprep.subr.mxu0 %v9000_v27  ;;  %v9005_v27 = vld [vmem:[%s14585_s17 + $0x1] ss:$0 sm:$0xff] }
0x23fe   : > { %9785 = vmatpush3.msra.mxu1 %v8952_v5  ;;  %9820 = vmatpush3.msra.mxu0 %v8984_v28 }
0x23ff   : > { %9786 = vmatprep.subr.mxu1 %v8967_v49  ;;  %9821 = vmatprep.subr.mxu0 %v8999_v50 }
0x2400   : > { %9787 = vmatpush3.msra.mxu1 %v8951_v9  ;;  %9822 = vmatpush3.msra.mxu0 %v8983_v10 }
0x2401   : > { %9788 = vmatprep.subr.mxu1 %v8966_v8  ;;  %9823 = vmatprep.subr.mxu0 %v8998_v29 }
0x2402   : > { %9789 = vmatpush3.msra.mxu1 %v8950_v33  ;;  %9824 = vmatpush3.msra.mxu0 %v8982_v34 }
0x2403   : > { %9790 = vmatprep.subr.mxu1 %v8965_v35  ;;  %9825 = vmatprep.subr.mxu0 %v8997_v36 }
0x2404   : > { %9791 = vmatpush3.msra.mxu1 %v8949_v37  ;;  %9826 = vmatpush3.msra.mxu0 %v8981_v40 }
0x2405   : > { %9792 = vmatprep.subr.mxu1 %v8964_v38  ;;  %9827 = vmatprep.subr.mxu0 %v8996_v41 }
0x2406   : > { %9793 = vmatpush3.msra.mxu1 %v8948_v44  ;;  %9828 = vmatpush3.msra.mxu0 %v8980_v45 }
0x2407   : > { %9794 = vmatprep.subr.mxu1 %v8963_v46  ;;  %9829 = vmatprep.subr.mxu0 %v8995_v6 }
0x2408   : > { %9795 = vmatpush3.msra.mxu1 %v8947_v7  ;;  %9830 = vmatpush3.msra.mxu0 %v8979_v47 }
0x2409   : > { %9796 = vmatprep.subr.mxu1 %v8962_v51  ;;  %9831 = vmatprep.subr.mxu0 %v8994_v52 }
0x240a   : > { %9797 = vmatpush3.msra.mxu1 %v8946_v61  ;;  %9832 = vmatpush3.msra.mxu0 %v8978_v4 }
0x240b   : > { %9798 = vmatprep.subr.mxu1 %v8961_v42  ;;  %9833 = vmatprep.subr.mxu0 %v8993_v53 }
0x240c   : > { %9799 = vmatpush3.msra.mxu1 %v8945_v54  ;;  %9834 = vmatpush3.msra.mxu0 %v8977_v55 }
0x240d   : > { %9800 = vmatprep.subr.mxu1 %v8960_v56  ;;  %9835 = vmatprep.subr.mxu0 %v8992_v43 }
0x240e   : > { %9801 = vmatpush3.msra.mxu1 %v8944_v57  ;;  %9836 = vmatpush3.msra.mxu0 %v8976_v58 }
0x240f   : > { %9802 = vmatprep.subr.mxu1 %v8959_v31  ;;  %9837 = vmatprep.subr.mxu0 %v8991_v32  ;;  %v8154_v31 = vld [vmem:[%s14588_s20 + $0x38] sm:$0xff]  ;;  %v8152_v32 = vld [vmem:[%s14588_s20 + $0x28] sm:$0xff] }
0x2410   : > { %9803 = vmatpush3.msra.mxu1 %v8943_v63  ;;  %9838 = vmatpush3.msra.mxu0 %v8975_v0  ;;  %v8149_v63 = vld [vmem:[%s14588_s20 + $0x10] sm:$0xff]  ;;  %v8148_v0 = vld [vmem:[%s14588_s20 + $0x8] sm:$0xff] }
0x2411   : > { %9804 = vmatprep.subr.mxu1 %v8958_v11  ;;  %9839 = vmatprep.subr.mxu0 %v8990_v22  ;;  %v8147_v11 = vld [vmem:[%s14588_s20] sm:$0xff] }
0x2412   : > { %9805 = vmatpush3.msra.mxu1 %v8942_v23  ;;  %9840 = vmatpush3.msra.mxu0 %v8974_v20 }
0x2413   : > { %9806 = vmatprep.subr.mxu1 %v8957_v2  ;;  %9841 = vmatprep.subr.mxu0 %v8989_v3  ;;  %v9008_v3 = vld [vmem:[%s14586_s18 + $0x1] ss:$0 sm:$0xff] }
0x2414   : > { %9807 = vmatpush3.msra.mxu1 %v8941_v14  ;;  %9842 = vmatpush3.msra.mxu0 %v8973_v15 }
0x2415   : > { %9808 = vmatprep.subr.mxu1 %v8956_v16  ;;  %9843 = vmatprep.subr.mxu0 %v8988_v39 }
0x2416   : > { %9809 = vmatpush3.msra.mxu1 %v8940_v30  ;;  %9844 = vmatpush3.msra.mxu0 %v8972_v17 }
0x2417   : > { %8040 = vmatmul.mubr.f32.vlgmr.msra.gmra.mxu1 %v7286_v18  ;;  %8110 = vmatmul.mubr.f32.vlgmr.msra.gmra.mxu0 %v7288_v19 }
0x2418   : > { %10454 = vmatprep.subr.mxu1 %v10616_v1  ;;  %10470 = vmatprep.mubr.msk.f32.mxu1 %vm10617_vm1, %v10616_v1 }
0x2419   : > { %10455 = vmatpush3.msra.mxu1 %v8154_v31 }
0x241a   : > { %10456 = vmatprep.subr.mxu1 %v10616_v1 }
0x2472   : > { %v9600_v62 = vpop.f32.mrf.mxu1  ;;  %v9635_v21 = vpop.f32.mrf.mxu0 }
0x2474   : > { %v9601_v48 = vpop.f32.mrf.mxu1  ;;  %v9636_v5 = vpop.f32.mrf.mxu0 }
0x2475   : > { %v9602_v26 = vadd.f32 %v9601_v48, %v9600_v62  ;;  %v9637_v10 = vadd.f32 %v9636_v5, %v9635_v21 }
0x2477   : > { %v7622_v49 = vadd.f32 %v9602_v26, %v9005_v27 }
0x2479   : > { %v7692_v29 = vadd.f32 %v9637_v10, %v7622_v49 }
0x2493   : > { %v9670_v25 = vpop.f32.mrf.mxu1  ;;  %v9705_v50 = vpop.f32.mrf.mxu0 }
0x2495   : > { %v9671_v28 = vpop.f32.mrf.mxu1  ;;  %v9706_v33 = vpop.f32.mrf.mxu0 }
0x2496   : > { %v9672_v8 = vadd.f32 %v9671_v28, %v9670_v25  ;;  %v9707_v37 = vadd.f32 %v9706_v33, %v9705_v50 }
0x2498   : > { %v7762_v35 = vadd.f32 %v9672_v8, %v7692_v29 }
0x249a   : > { %v7832_v38 = vadd.f32 %v9707_v37, %v7762_v35 }
0x24b5   : > { %v9740_v9 = vpop.f32.mrf.mxu1  ;;  %v9775_v36 = vpop.f32.mrf.mxu0 }
0x24b7   : > { %v9741_v34 = vpop.f32.mrf.mxu1  ;;  %v9776_v41 = vpop.f32.mrf.mxu0 }
0x24b8   : > { %v9742_v40 = vadd.f32 %v9741_v34, %v9740_v9  ;;  %v9777_v6 = vadd.f32 %v9776_v41, %v9775_v36 }
0x24ba   : > { %v7902_v44 = vadd.f32 %v9742_v40, %v7832_v38 }
0x24bc   : > { %v7972_v51 = vadd.f32 %v9777_v6, %v7902_v44 }
0x24d7   : > { %v9810_v45 = vpop.f32.mrf.mxu1  ;;  %v9845_v46 = vpop.f32.mrf.mxu0 }
0x24d9   : > { %v9811_v7 = vpop.f32.mrf.mxu1  ;;  %v9846_v47 = vpop.f32.mrf.mxu0 }
0x24da   : > { %v9812_v52 = vadd.f32 %v9811_v7, %v9810_v45  ;;  %v9847_v4 = vadd.f32 %v9846_v47, %v9845_v46 }
0x24dc   : > { %v8042_v61 = vadd.f32 %v9812_v52, %v7972_v51 }
0x24de   : > { %v8112_v42 = vadd.f32 %v9847_v4, %v8042_v61 }
0x24e0   : > { %v8115_v53 = vadd.f32 %v8112_v42, %v13344_v24  ;;  %v8153_v24 = vld [vmem:[%s14588_s20 + $0x30] sm:$0xff] }
0x24e1   : > { %10457 = vmatpush3.msra.mxu1 %v8153_v24 }
0x24e2   : > { %v8120_v54 = vsel %vm782_vm3, %v8115_v53, 0.0  ;;  %10458 = vmatprep.subr.mxu1 %v10616_v1 }
0x24e3   : > { %8121 = vadd.xlane.f32.xlu0 %v8120_v54  ;;  %10459 = vmatpush3.msra.mxu1 %v8152_v32 }
0x24e4   : > { %10460 = vmatprep.subr.mxu1 %v10616_v1 }
0x24e5   : > { %10461 = vmatpush3.msra.mxu1 %v8151_v59 }
0x24e6   : > { %10462 = vmatprep.subr.mxu1 %v10616_v1 }
0x24e7   : > { %10463 = vmatpush3.msra.mxu1 %v8150_v60 }
0x24e8   : > { %10464 = vmatprep.subr.mxu1 %v10616_v1 }
0x24e9   : > { %10465 = vmatpush3.msra.mxu1 %v8149_v63 }
0x24ea   : > { %10466 = vmatprep.subr.mxu1 %v10616_v1 }
0x24eb   : > { %10467 = vmatpush3.msra.mxu1 %v8148_v0 }
0x24ec   : > { %10468 = vmatprep.subr.mxu1 %v10616_v1  ;;  %v8155_v1 = vld [vmem:[%s14630_s26] sm:$0x1] }
0x24ed   : > { %10469 = vmatpush3.msra.mxu1 %v8147_v11 }
0x256c   : > { %v8122_v55 = vpop.xlane.xlu0 %8121 }
0x256d   : > { %v8123_v56 = vmul.f32 0.015625, %v8122_v55 }
0x256f   : > { %v8124_v43 = vsub.f32 %v8115_v53, %v8123_v56 }
0x2571   : > { %v8125_v57 = vmul.f32 %v8124_v43, %v8124_v43 }
0x2573   : > { %v8126_v58 = vsel %vm782_vm3, %v8125_v57, 0.0 }
0x2574   : > { %8127 = vadd.xlane.f32.xlu1 %v8126_v58 }
0x25fd   : > { %v8128_v22 = vpop.xlane.xlu1 %8127 }
0x25fe   : > { %v8129_v23 = vmul.f32 0.015625, %v8128_v22 }
0x2600   : > { %v8130_v20 = vadd.f32 1e-05, %v8129_v23 }
0x2602   : > { %10552 = vrsqrt.f32 %v8130_v20 }
0x260f   : > { %v10553_v2 = vpop.eup %10552 }
0x2610   : > { %v8132_v12 = vmul.f32 %v10553_v2, %v8124_v43 }
0x2612   : > { %v8139_v14 = vmul.f32 %v9008_v3, %v8132_v12 }
0x2614   : > { %v8146_v15 = vadd.f32 %v9009_v13, %v8139_v14 }
0x2616   : > { %v8157_v16 = vrot.slane %v8146_v15, 7 }
0x2618   : > { %10471 = vmatmul.mubr.msk.f32.vlgmr.msra.gmra.mxu1 %vm782_vm3, %v8157_v16 }
0x26d8   : > { %v8226_v39 = vpop.f32.mrf.mxu1 }
0x26d9   : > { %v8227_v30 = vadd.f32 %v8226_v39, %v8155_v1 }
0x26da   : > { %v10472_v17 = vpop.f32.mrf.mxu1 }
0x26db   : > { %8230 = vst [vmem:[%s673_s24] sm:$0x1] %v8227_v30 }
0x26dc   : > { %10567 = shalt.err (!%p10564_p3)
}
0x26dd   : > { %s10568_s26 = scalar_lea.hbm %s14533_s3, 16  ;;  %s10572_s24 = scalar_lea.hbm %s14631_s27, 32 }
0x26de   : > { %p10569_p4 = scmp.ne.s32.totalorder %s14533_s3, %s10568_s26  ;;  %p10573_p9 = scmp.lt.s32.totalorder %s14533_s3, %s14631_s27 }
0x26df   : > { %p10574_p10 = scmp.lt.s32.totalorder %s10572_s24, %s10568_s26 }
0x26e0   : > { %p10570_p7 = pnand %p10569_p4, %p10772_p5 }
0x26e1   : > { %p10575_p11 = por %p10574_p10, %p10573_p9 }
0x26e2   : > { %p10571_p8 = pneg %p10570_p7 }
0x26e4   : > { %p10576_p12 = pnand %p10575_p11, %p10571_p8 }
0x26e6   : > { %10579 = shalt.err (!%p10576_p12)
}
0x26e7   : > { %10473 = dma.vmem_to_hbm [thread:$0]  (%p10772_p5), %s8245_s29, 16, %s14533_s3, %s8232_s5  }
0x26e8 PF: > { %s14632_s7 = sld [smem:[#allocation7_spill]] }
0x26e9   : > { %s14633_s0 = sld [smem:[#allocation5_spill]] }
0x26ee   : > { %p10479_p13 = scmp.ge.s32.totalorder %s14632_s7, 2 }
0x26ef   : > { %s8256_s1 = sand.u32 1, %s14633_s0  }
0x26f0   : > { %p10476_p0 = pnand %p10479_p13, %p10776_p6  ;;  %s8257_s30 = scalar_lea.sflag [#allocation3], %s8256_s1 }
0x26f2   : > { %p10477_p1 = pneg %p10476_p0 }
0x26f4   : > { %10597 = dma.done.wait (%p10477_p1), %s8257_s30, 16  }
0x26f5   : > { %10599 = vsyncadd (%p10477_p1), %s8257_s30, 4294967280  ;;  %s14635_s30 = sld [smem:[#allocation8_spill]]  ;;  %s14638_s3 = smov %s10606_s28 }
0x26f6   : > { %s14636_s26 = sld [smem:[#allocation6_spill]] }
0x26f7   : > { %s14637_s29 = sld [smem:[#allocation9_spill]] }
0x26fb   : > { %p32_p2 = scmp.ge.s32.totalorder %s14635_s30, 4  }
0x26fc   : > { %s14639_s28 = smov %s14636_s26 }
0x26fd   :  { %34 = sbr.rel (!%p32_p2) target bundleno = 14 (0xe), region = 201 }
0x2702   :  { %8261 = vsyncpa [#allocation3], 1 }
0x2703   :  { %8263 = vsyncpa [#allocation3 + $0x1], 1 }

</bundles_post_ra>
